<compile_context>
chip_gen: v7x
topology: tpu7x:2x2x1
jax: 0.10.0
libtpu: 0.0.40
codegen_flags: <defaults>
</compile_context>

<pallas_src>
import functools

import numpy as np

import jax
import jax.numpy as jnp
from jax import lax
from jax.experimental import pallas as pl
from jax.experimental.pallas import tpu as pltpu

LRELU_SLOPE = 0.2
IN_EPS = 1e-5

# Conv matmuls: single bf16 MXU pass (perf review).  Set to HIGHEST to recover
# <1e-5 agreement with the f32 reference; validation tolerance below covers the
# bf16 input rounding.
MATMUL_PRECISION = lax.Precision.DEFAULT
# Tiny 0/1-selection-matrix dots used for the per-channel norm statistics stay
# exact so InstanceNorm matches the f32 reference closely.
STAT_PRECISION = lax.Precision.HIGHEST

# (kh, kw, sh, sw, ph, pw) for the 5 convolutions of _netD
CONV_CFG = [
    (4, 4, 2, 2, 1, 1),
    (4, 3, 2, 1, 1, 0),
    (4, 3, 2, 1, 2, 0),
    (8, 4, 2, 1, 1, 1),
    (6, 3, 1, 1, 0, 0),
]


# ------------------------- static layer planning -------------------------

def plan_layers(H, W, nc, ndf):
    """Static shape chain for the whole net (all Python ints)."""
    chans = [nc, ndf, ndf * 2, ndf * 4, ndf * 8, 1]
    plan = []
    h, w = H, W
    for li, (kh, kw, sh, sw, ph, pw) in enumerate(CONV_CFG):
        cin, cout = chans[li], chans[li + 1]
        hp, wp = h + 2 * ph, w + 2 * pw
        ho = (hp - kh) // sh + 1
        wo = (wp - kw) // sw + 1
        hp_pad = ((hp + sh - 1) // sh) * sh   # make polyphase split even
        wp_pad = ((wp + sw - 1) // sw) * sw
        plan.append(dict(
            kh=kh, kw=kw, sh=sh, sw=sw, ph=ph, pw=pw,
            cin=cin, cout=cout, h=h, w=w, hp=hp, wp=wp,
            hp_pad=hp_pad, wp_pad=wp_pad,
            hph=hp_pad // sh, wph=wp_pad // sw,
            ho=ho, wo=wo))
        h, w = ho, wo
    return plan


# ------------------------- parameter init / packing -------------------------

def init_params(key, ndf, nc):
    """Torch-layout parameters (Cout, Cin, kh, kw) + InstanceNorm affine."""
    chans = [nc, ndf, ndf * 2, ndf * 4, ndf * 8, 1]
    params = {"conv_w": [], "in_gamma": [], "in_beta": []}
    keys = jax.random.split(key, len(CONV_CFG))
    for li, (kh, kw, _, _, _, _) in enumerate(CONV_CFG):
        cin, cout = chans[li], chans[li + 1]
        bound = 1.0 / float(np.sqrt(cin * kh * kw))   # kaiming-uniform style
        w = jax.random.uniform(keys[li], (cout, cin, kh, kw),
                               minval=-bound, maxval=bound, dtype=jnp.float32)
        params["conv_w"].append(w)
    for c in (ndf * 2, ndf * 4, ndf * 8):              # InstanceNorm2d affine init
        params["in_gamma"].append(jnp.ones((c,), jnp.float32))
        params["in_beta"].append(jnp.zeros((c,), jnp.float32))
    return params


def _build_row_weights(w, sh, sw, wph, wo):
    """Pack a torch-layout conv weight (Cout,Cin,kh,kw) into kh*sw block-banded
    matrices of shape (wph*Cin, wo*Cout).

    Row (wt*Cin+ci), col (wo*Cout+co) holds w[co,ci,i,j] for the unique j with
    j % sw == b and wt == wo + (j-b)//sw, so that a contiguous (Ho, wph*Cin)
    row-slab of the W-phase-b / H-phase-(i%sh) input times this matrix is the
    kernel-row-i contribution to the conv output laid out as (Ho, Wo*Cout)."""
    cout, cin, kh, kw = w.shape
    wt_ = np.transpose(w, (2, 3, 1, 0))               # (kh, kw, Cin, Cout)
    rw = np.zeros((kh, sw, wph, cin, wo, cout), np.float32)
    for i in range(kh):
        for j in range(kw):
            b = j % sw
            d = (j - b) // sw
            for o in range(wo):
                rw[i, b, o + d, :, o, :] = wt_[i, j]
    return rw.reshape(kh * sw, wph * cin, wo * cout)


def prepare_params(params, plan):
    """Pre-pack every weight into the layout the fused kernels consume.

    Done once, outside jit (perf review: no per-forward weight transposes)."""
    prep = []
    for li, cfg in enumerate(plan):
        w = np.asarray(params["conv_w"][li], dtype=np.float32)
        entry = {}
        if li < 4:
            entry["rw"] = jnp.asarray(
                _build_row_weights(w, cfg["sh"], cfg["sw"], cfg["wph"], cfg["wo"]))
        if 1 <= li <= 3:
            cout, wo = cfg["cout"], cfg["wo"]
            g2c = np.tile(np.eye(cout, dtype=np.float32), (wo, 1))  # (wo*cout, cout)
            entry["g2c"] = jnp.asarray(g2c)
            entry["c2g"] = jnp.asarray(np.ascontiguousarray(g2c.T))
            entry["gamma"] = jnp.asarray(
                np.asarray(params["in_gamma"][li - 1], dtype=np.float32)[None, :])
            entry["beta"] = jnp.asarray(
                np.asarray(params["in_beta"][li - 1], dtype=np.float32)[None, :])
        if li == 4:
            # Head conv exactly covers layer 3's (Ho, Wo) map -> fuse it into
            # layer 3's kernel as an elementwise dot + sigmoid.
            assert cfg["ho"] == 1 and cfg["wo"] == 1, "head conv must reduce to 1x1"
            entry["w4"] = jnp.asarray(
                np.transpose(w[0], (1, 2, 0)).reshape(cfg["kh"], cfg["kw"] * cfg["cin"]))
        prep.append(entry)
    return prep


# ------------------------- Pallas kernels -------------------------

def _leaky_relu(y):
    return jnp.where(y > 0, y, LRELU_SLOPE * y)


def _accum_taps(ph_ref, rw_ref, taps, ho):
    """Sum over kernel taps: static row-slab slices of the stacked polyphase
    input (Ho, wph*Cin) x pre-packed block-banded weight (wph*Cin, Wo*Cout)."""
    acc = None
    for r0, w_idx in taps:
        slab = ph_ref[0, r0:r0 + ho, :]
        part = jnp.dot(slab, rw_ref[w_idx],
                       preferred_element_type=jnp.float32,
                       precision=MATMUL_PRECISION)
        acc = part if acc is None else acc + part
    return acc


def _instance_norm_affine(acc, gamma_ref, beta_ref, g2c_ref, c2g_ref, n_spatial):
    """Per-(sample, channel) InstanceNorm on a (Ho, Wo*Cout) slab.

    Single pass: E[x] and E[x^2] via one sublane reduction each plus a tiny
    (Wo*Cout, Cout) 0/1 selection dot; per-channel scale/shift broadcast back
    with the transposed selection matrix (no in-kernel reshapes)."""
    s1 = jnp.dot(jnp.sum(acc, axis=0, keepdims=True), g2c_ref[...],
                 preferred_element_type=jnp.float32, precision=STAT_PRECISION)
    s2 = jnp.dot(jnp.sum(acc * acc, axis=0, keepdims=True), g2c_ref[...],
                 preferred_element_type=jnp.float32, precision=STAT_PRECISION)
    mean = s1 / n_spatial
    var = s2 / n_spatial - mean * mean                 # biased, like torch
    scale_c = gamma_ref[...] * lax.rsqrt(var + IN_EPS)  # (1, Cout)
    shift_c = beta_ref[...] - mean * scale_c             # (1, Cout)
    scale = jnp.dot(scale_c, c2g_ref[...],
                    preferred_element_type=jnp.float32, precision=STAT_PRECISION)
    shift = jnp.dot(shift_c, c2g_ref[...],
                    preferred_element_type=jnp.float32, precision=STAT_PRECISION)
    return acc * scale + shift


def _conv_lrelu_kernel(ph_ref, rw_ref, o_ref, *, taps, ho):
    o_ref[0] = _leaky_relu(_accum_taps(ph_ref, rw_ref, taps, ho))


def _conv_in_lrelu_kernel(ph_ref, rw_ref, gamma_ref, beta_ref, g2c_ref, c2g_ref,
                          o_ref, *, taps, ho, n_spatial):
    acc = _accum_taps(ph_ref, rw_ref, taps, ho)
    o_ref[0] = _leaky_relu(
        _instance_norm_affine(acc, gamma_ref, beta_ref, g2c_ref, c2g_ref, n_spatial))


def _conv_in_lrelu_head_kernel(ph_ref, rw_ref, gamma_ref, beta_ref, g2c_ref,
                               c2g_ref, w4_ref, o_ref, *, taps, ho, n_spatial):
    acc = _accum_taps(ph_ref, rw_ref, taps, ho)
    y = _leaky_relu(
        _instance_norm_affine(acc, gamma_ref, beta_ref, g2c_ref, c2g_ref, n_spatial))
    # Fused final 1-channel conv (its kernel covers the whole map) + sigmoid.
    v = jnp.sum(y * w4_ref[...], axis=(0, 1), keepdims=True)   # (1, 1)
    o_ref[0] = 1.0 / (1.0 + jnp.exp(-v))


# ------------------------- JAX glue -------------------------

def _phase_stack(x_nhwc, cfg):
    """Zero-pad the NHWC activation and split it into sh*sw polyphase slabs,
    concatenated along rows: (N, sh*sw*Hph, Wph*Cin).  Same total bytes as the
    padded input (no kh*kw im2col duplication)."""
    n = x_nhwc.shape[0]
    cin, sh, sw = cfg["cin"], cfg["sh"], cfg["sw"]
    xp = jnp.pad(x_nhwc, (
        (0, 0),
        (cfg["ph"], cfg["ph"] + cfg["hp_pad"] - cfg["hp"]),
        (cfg["pw"], cfg["pw"] + cfg["wp_pad"] - cfg["wp"]),
        (0, 0)))
    phases = [
        xp[:, a::sh, b::sw, :].reshape(n, cfg["hph"], cfg["wph"] * cin)
        for a in range(sh) for b in range(sw)
    ]
    return jnp.concatenate(phases, axis=1)


def _taps(cfg):
    """Static (start_row_in_stacked_phases, row_weight_index) per kernel tap."""
    sh, sw, hph = cfg["sh"], cfg["sw"], cfg["hph"]
    return tuple(
        (((i % sh) * sw + b) * hph + i // sh, i * sw + b)
        for i in range(cfg["kh"]) for b in range(sw)
    )


def _full_spec(shape):
    return pl.BlockSpec(shape, lambda i: (0,) * len(shape))


def fused_conv_layer(x_nhwc, cfg, prep, head_prep=None):
    """One pallas_call: conv (tap matmuls) [+ InstanceNorm + affine] + LeakyReLU
    [+ fused 1-channel head conv + sigmoid].  grid=(N,): one sample per step,
    marked 'parallel' so v7x megacore can split the batch across TensorCores."""
    n = x_nhwc.shape[0]
    phases = _phase_stack(x_nhwc, cfg)
    _, tot_rows, wphc = phases.shape
    ho, wo, cout = cfg["ho"], cfg["wo"], cfg["cout"]
    taps = _taps(cfg)
    has_norm = "gamma" in prep

    inputs = [phases, prep["rw"]]
    in_specs = [
        pl.BlockSpec((1, tot_rows, wphc), lambda i: (i, 0, 0)),
        _full_spec(prep["rw"].shape),
    ]
    if has_norm:
        inputs += [prep["gamma"], prep["beta"], prep["g2c"], prep["c2g"]]
        in_specs += [_full_spec(prep["gamma"].shape), _full_spec(prep["beta"].shape),
                     _full_spec(prep["g2c"].shape), _full_spec(prep["c2g"].shape)]

    if head_prep is not None:
        inputs.append(head_prep["w4"])
        in_specs.append(_full_spec(head_prep["w4"].shape))
        kernel = functools.partial(_conv_in_lrelu_head_kernel, taps=taps, ho=ho,
                                   n_spatial=float(ho * wo))
        out_shape = jax.ShapeDtypeStruct((n, 1, 1), jnp.float32)
        out_spec = pl.BlockSpec((1, 1, 1), lambda i: (i, 0, 0))
    elif has_norm:
        kernel = functools.partial(_conv_in_lrelu_kernel, taps=taps, ho=ho,
                                   n_spatial=float(ho * wo))
        out_shape = jax.ShapeDtypeStruct((n, ho, wo * cout), jnp.float32)
        out_spec = pl.BlockSpec((1, ho, wo * cout), lambda i: (i, 0, 0))
    else:
        kernel = functools.partial(_conv_lrelu_kernel, taps=taps, ho=ho)
        out_shape = jax.ShapeDtypeStruct((n, ho, wo * cout), jnp.float32)
        out_spec = pl.BlockSpec((1, ho, wo * cout), lambda i: (i, 0, 0))

    out = pl.pallas_call(
        kernel,
        out_shape=out_shape,
        grid=(n,),
        in_specs=in_specs,
        out_specs=out_spec,
        compiler_params=pltpu.CompilerParams(
            dimension_semantics=("parallel",)),
    )(*inputs)

    if head_prep is not None:
        return out                                    # (N, 1, 1)
    return out.reshape(n, ho, wo, cout)               # NHWC for the next layer


def netD_forward(prep, x_nchw, *, plan):
    """Whole discriminator: NCHW in, (N, 1) sigmoid scores out.

    4 fused pallas_calls (layer 4 is folded into layer 3); activations move
    between layers in an NHWC/(H, W*C) layout, never as im2col buffers."""
    x = jnp.transpose(x_nchw, (0, 2, 3, 1)).astype(jnp.float32)
    x = fused_conv_layer(x, plan[0], prep[0])                        # conv0 + lrelu
    x = fused_conv_layer(x, plan[1], prep[1])                        # conv1 + IN + lrelu
    x = fused_conv_layer(x, plan[2], prep[2])                        # conv2 + IN + lrelu
    out = fused_conv_layer(x, plan[3], prep[3], head_prep=prep[4])   # conv3 + IN + lrelu + conv4 + sigmoid
    return out.reshape(-1, 1)                                        # == x.view(-1, 1)


# ------------------------- pure-JAX reference (for validation) -------------------------

def netD_reference(params, x_nchw):
    x = x_nchw.astype(jnp.float32)
    for li, (kh, kw, sh, sw, ph, pw) in enumerate(CONV_CFG):
        x = lax.conv_general_dilated(
            x, params["conv_w"][li], window_strides=(sh, sw),
            padding=((ph, ph), (pw, pw)),
            dimension_numbers=("NCHW", "OIHW", "NCHW"),
            precision=lax.Precision.HIGHEST)
        if 1 <= li <= 3:
            g = params["in_gamma"][li - 1][None, :, None, None]
            b = params["in_beta"][li - 1][None, :, None, None]
            mean = jnp.mean(x, axis=(2, 3), keepdims=True)
            var = jnp.mean((x - mean) ** 2, axis=(2, 3), keepdims=True)
            x = (x - mean) / jnp.sqrt(var + IN_EPS) * g + b
        if li < 4:
            x = jnp.where(x > 0, x, LRELU_SLOPE * x)
    x = 1.0 / (1.0 + jnp.exp(-x))
    return x.reshape(-1, 1)


if __name__ == "__main__":
    key = jax.random.PRNGKey(0)
    k_params, k_x = jax.random.split(key)

    # "16col" architecture: width must be 16; height 128 makes the final
    # (6,3) conv produce a 1x1 map.  Small batch/channels for the demo.
    ndf, nc = 8, 1
    N, H, W = 2, 128, 16

    params = init_params(k_params, ndf, nc)
    plan = plan_layers(H, W, nc, ndf)
    prep = prepare_params(params, plan)            # weight packing: once, outside jit
    x = jax.random.normal(k_x, (N, nc, H, W), dtype=jnp.float32)

    fwd = jax.jit(functools.partial(netD_forward, plan=plan))
    out = jax.block_until_ready(fwd(prep, x))

    ref = netD_reference(params, x)
    assert out.shape == (N, 1), out.shape
    # Conv matmuls run as a single bf16 MXU pass (Precision.DEFAULT, per the
    # perf review); 3e-3 covers bf16 input rounding vs. the f32 HIGHEST
    # reference.  Set MATMUL_PRECISION=HIGHEST to recover <1e-5 agreement.
    assert jnp.allclose(out, ref, atol=3e-3, rtol=3e-3), (out, ref)

    print("KERNEL_OK")
</pallas_src>

<mosaic_0001>
module attributes {stable_mosaic.version = 11 : i64} {
  func.func @_conv_lrelu_kernel(%arg0: i32, %arg1: memref<1x260x9xf32, #tpu.memory_space<vmem>>, %arg2: memref<8x9x64xf32, #tpu.memory_space<vmem>>, %arg3: memref<1x64x64xf32, #tpu.memory_space<vmem>>) attributes {dimension_semantics = [#tpu.dimension_semantics<parallel>], iteration_bounds = array<i64: 2>, scalar_prefetch = 0 : i64, scratch_operands = 0 : i64, tpu.core_type = #tpu.core_type<tc>, window_params = [{transform_indices = @transform_0, window_bounds = array<i64: 1, 260, 9>}, {pipeline_mode = #tpu.pipeline_mode<synchronous>, transform_indices = @transform_1, window_bounds = array<i64: 8, 9, 64>}, {transform_indices = @transform_2, window_bounds = array<i64: 1, 64, 64>}]} {
    %c0 = arith.constant 0 : index
    %c0_0 = arith.constant 0 : index
    %c0_1 = arith.constant 0 : index
    %0 = vector.load %arg1[%c0, %c0_0, %c0_1] : memref<1x260x9xf32, #tpu.memory_space<vmem>>, vector<1x64x9xf32>
    %1 = vector.shape_cast %0 : vector<1x64x9xf32> to vector<64x9xf32>
    %c0_2 = arith.constant 0 : index
    %c0_3 = arith.constant 0 : index
    %c0_4 = arith.constant 0 : index
    %2 = vector.load %arg2[%c0_2, %c0_3, %c0_4] : memref<8x9x64xf32, #tpu.memory_space<vmem>>, vector<1x9x64xf32>
    %3 = vector.shape_cast %2 : vector<1x9x64xf32> to vector<9x64xf32>
    %cst = arith.constant dense<0.000000e+00> : vector<64x64xf32>
    %4 = tpu.matmul %1, %3, %cst {dimension_numbers = #tpu.dot_dimension_numbers<[1], [0], [0], [1], [0, 0, 1, 1], [], []>} : vector<64x9xf32>, vector<9x64xf32>, vector<64x64xf32> -> vector<64x64xf32>
    %c0_5 = arith.constant 0 : index
    %c65 = arith.constant 65 : index
    %c0_6 = arith.constant 0 : index
    %5 = vector.load %arg1[%c0_5, %c65, %c0_6] : memref<1x260x9xf32, #tpu.memory_space<vmem>>, vector<1x64x9xf32>
    %6 = vector.shape_cast %5 : vector<1x64x9xf32> to vector<64x9xf32>
    %c1 = arith.constant 1 : index
    %c0_7 = arith.constant 0 : index
    %c0_8 = arith.constant 0 : index
    %7 = vector.load %arg2[%c1, %c0_7, %c0_8] : memref<8x9x64xf32, #tpu.memory_space<vmem>>, vector<1x9x64xf32>
    %8 = vector.shape_cast %7 : vector<1x9x64xf32> to vector<9x64xf32>
    %cst_9 = arith.constant dense<0.000000e+00> : vector<64x64xf32>
    %9 = tpu.matmul %6, %8, %cst_9 {dimension_numbers = #tpu.dot_dimension_numbers<[1], [0], [0], [1], [0, 0, 1, 1], [], []>} : vector<64x9xf32>, vector<9x64xf32>, vector<64x64xf32> -> vector<64x64xf32>
    %10 = arith.addf %4, %9 : vector<64x64xf32>
    %c0_10 = arith.constant 0 : index
    %c130 = arith.constant 130 : index
    %c0_11 = arith.constant 0 : index
    %11 = vector.load %arg1[%c0_10, %c130, %c0_11] : memref<1x260x9xf32, #tpu.memory_space<vmem>>, vector<1x64x9xf32>
    %12 = vector.shape_cast %11 : vector<1x64x9xf32> to vector<64x9xf32>
    %c2 = arith.constant 2 : index
    %c0_12 = arith.constant 0 : index
    %c0_13 = arith.constant 0 : index
    %13 = vector.load %arg2[%c2, %c0_12, %c0_13] : memref<8x9x64xf32, #tpu.memory_space<vmem>>, vector<1x9x64xf32>
    %14 = vector.shape_cast %13 : vector<1x9x64xf32> to vector<9x64xf32>
    %cst_14 = arith.constant dense<0.000000e+00> : vector<64x64xf32>
    %15 = tpu.matmul %12, %14, %cst_14 {dimension_numbers = #tpu.dot_dimension_numbers<[1], [0], [0], [1], [0, 0, 1, 1], [], []>} : vector<64x9xf32>, vector<9x64xf32>, vector<64x64xf32> -> vector<64x64xf32>
    %16 = arith.addf %10, %15 : vector<64x64xf32>
    %c0_15 = arith.constant 0 : index
    %c195 = arith.constant 195 : index
    %c0_16 = arith.constant 0 : index
    %17 = vector.load %arg1[%c0_15, %c195, %c0_16] : memref<1x260x9xf32, #tpu.memory_space<vmem>>, vector<1x64x9xf32>
    %18 = vector.shape_cast %17 : vector<1x64x9xf32> to vector<64x9xf32>
    %c3 = arith.constant 3 : index
    %c0_17 = arith.constant 0 : index
    %c0_18 = arith.constant 0 : index
    %19 = vector.load %arg2[%c3, %c0_17, %c0_18] : memref<8x9x64xf32, #tpu.memory_space<vmem>>, vector<1x9x64xf32>
    %20 = vector.shape_cast %19 : vector<1x9x64xf32> to vector<9x64xf32>
    %cst_19 = arith.constant dense<0.000000e+00> : vector<64x64xf32>
    %21 = tpu.matmul %18, %20, %cst_19 {dimension_numbers = #tpu.dot_dimension_numbers<[1], [0], [0], [1], [0, 0, 1, 1], [], []>} : vector<64x9xf32>, vector<9x64xf32>, vector<64x64xf32> -> vector<64x64xf32>
    %22 = arith.addf %16, %21 : vector<64x64xf32>
    %c0_20 = arith.constant 0 : index
    %c1_21 = arith.constant 1 : index
    %c0_22 = arith.constant 0 : index
    %23 = vector.load %arg1[%c0_20, %c1_21, %c0_22] : memref<1x260x9xf32, #tpu.memory_space<vmem>>, vector<1x64x9xf32>
    %24 = vector.shape_cast %23 : vector<1x64x9xf32> to vector<64x9xf32>
    %c4 = arith.constant 4 : index
    %c0_23 = arith.constant 0 : index
    %c0_24 = arith.constant 0 : index
    %25 = vector.load %arg2[%c4, %c0_23, %c0_24] : memref<8x9x64xf32, #tpu.memory_space<vmem>>, vector<1x9x64xf32>
    %26 = vector.shape_cast %25 : vector<1x9x64xf32> to vector<9x64xf32>
    %cst_25 = arith.constant dense<0.000000e+00> : vector<64x64xf32>
    %27 = tpu.matmul %24, %26, %cst_25 {dimension_numbers = #tpu.dot_dimension_numbers<[1], [0], [0], [1], [0, 0, 1, 1], [], []>} : vector<64x9xf32>, vector<9x64xf32>, vector<64x64xf32> -> vector<64x64xf32>
    %28 = arith.addf %22, %27 : vector<64x64xf32>
    %c0_26 = arith.constant 0 : index
    %c66 = arith.constant 66 : index
    %c0_27 = arith.constant 0 : index
    %29 = vector.load %arg1[%c0_26, %c66, %c0_27] : memref<1x260x9xf32, #tpu.memory_space<vmem>>, vector<1x64x9xf32>
    %30 = vector.shape_cast %29 : vector<1x64x9xf32> to vector<64x9xf32>
    %c5 = arith.constant 5 : index
    %c0_28 = arith.constant 0 : index
    %c0_29 = arith.constant 0 : index
    %31 = vector.load %arg2[%c5, %c0_28, %c0_29] : memref<8x9x64xf32, #tpu.memory_space<vmem>>, vector<1x9x64xf32>
    %32 = vector.shape_cast %31 : vector<1x9x64xf32> to vector<9x64xf32>
    %cst_30 = arith.constant dense<0.000000e+00> : vector<64x64xf32>
    %33 = tpu.matmul %30, %32, %cst_30 {dimension_numbers = #tpu.dot_dimension_numbers<[1], [0], [0], [1], [0, 0, 1, 1], [], []>} : vector<64x9xf32>, vector<9x64xf32>, vector<64x64xf32> -> vector<64x64xf32>
    %34 = arith.addf %28, %33 : vector<64x64xf32>
    %c0_31 = arith.constant 0 : index
    %c131 = arith.constant 131 : index
    %c0_32 = arith.constant 0 : index
    %35 = vector.load %arg1[%c0_31, %c131, %c0_32] : memref<1x260x9xf32, #tpu.memory_space<vmem>>, vector<1x64x9xf32>
    %36 = vector.shape_cast %35 : vector<1x64x9xf32> to vector<64x9xf32>
    %c6 = arith.constant 6 : index
    %c0_33 = arith.constant 0 : index
    %c0_34 = arith.constant 0 : index
    %37 = vector.load %arg2[%c6, %c0_33, %c0_34] : memref<8x9x64xf32, #tpu.memory_space<vmem>>, vector<1x9x64xf32>
    %38 = vector.shape_cast %37 : vector<1x9x64xf32> to vector<9x64xf32>
    %cst_35 = arith.constant dense<0.000000e+00> : vector<64x64xf32>
    %39 = tpu.matmul %36, %38, %cst_35 {dimension_numbers = #tpu.dot_dimension_numbers<[1], [0], [0], [1], [0, 0, 1, 1], [], []>} : vector<64x9xf32>, vector<9x64xf32>, vector<64x64xf32> -> vector<64x64xf32>
    %40 = arith.addf %34, %39 : vector<64x64xf32>
    %c0_36 = arith.constant 0 : index
    %c196 = arith.constant 196 : index
    %c0_37 = arith.constant 0 : index
    %41 = vector.load %arg1[%c0_36, %c196, %c0_37] : memref<1x260x9xf32, #tpu.memory_space<vmem>>, vector<1x64x9xf32>
    %42 = vector.shape_cast %41 : vector<1x64x9xf32> to vector<64x9xf32>
    %c7 = arith.constant 7 : index
    %c0_38 = arith.constant 0 : index
    %c0_39 = arith.constant 0 : index
    %43 = vector.load %arg2[%c7, %c0_38, %c0_39] : memref<8x9x64xf32, #tpu.memory_space<vmem>>, vector<1x9x64xf32>
    %44 = vector.shape_cast %43 : vector<1x9x64xf32> to vector<9x64xf32>
    %cst_40 = arith.constant dense<0.000000e+00> : vector<64x64xf32>
    %45 = tpu.matmul %42, %44, %cst_40 {dimension_numbers = #tpu.dot_dimension_numbers<[1], [0], [0], [1], [0, 0, 1, 1], [], []>} : vector<64x9xf32>, vector<9x64xf32>, vector<64x64xf32> -> vector<64x64xf32>
    %46 = arith.addf %40, %45 : vector<64x64xf32>
    %cst_41 = arith.constant 0.000000e+00 : f32
    %47 = vector.broadcast %cst_41 : f32 to vector<64x64xf32>
    %48 = arith.cmpf ogt, %46, %47 : vector<64x64xf32>
    %cst_42 = arith.constant 2.000000e-01 : f32
    %49 = vector.broadcast %cst_42 : f32 to vector<64x64xf32>
    %50 = arith.mulf %49, %46 : vector<64x64xf32>
    %51 = arith.select %48, %46, %50 : vector<64x64xi1>, vector<64x64xf32>
    %c0_43 = arith.constant 0 : index
    %c0_44 = arith.constant 0 : index
    %c0_45 = arith.constant 0 : index
    %52 = vector.load %arg3[%c0_43, %c0_44, %c0_45] : memref<1x64x64xf32, #tpu.memory_space<vmem>>, vector<1x64x64xf32>
    %53 = vector.shape_cast %52 : vector<1x64x64xf32> to vector<64x64xf32>
    %54 = vector.shape_cast %51 : vector<64x64xf32> to vector<1x64x64xf32>
    tpu.vector_store %arg3[%c0_43, %c0_44, %c0_45], %54 {strides = array<i32>} : memref<1x64x64xf32, #tpu.memory_space<vmem>>, vector<1x64x64xf32>,
    return
  }
  func.func @transform_0(%arg0: i32) -> (i32, i32, i32) {
    %c0_i32 = arith.constant 0 : i32
    %c0_i32_0 = arith.constant 0 : i32
    %c0_i32_1 = arith.constant 0 : i32
    return %arg0, %c0_i32, %c0_i32_0 : i32, i32, i32
  }
  func.func @transform_1(%arg0: i32) -> (i32, i32, i32) {
    %c0_i32 = arith.constant 0 : i32
    %c0_i32_0 = arith.constant 0 : i32
    %c0_i32_1 = arith.constant 0 : i32
    %c0_i32_2 = arith.constant 0 : i32
    return %c0_i32, %c0_i32_0, %c0_i32_1 : i32, i32, i32
  }
  func.func @transform_2(%arg0: i32) -> (i32, i32, i32) {
    %c0_i32 = arith.constant 0 : i32
    %c0_i32_0 = arith.constant 0 : i32
    %c0_i32_1 = arith.constant 0 : i32
    return %arg0, %c0_i32, %c0_i32_0 : i32, i32, i32
  }
}

module attributes {stable_mosaic.version = 11 : i64} {
  func.func @_conv_in_lrelu_kernel(%arg0: i32, %arg1: memref<1x66x64xf32, #tpu.memory_space<vmem>>, %arg2: memref<4x64x96xf32, #tpu.memory_space<vmem>>, %arg3: memref<1x16xf32, #tpu.memory_space<vmem>>, %arg4: memref<1x16xf32, #tpu.memory_space<vmem>>, %arg5: memref<96x16xf32, #tpu.memory_space<vmem>>, %arg6: memref<16x96xf32, #tpu.memory_space<vmem>>, %arg7: memref<1x32x96xf32, #tpu.memory_space<vmem>>) attributes {dimension_semantics = [#tpu.dimension_semantics<parallel>], iteration_bounds = array<i64: 2>, scalar_prefetch = 0 : i64, scratch_operands = 0 : i64, tpu.core_type = #tpu.core_type<tc>, window_params = [{transform_indices = @transform_0, window_bounds = array<i64: 1, 66, 64>}, {pipeline_mode = #tpu.pipeline_mode<synchronous>, transform_indices = @transform_1, window_bounds = array<i64: 4, 64, 96>}, {pipeline_mode = #tpu.pipeline_mode<synchronous>, transform_indices = @transform_2, window_bounds = array<i64: 1, 16>}, {pipeline_mode = #tpu.pipeline_mode<synchronous>, transform_indices = @transform_3, window_bounds = array<i64: 1, 16>}, {pipeline_mode = #tpu.pipeline_mode<synchronous>, transform_indices = @transform_4, window_bounds = array<i64: 96, 16>}, {pipeline_mode = #tpu.pipeline_mode<synchronous>, transform_indices = @transform_5, window_bounds = array<i64: 16, 96>}, {transform_indices = @transform_6, window_bounds = array<i64: 1, 32, 96>}]} {
    %c0 = arith.constant 0 : index
    %c0_0 = arith.constant 0 : index
    %c0_1 = arith.constant 0 : index
    %0 = vector.load %arg1[%c0, %c0_0, %c0_1] : memref<1x66x64xf32, #tpu.memory_space<vmem>>, vector<1x32x64xf32>
    %1 = vector.shape_cast %0 : vector<1x32x64xf32> to vector<32x64xf32>
    %c0_2 = arith.constant 0 : index
    %c0_3 = arith.constant 0 : index
    %c0_4 = arith.constant 0 : index
    %2 = vector.load %arg2[%c0_2, %c0_3, %c0_4] : memref<4x64x96xf32, #tpu.memory_space<vmem>>, vector<1x64x96xf32>
    %3 = vector.shape_cast %2 : vector<1x64x96xf32> to vector<64x96xf32>
    %cst = arith.constant dense<0.000000e+00> : vector<32x96xf32>
    %4 = tpu.matmul %1, %3, %cst {dimension_numbers = #tpu.dot_dimension_numbers<[1], [0], [0], [1], [0, 0, 1, 1], [], []>} : vector<32x64xf32>, vector<64x96xf32>, vector<32x96xf32> -> vector<32x96xf32>
    %c0_5 = arith.constant 0 : index
    %c33 = arith.constant 33 : index
    %c0_6 = arith.constant 0 : index
    %5 = vector.load %arg1[%c0_5, %c33, %c0_6] : memref<1x66x64xf32, #tpu.memory_space<vmem>>, vector<1x32x64xf32>
    %6 = vector.shape_cast %5 : vector<1x32x64xf32> to vector<32x64xf32>
    %c1 = arith.constant 1 : index
    %c0_7 = arith.constant 0 : index
    %c0_8 = arith.constant 0 : index
    %7 = vector.load %arg2[%c1, %c0_7, %c0_8] : memref<4x64x96xf32, #tpu.memory_space<vmem>>, vector<1x64x96xf32>
    %8 = vector.shape_cast %7 : vector<1x64x96xf32> to vector<64x96xf32>
    %cst_9 = arith.constant dense<0.000000e+00> : vector<32x96xf32>
    %9 = tpu.matmul %6, %8, %cst_9 {dimension_numbers = #tpu.dot_dimension_numbers<[1], [0], [0], [1], [0, 0, 1, 1], [], []>} : vector<32x64xf32>, vector<64x96xf32>, vector<32x96xf32> -> vector<32x96xf32>
    %10 = arith.addf %4, %9 : vector<32x96xf32>
    %c0_10 = arith.constant 0 : index
    %c1_11 = arith.constant 1 : index
    %c0_12 = arith.constant 0 : index
    %11 = vector.load %arg1[%c0_10, %c1_11, %c0_12] : memref<1x66x64xf32, #tpu.memory_space<vmem>>, vector<1x32x64xf32>
    %12 = vector.shape_cast %11 : vector<1x32x64xf32> to vector<32x64xf32>
    %c2 = arith.constant 2 : index
    %c0_13 = arith.constant 0 : index
    %c0_14 = arith.constant 0 : index
    %13 = vector.load %arg2[%c2, %c0_13, %c0_14] : memref<4x64x96xf32, #tpu.memory_space<vmem>>, vector<1x64x96xf32>
    %14 = vector.shape_cast %13 : vector<1x64x96xf32> to vector<64x96xf32>
    %cst_15 = arith.constant dense<0.000000e+00> : vector<32x96xf32>
    %15 = tpu.matmul %12, %14, %cst_15 {dimension_numbers = #tpu.dot_dimension_numbers<[1], [0], [0], [1], [0, 0, 1, 1], [], []>} : vector<32x64xf32>, vector<64x96xf32>, vector<32x96xf32> -> vector<32x96xf32>
    %16 = arith.addf %10, %15 : vector<32x96xf32>
    %c0_16 = arith.constant 0 : index
    %c34 = arith.constant 34 : index
    %c0_17 = arith.constant 0 : index
    %17 = vector.load %arg1[%c0_16, %c34, %c0_17] : memref<1x66x64xf32, #tpu.memory_space<vmem>>, vector<1x32x64xf32>
    %18 = vector.shape_cast %17 : vector<1x32x64xf32> to vector<32x64xf32>
    %c3 = arith.constant 3 : index
    %c0_18 = arith.constant 0 : index
    %c0_19 = arith.constant 0 : index
    %19 = vector.load %arg2[%c3, %c0_18, %c0_19] : memref<4x64x96xf32, #tpu.memory_space<vmem>>, vector<1x64x96xf32>
    %20 = vector.shape_cast %19 : vector<1x64x96xf32> to vector<64x96xf32>
    %cst_20 = arith.constant dense<0.000000e+00> : vector<32x96xf32>
    %21 = tpu.matmul %18, %20, %cst_20 {dimension_numbers = #tpu.dot_dimension_numbers<[1], [0], [0], [1], [0, 0, 1, 1], [], []>} : vector<32x64xf32>, vector<64x96xf32>, vector<32x96xf32> -> vector<32x96xf32>
    %22 = arith.addf %16, %21 : vector<32x96xf32>
    %cst_21 = arith.constant dense<0.000000e+00> : vector<96xf32>
    %23 = vector.multi_reduction <add>, %22, %cst_21 [0] : vector<32x96xf32> to vector<96xf32>
    %24 = vector.shape_cast %23 : vector<96xf32> to vector<1x96xf32>
    %c0_22 = arith.constant 0 : index
    %c0_23 = arith.constant 0 : index
    %25 = vector.load %arg5[%c0_22, %c0_23] : memref<96x16xf32, #tpu.memory_space<vmem>>, vector<96x16xf32>
    %cst_24 = arith.constant dense<0.000000e+00> : vector<1x16xf32>
    %26 = tpu.matmul %24, %25, %cst_24 {dimension_numbers = #tpu.dot_dimension_numbers<[1], [0], [0], [1], [0, 0, 1, 1], [], []>, precision = #tpu.contract_precision<fp32>} : vector<1x96xf32>, vector<96x16xf32>, vector<1x16xf32> -> vector<1x16xf32>
    %27 = arith.mulf %22, %22 : vector<32x96xf32>
    %cst_25 = arith.constant dense<0.000000e+00> : vector<96xf32>
    %28 = vector.multi_reduction <add>, %27, %cst_25 [0] : vector<32x96xf32> to vector<96xf32>
    %29 = vector.shape_cast %28 : vector<96xf32> to vector<1x96xf32>
    %c0_26 = arith.constant 0 : index
    %c0_27 = arith.constant 0 : index
    %30 = vector.load %arg5[%c0_26, %c0_27] : memref<96x16xf32, #tpu.memory_space<vmem>>, vector<96x16xf32>
    %cst_28 = arith.constant dense<0.000000e+00> : vector<1x16xf32>
    %31 = tpu.matmul %29, %30, %cst_28 {dimension_numbers = #tpu.dot_dimension_numbers<[1], [0], [0], [1], [0, 0, 1, 1], [], []>, precision = #tpu.contract_precision<fp32>} : vector<1x96xf32>, vector<96x16xf32>, vector<1x16xf32> -> vector<1x16xf32>
    %cst_29 = arith.constant 1.920000e+02 : f32
    %32 = vector.broadcast %cst_29 : f32 to vector<1x16xf32>
    %33 = arith.divf %26, %32 : vector<1x16xf32>
    %cst_30 = arith.constant 1.920000e+02 : f32
    %34 = vector.broadcast %cst_30 : f32 to vector<1x16xf32>
    %35 = arith.divf %31, %34 : vector<1x16xf32>
    %36 = arith.mulf %33, %33 : vector<1x16xf32>
    %37 = arith.subf %35, %36 : vector<1x16xf32>
    %c0_31 = arith.constant 0 : index
    %c0_32 = arith.constant 0 : index
    %38 = vector.load %arg3[%c0_31, %c0_32] : memref<1x16xf32, #tpu.memory_space<vmem>>, vector<1x16xf32>
    %cst_33 = arith.constant 9.99999974E-6 : f32
    %39 = vector.broadcast %cst_33 : f32 to vector<1x16xf32>
    %40 = arith.addf %37, %39 : vector<1x16xf32>
    %41 = math.rsqrt %40 : vector<1x16xf32>
    %42 = arith.mulf %38, %41 : vector<1x16xf32>
    %c0_34 = arith.constant 0 : index
    %c0_35 = arith.constant 0 : index
    %43 = vector.load %arg4[%c0_34, %c0_35] : memref<1x16xf32, #tpu.memory_space<vmem>>, vector<1x16xf32>
    %44 = arith.mulf %33, %42 : vector<1x16xf32>
    %45 = arith.subf %43, %44 : vector<1x16xf32>
    %c0_36 = arith.constant 0 : index
    %c0_37 = arith.constant 0 : index
    %46 = vector.load %arg6[%c0_36, %c0_37] : memref<16x96xf32, #tpu.memory_space<vmem>>, vector<16x96xf32>
    %cst_38 = arith.constant dense<0.000000e+00> : vector<1x96xf32>
    %47 = tpu.matmul %42, %46, %cst_38 {dimension_numbers = #tpu.dot_dimension_numbers<[1], [0], [0], [1], [0, 0, 1, 1], [], []>, precision = #tpu.contract_precision<fp32>} : vector<1x16xf32>, vector<16x96xf32>, vector<1x96xf32> -> vector<1x96xf32>
    %c0_39 = arith.constant 0 : index
    %c0_40 = arith.constant 0 : index
    %48 = vector.load %arg6[%c0_39, %c0_40] : memref<16x96xf32, #tpu.memory_space<vmem>>, vector<16x96xf32>
    %cst_41 = arith.constant dense<0.000000e+00> : vector<1x96xf32>
    %49 = tpu.matmul %45, %48, %cst_41 {dimension_numbers = #tpu.dot_dimension_numbers<[1], [0], [0], [1], [0, 0, 1, 1], [], []>, precision = #tpu.contract_precision<fp32>} : vector<1x16xf32>, vector<16x96xf32>, vector<1x96xf32> -> vector<1x96xf32>
    %50 = vector.broadcast %47 : vector<1x96xf32> to vector<32x96xf32>
    %51 = arith.mulf %22, %50 : vector<32x96xf32>
    %52 = vector.broadcast %49 : vector<1x96xf32> to vector<32x96xf32>
    %53 = arith.addf %51, %52 : vector<32x96xf32>
    %cst_42 = arith.constant 0.000000e+00 : f32
    %54 = vector.broadcast %cst_42 : f32 to vector<32x96xf32>
    %55 = arith.cmpf ogt, %53, %54 : vector<32x96xf32>
    %cst_43 = arith.constant 2.000000e-01 : f32
    %56 = vector.broadcast %cst_43 : f32 to vector<32x96xf32>
    %57 = arith.mulf %56, %53 : vector<32x96xf32>
    %58 = arith.select %55, %53, %57 : vector<32x96xi1>, vector<32x96xf32>
    %c0_44 = arith.constant 0 : index
    %c0_45 = arith.constant 0 : index
    %c0_46 = arith.constant 0 : index
    %59 = vector.load %arg7[%c0_44, %c0_45, %c0_46] : memref<1x32x96xf32, #tpu.memory_space<vmem>>, vector<1x32x96xf32>
    %60 = vector.shape_cast %59 : vector<1x32x96xf32> to vector<32x96xf32>
    %61 = vector.shape_cast %58 : vector<32x96xf32> to vector<1x32x96xf32>
    tpu.vector_store %arg7[%c0_44, %c0_45, %c0_46], %61 {strides = array<i32>} : memref<1x32x96xf32, #tpu.memory_space<vmem>>, vector<1x32x96xf32>,
    return
  }
  func.func @transform_0(%arg0: i32) -> (i32, i32, i32) {
    %c0_i32 = arith.constant 0 : i32
    %c0_i32_0 = arith.constant 0 : i32
    %c0_i32_1 = arith.constant 0 : i32
    return %arg0, %c0_i32, %c0_i32_0 : i32, i32, i32
  }
  func.func @transform_1(%arg0: i32) -> (i32, i32, i32) {
    %c0_i32 = arith.constant 0 : i32
    %c0_i32_0 = arith.constant 0 : i32
    %c0_i32_1 = arith.constant 0 : i32
    %c0_i32_2 = arith.constant 0 : i32
    return %c0_i32, %c0_i32_0, %c0_i32_1 : i32, i32, i32
  }
  func.func @transform_2(%arg0: i32) -> (i32, i32) {
    %c0_i32 = arith.constant 0 : i32
    %c0_i32_0 = arith.constant 0 : i32
    %c0_i32_1 = arith.constant 0 : i32
    return %c0_i32, %c0_i32_0 : i32, i32
  }
  func.func @transform_3(%arg0: i32) -> (i32, i32) {
    %c0_i32 = arith.constant 0 : i32
    %c0_i32_0 = arith.constant 0 : i32
    %c0_i32_1 = arith.constant 0 : i32
    return %c0_i32, %c0_i32_0 : i32, i32
  }
  func.func @transform_4(%arg0: i32) -> (i32, i32) {
    %c0_i32 = arith.constant 0 : i32
    %c0_i32_0 = arith.constant 0 : i32
    %c0_i32_1 = arith.constant 0 : i32
    return %c0_i32, %c0_i32_0 : i32, i32
  }
  func.func @transform_5(%arg0: i32) -> (i32, i32) {
    %c0_i32 = arith.constant 0 : i32
    %c0_i32_0 = arith.constant 0 : i32
    %c0_i32_1 = arith.constant 0 : i32
    return %c0_i32, %c0_i32_0 : i32, i32
  }
  func.func @transform_6(%arg0: i32) -> (i32, i32, i32) {
    %c0_i32 = arith.constant 0 : i32
    %c0_i32_0 = arith.constant 0 : i32
    %c0_i32_1 = arith.constant 0 : i32
    return %arg0, %c0_i32, %c0_i32_0 : i32, i32, i32
  }
}

module attributes {stable_mosaic.version = 11 : i64} {
  func.func @_conv_in_lrelu_kernel(%arg0: i32, %arg1: memref<1x36x96xf32, #tpu.memory_space<vmem>>, %arg2: memref<4x96x128xf32, #tpu.memory_space<vmem>>, %arg3: memref<1x32xf32, #tpu.memory_space<vmem>>, %arg4: memref<1x32xf32, #tpu.memory_space<vmem>>, %arg5: memref<128x32xf32, #tpu.memory_space<vmem>>, %arg6: memref<32x128xf32, #tpu.memory_space<vmem>>, %arg7: memref<1x17x128xf32, #tpu.memory_space<vmem>>) attributes {dimension_semantics = [#tpu.dimension_semantics<parallel>], iteration_bounds = array<i64: 2>, scalar_prefetch = 0 : i64, scratch_operands = 0 : i64, tpu.core_type = #tpu.core_type<tc>, window_params = [{transform_indices = @transform_0, window_bounds = array<i64: 1, 36, 96>}, {pipeline_mode = #tpu.pipeline_mode<synchronous>, transform_indices = @transform_1, window_bounds = array<i64: 4, 96, 128>}, {pipeline_mode = #tpu.pipeline_mode<synchronous>, transform_indices = @transform_2, window_bounds = array<i64: 1, 32>}, {pipeline_mode = #tpu.pipeline_mode<synchronous>, transform_indices = @transform_3, window_bounds = array<i64: 1, 32>}, {pipeline_mode = #tpu.pipeline_mode<synchronous>, transform_indices = @transform_4, window_bounds = array<i64: 128, 32>}, {pipeline_mode = #tpu.pipeline_mode<synchronous>, transform_indices = @transform_5, window_bounds = array<i64: 32, 128>}, {transform_indices = @transform_6, window_bounds = array<i64: 1, 17, 128>}]} {
    %c0 = arith.constant 0 : index
    %c0_0 = arith.constant 0 : index
    %c0_1 = arith.constant 0 : index
    %0 = vector.load %arg1[%c0, %c0_0, %c0_1] : memref<1x36x96xf32, #tpu.memory_space<vmem>>, vector<1x17x96xf32>
    %1 = vector.shape_cast %0 : vector<1x17x96xf32> to vector<17x96xf32>
    %c0_2 = arith.constant 0 : index
    %c0_3 = arith.constant 0 : index
    %c0_4 = arith.constant 0 : index
    %2 = vector.load %arg2[%c0_2, %c0_3, %c0_4] : memref<4x96x128xf32, #tpu.memory_space<vmem>>, vector<1x96x128xf32>
    %3 = vector.shape_cast %2 : vector<1x96x128xf32> to vector<96x128xf32>
    %cst = arith.constant dense<0.000000e+00> : vector<17x128xf32>
    %4 = tpu.matmul %1, %3, %cst {dimension_numbers = #tpu.dot_dimension_numbers<[1], [0], [0], [1], [0, 0, 1, 1], [], []>} : vector<17x96xf32>, vector<96x128xf32>, vector<17x128xf32> -> vector<17x128xf32>
    %c0_5 = arith.constant 0 : index
    %c18 = arith.constant 18 : index
    %c0_6 = arith.constant 0 : index
    %5 = vector.load %arg1[%c0_5, %c18, %c0_6] : memref<1x36x96xf32, #tpu.memory_space<vmem>>, vector<1x17x96xf32>
    %6 = vector.shape_cast %5 : vector<1x17x96xf32> to vector<17x96xf32>
    %c1 = arith.constant 1 : index
    %c0_7 = arith.constant 0 : index
    %c0_8 = arith.constant 0 : index
    %7 = vector.load %arg2[%c1, %c0_7, %c0_8] : memref<4x96x128xf32, #tpu.memory_space<vmem>>, vector<1x96x128xf32>
    %8 = vector.shape_cast %7 : vector<1x96x128xf32> to vector<96x128xf32>
    %cst_9 = arith.constant dense<0.000000e+00> : vector<17x128xf32>
    %9 = tpu.matmul %6, %8, %cst_9 {dimension_numbers = #tpu.dot_dimension_numbers<[1], [0], [0], [1], [0, 0, 1, 1], [], []>} : vector<17x96xf32>, vector<96x128xf32>, vector<17x128xf32> -> vector<17x128xf32>
    %10 = arith.addf %4, %9 : vector<17x128xf32>
    %c0_10 = arith.constant 0 : index
    %c1_11 = arith.constant 1 : index
    %c0_12 = arith.constant 0 : index
    %11 = vector.load %arg1[%c0_10, %c1_11, %c0_12] : memref<1x36x96xf32, #tpu.memory_space<vmem>>, vector<1x17x96xf32>
    %12 = vector.shape_cast %11 : vector<1x17x96xf32> to vector<17x96xf32>
    %c2 = arith.constant 2 : index
    %c0_13 = arith.constant 0 : index
    %c0_14 = arith.constant 0 : index
    %13 = vector.load %arg2[%c2, %c0_13, %c0_14] : memref<4x96x128xf32, #tpu.memory_space<vmem>>, vector<1x96x128xf32>
    %14 = vector.shape_cast %13 : vector<1x96x128xf32> to vector<96x128xf32>
    %cst_15 = arith.constant dense<0.000000e+00> : vector<17x128xf32>
    %15 = tpu.matmul %12, %14, %cst_15 {dimension_numbers = #tpu.dot_dimension_numbers<[1], [0], [0], [1], [0, 0, 1, 1], [], []>} : vector<17x96xf32>, vector<96x128xf32>, vector<17x128xf32> -> vector<17x128xf32>
    %16 = arith.addf %10, %15 : vector<17x128xf32>
    %c0_16 = arith.constant 0 : index
    %c19 = arith.constant 19 : index
    %c0_17 = arith.constant 0 : index
    %17 = vector.load %arg1[%c0_16, %c19, %c0_17] : memref<1x36x96xf32, #tpu.memory_space<vmem>>, vector<1x17x96xf32>
    %18 = vector.shape_cast %17 : vector<1x17x96xf32> to vector<17x96xf32>
    %c3 = arith.constant 3 : index
    %c0_18 = arith.constant 0 : index
    %c0_19 = arith.constant 0 : index
    %19 = vector.load %arg2[%c3, %c0_18, %c0_19] : memref<4x96x128xf32, #tpu.memory_space<vmem>>, vector<1x96x128xf32>
    %20 = vector.shape_cast %19 : vector<1x96x128xf32> to vector<96x128xf32>
    %cst_20 = arith.constant dense<0.000000e+00> : vector<17x128xf32>
    %21 = tpu.matmul %18, %20, %cst_20 {dimension_numbers = #tpu.dot_dimension_numbers<[1], [0], [0], [1], [0, 0, 1, 1], [], []>} : vector<17x96xf32>, vector<96x128xf32>, vector<17x128xf32> -> vector<17x128xf32>
    %22 = arith.addf %16, %21 : vector<17x128xf32>
    %cst_21 = arith.constant dense<0.000000e+00> : vector<128xf32>
    %23 = vector.multi_reduction <add>, %22, %cst_21 [0] : vector<17x128xf32> to vector<128xf32>
    %24 = vector.shape_cast %23 : vector<128xf32> to vector<1x128xf32>
    %c0_22 = arith.constant 0 : index
    %c0_23 = arith.constant 0 : index
    %25 = vector.load %arg5[%c0_22, %c0_23] : memref<128x32xf32, #tpu.memory_space<vmem>>, vector<128x32xf32>
    %cst_24 = arith.constant dense<0.000000e+00> : vector<1x32xf32>
    %26 = tpu.matmul %24, %25, %cst_24 {dimension_numbers = #tpu.dot_dimension_numbers<[1], [0], [0], [1], [0, 0, 1, 1], [], []>, precision = #tpu.contract_precision<fp32>} : vector<1x128xf32>, vector<128x32xf32>, vector<1x32xf32> -> vector<1x32xf32>
    %27 = arith.mulf %22, %22 : vector<17x128xf32>
    %cst_25 = arith.constant dense<0.000000e+00> : vector<128xf32>
    %28 = vector.multi_reduction <add>, %27, %cst_25 [0] : vector<17x128xf32> to vector<128xf32>
    %29 = vector.shape_cast %28 : vector<128xf32> to vector<1x128xf32>
    %c0_26 = arith.constant 0 : index
    %c0_27 = arith.constant 0 : index
    %30 = vector.load %arg5[%c0_26, %c0_27] : memref<128x32xf32, #tpu.memory_space<vmem>>, vector<128x32xf32>
    %cst_28 = arith.constant dense<0.000000e+00> : vector<1x32xf32>
    %31 = tpu.matmul %29, %30, %cst_28 {dimension_numbers = #tpu.dot_dimension_numbers<[1], [0], [0], [1], [0, 0, 1, 1], [], []>, precision = #tpu.contract_precision<fp32>} : vector<1x128xf32>, vector<128x32xf32>, vector<1x32xf32> -> vector<1x32xf32>
    %cst_29 = arith.constant 6.800000e+01 : f32
    %32 = vector.broadcast %cst_29 : f32 to vector<1x32xf32>
    %33 = arith.divf %26, %32 : vector<1x32xf32>
    %cst_30 = arith.constant 6.800000e+01 : f32
    %34 = vector.broadcast %cst_30 : f32 to vector<1x32xf32>
    %35 = arith.divf %31, %34 : vector<1x32xf32>
    %36 = arith.mulf %33, %33 : vector<1x32xf32>
    %37 = arith.subf %35, %36 : vector<1x32xf32>
    %c0_31 = arith.constant 0 : index
    %c0_32 = arith.constant 0 : index
    %38 = vector.load %arg3[%c0_31, %c0_32] : memref<1x32xf32, #tpu.memory_space<vmem>>, vector<1x32xf32>
    %cst_33 = arith.constant 9.99999974E-6 : f32
    %39 = vector.broadcast %cst_33 : f32 to vector<1x32xf32>
    %40 = arith.addf %37, %39 : vector<1x32xf32>
    %41 = math.rsqrt %40 : vector<1x32xf32>
    %42 = arith.mulf %38, %41 : vector<1x32xf32>
    %c0_34 = arith.constant 0 : index
    %c0_35 = arith.constant 0 : index
    %43 = vector.load %arg4[%c0_34, %c0_35] : memref<1x32xf32, #tpu.memory_space<vmem>>, vector<1x32xf32>
    %44 = arith.mulf %33, %42 : vector<1x32xf32>
    %45 = arith.subf %43, %44 : vector<1x32xf32>
    %c0_36 = arith.constant 0 : index
    %c0_37 = arith.constant 0 : index
    %46 = vector.load %arg6[%c0_36, %c0_37] : memref<32x128xf32, #tpu.memory_space<vmem>>, vector<32x128xf32>
    %cst_38 = arith.constant dense<0.000000e+00> : vector<1x128xf32>
    %47 = tpu.matmul %42, %46, %cst_38 {dimension_numbers = #tpu.dot_dimension_numbers<[1], [0], [0], [1], [0, 0, 1, 1], [], []>, precision = #tpu.contract_precision<fp32>} : vector<1x32xf32>, vector<32x128xf32>, vector<1x128xf32> -> vector<1x128xf32>
    %c0_39 = arith.constant 0 : index
    %c0_40 = arith.constant 0 : index
    %48 = vector.load %arg6[%c0_39, %c0_40] : memref<32x128xf32, #tpu.memory_space<vmem>>, vector<32x128xf32>
    %cst_41 = arith.constant dense<0.000000e+00> : vector<1x128xf32>
    %49 = tpu.matmul %45, %48, %cst_41 {dimension_numbers = #tpu.dot_dimension_numbers<[1], [0], [0], [1], [0, 0, 1, 1], [], []>, precision = #tpu.contract_precision<fp32>} : vector<1x32xf32>, vector<32x128xf32>, vector<1x128xf32> -> vector<1x128xf32>
    %50 = vector.broadcast %47 : vector<1x128xf32> to vector<17x128xf32>
    %51 = arith.mulf %22, %50 : vector<17x128xf32>
    %52 = vector.broadcast %49 : vector<1x128xf32> to vector<17x128xf32>
    %53 = arith.addf %51, %52 : vector<17x128xf32>
    %cst_42 = arith.constant 0.000000e+00 : f32
    %54 = vector.broadcast %cst_42 : f32 to vector<17x128xf32>
    %55 = arith.cmpf ogt, %53, %54 : vector<17x128xf32>
    %cst_43 = arith.constant 2.000000e-01 : f32
    %56 = vector.broadcast %cst_43 : f32 to vector<17x128xf32>
    %57 = arith.mulf %56, %53 : vector<17x128xf32>
    %58 = arith.select %55, %53, %57 : vector<17x128xi1>, vector<17x128xf32>
    %c0_44 = arith.constant 0 : index
    %c0_45 = arith.constant 0 : index
    %c0_46 = arith.constant 0 : index
    %59 = vector.load %arg7[%c0_44, %c0_45, %c0_46] : memref<1x17x128xf32, #tpu.memory_space<vmem>>, vector<1x17x128xf32>
    %60 = vector.shape_cast %59 : vector<1x17x128xf32> to vector<17x128xf32>
    %61 = vector.shape_cast %58 : vector<17x128xf32> to vector<1x17x128xf32>
    tpu.vector_store %arg7[%c0_44, %c0_45, %c0_46], %61 {strides = array<i32>} : memref<1x17x128xf32, #tpu.memory_space<vmem>>, vector<1x17x128xf32>,
    return
  }
  func.func @transform_0(%arg0: i32) -> (i32, i32, i32) {
    %c0_i32 = arith.constant 0 : i32
    %c0_i32_0 = arith.constant 0 : i32
    %c0_i32_1 = arith.constant 0 : i32
    return %arg0, %c0_i32, %c0_i32_0 : i32, i32, i32
  }
  func.func @transform_1(%arg0: i32) -> (i32, i32, i32) {
    %c0_i32 = arith.constant 0 : i32
    %c0_i32_0 = arith.constant 0 : i32
    %c0_i32_1 = arith.constant 0 : i32
    %c0_i32_2 = arith.constant 0 : i32
    return %c0_i32, %c0_i32_0, %c0_i32_1 : i32, i32, i32
  }
  func.func @transform_2(%arg0: i32) -> (i32, i32) {
    %c0_i32 = arith.constant 0 : i32
    %c0_i32_0 = arith.constant 0 : i32
    %c0_i32_1 = arith.constant 0 : i32
    return %c0_i32, %c0_i32_0 : i32, i32
  }
  func.func @transform_3(%arg0: i32) -> (i32, i32) {
    %c0_i32 = arith.constant 0 : i32
    %c0_i32_0 = arith.constant 0 : i32
    %c0_i32_1 = arith.constant 0 : i32
    return %c0_i32, %c0_i32_0 : i32, i32
  }
  func.func @transform_4(%arg0: i32) -> (i32, i32) {
    %c0_i32 = arith.constant 0 : i32
    %c0_i32_0 = arith.constant 0 : i32
    %c0_i32_1 = arith.constant 0 : i32
    return %c0_i32, %c0_i32_0 : i32, i32
  }
  func.func @transform_5(%arg0: i32) -> (i32, i32) {
    %c0_i32 = arith.constant 0 : i32
    %c0_i32_0 = arith.constant 0 : i32
    %c0_i32_1 = arith.constant 0 : i32
    return %c0_i32, %c0_i32_0 : i32, i32
  }
  func.func @transform_6(%arg0: i32) -> (i32, i32, i32) {
    %c0_i32 = arith.constant 0 : i32
    %c0_i32_0 = arith.constant 0 : i32
    %c0_i32_1 = arith.constant 0 : i32
    return %arg0, %c0_i32, %c0_i32_0 : i32, i32, i32
  }
}

module attributes {stable_mosaic.version = 11 : i64} {
  func.func @_conv_in_lrelu_head_kernel(%arg0: i32, %arg1: memref<1x20x192xf32, #tpu.memory_space<vmem>>, %arg2: memref<8x192x192xf32, #tpu.memory_space<vmem>>, %arg3: memref<1x64xf32, #tpu.memory_space<vmem>>, %arg4: memref<1x64xf32, #tpu.memory_space<vmem>>, %arg5: memref<192x64xf32, #tpu.memory_space<vmem>>, %arg6: memref<64x192xf32, #tpu.memory_space<vmem>>, %arg7: memref<6x192xf32, #tpu.memory_space<vmem>>, %arg8: memref<1x1x1xf32, #tpu.memory_space<vmem>>) attributes {dimension_semantics = [#tpu.dimension_semantics<parallel>], iteration_bounds = array<i64: 2>, scalar_prefetch = 0 : i64, scratch_operands = 0 : i64, tpu.core_type = #tpu.core_type<tc>, window_params = [{transform_indices = @transform_0, window_bounds = array<i64: 1, 20, 192>}, {pipeline_mode = #tpu.pipeline_mode<synchronous>, transform_indices = @transform_1, window_bounds = array<i64: 8, 192, 192>}, {pipeline_mode = #tpu.pipeline_mode<synchronous>, transform_indices = @transform_2, window_bounds = array<i64: 1, 64>}, {pipeline_mode = #tpu.pipeline_mode<synchronous>, transform_indices = @transform_3, window_bounds = array<i64: 1, 64>}, {pipeline_mode = #tpu.pipeline_mode<synchronous>, transform_indices = @transform_4, window_bounds = array<i64: 192, 64>}, {pipeline_mode = #tpu.pipeline_mode<synchronous>, transform_indices = @transform_5, window_bounds = array<i64: 64, 192>}, {pipeline_mode = #tpu.pipeline_mode<synchronous>, transform_indices = @transform_6, window_bounds = array<i64: 6, 192>}, {transform_indices = @transform_7, window_bounds = array<i64: 1, 1, 1>}]} {
    %c0 = arith.constant 0 : index
    %c0_0 = arith.constant 0 : index
    %c0_1 = arith.constant 0 : index
    %0 = vector.load %arg1[%c0, %c0_0, %c0_1] : memref<1x20x192xf32, #tpu.memory_space<vmem>>, vector<1x6x192xf32>
    %1 = vector.shape_cast %0 : vector<1x6x192xf32> to vector<6x192xf32>
    %c0_2 = arith.constant 0 : index
    %c0_3 = arith.constant 0 : index
    %c0_4 = arith.constant 0 : index
    %2 = vector.load %arg2[%c0_2, %c0_3, %c0_4] : memref<8x192x192xf32, #tpu.memory_space<vmem>>, vector<1x192x192xf32>
    %3 = vector.shape_cast %2 : vector<1x192x192xf32> to vector<192x192xf32>
    %cst = arith.constant dense<0.000000e+00> : vector<6x192xf32>
    %4 = tpu.matmul %1, %3, %cst {dimension_numbers = #tpu.dot_dimension_numbers<[1], [0], [0], [1], [0, 0, 1, 1], [], []>} : vector<6x192xf32>, vector<192x192xf32>, vector<6x192xf32> -> vector<6x192xf32>
    %c0_5 = arith.constant 0 : index
    %c10 = arith.constant 10 : index
    %c0_6 = arith.constant 0 : index
    %5 = vector.load %arg1[%c0_5, %c10, %c0_6] : memref<1x20x192xf32, #tpu.memory_space<vmem>>, vector<1x6x192xf32>
    %6 = vector.shape_cast %5 : vector<1x6x192xf32> to vector<6x192xf32>
    %c1 = arith.constant 1 : index
    %c0_7 = arith.constant 0 : index
    %c0_8 = arith.constant 0 : index
    %7 = vector.load %arg2[%c1, %c0_7, %c0_8] : memref<8x192x192xf32, #tpu.memory_space<vmem>>, vector<1x192x192xf32>
    %8 = vector.shape_cast %7 : vector<1x192x192xf32> to vector<192x192xf32>
    %cst_9 = arith.constant dense<0.000000e+00> : vector<6x192xf32>
    %9 = tpu.matmul %6, %8, %cst_9 {dimension_numbers = #tpu.dot_dimension_numbers<[1], [0], [0], [1], [0, 0, 1, 1], [], []>} : vector<6x192xf32>, vector<192x192xf32>, vector<6x192xf32> -> vector<6x192xf32>
    %10 = arith.addf %4, %9 : vector<6x192xf32>
    %c0_10 = arith.constant 0 : index
    %c1_11 = arith.constant 1 : index
    %c0_12 = arith.constant 0 : index
    %11 = vector.load %arg1[%c0_10, %c1_11, %c0_12] : memref<1x20x192xf32, #tpu.memory_space<vmem>>, vector<1x6x192xf32>
    %12 = vector.shape_cast %11 : vector<1x6x192xf32> to vector<6x192xf32>
    %c2 = arith.constant 2 : index
    %c0_13 = arith.constant 0 : index
    %c0_14 = arith.constant 0 : index
    %13 = vector.load %arg2[%c2, %c0_13, %c0_14] : memref<8x192x192xf32, #tpu.memory_space<vmem>>, vector<1x192x192xf32>
    %14 = vector.shape_cast %13 : vector<1x192x192xf32> to vector<192x192xf32>
    %cst_15 = arith.constant dense<0.000000e+00> : vector<6x192xf32>
    %15 = tpu.matmul %12, %14, %cst_15 {dimension_numbers = #tpu.dot_dimension_numbers<[1], [0], [0], [1], [0, 0, 1, 1], [], []>} : vector<6x192xf32>, vector<192x192xf32>, vector<6x192xf32> -> vector<6x192xf32>
    %16 = arith.addf %10, %15 : vector<6x192xf32>
    %c0_16 = arith.constant 0 : index
    %c11 = arith.constant 11 : index
    %c0_17 = arith.constant 0 : index
    %17 = vector.load %arg1[%c0_16, %c11, %c0_17] : memref<1x20x192xf32, #tpu.memory_space<vmem>>, vector<1x6x192xf32>
    %18 = vector.shape_cast %17 : vector<1x6x192xf32> to vector<6x192xf32>
    %c3 = arith.constant 3 : index
    %c0_18 = arith.constant 0 : index
    %c0_19 = arith.constant 0 : index
    %19 = vector.load %arg2[%c3, %c0_18, %c0_19] : memref<8x192x192xf32, #tpu.memory_space<vmem>>, vector<1x192x192xf32>
    %20 = vector.shape_cast %19 : vector<1x192x192xf32> to vector<192x192xf32>
    %cst_20 = arith.constant dense<0.000000e+00> : vector<6x192xf32>
    %21 = tpu.matmul %18, %20, %cst_20 {dimension_numbers = #tpu.dot_dimension_numbers<[1], [0], [0], [1], [0, 0, 1, 1], [], []>} : vector<6x192xf32>, vector<192x192xf32>, vector<6x192xf32> -> vector<6x192xf32>
    %22 = arith.addf %16, %21 : vector<6x192xf32>
    %c0_21 = arith.constant 0 : index
    %c2_22 = arith.constant 2 : index
    %c0_23 = arith.constant 0 : index
    %23 = vector.load %arg1[%c0_21, %c2_22, %c0_23] : memref<1x20x192xf32, #tpu.memory_space<vmem>>, vector<1x6x192xf32>
    %24 = vector.shape_cast %23 : vector<1x6x192xf32> to vector<6x192xf32>
    %c4 = arith.constant 4 : index
    %c0_24 = arith.constant 0 : index
    %c0_25 = arith.constant 0 : index
    %25 = vector.load %arg2[%c4, %c0_24, %c0_25] : memref<8x192x192xf32, #tpu.memory_space<vmem>>, vector<1x192x192xf32>
    %26 = vector.shape_cast %25 : vector<1x192x192xf32> to vector<192x192xf32>
    %cst_26 = arith.constant dense<0.000000e+00> : vector<6x192xf32>
    %27 = tpu.matmul %24, %26, %cst_26 {dimension_numbers = #tpu.dot_dimension_numbers<[1], [0], [0], [1], [0, 0, 1, 1], [], []>} : vector<6x192xf32>, vector<192x192xf32>, vector<6x192xf32> -> vector<6x192xf32>
    %28 = arith.addf %22, %27 : vector<6x192xf32>
    %c0_27 = arith.constant 0 : index
    %c12 = arith.constant 12 : index
    %c0_28 = arith.constant 0 : index
    %29 = vector.load %arg1[%c0_27, %c12, %c0_28] : memref<1x20x192xf32, #tpu.memory_space<vmem>>, vector<1x6x192xf32>
    %30 = vector.shape_cast %29 : vector<1x6x192xf32> to vector<6x192xf32>
    %c5 = arith.constant 5 : index
    %c0_29 = arith.constant 0 : index
    %c0_30 = arith.constant 0 : index
    %31 = vector.load %arg2[%c5, %c0_29, %c0_30] : memref<8x192x192xf32, #tpu.memory_space<vmem>>, vector<1x192x192xf32>
    %32 = vector.shape_cast %31 : vector<1x192x192xf32> to vector<192x192xf32>
    %cst_31 = arith.constant dense<0.000000e+00> : vector<6x192xf32>
    %33 = tpu.matmul %30, %32, %cst_31 {dimension_numbers = #tpu.dot_dimension_numbers<[1], [0], [0], [1], [0, 0, 1, 1], [], []>} : vector<6x192xf32>, vector<192x192xf32>, vector<6x192xf32> -> vector<6x192xf32>
    %34 = arith.addf %28, %33 : vector<6x192xf32>
    %c0_32 = arith.constant 0 : index
    %c3_33 = arith.constant 3 : index
    %c0_34 = arith.constant 0 : index
    %35 = vector.load %arg1[%c0_32, %c3_33, %c0_34] : memref<1x20x192xf32, #tpu.memory_space<vmem>>, vector<1x6x192xf32>
    %36 = vector.shape_cast %35 : vector<1x6x192xf32> to vector<6x192xf32>
    %c6 = arith.constant 6 : index
    %c0_35 = arith.constant 0 : index
    %c0_36 = arith.constant 0 : index
    %37 = vector.load %arg2[%c6, %c0_35, %c0_36] : memref<8x192x192xf32, #tpu.memory_space<vmem>>, vector<1x192x192xf32>
    %38 = vector.shape_cast %37 : vector<1x192x192xf32> to vector<192x192xf32>
    %cst_37 = arith.constant dense<0.000000e+00> : vector<6x192xf32>
    %39 = tpu.matmul %36, %38, %cst_37 {dimension_numbers = #tpu.dot_dimension_numbers<[1], [0], [0], [1], [0, 0, 1, 1], [], []>} : vector<6x192xf32>, vector<192x192xf32>, vector<6x192xf32> -> vector<6x192xf32>
    %40 = arith.addf %34, %39 : vector<6x192xf32>
    %c0_38 = arith.constant 0 : index
    %c13 = arith.constant 13 : index
    %c0_39 = arith.constant 0 : index
    %41 = vector.load %arg1[%c0_38, %c13, %c0_39] : memref<1x20x192xf32, #tpu.memory_space<vmem>>, vector<1x6x192xf32>
    %42 = vector.shape_cast %41 : vector<1x6x192xf32> to vector<6x192xf32>
    %c7 = arith.constant 7 : index
    %c0_40 = arith.constant 0 : index
    %c0_41 = arith.constant 0 : index
    %43 = vector.load %arg2[%c7, %c0_40, %c0_41] : memref<8x192x192xf32, #tpu.memory_space<vmem>>, vector<1x192x192xf32>
    %44 = vector.shape_cast %43 : vector<1x192x192xf32> to vector<192x192xf32>
    %cst_42 = arith.constant dense<0.000000e+00> : vector<6x192xf32>
    %45 = tpu.matmul %42, %44, %cst_42 {dimension_numbers = #tpu.dot_dimension_numbers<[1], [0], [0], [1], [0, 0, 1, 1], [], []>} : vector<6x192xf32>, vector<192x192xf32>, vector<6x192xf32> -> vector<6x192xf32>
    %46 = arith.addf %40, %45 : vector<6x192xf32>
    %cst_43 = arith.constant dense<0.000000e+00> : vector<192xf32>
    %47 = vector.multi_reduction <add>, %46, %cst_43 [0] : vector<6x192xf32> to vector<192xf32>
    %48 = vector.shape_cast %47 : vector<192xf32> to vector<1x192xf32>
    %c0_44 = arith.constant 0 : index
    %c0_45 = arith.constant 0 : index
    %49 = vector.load %arg5[%c0_44, %c0_45] : memref<192x64xf32, #tpu.memory_space<vmem>>, vector<192x64xf32>
    %cst_46 = arith.constant dense<0.000000e+00> : vector<1x64xf32>
    %50 = tpu.matmul %48, %49, %cst_46 {dimension_numbers = #tpu.dot_dimension_numbers<[1], [0], [0], [1], [0, 0, 1, 1], [], []>, precision = #tpu.contract_precision<fp32>} : vector<1x192xf32>, vector<192x64xf32>, vector<1x64xf32> -> vector<1x64xf32>
    %51 = arith.mulf %46, %46 : vector<6x192xf32>
    %cst_47 = arith.constant dense<0.000000e+00> : vector<192xf32>
    %52 = vector.multi_reduction <add>, %51, %cst_47 [0] : vector<6x192xf32> to vector<192xf32>
    %53 = vector.shape_cast %52 : vector<192xf32> to vector<1x192xf32>
    %c0_48 = arith.constant 0 : index
    %c0_49 = arith.constant 0 : index
    %54 = vector.load %arg5[%c0_48, %c0_49] : memref<192x64xf32, #tpu.memory_space<vmem>>, vector<192x64xf32>
    %cst_50 = arith.constant dense<0.000000e+00> : vector<1x64xf32>
    %55 = tpu.matmul %53, %54, %cst_50 {dimension_numbers = #tpu.dot_dimension_numbers<[1], [0], [0], [1], [0, 0, 1, 1], [], []>, precision = #tpu.contract_precision<fp32>} : vector<1x192xf32>, vector<192x64xf32>, vector<1x64xf32> -> vector<1x64xf32>
    %cst_51 = arith.constant 1.800000e+01 : f32
    %56 = vector.broadcast %cst_51 : f32 to vector<1x64xf32>
    %57 = arith.divf %50, %56 : vector<1x64xf32>
    %cst_52 = arith.constant 1.800000e+01 : f32
    %58 = vector.broadcast %cst_52 : f32 to vector<1x64xf32>
    %59 = arith.divf %55, %58 : vector<1x64xf32>
    %60 = arith.mulf %57, %57 : vector<1x64xf32>
    %61 = arith.subf %59, %60 : vector<1x64xf32>
    %c0_53 = arith.constant 0 : index
    %c0_54 = arith.constant 0 : index
    %62 = vector.load %arg3[%c0_53, %c0_54] : memref<1x64xf32, #tpu.memory_space<vmem>>, vector<1x64xf32>
    %cst_55 = arith.constant 9.99999974E-6 : f32
    %63 = vector.broadcast %cst_55 : f32 to vector<1x64xf32>
    %64 = arith.addf %61, %63 : vector<1x64xf32>
    %65 = math.rsqrt %64 : vector<1x64xf32>
    %66 = arith.mulf %62, %65 : vector<1x64xf32>
    %c0_56 = arith.constant 0 : index
    %c0_57 = arith.constant 0 : index
    %67 = vector.load %arg4[%c0_56, %c0_57] : memref<1x64xf32, #tpu.memory_space<vmem>>, vector<1x64xf32>
    %68 = arith.mulf %57, %66 : vector<1x64xf32>
    %69 = arith.subf %67, %68 : vector<1x64xf32>
    %c0_58 = arith.constant 0 : index
    %c0_59 = arith.constant 0 : index
    %70 = vector.load %arg6[%c0_58, %c0_59] : memref<64x192xf32, #tpu.memory_space<vmem>>, vector<64x192xf32>
    %cst_60 = arith.constant dense<0.000000e+00> : vector<1x192xf32>
    %71 = tpu.matmul %66, %70, %cst_60 {dimension_numbers = #tpu.dot_dimension_numbers<[1], [0], [0], [1], [0, 0, 1, 1], [], []>, precision = #tpu.contract_precision<fp32>} : vector<1x64xf32>, vector<64x192xf32>, vector<1x192xf32> -> vector<1x192xf32>
    %c0_61 = arith.constant 0 : index
    %c0_62 = arith.constant 0 : index
    %72 = vector.load %arg6[%c0_61, %c0_62] : memref<64x192xf32, #tpu.memory_space<vmem>>, vector<64x192xf32>
    %cst_63 = arith.constant dense<0.000000e+00> : vector<1x192xf32>
    %73 = tpu.matmul %69, %72, %cst_63 {dimension_numbers = #tpu.dot_dimension_numbers<[1], [0], [0], [1], [0, 0, 1, 1], [], []>, precision = #tpu.contract_precision<fp32>} : vector<1x64xf32>, vector<64x192xf32>, vector<1x192xf32> -> vector<1x192xf32>
    %74 = vector.broadcast %71 : vector<1x192xf32> to vector<6x192xf32>
    %75 = arith.mulf %46, %74 : vector<6x192xf32>
    %76 = vector.broadcast %73 : vector<1x192xf32> to vector<6x192xf32>
    %77 = arith.addf %75, %76 : vector<6x192xf32>
    %cst_64 = arith.constant 0.000000e+00 : f32
    %78 = vector.broadcast %cst_64 : f32 to vector<6x192xf32>
    %79 = arith.cmpf ogt, %77, %78 : vector<6x192xf32>
    %cst_65 = arith.constant 2.000000e-01 : f32
    %80 = vector.broadcast %cst_65 : f32 to vector<6x192xf32>
    %81 = arith.mulf %80, %77 : vector<6x192xf32>
    %82 = arith.select %79, %77, %81 : vector<6x192xi1>, vector<6x192xf32>
    %c0_66 = arith.constant 0 : index
    %c0_67 = arith.constant 0 : index
    %83 = vector.load %arg7[%c0_66, %c0_67] : memref<6x192xf32, #tpu.memory_space<vmem>>, vector<6x192xf32>
    %84 = arith.mulf %82, %83 : vector<6x192xf32>
    %85 = vector.shape_cast %84 : vector<6x192xf32> to vector<1x6x192xf32>
    %cst_68 = arith.constant dense<0.000000e+00> : vector<1xf32>
    %86 = vector.multi_reduction <add>, %85, %cst_68 [1, 2] : vector<1x6x192xf32> to vector<1xf32>
    %87 = vector.shape_cast %86 : vector<1xf32> to vector<1x1x1xf32>
    %88 = vector.extract %87[0, 0, 0] : f32 from vector<1x1x1xf32>
    %89 = vector.broadcast %88 : f32 to vector<1x1xf32>
    %cst_69 = arith.constant 0.000000e+00 : f32
    %90 = vector.broadcast %cst_69 : f32 to vector<1x1xf32>
    %91 = arith.subf %90, %89 : vector<1x1xf32>
    %92 = math.exp %91 : vector<1x1xf32>
    %cst_70 = arith.constant 1.000000e+00 : f32
    %93 = vector.broadcast %cst_70 : f32 to vector<1x1xf32>
    %94 = arith.addf %93, %92 : vector<1x1xf32>
    %cst_71 = arith.constant 1.000000e+00 : f32
    %95 = vector.broadcast %cst_71 : f32 to vector<1x1xf32>
    %96 = arith.divf %95, %94 : vector<1x1xf32>
    %c0_72 = arith.constant 0 : index
    %c0_73 = arith.constant 0 : index
    %c0_74 = arith.constant 0 : index
    %97 = vector.load %arg8[%c0_72, %c0_73, %c0_74] : memref<1x1x1xf32, #tpu.memory_space<vmem>>, vector<1x1x1xf32>
    %98 = vector.shape_cast %97 : vector<1x1x1xf32> to vector<1x1xf32>
    %99 = vector.shape_cast %96 : vector<1x1xf32> to vector<1x1x1xf32>
    tpu.vector_store %arg8[%c0_72, %c0_73, %c0_74], %99 {strides = array<i32>} : memref<1x1x1xf32, #tpu.memory_space<vmem>>, vector<1x1x1xf32>,
    return
  }
  func.func @transform_0(%arg0: i32) -> (i32, i32, i32) {
    %c0_i32 = arith.constant 0 : i32
    %c0_i32_0 = arith.constant 0 : i32
    %c0_i32_1 = arith.constant 0 : i32
    return %arg0, %c0_i32, %c0_i32_0 : i32, i32, i32
  }
  func.func @transform_1(%arg0: i32) -> (i32, i32, i32) {
    %c0_i32 = arith.constant 0 : i32
    %c0_i32_0 = arith.constant 0 : i32
    %c0_i32_1 = arith.constant 0 : i32
    %c0_i32_2 = arith.constant 0 : i32
    return %c0_i32, %c0_i32_0, %c0_i32_1 : i32, i32, i32
  }
  func.func @transform_2(%arg0: i32) -> (i32, i32) {
    %c0_i32 = arith.constant 0 : i32
    %c0_i32_0 = arith.constant 0 : i32
    %c0_i32_1 = arith.constant 0 : i32
    return %c0_i32, %c0_i32_0 : i32, i32
  }
  func.func @transform_3(%arg0: i32) -> (i32, i32) {
    %c0_i32 = arith.constant 0 : i32
    %c0_i32_0 = arith.constant 0 : i32
    %c0_i32_1 = arith.constant 0 : i32
    return %c0_i32, %c0_i32_0 : i32, i32
  }
  func.func @transform_4(%arg0: i32) -> (i32, i32) {
    %c0_i32 = arith.constant 0 : i32
    %c0_i32_0 = arith.constant 0 : i32
    %c0_i32_1 = arith.constant 0 : i32
    return %c0_i32, %c0_i32_0 : i32, i32
  }
  func.func @transform_5(%arg0: i32) -> (i32, i32) {
    %c0_i32 = arith.constant 0 : i32
    %c0_i32_0 = arith.constant 0 : i32
    %c0_i32_1 = arith.constant 0 : i32
    return %c0_i32, %c0_i32_0 : i32, i32
  }
  func.func @transform_6(%arg0: i32) -> (i32, i32) {
    %c0_i32 = arith.constant 0 : i32
    %c0_i32_0 = arith.constant 0 : i32
    %c0_i32_1 = arith.constant 0 : i32
    return %c0_i32, %c0_i32_0 : i32, i32
  }
  func.func @transform_7(%arg0: i32) -> (i32, i32, i32) {
    %c0_i32 = arith.constant 0 : i32
    %c0_i32_0 = arith.constant 0 : i32
    %c0_i32_1 = arith.constant 0 : i32
    return %arg0, %c0_i32, %c0_i32_0 : i32, i32, i32
  }
}

</mosaic_0001>

<bundles_post_ra>
// kernel: netD_forward.4
= control target key start
LH: loop header
LB: loop body
LE: loop exit
PB: predicated region body
PF: predicated region fallthrough
CT: control target
= control target key end

     0   :  { %s1868_s9 = smov 0   ;;  %s2121_s0 = inlined_call_operand.vmem [shape: f32[2,260,9], index: 0, kind: input, shape index: {}]   ;;  %s2122_s1 = inlined_call_operand.vmem [shape: f32[8,9,64], index: 1, kind: input, shape index: {}]   ;;  %s2123_s2 = inlined_call_operand.vmem [shape: f32[2,64,64], index: 2, kind: output, shape index: {}]  }
   0x1 LB: > { %s1425_s10 = sadd.s32 4294967295, %s1850_s9   ;;  %p1429_p0 = scmp.ge.s32.totalorder %s1850_s9, 1  ;;  %s1850_s9 = sphi %s1868_s9, %s12_s9  }
   0x2   : > { %p112_p1 = scmp.lt.s32.totalorder %s1850_s9, 3 }
   0x4   : > { %p113_p2 = pnand %p1429_p0, %p112_p1 }
   0x5   : > { %v1433_v0 = vld [vmem:[%s2122_s1 + $0x10] sm:$0xff] (!%p113_p2)  ;;  %v1434_v1 = vld [vmem:[%s2122_s1 + $0x18] sm:$0x1] (!%p113_p2)  ;;  %vm190_vm0 = vcmask (!%p113_p2), 1040384   ;;  %v1475_v2 = vld [vmem:[%s2122_s1 + $0x40] sm:$0xff] (!%p113_p2)  ;;  %vm1852_vm1 = vmmov (!%p113_p2), 1  }
   0x6   : > { %116 = sbr.rel (%p113_p2) target bundleno = 299 (0x12b), region = 28  ;;  %v1730_v3 = vpack.c.bf16 (!%p113_p2), %v1434_v1, %v1433_v0  ;;  %vm1885_vm2 = vmpackc.low (!%p113_p2), %vm190_vm0, %vm1852_vm1  ;;  %v1476_v5 = vld [vmem:[%s2122_s1 + $0x48] sm:$0x1] (!%p113_p2)  ;;  %p134_p3 = scmp.lt.s32.totalorder (!%p113_p2), %s1425_s10, 1  ;;  %v152_v6 = vld [vmem:[%s2122_s1] sm:$0xff] (!%p113_p2)  ;;  %vm165_vm3 = vcmask (!%p113_p2), 72704  }
   0x7   : > { %v1754_v7 = vpack.c.bf16 (!%p113_p2), %v1476_v5, %v1475_v2  ;;  %v153_v8 = vld [vmem:[%s2122_s1 + $0x8] sm:$0x1] (!%p113_p2)  ;;  %v1486_v9 = vld [vmem:[%s2122_s1 + $0x50] sm:$0xff] (!%p113_p2)  ;;  %v1487_v10 = vld [vmem:[%s2122_s1 + $0x58] sm:$0x1] (!%p113_p2)  ;;  %vm1361_vm5 = vcmask (!%p113_p2), 523264  }
   0x8   : > { %1732 = vmatprep.subr.msk.bf16.mxu1 (!%p113_p2), %vm1885_vm2, %v1730_v3  ;;  %v1736_v11 = vpack.c.bf16 (!%p113_p2), %v153_v8, %v152_v6  ;;  %v1760_v12 = vpack.c.bf16 (!%p113_p2), %v1487_v10, %v1486_v9  ;;  %v1453_v13 = vld [vmem:[%s2122_s1 + $0x20] sm:$0xff] (!%p113_p2)  ;;  %v1454_v14 = vld [vmem:[%s2122_s1 + $0x28] sm:$0x1] (!%p113_p2)  ;;  %v1464_v37 = vld [vmem:[%s2122_s1 + $0x30] sm:$0xff] (!%p113_p2) }
   0x9   : > { %1756 = vmatprep.subr.msk.bf16.mxu0 (!%p113_p2), %vm1885_vm2, %v1754_v7  ;;  %1735 = vmatpush3.bf16.msk.msra.mxu1 (!%p113_p2), %vm1885_vm2, %v1730_v3  ;;  %v1497_v15 = vld [vmem:[%s2122_s1 + $0x60] sm:$0xff] (!%p113_p2)  ;;  %v1498_v16 = vld [vmem:[%s2122_s1 + $0x68] sm:$0x1] (!%p113_p2)  ;;  %v1742_v23 = vpack.c.bf16 (!%p113_p2), %v1454_v14, %v1453_v13  ;;  %v1465_v38 = vld [vmem:[%s2122_s1 + $0x38] sm:$0x1] (!%p113_p2) }
   0xa   : > { %1759 = vmatpush3.bf16.msk.msra.mxu0 (!%p113_p2), %vm1885_vm2, %v1754_v7  ;;  %1738 = vmatprep.subr.msk.bf16.mxu1 (!%p113_p2), %vm1885_vm2, %v1736_v11  ;;  %v1766_v24 = vpack.c.bf16 (!%p113_p2), %v1498_v16, %v1497_v15  ;;  %v1508_v39 = vld [vmem:[%s2122_s1 + $0x70] sm:$0xff] (!%p113_p2)  ;;  %v1509_v40 = vld [vmem:[%s2122_s1 + $0x78] sm:$0x1] (!%p113_p2)  ;;  %v1748_v45 = vpack.c.bf16 (!%p113_p2), %v1465_v38, %v1464_v37 }
   0xb   : > { %1762 = vmatprep.subr.msk.bf16.mxu0 (!%p113_p2), %vm1885_vm2, %v1760_v12  ;;  %v1772_v46 = vpack.c.bf16 (!%p113_p2), %v1509_v40, %v1508_v39 }
   0xd   : > { %s2127_s10 = smov (!%p134_p3, %s1425_s10), 1 }
   0xe   : > { %s1834_s27 = smul.u32 264, %s2127_s10  ;;  %s1521_s21 = sshll.u32 %s2127_s10, 6 }
   0xf   : > { %s2100_s24 = scalar_lea.vmem %s2123_s2, %s1521_s21 }
  0x10   : > { %s1934_s12 = scalar_lea.vmem %s2121_s0, %s1834_s27 }
  0x11   : > { %v154_v17 = vld [vmem:[%s1934_s12 + $0x41] sm:$0xff]  ;;  %v155_v19 = vld [vmem:[%s1934_s12 + $0x49] sm:$0xff]  ;;  %v156_v21 = vld [vmem:[%s1934_s12 + $0x51] sm:$0xff] }
  0x12   : > { %v733_v18 = vld [vmem:[%s1934_s12 + $0x1] sm:$0xff]  ;;  %1606 = vmatprep.mubr.msk.f32.mxu1 %vm165_vm3, %v154_v17  ;;  %v734_v20 = vld [vmem:[%s1934_s12 + $0x9] sm:$0xff]  ;;  %v735_v22 = vld [vmem:[%s1934_s12 + $0x11] sm:$0xff] }
  0x13   : > { %1670 = vmatprep.mubr.msk.f32.mxu0 %vm165_vm3, %v733_v18  ;;  %1607 = vmatmul.mubr.msk.f32.vlgmr.msra.gmra.mrb[0].mxu1 %vm165_vm3, %v155_v19  ;;  %v157_v25 = vld [vmem:[%s1934_s12 + $0x59] sm:$0xff]  ;;  %v158_v27 = vld [vmem:[%s1934_s12 + $0x61] sm:$0xff]  ;;  %v159_v29 = vld [vmem:[%s1934_s12 + $0x69] sm:$0xff] }
  0x14   : > { %1671 = vmatmul.mubr.msk.f32.vlgmr.msra.gmra.mrb[0].mxu0 %vm165_vm3, %v734_v20  ;;  %1741 = vmatpush3.bf16.msk.msra.mxu1 %vm1885_vm2, %v1736_v11  ;;  %v736_v26 = vld [vmem:[%s1934_s12 + $0x19] sm:$0xff]  ;;  %v737_v28 = vld [vmem:[%s1934_s12 + $0x21] sm:$0xff]  ;;  %v738_v30 = vld [vmem:[%s1934_s12 + $0x29] sm:$0xff] }
  0x15   : > { %1765 = vmatpush3.bf16.msk.msra.mxu0 %vm1885_vm2, %v1760_v12  ;;  %1609 = vmatprep.mubr.msk.f32.mxu1 %vm165_vm3, %v156_v21  ;;  %v160_v31 = vld [vmem:[%s1934_s12 + $0x71] sm:$0xff]  ;;  %v161_v33 = vld [vmem:[%s1934_s12 + $0x79] sm:$0xff]  ;;  %v884_v36 = vld [vmem:[%s1934_s12 + $0x42] sm:$0xff] }
  0x16   : > { %1673 = vmatprep.mubr.msk.f32.mxu0 %vm165_vm3, %v735_v22  ;;  %1744 = vmatprep.subr.msk.bf16.mxu1 %vm1885_vm2, %v1742_v23  ;;  %v739_v32 = vld [vmem:[%s1934_s12 + $0x31] sm:$0xff]  ;;  %v740_v34 = vld [vmem:[%s1934_s12 + $0x39] sm:$0xff]  ;;  %v145_v41 = vld [vmem:[%s1934_s12 + $0x8] sm:$0xff] }
  0x17   : > { %1768 = vmatprep.subr.msk.bf16.mxu0 %vm1885_vm2, %v1766_v24  ;;  %1610 = vmatmul.mubr.msk.f32.gmra.mrb[2].mxu1 %vm165_vm3, %v157_v25  ;;  %v144_v35 = vld [vmem:[%s1934_s12] sm:$0xff]  ;;  %v885_v42 = vld [vmem:[%s1934_s12 + $0x4a] sm:$0xff]  ;;  %v886_v44 = vld [vmem:[%s1934_s12 + $0x52] sm:$0xff] }
  0x18   : > { %1674 = vmatmul.mubr.msk.f32.gmra.mrb[2].mxu0 %vm165_vm3, %v736_v26  ;;  %1612 = vmatprep.mubr.msk.f32.mxu1 %vm165_vm3, %v158_v27  ;;  %v146_v43 = vld [vmem:[%s1934_s12 + $0x10] sm:$0xff]  ;;  %v147_v47 = vld [vmem:[%s1934_s12 + $0x18] sm:$0xff]  ;;  %v148_v49 = vld [vmem:[%s1934_s12 + $0x20] sm:$0xff] }
  0x19   : > { %1676 = vmatprep.mubr.msk.f32.mxu0 %vm165_vm3, %v737_v28  ;;  %v887_v48 = vld [vmem:[%s1934_s12 + $0x5a] sm:$0xff]  ;;  %v888_v50 = vld [vmem:[%s1934_s12 + $0x62] sm:$0xff]  ;;  %v889_v52 = vld [vmem:[%s1934_s12 + $0x6a] sm:$0xff] }
  0x1a   : > { %v149_v51 = vld [vmem:[%s1934_s12 + $0x28] sm:$0xff]  ;;  %v150_v53 = vld [vmem:[%s1934_s12 + $0x30] sm:$0xff]  ;;  %v151_v55 = vld [vmem:[%s1934_s12 + $0x38] sm:$0xff] }
  0x1b   : > { %1613 = vmatmul.mubr.msk.f32.gmra.mrb[4].mxu1 %vm165_vm3, %v159_v29  ;;  %v890_v54 = vld [vmem:[%s1934_s12 + $0x72] sm:$0xff]  ;;  %v891_v56 = vld [vmem:[%s1934_s12 + $0x7a] sm:$0xff]  ;;  %v431_v57 = vld [vmem:[%s1934_s12 + $0x82] sm:$0xff] }
  0x1c   : > { %1677 = vmatmul.mubr.msk.f32.gmra.mrb[4].mxu0 %vm165_vm3, %v738_v30  ;;  %1615 = vmatprep.mubr.msk.f32.mxu1 %vm165_vm3, %v160_v31  ;;  %v1035_v58 = vld [vmem:[%s1934_s12 + $0x83] sm:$0xff]  ;;  %v1036_v60 = vld [vmem:[%s1934_s12 + $0x8b] sm:$0xff]  ;;  %v1037_v62 = vld [vmem:[%s1934_s12 + $0x93] sm:$0xff] }
  0x1d   : > { %1679 = vmatprep.mubr.msk.f32.mxu0 %vm165_vm3, %v739_v32  ;;  %v432_v59 = vld [vmem:[%s1934_s12 + $0x8a] sm:$0xff]  ;;  %v433_v61 = vld [vmem:[%s1934_s12 + $0x92] sm:$0xff]  ;;  %v434_v63 = vld [vmem:[%s1934_s12 + $0x9a] sm:$0xff] }
  0x1e   : > { %v1038_v0 = vld [vmem:[%s1934_s12 + $0x9b] sm:$0xff]  ;;  %v1039_v2 = vld [vmem:[%s1934_s12 + $0xa3] sm:$0xff]  ;;  %v1040_v4 = vld [vmem:[%s1934_s12 + $0xab] sm:$0xff] }
  0x1f   : > { %1616 = vmatmul.mubr.msk.f32.gmra.mrb[6].mxu1 %vm165_vm3, %v161_v33  ;;  %v435_v1 = vld [vmem:[%s1934_s12 + $0xa2] sm:$0xff]  ;;  %v436_v3 = vld [vmem:[%s1934_s12 + $0xaa] sm:$0xff]  ;;  %v437_v5 = vld [vmem:[%s1934_s12 + $0xb2] sm:$0xff] }
  0x20   : > { %1680 = vmatmul.mubr.msk.f32.gmra.mrb[6].mxu0 %vm165_vm3, %v740_v34  ;;  %1622 = vmatprep.mubr.msk.f32.mxu1 %vm165_vm3, %v144_v35  ;;  %v1041_v6 = vld [vmem:[%s1934_s12 + $0xb3] sm:$0xff]  ;;  %v1042_v8 = vld [vmem:[%s1934_s12 + $0xbb] sm:$0xff]  ;;  %v582_v9 = vld [vmem:[%s1934_s12 + $0xc3] sm:$0xff] }
  0x21   : > { %1686 = vmatprep.mubr.msk.f32.mxu0 %vm165_vm3, %v884_v36  ;;  %v438_v7 = vld [vmem:[%s1934_s12 + $0xba] sm:$0xff]  ;;  %v1186_v10 = vld [vmem:[%s1934_s12 + $0xc4] sm:$0xff]  ;;  %v1187_v12 = vld [vmem:[%s1934_s12 + $0xcc] sm:$0xff] }
  0x22   : > { %v583_v11 = vld [vmem:[%s1934_s12 + $0xcb] sm:$0xff]  ;;  %v584_v13 = vld [vmem:[%s1934_s12 + $0xd3] sm:$0xff]  ;;  %v585_v15 = vld [vmem:[%s1934_s12 + $0xdb] sm:$0xff] }
  0x23   : > { %1623 = vmatmul.mubr.msk.f32.vlgmr.msra.gmra.mrb[0].mxu1 %vm165_vm3, %v145_v41  ;;  %v1188_v14 = vld [vmem:[%s1934_s12 + $0xd4] sm:$0xff]  ;;  %v1189_v16 = vld [vmem:[%s1934_s12 + $0xdc] sm:$0xff]  ;;  %v1190_v18 = vld [vmem:[%s1934_s12 + $0xe4] sm:$0xff] }
  0x24   : > { %1687 = vmatmul.mubr.msk.f32.vlgmr.msra.gmra.mrb[0].mxu0 %vm165_vm3, %v885_v42  ;;  %1747 = vmatpush3.bf16.msk.msra.mxu1 %vm1885_vm2, %v1742_v23  ;;  %v586_v17 = vld [vmem:[%s1934_s12 + $0xe3] sm:$0xff]  ;;  %v587_v19 = vld [vmem:[%s1934_s12 + $0xeb] sm:$0xff]  ;;  %v588_v21 = vld [vmem:[%s1934_s12 + $0xf3] sm:$0xff] }
  0x25   : > { %1771 = vmatpush3.bf16.msk.msra.mxu0 %vm1885_vm2, %v1766_v24  ;;  %1625 = vmatprep.mubr.msk.f32.mxu1 %vm165_vm3, %v146_v43  ;;  %v1191_v20 = vld [vmem:[%s1934_s12 + $0xec] sm:$0xff]  ;;  %v1192_v22 = vld [vmem:[%s1934_s12 + $0xf4] sm:$0xff]  ;;  %v1193_v24 = vld [vmem:[%s1934_s12 + $0xfc] sm:$0xff] }
  0x26   : > { %1689 = vmatprep.mubr.msk.f32.mxu0 %vm165_vm3, %v886_v44  ;;  %1750 = vmatprep.subr.msk.bf16.mxu1 %vm1885_vm2, %v1748_v45  ;;  %v589_v23 = vld [vmem:[%s1934_s12 + $0xfb] sm:$0xff] }
  0x27   : > { %1774 = vmatprep.subr.msk.bf16.mxu0 %vm1885_vm2, %v1772_v46  ;;  %1626 = vmatmul.mubr.msk.f32.gmra.mrb[2].mxu1 %vm165_vm3, %v147_v47 }
  0x28   : > { %1690 = vmatmul.mubr.msk.f32.gmra.mrb[2].mxu0 %vm165_vm3, %v887_v48  ;;  %1628 = vmatprep.mubr.msk.f32.mxu1 %vm165_vm3, %v148_v49 }
  0x29   : > { %1692 = vmatprep.mubr.msk.f32.mxu0 %vm165_vm3, %v888_v50 }
  0x2b   : > { %1629 = vmatmul.mubr.msk.f32.gmra.mrb[4].mxu1 %vm165_vm3, %v149_v51 }
  0x2c   : > { %1693 = vmatmul.mubr.msk.f32.gmra.mrb[4].mxu0 %vm165_vm3, %v889_v52  ;;  %1631 = vmatprep.mubr.msk.f32.mxu1 %vm165_vm3, %v150_v53 }
  0x2d   : > { %1695 = vmatprep.mubr.msk.f32.mxu0 %vm165_vm3, %v890_v54 }
  0x2f   : > { %1632 = vmatmul.mubr.msk.f32.gmra.mrb[6].mxu1 %vm165_vm3, %v151_v55 }
  0x30   : > { %1696 = vmatmul.mubr.msk.f32.gmra.mrb[6].mxu0 %vm165_vm3, %v891_v56  ;;  %1638 = vmatprep.mubr.msk.f32.mxu1 %vm165_vm3, %v431_v57 }
  0x31   : > { %1702 = vmatprep.mubr.msk.f32.mxu0 %vm165_vm3, %v1035_v58 }
  0x33   : > { %1639 = vmatmul.mubr.msk.f32.vlgmr.msra.gmra.mrb[0].mxu1 %vm165_vm3, %v432_v59 }
  0x34   : > { %1703 = vmatmul.mubr.msk.f32.vlgmr.msra.gmra.mrb[0].mxu0 %vm165_vm3, %v1036_v60  ;;  %1753 = vmatpush3.bf16.msk.msra.mxu1 %vm1885_vm2, %v1748_v45 }
  0x35   : > { %1777 = vmatpush3.bf16.msk.msra.mxu0 %vm1885_vm2, %v1772_v46  ;;  %1641 = vmatprep.mubr.msk.f32.mxu1 %vm165_vm3, %v433_v61 }
  0x36   : > { %1705 = vmatprep.mubr.msk.f32.mxu0 %vm165_vm3, %v1037_v62 }
  0x37   : > { %1642 = vmatmul.mubr.msk.f32.gmra.mrb[2].mxu1 %vm165_vm3, %v434_v63 }
  0x38   : > { %1706 = vmatmul.mubr.msk.f32.gmra.mrb[2].mxu0 %vm165_vm3, %v1038_v0  ;;  %1644 = vmatprep.mubr.msk.f32.mxu1 %vm165_vm3, %v435_v1 }
  0x39   : > { %1708 = vmatprep.mubr.msk.f32.mxu0 %vm165_vm3, %v1039_v2 }
  0x3b   : > { %1645 = vmatmul.mubr.msk.f32.gmra.mrb[4].mxu1 %vm165_vm3, %v436_v3 }
  0x3c   : > { %1709 = vmatmul.mubr.msk.f32.gmra.mrb[4].mxu0 %vm165_vm3, %v1040_v4  ;;  %1647 = vmatprep.mubr.msk.f32.mxu1 %vm165_vm3, %v437_v5 }
  0x3d   : > { %1711 = vmatprep.mubr.msk.f32.mxu0 %vm165_vm3, %v1041_v6 }
  0x3f   : > { %1648 = vmatmul.mubr.msk.f32.gmra.mrb[6].mxu1 %vm165_vm3, %v438_v7 }
  0x40   : > { %1712 = vmatmul.mubr.msk.f32.gmra.mrb[6].mxu0 %vm165_vm3, %v1042_v8  ;;  %1654 = vmatprep.mubr.msk.f32.mxu1 %vm165_vm3, %v582_v9 }
  0x41   : > { %1718 = vmatprep.mubr.msk.f32.mxu0 %vm165_vm3, %v1186_v10 }
  0x43   : > { %1655 = vmatmul.mubr.msk.f32.vlgmr.msra.gmra.mrb[0].mxu1 %vm165_vm3, %v583_v11 }
  0x44   : > { %1719 = vmatmul.mubr.msk.f32.vlgmr.msra.gmra.mrb[0].mxu0 %vm165_vm3, %v1187_v12  ;;  %1657 = vmatprep.mubr.msk.f32.mxu1 %vm165_vm3, %v584_v13 }
  0x45   : > { %1721 = vmatprep.mubr.msk.f32.mxu0 %vm165_vm3, %v1188_v14 }
  0x47   : > { %1658 = vmatmul.mubr.msk.f32.gmra.mrb[2].mxu1 %vm165_vm3, %v585_v15 }
  0x48   : > { %1722 = vmatmul.mubr.msk.f32.gmra.mrb[2].mxu0 %vm165_vm3, %v1189_v16  ;;  %1660 = vmatprep.mubr.msk.f32.mxu1 %vm165_vm3, %v586_v17 }
  0x49   : > { %1724 = vmatprep.mubr.msk.f32.mxu0 %vm165_vm3, %v1190_v18 }
  0x4b   : > { %1661 = vmatmul.mubr.msk.f32.gmra.mrb[4].mxu1 %vm165_vm3, %v587_v19 }
  0x4c   : > { %1725 = vmatmul.mubr.msk.f32.gmra.mrb[4].mxu0 %vm165_vm3, %v1191_v20  ;;  %1663 = vmatprep.mubr.msk.f32.mxu1 %vm165_vm3, %v588_v21 }
  0x4d   : > { %1727 = vmatprep.mubr.msk.f32.mxu0 %vm165_vm3, %v1192_v22 }
  0x4f   : > { %1664 = vmatmul.mubr.msk.f32.gmra.mrb[6].mxu1 %vm165_vm3, %v589_v23 }
  0x50   : > { %1728 = vmatmul.mubr.msk.f32.gmra.mrb[6].mxu0 %vm165_vm3, %v1193_v24 }
 0x116   : > { %v1656_v25 = vpop.f32.mrb[0].mxu1 }
 0x117   : > { %v1720_v26 = vpop.f32.mrb[0].mxu0  ;;  %v686_v28 = vpop.f32.mrb[1].mxu1 }
 0x118   : > { %v1778_v27 = vadd.f32 %v1720_v26, %v1656_v25  ;;  %v1290_v29 = vpop.f32.mrb[1].mxu0 }
 0x119   : > { %v1779_v30 = vadd.f32 %v1290_v29, %v686_v28 }
 0x11a   : > { %vm1338_vm4 = vcmp.gt.f32.partialorder %v1778_v27, 0.0  ;;  %v1346_v31 = vmul.f32 0.2, %v1778_v27  ;;  %v1659_v33 = vpop.f32.mrb[2].mxu1 }
 0x11b   : > { %vm1337_vm6 = vcmp.gt.f32.partialorder %v1779_v30, 0.0  ;;  %v1345_v32 = vmul.f32 0.2, %v1779_v30  ;;  %v1723_v34 = vpop.f32.mrb[2].mxu0  ;;  %v696_v37 = vpop.f32.mrb[3].mxu1 }
 0x11c   : > { %v1354_v35 = vsel %vm1338_vm4, %v1778_v27, %v1346_v31  ;;  %v1780_v36 = vadd.f32 %v1723_v34, %v1659_v33  ;;  %v1300_v38 = vpop.f32.mrb[3].mxu0 }
 0x11d   : > { %1363 = vst.msk [vmem:[%s2100_s24 + $0x8] sm:$0xff] %vm1361_vm5, %v1354_v35  ;;  %v1353_v39 = vsel %vm1337_vm6, %v1779_v30, %v1345_v32  ;;  %v1781_v40 = vadd.f32 %v1300_v38, %v696_v37 }
 0x11e   : > { %1362 = vst.msk [vmem:[%s2100_s24] sm:$0xff] %vm1361_vm5, %v1353_v39  ;;  %vm1340_vm7 = vcmp.gt.f32.partialorder %v1780_v36, 0.0  ;;  %v1348_v41 = vmul.f32 0.2, %v1780_v36  ;;  %v1662_v43 = vpop.f32.mrb[4].mxu1 }
 0x11f   : > { %vm1339_vm8 = vcmp.gt.f32.partialorder %v1781_v40, 0.0  ;;  %v1347_v42 = vmul.f32 0.2, %v1781_v40  ;;  %v1726_v44 = vpop.f32.mrb[4].mxu0  ;;  %v706_v47 = vpop.f32.mrb[5].mxu1 }
 0x120   : > { %v1356_v45 = vsel %vm1340_vm7, %v1780_v36, %v1348_v41  ;;  %v1782_v46 = vadd.f32 %v1726_v44, %v1662_v43  ;;  %v1310_v48 = vpop.f32.mrb[5].mxu0 }
 0x121   : > { %1365 = vst.msk [vmem:[%s2100_s24 + $0x18] sm:$0xff] %vm1361_vm5, %v1356_v45  ;;  %v1355_v49 = vsel %vm1339_vm8, %v1781_v40, %v1347_v42  ;;  %v1783_v50 = vadd.f32 %v1310_v48, %v706_v47 }
 0x122   : > { %1364 = vst.msk [vmem:[%s2100_s24 + $0x10] sm:$0xff] %vm1361_vm5, %v1355_v49  ;;  %vm1342_vm9 = vcmp.gt.f32.partialorder %v1782_v46, 0.0  ;;  %v1350_v51 = vmul.f32 0.2, %v1782_v46  ;;  %v1665_v53 = vpop.f32.mrb[6].mxu1 }
 0x123   : > { %vm1341_vm10 = vcmp.gt.f32.partialorder %v1783_v50, 0.0  ;;  %v1349_v52 = vmul.f32 0.2, %v1783_v50  ;;  %v1729_v54 = vpop.f32.mrb[6].mxu0  ;;  %v716_v57 = vpop.f32.mrb[7].mxu1 }
 0x124   : > { %v1358_v55 = vsel %vm1342_vm9, %v1782_v46, %v1350_v51  ;;  %v1784_v56 = vadd.f32 %v1729_v54, %v1665_v53  ;;  %v1320_v58 = vpop.f32.mrb[7].mxu0 }
 0x125   : > { %1367 = vst.msk [vmem:[%s2100_s24 + $0x28] sm:$0xff] %vm1361_vm5, %v1358_v55  ;;  %v1357_v59 = vsel %vm1341_vm10, %v1783_v50, %v1349_v52  ;;  %v1785_v60 = vadd.f32 %v1320_v58, %v716_v57 }
 0x126   : > { %1366 = vst.msk [vmem:[%s2100_s24 + $0x20] sm:$0xff] %vm1361_vm5, %v1357_v59  ;;  %vm1344_vm11 = vcmp.gt.f32.partialorder %v1784_v56, 0.0  ;;  %v1352_v61 = vmul.f32 0.2, %v1784_v56 }
 0x127   : > { %vm1343_vm12 = vcmp.gt.f32.partialorder %v1785_v60, 0.0  ;;  %v1351_v62 = vmul.f32 0.2, %v1785_v60 }
 0x128   : > { %v1360_v63 = vsel %vm1344_vm11, %v1784_v56, %v1352_v61 }
 0x129   : > { %1369 = vst.msk [vmem:[%s2100_s24 + $0x38] sm:$0xff] %vm1361_vm5, %v1360_v63  ;;  %v1359_v0 = vsel %vm1343_vm12, %v1785_v60, %v1351_v62 }
 0x12a   : > { %1368 = vst.msk [vmem:[%s2100_s24 + $0x30] sm:$0xff] %vm1361_vm5, %v1359_v0 }
 0x12b PF: > { %s12_s9 = sadd.s32 1, %s1850_s9  }
 0x12c   : > { %p9_p4 = scmp.ge.s32.totalorder %s12_s9, 4  }
 0x12e   :  { %11 = sbr.rel (!%p9_p4) target bundleno = 1 (0x1), region = 65 }

// kernel: netD_forward.5
= control target key start
LH: loop header
LB: loop body
LE: loop exit
PB: predicated region body
PF: predicated region fallthrough
CT: control target
= control target key end

     0   :  { %s4168_s21 = smov 0   ;;  %s4785_s0 = inlined_call_operand.vmem [shape: f32[2,66,64], index: 0, kind: input, shape index: {}]   ;;  %s4786_s1 = inlined_call_operand.vmem [shape: f32[4,64,96], index: 1, kind: input, shape index: {}]   ;;  %s4787_s2 = inlined_call_operand.vmem [shape: f32[1,16], index: 2, kind: input, shape index: {}]   ;;  %s4788_s3 = inlined_call_operand.vmem [shape: f32[1,16], index: 3, kind: input, shape index: {}]   ;;  %s4789_s4 = inlined_call_operand.vmem [shape: f32[96,16], index: 4, kind: input, shape index: {}]   ;;  %s4790_s5 = inlined_call_operand.vmem [shape: f32[16,96], index: 5, kind: input, shape index: {}]   ;;  %s4791_s6 = inlined_call_operand.vmem [shape: f32[2,32,96], index: 6, kind: output, shape index: {}]  }
   0x1 LB: > { %s2953_s22 = sadd.s32 4294967295, %s4128_s21   ;;  %p2957_p0 = scmp.ge.s32.totalorder %s4128_s21, 1  ;;  %s4128_s21 = sphi %s4168_s21, %s16_s21  }
   0x2   : > { %p212_p1 = scmp.lt.s32.totalorder %s4128_s21, 3 }
   0x4   : > { %p213_p2 = pnand %p2957_p0, %p212_p1 }
   0x5   : > { %v2961_v0 = vld [vmem:[%s4786_s1 + $0x40] sm:$0xff] (!%p213_p2)  ;;  %v2962_v1 = vld [vmem:[%s4786_s1 + $0x48] sm:$0xff] (!%p213_p2)  ;;  %v2963_v2 = vld [vmem:[%s4786_s1 + $0x50] sm:$0xff] (!%p213_p2)  ;;  %p242_p3 = scmp.lt.s32.totalorder (!%p213_p2), %s2953_s22, 1  ;;  %vm277_vm0 = vcmask (!%p213_p2), 523264   ;;  %vm4131_vm1 = vmmov (!%p213_p2), 0  }
   0x6   : > { %216 = sbr.rel (%p213_p2) target bundleno = 987 (0x3db), region = 44  ;;  %v3740_v3 = vpack.c.bf16 (!%p213_p2), %v2962_v1, %v2961_v0  ;;  %v2964_v4 = vld [vmem:[%s4786_s1 + $0x58] sm:$0xff] (!%p213_p2)  ;;  %v2965_v6 = vld [vmem:[%s4786_s1 + $0x60] sm:$0xff] (!%p213_p2)  ;;  %v2966_v7 = vld [vmem:[%s4786_s1 + $0x68] sm:$0xff] (!%p213_p2)  ;;  %vm700_vm2 = vcmask (!%p213_p2), 785408   ;;  %vm1941_vm3 = vcmask (!%p213_p2), 130048  }
   0x7   : > { %v3744_v5 = vpack.c.bf16 (!%p213_p2), %v2964_v4, %v2963_v2  ;;  %v3748_v8 = vpack.c.bf16 (!%p213_p2), %v2966_v7, %v2965_v6  ;;  %v2967_v9 = vld [vmem:[%s4786_s1 + $0x70] sm:$0xff] (!%p213_p2)  ;;  %v2968_v10 = vld [vmem:[%s4786_s1 + $0x78] sm:$0xff] (!%p213_p2)  ;;  %v256_v13 = vld [vmem:[%s4786_s1] sm:$0xff] (!%p213_p2) }
   0x8   : > { %3741 = vmatprep.subr.bf16.mxu0 (!%p213_p2), %v3740_v3  ;;  %v3752_v12 = vpack.c.bf16 (!%p213_p2), %v2968_v10, %v2967_v9  ;;  %v257_v14 = vld [vmem:[%s4786_s1 + $0x8] sm:$0xff] (!%p213_p2)  ;;  %v258_v16 = vld [vmem:[%s4786_s1 + $0x10] sm:$0xff] (!%p213_p2)  ;;  %v259_v17 = vld [vmem:[%s4786_s1 + $0x18] sm:$0xff] (!%p213_p2) }
   0x9   : > { %3743 = vmatpush3.bf16.msra.mxu0 (!%p213_p2), %v3740_v3  ;;  %v3756_v15 = vpack.c.bf16 (!%p213_p2), %v257_v14, %v256_v13  ;;  %v3760_v19 = vpack.c.bf16 (!%p213_p2), %v259_v17, %v258_v16  ;;  %v260_v21 = vld [vmem:[%s4786_s1 + $0x20] sm:$0xff] (!%p213_p2)  ;;  %v261_v22 = vld [vmem:[%s4786_s1 + $0x28] sm:$0xff] (!%p213_p2)  ;;  %v262_v26 = vld [vmem:[%s4786_s1 + $0x30] sm:$0xff] (!%p213_p2) }
   0xa   : > { %3745 = vmatprep.subr.bf16.mxu0 (!%p213_p2), %v3744_v5  ;;  %v3764_v24 = vpack.c.bf16 (!%p213_p2), %v261_v22, %v260_v21  ;;  %v263_v27 = vld [vmem:[%s4786_s1 + $0x38] sm:$0xff] (!%p213_p2)  ;;  %v2977_v29 = vld [vmem:[%s4786_s1 + $0x80] sm:$0xff] (!%p213_p2)  ;;  %v2978_v30 = vld [vmem:[%s4786_s1 + $0x88] sm:$0xff] (!%p213_p2) }
   0xb   : > { %v3768_v28 = vpack.c.bf16 (!%p213_p2), %v263_v27, %v262_v26  ;;  %v3772_v31 = vpack.c.bf16 (!%p213_p2), %v2978_v30, %v2977_v29  ;;  %v2979_v32 = vld [vmem:[%s4786_s1 + $0x90] sm:$0xff] (!%p213_p2)  ;;  %v2980_v33 = vld [vmem:[%s4786_s1 + $0x98] sm:$0xff] (!%p213_p2)  ;;  %v2981_v37 = vld [vmem:[%s4786_s1 + $0xa0] sm:$0xff] (!%p213_p2) }
   0xc   : > { %v3776_v35 = vpack.c.bf16 (!%p213_p2), %v2980_v33, %v2979_v32  ;;  %v2982_v38 = vld [vmem:[%s4786_s1 + $0xa8] sm:$0xff] (!%p213_p2)  ;;  %v2983_v42 = vld [vmem:[%s4786_s1 + $0xb0] sm:$0xff] (!%p213_p2)  ;;  %v2984_v43 = vld [vmem:[%s4786_s1 + $0xb8] sm:$0xff] (!%p213_p2) }
   0xd   : > { %s4807_s22 = smov (!%p242_p3, %s2953_s22), 1  ;;  %3747 = vmatpush3.bf16.msra.mxu0 %v3744_v5  ;;  %v3780_v40 = vpack.c.bf16 %v2982_v38, %v2981_v37  ;;  %v3784_v44 = vpack.c.bf16 %v2984_v43, %v2983_v42  ;;  %v2989_v45 = vld [vmem:[%s4786_s1 + $0xc0] sm:$0xff]  ;;  %v2990_v46 = vld [vmem:[%s4786_s1 + $0xc8] sm:$0xff]  ;;  %v2991_v48 = vld [vmem:[%s4786_s1 + $0xd0] sm:$0xff]  ;;  %v4130_v5 = vmov 0.0|0.0  }
   0xe   : > { %s4108_s11 = smul.u32 72, %s4807_s22  ;;  %3749 = vmatprep.subr.bf16.mxu0 %v3748_v8  ;;  %v3788_v47 = vpack.c.bf16 %v2990_v46, %v2989_v45  ;;  %v2992_v49 = vld [vmem:[%s4786_s1 + $0xd8] sm:$0xff]  ;;  %v2993_v53 = vld [vmem:[%s4786_s1 + $0xe0] sm:$0xff]  ;;  %v2994_v54 = vld [vmem:[%s4786_s1 + $0xe8] sm:$0xff]  ;;  %3804 = vmatprep.subr.bf16.mxu1 %v4130_v5  ;;  %s3003_s12 = sshll.u32 %s4807_s22, 5 }
   0xf   : > { %v3792_v51 = vpack.c.bf16 %v2992_v49, %v2991_v48  ;;  %v3796_v56 = vpack.c.bf16 %v2994_v54, %v2993_v53  ;;  %v2995_v58 = vld [vmem:[%s4786_s1 + $0xf0] sm:$0xff]  ;;  %v2996_v59 = vld [vmem:[%s4786_s1 + $0xf8] sm:$0xff]  ;;  %v714_v0 = vld [vmem:[%s4789_s4] sm:$0xff]  ;;  %s251_s15 = scalar_lea.vmem %s4791_s6, %s3003_s12 }
  0x10   : > { %s4206_s18 = scalar_lea.vmem %s4785_s0, %s4108_s11  ;;  %v3800_v60 = vpack.c.bf16 %v2996_v59, %v2995_v58  ;;  %v715_v1 = vld [vmem:[%s4789_s4 + $0x8] sm:$0xff]  ;;  %v730_v2 = vand.u32 4294901760, %v714_v0  ;;  %v716_v6 = vld [vmem:[%s4789_s4 + $0x10] sm:$0xff]  ;;  %v717_v7 = vld [vmem:[%s4789_s4 + $0x18] sm:$0xff] }
  0x11   : > { %v264_v11 = vld [vmem:[%s4206_s18 + $0x21] sm:$0xff]  ;;  %3751 = vmatpush3.bf16.msra.mxu0 %v3748_v8  ;;  %v265_v18 = vld [vmem:[%s4206_s18 + $0x29] sm:$0xff]  ;;  %v266_v20 = vld [vmem:[%s4206_s18 + $0x31] sm:$0xff]  ;;  %v733_v3 = vand.u32 4294901760, %v715_v1  ;;  %v736_v8 = vand.u32 4294901760, %v716_v6  ;;  %v739_v9 = vand.u32 4294901760, %v717_v7 }
  0x12   : > { %3260 = vmatprep.mubr.msk.f32.mxu0 %vm277_vm0, %v264_v11  ;;  %3753 = vmatprep.subr.bf16.mxu0 %v3752_v12  ;;  %v267_v23 = vld [vmem:[%s4206_s18 + $0x39] sm:$0xff]  ;;  %v253_v34 = vld [vmem:[%s4206_s18 + $0x8] sm:$0xff]  ;;  %v254_v36 = vld [vmem:[%s4206_s18 + $0x10] sm:$0xff]  ;;  %v4370_v26 = vsub.f32 %v714_v0, %v730_v2 }
  0x13   : > { %v252_v25 = vld [vmem:[%s4206_s18] sm:$0xff]  ;;  %v255_v39 = vld [vmem:[%s4206_s18 + $0x18] sm:$0xff]  ;;  %v473_v50 = vld [vmem:[%s4206_s18 + $0x9] sm:$0xff]  ;;  %v4318_v4 = vpack.c.bf16 %v733_v3, %v730_v2  ;;  %v4332_v10 = vpack.c.bf16 %v739_v9, %v736_v8  ;;  %v4372_v27 = vsub.f32 %v715_v1, %v733_v3  ;;  %v4398_v38 = vsub.f32 %v716_v6, %v736_v8 }
  0x14   : > { %v472_v41 = vld [vmem:[%s4206_s18 + $0x1] sm:$0xff]  ;;  %v474_v52 = vld [vmem:[%s4206_s18 + $0x11] sm:$0xff]  ;;  %v475_v55 = vld [vmem:[%s4206_s18 + $0x19] sm:$0xff]  ;;  %v819_v32 = vand.u32 4294901760, %v4370_v26 }
  0x15   : > { %3755 = vmatpush3.bf16.msra.mxu0 %v3752_v12  ;;  %v586_v57 = vld [vmem:[%s4206_s18 + $0x22] sm:$0xff]  ;;  %v587_v61 = vld [vmem:[%s4206_s18 + $0x2a] sm:$0xff]  ;;  %v588_v62 = vld [vmem:[%s4206_s18 + $0x32] sm:$0xff]  ;;  %3806 = vmatpush3.bf16.msra.mxu1 %v4318_v4  ;;  %v826_v33 = vand.u32 4294901760, %v4372_v27  ;;  %v833_v42 = vand.u32 4294901760, %v4398_v38 }
  0x16   : > { %3757 = vmatprep.subr.bf16.mxu0 %v3756_v15  ;;  %v589_v63 = vld [vmem:[%s4206_s18 + $0x3a] sm:$0xff]  ;;  %3807 = vmatprep.subr.bf16.mxu1 %v4130_v5  ;;  %v719_v12 = vld [vmem:[%s4789_s4 + $0x28] sm:$0xff]  ;;  %v720_v16 = vld [vmem:[%s4789_s4 + $0x30] sm:$0xff] }
  0x17   : > { %v718_v11 = vld [vmem:[%s4789_s4 + $0x20] sm:$0xff]  ;;  %v745_v14 = vand.u32 4294901760, %v719_v12  ;;  %v721_v17 = vld [vmem:[%s4789_s4 + $0x38] sm:$0xff]  ;;  %v723_v22 = vld [vmem:[%s4789_s4 + $0x48] sm:$0xff]  ;;  %v827_v37 = vsub.f32 %v4372_v27, %v826_v33  ;;  %v834_v45 = vsub.f32 %v4398_v38, %v833_v42 }
  0x18   : > { %3261 = vmatmul.mubr.msk.f32.vlgmr.msra.gmra.mrb[0].mxu0 %vm277_vm0, %v265_v18  ;;  %v742_v13 = vand.u32 4294901760, %v718_v11  ;;  %v748_v18 = vand.u32 4294901760, %v720_v16  ;;  %v722_v21 = vld [vmem:[%s4789_s4 + $0x40] sm:$0xff]  ;;  %v725_v29 = vld [vmem:[%s4789_s4 + $0x58] sm:$0xff] }
  0x19   : > { %3759 = vmatpush3.bf16.msra.mxu0 %v3756_v15  ;;  %3263 = vmatprep.mubr.msk.f32.mxu0 %vm277_vm0, %v266_v20  ;;  %v4418_v48 = vsub.f32 %v719_v12, %v745_v14  ;;  %v835_v49 = vand.u32 4294901760, %v834_v45 }
  0x1a   : > { %3761 = vmatprep.subr.bf16.mxu0 %v3760_v19  ;;  %3809 = vmatpush3.bf16.msra.mxu1 %v4332_v10  ;;  %v4344_v15 = vpack.c.bf16 %v745_v14, %v742_v13 }
  0x1b   : > { %3810 = vmatprep.subr.bf16.mxu1 %v4130_v5 }
  0x1c   : > { %3264 = vmatmul.mubr.msk.f32.gmra.mrb[2].mxu0 %vm277_vm0, %v267_v23  ;;  %v754_v23 = vand.u32 4294901760, %v722_v21 }
  0x1d   : > { %3763 = vmatpush3.bf16.msra.mxu0 %v3760_v19  ;;  %3282 = vmatprep.mubr.msk.f32.mxu0 %vm277_vm0, %v252_v25  ;;  %v751_v19 = vand.u32 4294901760, %v721_v17 }
  0x1e   : > { %3765 = vmatprep.subr.bf16.mxu0 %v3764_v24  ;;  %3812 = vmatpush3.bf16.msra.mxu1 %v4344_v15  ;;  %v4442_v0 = vsub.f32 %v722_v21, %v754_v23 }
  0x1f   : > { %3813 = vmatprep.subr.bf16.mxu1 %v4130_v5  ;;  %v4356_v20 = vpack.c.bf16 %v751_v19, %v748_v18 }
  0x21   : > { %3767 = vmatpush3.bf16.msra.mxu0 %v3764_v24  ;;  %v757_v24 = vand.u32 4294901760, %v723_v22 }
  0x22   : > { %3769 = vmatprep.subr.bf16.mxu0 %v3768_v28  ;;  %3815 = vmatpush3.bf16.msra.mxu1 %v4356_v20 }
  0x23   : > { %3816 = vmatprep.subr.bf16.mxu1 %v4130_v5  ;;  %v4368_v25 = vpack.c.bf16 %v757_v24, %v754_v23  ;;  %v4444_v1 = vsub.f32 %v723_v22, %v757_v24 }
  0x25   : > { %3771 = vmatpush3.bf16.msra.mxu0 %v3768_v28  ;;  %v724_v28 = vld [vmem:[%s4789_s4 + $0x50] sm:$0xff]  ;;  %v4794_v8 = vand.u32 4294901760, %v4444_v1 }
  0x26   : > { %3773 = vmatprep.subr.bf16.mxu0 %v3772_v31  ;;  %3818 = vmatpush3.bf16.msra.mxu1 %v4368_v25  ;;  %v760_v30 = vand.u32 4294901760, %v724_v28 }
  0x27   : > { %3819 = vmatprep.subr.bf16.mxu1 %v4130_v5  ;;  %v883_v12 = vsub.f32 %v4444_v1, %v4794_v8 }
  0x28   : > { %3283 = vmatmul.mubr.msk.f32.vlgmr.msra.gmra.mrb[0].mxu0 %vm277_vm0, %v253_v34 }
  0x29   : > { %3775 = vmatpush3.bf16.msra.mxu0 %v3772_v31  ;;  %3285 = vmatprep.mubr.msk.f32.mxu0 %vm277_vm0, %v254_v36  ;;  %v763_v31 = vand.u32 4294901760, %v725_v29  ;;  %v820_v36 = vsub.f32 %v4370_v26, %v819_v32 }
  0x2a   : > { %3777 = vmatprep.subr.bf16.mxu0 %v3776_v35 }
  0x2b   : > { %v4386_v34 = vpack.c.bf16 %v763_v31, %v760_v30  ;;  %v4460_v14 = vsub.f32 %v725_v29, %v763_v31 }
  0x2c   : > { %3286 = vmatmul.mubr.msk.f32.gmra.mrb[2].mxu0 %vm277_vm0, %v255_v39  ;;  %v4400_v39 = vsub.f32 %v717_v7, %v739_v9  ;;  %v4795_v7 = vand.u32 4294901760, %v4442_v0 }
  0x2d   : > { %3779 = vmatpush3.bf16.msra.mxu0 %v3776_v35  ;;  %3304 = vmatprep.mubr.msk.f32.mxu0 %vm277_vm0, %v472_v41  ;;  %v4132_v35 = vmov 0.0   ;;  %v828_v41 = vand.u32 4294901760, %v827_v37 }
  0x2e   : > { %3781 = vmatprep.subr.bf16.mxu0 %v3780_v40  ;;  %3356 = vmatprep.mubr.msk.f32.mxu1 %vm4131_vm1, %v4132_v35  ;;  %v840_v43 = vand.u32 4294901760, %v4400_v39  ;;  %v4480_v31 = vpack.c.bf16 %v4400_v39, %v4398_v38 }
  0x2f   : > { %3821 = vmatpush3.bf16.msra.mxu1 %v4386_v34 }
  0x30   : > { %3822 = vmatprep.subr.bf16.mxu1 %v4130_v5  ;;  %v841_v46 = vsub.f32 %v4400_v39, %v840_v43  ;;  %v4802_v39 = vand.u32 4294901760, %v4442_v0 }
  0x31   : > { %3783 = vmatpush3.bf16.msra.mxu0 %v3780_v40  ;;  %v821_v40 = vand.u32 4294901760, %v820_v36 }
  0x32   : > { %3785 = vmatprep.subr.bf16.mxu0 %v3784_v44 }
  0x35   : > { %3787 = vmatpush3.bf16.msra.mxu0 %v3784_v44  ;;  %v4408_v44 = vpack.c.bf16 %v828_v41, %v821_v40  ;;  %v4492_v40 = vpack.c.bf16 %v4444_v1, %v4442_v0 }
  0x36   : > { %3789 = vmatprep.subr.bf16.mxu0 %v3788_v47 }
  0x38   : > { %3305 = vmatmul.mubr.msk.f32.vlgmr.msra.gmra.mrb[0].mxu0 %vm277_vm0, %v473_v50  ;;  %v842_v50 = vand.u32 4294901760, %v841_v46 }
  0x39   : > { %3791 = vmatpush3.bf16.msra.mxu0 %v3788_v47  ;;  %3307 = vmatprep.mubr.msk.f32.mxu0 %vm277_vm0, %v474_v52  ;;  %v4416_v47 = vsub.f32 %v718_v11, %v742_v13  ;;  %v4798_v52 = vand.u32 4294901760, %v4418_v48  ;;  %v876_v11 = vsub.f32 %v4442_v0, %v4795_v7  ;;  %v4458_v13 = vsub.f32 %v724_v28, %v760_v30 }
  0x3a   : > { %3793 = vmatprep.subr.bf16.mxu0 %v3792_v51  ;;  %v4422_v53 = vpack.c.bf16 %v842_v50, %v835_v49  ;;  %v4476_v30 = vpack.c.bf16 %v4372_v27, %v4370_v26  ;;  %v4799_v26 = vand.u32 4294901760, %v4418_v48 }
  0x3b   : > { %v4484_v36 = vpack.c.bf16 %v4418_v48, %v4416_v47  ;;  %v4496_v41 = vpack.c.bf16 %v4460_v14, %v4458_v13 }
  0x3c   : > { %3308 = vmatmul.mubr.msk.f32.gmra.mrb[2].mxu0 %vm277_vm0, %v475_v55  ;;  %v4427_v55 = vsub.f32 %v720_v16, %v748_v18  ;;  %v877_v16 = vand.u32 4294901760, %v876_v11  ;;  %v4793_v18 = vand.u32 4294901760, %v4458_v13 }
  0x3d   : > { %3795 = vmatpush3.bf16.msra.mxu0 %v3792_v51  ;;  %3326 = vmatprep.mubr.msk.f32.mxu0 %vm277_vm0, %v586_v57  ;;  %v847_v51 = vand.u32 4294901760, %v4416_v47  ;;  %v855_v57 = vsub.f32 %v4418_v48, %v4798_v52  ;;  %v4805_v48 = vand.u32 4294901760, %v4460_v14 }
  0x3e   : > { %3797 = vmatprep.subr.bf16.mxu0 %v3796_v56  ;;  %v4797_v59 = vand.u32 4294901760, %v4427_v55  ;;  %v890_v22 = vsub.f32 %v4458_v13, %v4793_v18 }
  0x3f   : > { %v848_v54 = vsub.f32 %v4416_v47, %v847_v51  ;;  %v3883_v27 = vpack.c.bf16 %v4799_v26, %v847_v51  ;;  %v4804_v47 = vand.u32 4294901760, %v4458_v13 }
  0x40   : > { %v891_v24 = vand.u32 4294901760, %v890_v22 }
  0x41   : > { %3799 = vmatpush3.bf16.msra.mxu0 %v3796_v56  ;;  %v4429_v56 = vsub.f32 %v721_v17, %v751_v19  ;;  %v849_v58 = vand.u32 4294901760, %v848_v54  ;;  %v884_v17 = vand.u32 4294901760, %v883_v12  ;;  %v4792_v19 = vand.u32 4294901760, %v4460_v14 }
  0x42   : > { %3801 = vmatprep.subr.bf16.mxu0 %v3800_v60  ;;  %v3892_v51 = vpack.c.bf16 %v4805_v48, %v4804_v47 }
  0x43   : > { %v4464_v21 = vpack.c.bf16 %v884_v17, %v877_v16  ;;  %v897_v23 = vsub.f32 %v4460_v14, %v4792_v19  ;;  %v4488_v37 = vpack.c.bf16 %v4429_v56, %v4427_v55 }
  0x45   : > { %3803 = vmatpush3.bf16.msra.mxu0 %v3800_v60  ;;  %v4796_v60 = vand.u32 4294901760, %v4429_v56  ;;  %v898_v28 = vand.u32 4294901760, %v897_v23 }
  0x46   : > { %3912 = vmatprep.subr.bf16.mxu0 %v4130_v5 }
  0x47   : > { %v4472_v29 = vpack.c.bf16 %v898_v28, %v891_v24 }
  0x48   : > { %3327 = vmatmul.mubr.msk.f32.vlgmr.msra.gmra.mrb[0].mxu0 %vm277_vm0, %v587_v61  ;;  %v856_v61 = vand.u32 4294901760, %v855_v57 }
  0x49   : > { %3329 = vmatprep.mubr.msk.f32.mxu0 %vm277_vm0, %v588_v62  ;;  %3914 = vmatpush3.bf16.msra.mxu0 %v4318_v4  ;;  %v862_v62 = vsub.f32 %v4427_v55, %v4797_v59 }
  0x4a   : > { %3915 = vmatprep.subr.bf16.mxu0 %v4130_v5  ;;  %v4446_v2 = vpack.c.bf16 %v856_v61, %v849_v58 }
  0x4b   : > { %v863_v3 = vand.u32 4294901760, %v862_v62 }
  0x4c   : > { %3330 = vmatmul.mubr.msk.f32.gmra.mrb[2].mxu0 %vm277_vm0, %v589_v63  ;;  %v869_v63 = vsub.f32 %v4429_v56, %v4796_v60 }
  0x4d   : > { %3917 = vmatpush3.bf16.msra.mxu0 %v4332_v10  ;;  %3518 = vmatprep.mubr.msk.f32.mxu0 %vm4131_vm1, %v4132_v35 }
  0x4e   : > { %3918 = vmatprep.subr.bf16.mxu0 %v4130_v5  ;;  %v870_v6 = vand.u32 4294901760, %v869_v63 }
  0x50   : > { %v4450_v9 = vpack.c.bf16 %v870_v6, %v863_v3 }
  0x51   : > { %3920 = vmatpush3.bf16.msra.mxu0 %v4344_v15 }
  0x52   : > { %3921 = vmatprep.subr.bf16.mxu0 %v4130_v5 }
  0x55   : > { %3923 = vmatpush3.bf16.msra.mxu0 %v4356_v20 }
  0x56   : > { %3924 = vmatprep.subr.bf16.mxu0 %v4130_v5 }
  0x59   : > { %3926 = vmatpush3.bf16.msra.mxu0 %v4368_v25 }
  0x5a   : > { %3927 = vmatprep.subr.bf16.mxu0 %v4130_v5 }
  0x5d   : > { %3929 = vmatpush3.bf16.msra.mxu0 %v4386_v34 }
  0x5e   : > { %3930 = vmatprep.subr.bf16.mxu0 %v4130_v5 }
 0x11b   : > { %v4498_v45 = vpop.f32.mrb[0].mxu0 }
 0x11c   : > { %v702_v46 = vsel %vm700_vm2, %v4498_v45, 0.0  ;;  %v1319_v49 = vmul.f32 %v4498_v45, %v4498_v45  ;;  %v4504_v50 = vpop.f32.mrb[1].mxu0 }
 0x11d   : > { %v701_v54 = vsel %vm700_vm2, %v4504_v50, 0.0  ;;  %v1318_v57 = vmul.f32 %v4504_v50, %v4504_v50 }
 0x11e   : > { %v1323_v58 = vsel %vm700_vm2, %v1319_v49, 0.0  ;;  %v703_v61 = vadd.f32 %v702_v46, %v701_v54 }
 0x11f   : > { %v1322_v62 = vsel %vm700_vm2, %v1318_v57, 0.0  ;;  %v4512_v63 = vpop.f32.mrb[2].mxu0 }
 0x120   : > { %v1324_v3 = vadd.f32 %v1323_v58, %v1322_v62  ;;  %v4514_v6 = vpop.f32.mrb[3].mxu0  ;;  %v1321_v11 = vmul.f32 %v4512_v63, %v4512_v63  ;;  %v706_v22 = vsel %vm700_vm2, %v4512_v63, 0.0 }
 0x121   : > { %v704_v12 = vsel %vm700_vm2, %v4514_v6, 0.0  ;;  %v1320_v16 = vmul.f32 %v4514_v6, %v4514_v6 }
 0x122   : > { %v705_v17 = vadd.f32 %v704_v12, %v703_v61  ;;  %v1327_v46 = vsel %vm700_vm2, %v1321_v11, 0.0 }
 0x123   : > { %v1325_v23 = vsel %vm700_vm2, %v1320_v16, 0.0 }
 0x124   : > { %v707_v24 = vadd.f32 %v706_v22, %v705_v17  ;;  %v1326_v28 = vadd.f32 %v1325_v23, %v1324_v3 }
 0x126   : > { %v708_v49 = vrot.slane %v707_v24, 4  ;;  %v1328_v54 = vadd.f32 %v1327_v46, %v1326_v28  ;;  %v1932_v28 = vld [vmem:[%s4787_s2] sm:$0x1] }
 0x128   : > { %v709_v57 = vadd.f32 %v708_v49, %v707_v24  ;;  %v1329_v58 = vrot.slane %v1328_v54, 4 }
 0x12a   : > { %v710_v62 = vrot.slane %v709_v57, 2  ;;  %v1330_v19 = vadd.f32 %v1329_v58, %v1328_v54 }
 0x12c   : > { %v711_v18 = vadd.f32 %v710_v62, %v709_v57  ;;  %v1331_v8 = vrot.slane %v1330_v19, 2 }
 0x12e   : > { %v712_v7 = vrot.slane %v711_v18, 1  ;;  %v1332_v60 = vadd.f32 %v1331_v8, %v1330_v19 }
 0x130   : > { %v1333_v61 = vrot.slane %v1332_v60, 1  ;;  %v713_v12 = vadd.f32 %v712_v7, %v711_v18 }
 0x132   : > { %v1334_v59 = vadd.f32 %v1333_v61, %v1332_v60  ;;  %v727_v52 = vsel %vm700_vm2, %v713_v12, 0 }
 0x133   : > { %v4527_v16 = vand.u32 4294901760, %v727_v52 }
 0x134   : > { %v1336_v3 = vsel %vm700_vm2, %v1334_v59, 0 }
 0x135   : > { %v4530_v11 = vand.u32 4294901760, %v1336_v3  ;;  %v4533_v17 = vsub.f32 %v727_v52, %v4527_v16  ;;  %v3880_v52 = vpack.c.bf16 %v840_v43, %v833_v42  ;;  %v4803_v42 = vand.u32 4294901760, %v4444_v1 }
 0x137   : > { %v808_v22 = vand.u32 4294901760, %v4533_v17  ;;  %v4537_v23 = vsub.f32 %v1336_v3, %v4530_v11  ;;  %v3889_v43 = vpack.c.bf16 %v4803_v42, %v4802_v39  ;;  %v1936_v3 = vld [vmem:[%s4788_s3] sm:$0x1] }
 0x139   : > { %v809_v60 = vsub.f32 %v4533_v17, %v808_v22  ;;  %v1417_v7 = vand.u32 4294901760, %v4537_v23 }
 0x13b   : > { %v810_v8 = vand.u32 4294901760, %v809_v60  ;;  %v1418_v59 = vsub.f32 %v4537_v23, %v1417_v7 }
 0x13d   : > { %3357 = vmatmul.mubr.f32.vlgmr.msra.gmra.mrb[0].mxu1 %v810_v8  ;;  %v1419_v18 = vand.u32 4294901760, %v1418_v59  ;;  %v2866_v59 = vlaneseq }
 0x13e   : > { %3824 = vmatpush3.bf16.msra.mxu1 %v4408_v44  ;;  %3383 = vmatprep.mubr.msk.f32.mxu1 %vm4131_vm1, %v4132_v35 }
 0x13f   : > { %3519 = vmatmul.mubr.f32.vlgmr.msra.gmra.mrb[4].mxu0 %v1419_v18  ;;  %3825 = vmatprep.subr.bf16.mxu1 %v4130_v5  ;;  %v2867_v18 = vshrl.u32 %v2866_v59, 7 }
 0x140   : > { %3932 = vmatpush3.bf16.msra.mxu0 %v4408_v44  ;;  %3545 = vmatprep.mubr.msk.f32.mxu0 %vm4131_vm1, %v4132_v35  ;;  %v3877_v44 = vpack.c.bf16 %v826_v33, %v819_v32  ;;  %v4800_v32 = vand.u32 4294901760, %v4427_v55  ;;  %v4801_v33 = vand.u32 4294901760, %v4429_v56 }
 0x141   : > { %3933 = vmatprep.subr.bf16.mxu0 %v4130_v5 }
 0x142   : > { %3827 = vmatpush3.bf16.msra.mxu1 %v4422_v53  ;;  %v3886_v38 = vpack.c.bf16 %v4801_v33, %v4800_v32 }
 0x143   : > { %3828 = vmatprep.subr.bf16.mxu1 %v4130_v5 }
 0x144   : > { %3935 = vmatpush3.bf16.msra.mxu0 %v4422_v53 }
 0x145   : > { %3936 = vmatprep.subr.bf16.mxu0 %v4130_v5 }
 0x146   : > { %3830 = vmatpush3.bf16.msra.mxu1 %v4446_v2 }
 0x147   : > { %3831 = vmatprep.subr.bf16.mxu1 %v4130_v5 }
 0x148   : > { %3938 = vmatpush3.bf16.msra.mxu0 %v4446_v2 }
 0x149   : > { %3939 = vmatprep.subr.bf16.mxu0 %v4130_v5 }
 0x14a   : > { %3833 = vmatpush3.bf16.msra.mxu1 %v4450_v9 }
 0x14b   : > { %3834 = vmatprep.subr.bf16.mxu1 %v4130_v5 }
 0x14c   : > { %3941 = vmatpush3.bf16.msra.mxu0 %v4450_v9 }
 0x14d   : > { %3942 = vmatprep.subr.bf16.mxu0 %v4130_v5 }
 0x14e   : > { %3836 = vmatpush3.bf16.msra.mxu1 %v4464_v21 }
 0x14f   : > { %3837 = vmatprep.subr.bf16.mxu1 %v4130_v5 }
 0x150   : > { %3944 = vmatpush3.bf16.msra.mxu0 %v4464_v21 }
 0x151   : > { %3945 = vmatprep.subr.bf16.mxu0 %v4130_v5 }
 0x152   : > { %3839 = vmatpush3.bf16.msra.mxu1 %v4472_v29 }
 0x153   : > { %3840 = vmatprep.subr.bf16.mxu1 %v4130_v5 }
 0x154   : > { %3947 = vmatpush3.bf16.msra.mxu0 %v4472_v29 }
 0x155   : > { %3384 = vmatmul.mubr.f32.vlgmr.msra.gmra.mrb[0].mxu1 %v4527_v16  ;;  %3948 = vmatprep.subr.bf16.mxu0 %v4130_v5 }
 0x156   : > { %3842 = vmatpush3.bf16.msra.mxu1 %v4476_v30  ;;  %3410 = vmatprep.mubr.msk.f32.mxu1 %vm4131_vm1, %v4132_v35 }
 0x157   : > { %3546 = vmatmul.mubr.f32.vlgmr.msra.gmra.mrb[4].mxu0 %v4530_v11  ;;  %3843 = vmatprep.subr.bf16.mxu1 %v4130_v5 }
 0x158   : > { %3950 = vmatpush3.bf16.msra.mxu0 %v4476_v30  ;;  %3572 = vmatprep.mubr.msk.f32.mxu0 %vm4131_vm1, %v4132_v35 }
 0x159   : > { %3951 = vmatprep.subr.bf16.mxu0 %v4130_v5 }
 0x15a   : > { %3845 = vmatpush3.bf16.msra.mxu1 %v4480_v31 }
 0x15b   : > { %3846 = vmatprep.subr.bf16.mxu1 %v4130_v5 }
 0x15c   : > { %3953 = vmatpush3.bf16.msra.mxu0 %v4480_v31 }
 0x15d   : > { %3954 = vmatprep.subr.bf16.mxu0 %v4130_v5 }
 0x15e   : > { %3848 = vmatpush3.bf16.msra.mxu1 %v4484_v36 }
 0x15f   : > { %3849 = vmatprep.subr.bf16.mxu1 %v4130_v5 }
 0x160   : > { %3956 = vmatpush3.bf16.msra.mxu0 %v4484_v36 }
 0x161   : > { %3957 = vmatprep.subr.bf16.mxu0 %v4130_v5 }
 0x162   : > { %3851 = vmatpush3.bf16.msra.mxu1 %v4488_v37 }
 0x163   : > { %3852 = vmatprep.subr.bf16.mxu1 %v4130_v5 }
 0x164   : > { %3959 = vmatpush3.bf16.msra.mxu0 %v4488_v37 }
 0x165   : > { %3960 = vmatprep.subr.bf16.mxu0 %v4130_v5 }
 0x166   : > { %3854 = vmatpush3.bf16.msra.mxu1 %v4492_v40 }
 0x167   : > { %3855 = vmatprep.subr.bf16.mxu1 %v4130_v5 }
 0x168   : > { %3962 = vmatpush3.bf16.msra.mxu0 %v4492_v40 }
 0x169   : > { %3963 = vmatprep.subr.bf16.mxu0 %v4130_v5 }
 0x16a   : > { %3857 = vmatpush3.bf16.msra.mxu1 %v4496_v41 }
 0x16b   : > { %3858 = vmatprep.subr.bf16.mxu1 %v4130_v5 }
 0x16c   : > { %3965 = vmatpush3.bf16.msra.mxu0 %v4496_v41 }
 0x16d   : > { %3411 = vmatmul.mubr.f32.vlgmr.msra.gmra.mrb[0].mxu1 %v4533_v17  ;;  %3966 = vmatprep.subr.bf16.mxu0 %v4130_v5 }
 0x16e   : > { %3860 = vmatpush3.bf16.msra.mxu1 %v4318_v4  ;;  %3437 = vmatprep.mubr.msk.f32.mxu1 %vm4131_vm1, %v4132_v35 }
 0x16f   : > { %3573 = vmatmul.mubr.f32.vlgmr.msra.gmra.mrb[4].mxu0 %v4537_v23  ;;  %3861 = vmatprep.subr.bf16.mxu1 %v4130_v5 }
 0x170   : > { %3968 = vmatpush3.bf16.msra.mxu0 %v4318_v4  ;;  %3599 = vmatprep.mubr.msk.f32.mxu0 %vm4131_vm1, %v4132_v35 }
 0x171   : > { %3969 = vmatprep.subr.bf16.mxu0 %v4130_v5 }
 0x172   : > { %3863 = vmatpush3.bf16.msra.mxu1 %v4332_v10 }
 0x173   : > { %3864 = vmatprep.subr.bf16.mxu1 %v4130_v5 }
 0x174   : > { %3971 = vmatpush3.bf16.msra.mxu0 %v4332_v10 }
 0x175   : > { %3972 = vmatprep.subr.bf16.mxu0 %v4130_v5 }
 0x176   : > { %3866 = vmatpush3.bf16.msra.mxu1 %v4344_v15 }
 0x177   : > { %3867 = vmatprep.subr.bf16.mxu1 %v4130_v5 }
 0x178   : > { %3974 = vmatpush3.bf16.msra.mxu0 %v4344_v15 }
 0x179   : > { %3975 = vmatprep.subr.bf16.mxu0 %v4130_v5 }
 0x17a   : > { %3869 = vmatpush3.bf16.msra.mxu1 %v4356_v20 }
 0x17b   : > { %3870 = vmatprep.subr.bf16.mxu1 %v4130_v5 }
 0x17c   : > { %3977 = vmatpush3.bf16.msra.mxu0 %v4356_v20 }
 0x17d   : > { %3978 = vmatprep.subr.bf16.mxu0 %v4130_v5 }
 0x17e   : > { %3872 = vmatpush3.bf16.msra.mxu1 %v4368_v25 }
 0x17f   : > { %3873 = vmatprep.subr.bf16.mxu1 %v4130_v5 }
 0x180   : > { %3980 = vmatpush3.bf16.msra.mxu0 %v4368_v25 }
 0x181   : > { %3981 = vmatprep.subr.bf16.mxu0 %v4130_v5 }
 0x182   : > { %3875 = vmatpush3.bf16.msra.mxu1 %v4386_v34 }
 0x183   : > { %3876 = vmatprep.subr.bf16.mxu1 %v4130_v5 }
 0x184   : > { %3983 = vmatpush3.bf16.msra.mxu0 %v4386_v34 }
 0x185   : > { %3438 = vmatmul.mubr.f32.vlgmr.msra.gmra.mrb[0].mxu1 %v808_v22  ;;  %3984 = vmatprep.subr.bf16.mxu0 %v4130_v5 }
 0x186   : > { %3878 = vmatpush3.bf16.msra.mxu1 %v3877_v44  ;;  %3464 = vmatprep.mubr.msk.f32.mxu1 %vm4131_vm1, %v4132_v35 }
 0x187   : > { %3600 = vmatmul.mubr.f32.vlgmr.msra.gmra.mrb[4].mxu0 %v1417_v7  ;;  %3879 = vmatprep.subr.bf16.mxu1 %v4130_v5 }
 0x188   : > { %3986 = vmatpush3.bf16.msra.mxu0 %v3877_v44  ;;  %3626 = vmatprep.mubr.msk.f32.mxu0 %vm4131_vm1, %v4132_v35  ;;  %v2868_v44 = vsub.s32 0, %v2867_v18 }
 0x189   : > { %3987 = vmatprep.subr.bf16.mxu0 %v4130_v5 }
 0x18a   : > { %3881 = vmatpush3.bf16.msra.mxu1 %v3880_v52 }
 0x18b   : > { %3882 = vmatprep.subr.bf16.mxu1 %v4130_v5 }
 0x18c   : > { %3989 = vmatpush3.bf16.msra.mxu0 %v3880_v52 }
 0x18d   : > { %3990 = vmatprep.subr.bf16.mxu0 %v4130_v5 }
 0x18e   : > { %3884 = vmatpush3.bf16.msra.mxu1 %v3883_v27 }
 0x18f   : > { %3885 = vmatprep.subr.bf16.mxu1 %v4130_v5 }
 0x190   : > { %3992 = vmatpush3.bf16.msra.mxu0 %v3883_v27 }
 0x191   : > { %3993 = vmatprep.subr.bf16.mxu0 %v4130_v5 }
 0x192   : > { %3887 = vmatpush3.bf16.msra.mxu1 %v3886_v38 }
 0x193   : > { %3888 = vmatprep.subr.bf16.mxu1 %v4130_v5 }
 0x194   : > { %3995 = vmatpush3.bf16.msra.mxu0 %v3886_v38 }
 0x195   : > { %3996 = vmatprep.subr.bf16.mxu0 %v4130_v5 }
 0x196   : > { %3890 = vmatpush3.bf16.msra.mxu1 %v3889_v43 }
 0x197   : > { %3891 = vmatprep.subr.bf16.mxu1 %v4130_v5 }
 0x198   : > { %3998 = vmatpush3.bf16.msra.mxu0 %v3889_v43 }
 0x199   : > { %3999 = vmatprep.subr.bf16.mxu0 %v4130_v5 }
 0x19a   : > { %3893 = vmatpush3.bf16.msra.mxu1 %v3892_v51 }
 0x19b   : > { %3894 = vmatprep.subr.bf16.mxu1 %v4130_v5 }
 0x19c   : > { %4001 = vmatpush3.bf16.msra.mxu0 %v3892_v51 }
 0x19d   : > { %3465 = vmatmul.mubr.f32.vlgmr.msra.gmra.mrb[0].mxu1 %v4527_v16  ;;  %4002 = vmatprep.subr.bf16.mxu0 %v4130_v5 }
 0x19e   : > { %3896 = vmatpush3.bf16.msra.mxu1 %v4318_v4  ;;  %3491 = vmatprep.mubr.msk.f32.mxu1 %vm4131_vm1, %v4132_v35 }
 0x19f   : > { %3627 = vmatmul.mubr.f32.vlgmr.msra.gmra.mrb[4].mxu0 %v4530_v11  ;;  %3897 = vmatprep.subr.bf16.mxu1 %v4130_v5 }
 0x1a0   : > { %4004 = vmatpush3.bf16.msra.mxu0 %v4318_v4  ;;  %3653 = vmatprep.mubr.msk.f32.mxu0 %vm4131_vm1, %v4132_v35  ;;  %v1939_v4 = vld [vmem:[%s4790_s5] sm:$0xff] }
 0x1a1   : > { %4005 = vmatprep.subr.bf16.mxu0 %v4130_v5 }
 0x1a2   : > { %3899 = vmatpush3.bf16.msra.mxu1 %v4332_v10 }
 0x1a3   : > { %3900 = vmatprep.subr.bf16.mxu1 %v4130_v5 }
 0x1a4   : > { %4007 = vmatpush3.bf16.msra.mxu0 %v4332_v10  ;;  %v1940_v10 = vld [vmem:[%s4790_s5 + $0x8] sm:$0xff] }
 0x1a5   : > { %4008 = vmatprep.subr.bf16.mxu0 %v4130_v5 }
 0x1a6   : > { %3902 = vmatpush3.bf16.msra.mxu1 %v4344_v15 }
 0x1a7   : > { %3903 = vmatprep.subr.bf16.mxu1 %v4130_v5 }
 0x1a8   : > { %4010 = vmatpush3.bf16.msra.mxu0 %v4344_v15  ;;  %v1946_v15 = vand.u32 4294901760, %v1939_v4 }
 0x1a9   : > { %4011 = vmatprep.subr.bf16.mxu0 %v4130_v5 }
 0x1aa   : > { %3905 = vmatpush3.bf16.msra.mxu1 %v4356_v20 }
 0x1ab   : > { %3906 = vmatprep.subr.bf16.mxu1 %v4130_v5 }
 0x1ac   : > { %4013 = vmatpush3.bf16.msra.mxu0 %v4356_v20  ;;  %v1949_v20 = vand.u32 4294901760, %v1940_v10 }
 0x1ad   : > { %4014 = vmatprep.subr.bf16.mxu0 %v4130_v5 }
 0x1ae   : > { %3908 = vmatpush3.bf16.msra.mxu1 %v4368_v25  ;;  %v2031_v53 = vsub.f32 %v1940_v10, %v1949_v20 }
 0x1af   : > { %3909 = vmatprep.subr.bf16.mxu1 %v4130_v5 }
 0x1b0   : > { %4016 = vmatpush3.bf16.msra.mxu0 %v4368_v25  ;;  %v4717_v25 = vpack.c.bf16 %v1949_v20, %v1946_v15  ;;  %v2032_v56 = vand.u32 4294901760, %v2031_v53 }
 0x1b1   : > { %4017 = vmatprep.subr.bf16.mxu0 %v4130_v5 }
 0x1b2   : > { %3911 = vmatpush3.bf16.msra.mxu1 %v4386_v34  ;;  %v2033_v1 = vsub.f32 %v2031_v53, %v2032_v56 }
 0x1b3   : > { %4020 = vmatprep.subr.bf16.mxu1 %v4130_v5 }
 0x1b4   : > { %4019 = vmatpush3.bf16.msra.mxu0 %v4386_v34  ;;  %v2024_v34 = vsub.f32 %v1939_v4, %v1946_v15  ;;  %v2034_v9 = vand.u32 4294901760, %v2033_v1 }
 0x1b5   : > { %3492 = vmatmul.mubr.f32.vlgmr.msra.gmra.mrb[0].mxu1 %v4527_v16 }
 0x1b6   : > { %3660 = vmatprep.mubr.msk.f32.mxu1 %vm4131_vm1, %v4132_v35  ;;  %4022 = vmatpush3.bf16.msra.mxu1 %v4717_v25  ;;  %v2025_v55 = vand.u32 4294901760, %v2024_v34  ;;  %v4027_v14 = vpack.c.bf16 %v2031_v53, %v2024_v34 }
 0x1b7   : > { %3654 = vmatmul.mubr.f32.vlgmr.msra.gmra.mrb[4].mxu0 %v4530_v11  ;;  %4023 = vmatprep.subr.bf16.mxu1 %v4130_v5 }
 0x1b8   : > { %v2026_v0 = vsub.f32 %v2024_v34, %v2025_v55  ;;  %v4721_v19 = vpack.c.bf16 %v2032_v56, %v2025_v55 }
 0x1ba   : > { %v2027_v2 = vand.u32 4294901760, %v2026_v0 }
 0x1bc   : > { %v4024_v13 = vpack.c.bf16 %v2034_v9, %v2027_v2 }
 0x288   : > { %v1314_v21 = vpop.f32.mrb[0].mxu1 }
 0x289   : > { %v1928_v29 = vmul.f32 0.0052083335, %v1314_v21  ;;  %v3493_v30 = vpop.f32.mrb[1].mxu1 }
 0x28a   : > { %v1923_v31 = vpop.f32.mrb[4].mxu0 }
 0x28b   : > { %v1930_v36 = vmul.f32 %v1928_v29, %v1928_v29  ;;  %v1929_v37 = vmul.f32 0.0052083335, %v1923_v31  ;;  %v3655_v40 = vpop.f32.mrb[5].mxu0 }
 0x28d   : > { %v1931_v41 = vsub.f32 %v1929_v37, %v1930_v36 }
 0x28f   : > { %v1933_v24 = vadd.f32 1e-05, %v1931_v41 }
 0x291   : > { %4120 = vrsqrt.f32 %v1933_v24 }
 0x29b   : > { %v4121_v46 = vpop.eup %4120 }
 0x29c   : > { %v1935_v49 = vmul.f32 %v4121_v46, %v1932_v28 }
 0x29e   : > { %v1937_v54 = vmul.f32 %v1935_v49, %v1928_v29  ;;  %v1943_v57 = vsel %vm1941_vm3, %v1935_v49, 0 }
 0x29f   : > { %v2012_v58 = vand.u32 4294901760, %v1943_v57 }
 0x2a0   : > { %v1938_v11 = vsub.f32 %v1936_v3, %v1937_v54 }
 0x2a1   : > { %v2013_v62 = vsub.f32 %v1943_v57, %v2012_v58 }
 0x2a2   : > { %v2405_v17 = vsel %vm1941_vm3, %v1938_v11, 0 }
 0x2a3   : > { %v2014_v61 = vand.u32 4294901760, %v2013_v62  ;;  %v2474_v22 = vand.u32 4294901760, %v2405_v17 }
 0x2a5   : > { %v2015_v12 = vsub.f32 %v2013_v62, %v2014_v61  ;;  %v2475_v23 = vsub.f32 %v2405_v17, %v2474_v22 }
 0x2a7   : > { %v2016_v16 = vand.u32 4294901760, %v2015_v12  ;;  %v2476_v60 = vand.u32 4294901760, %v2475_v23 }
 0x2a9   : > { %3661 = vmatmul.mubr.f32.vlgmr.msra.gmra.mrb[2].mxu1 %v2016_v16  ;;  %v2477_v7 = vsub.f32 %v2475_v23, %v2476_v60 }
 0x2aa   : > { %4025 = vmatpush3.bf16.msra.mxu1 %v4024_v13  ;;  %3667 = vmatprep.mubr.msk.f32.mxu1 %vm4131_vm1, %v4132_v35 }
 0x2ab   : > { %4026 = vmatprep.subr.bf16.mxu1 %v4130_v5  ;;  %v2478_v8 = vand.u32 4294901760, %v2477_v7 }
 0x2b1   : > { %3668 = vmatmul.mubr.f32.vlgmr.msra.gmra.mrb[2].mxu1 %v2012_v58 }
 0x2b2   : > { %4028 = vmatpush3.bf16.msra.mxu1 %v4027_v14  ;;  %3674 = vmatprep.mubr.msk.f32.mxu1 %vm4131_vm1, %v4132_v35 }
 0x2b3   : > { %4029 = vmatprep.subr.bf16.mxu1 %v4130_v5 }
 0x2b9   : > { %3675 = vmatmul.mubr.f32.vlgmr.msra.gmra.mrb[2].mxu1 %v2013_v62 }
 0x2ba   : > { %4031 = vmatpush3.bf16.msra.mxu1 %v4717_v25  ;;  %3681 = vmatprep.mubr.msk.f32.mxu1 %vm4131_vm1, %v4132_v35 }
 0x2bb   : > { %4032 = vmatprep.subr.bf16.mxu1 %v4130_v5 }
 0x2c1   : > { %3682 = vmatmul.mubr.f32.vlgmr.msra.gmra.mrb[2].mxu1 %v2014_v61 }
 0x2c2   : > { %4034 = vmatpush3.bf16.msra.mxu1 %v4721_v19  ;;  %3688 = vmatprep.mubr.msk.f32.mxu1 %vm4131_vm1, %v4132_v35 }
 0x2c3   : > { %4035 = vmatprep.subr.bf16.mxu1 %v4130_v5 }
 0x2c9   : > { %3689 = vmatmul.mubr.f32.vlgmr.msra.gmra.mrb[2].mxu1 %v2012_v58 }
 0x2ca   : > { %4037 = vmatpush3.bf16.msra.mxu1 %v4717_v25  ;;  %3695 = vmatprep.mubr.msk.f32.mxu1 %vm4131_vm1, %v4132_v35 }
 0x2cb   : > { %4038 = vmatprep.subr.bf16.mxu1 %v4130_v5 }
 0x2d1   : > { %3696 = vmatmul.mubr.f32.vlgmr.msra.gmra.mrb[2].mxu1 %v2012_v58 }
 0x2d2   : > { %4040 = vmatpush3.bf16.msra.mxu1 %v4717_v25  ;;  %3702 = vmatprep.mubr.msk.f32.mxu1 %vm4131_vm1, %v4132_v35 }
 0x2d3   : > { %4041 = vmatprep.subr.bf16.mxu1 %v4130_v5 }
 0x2d5   : > { %3703 = vmatmul.mubr.f32.vlgmr.msra.gmra.mrb[4].mxu1 %v2478_v8 }
 0x2d6   : > { %4043 = vmatpush3.bf16.msra.mxu1 %v4024_v13  ;;  %3709 = vmatprep.mubr.msk.f32.mxu1 %vm4131_vm1, %v4132_v35 }
 0x2d7   : > { %4044 = vmatprep.subr.bf16.mxu1 %v4130_v5 }
 0x2dd   : > { %3710 = vmatmul.mubr.f32.vlgmr.msra.gmra.mrb[4].mxu1 %v2474_v22 }
 0x2de   : > { %4046 = vmatpush3.bf16.msra.mxu1 %v4027_v14  ;;  %3716 = vmatprep.mubr.msk.f32.mxu1 %vm4131_vm1, %v4132_v35 }
 0x2df   : > { %4047 = vmatprep.subr.bf16.mxu1 %v4130_v5 }
 0x2e5   : > { %3717 = vmatmul.mubr.f32.vlgmr.msra.gmra.mrb[4].mxu1 %v2475_v23 }
 0x2e6   : > { %4049 = vmatpush3.bf16.msra.mxu1 %v4717_v25  ;;  %3723 = vmatprep.mubr.msk.f32.mxu1 %vm4131_vm1, %v4132_v35 }
 0x2e7   : > { %4050 = vmatprep.subr.bf16.mxu1 %v4130_v5 }
 0x2ed   : > { %3724 = vmatmul.mubr.f32.vlgmr.msra.gmra.mrb[4].mxu1 %v2476_v60 }
 0x2ee   : > { %4052 = vmatpush3.bf16.msra.mxu1 %v4721_v19  ;;  %3730 = vmatprep.mubr.msk.f32.mxu1 %vm4131_vm1, %v4132_v35 }
 0x2ef   : > { %4053 = vmatprep.subr.bf16.mxu1 %v4130_v5 }
 0x2f5   : > { %3731 = vmatmul.mubr.f32.vlgmr.msra.gmra.mrb[4].mxu1 %v2474_v22 }
 0x2f6   : > { %4055 = vmatpush3.bf16.msra.mxu1 %v4717_v25  ;;  %3737 = vmatprep.mubr.msk.f32.mxu1 %vm4131_vm1, %v4132_v35 }
 0x2fd   : > { %3738 = vmatmul.mubr.f32.vlgmr.msra.gmra.mrb[4].mxu1 %v2474_v22 }
 0x3a4   : > { %v2400_v52 = vpop.f32.mrb[2].mxu1 }
 0x3a5   : > { %v2869_v26 = vrot.slane %v2400_v52, %v2868_v44  ;;  %v3697_v27 = vpop.f32.mrb[3].mxu1 }
 0x3a7   : > { %v2870_v32 = vmul.f32 %v2869_v26, %v4504_v50  ;;  %v2871_v33 = vmul.f32 %v4498_v45, %v2869_v26  ;;  %v2872_v5 = vmul.f32 %v2869_v26, %v4514_v6  ;;  %v2873_v38 = vmul.f32 %v4512_v63, %v2869_v26 }
 0x3d0   : > { %v2862_v39 = vpop.f32.mrb[4].mxu1 }
 0x3d1   : > { %v2877_v42 = vrot.slane %v2862_v39, %v2868_v44  ;;  %v3739_v43 = vpop.f32.mrb[5].mxu1 }
 0x3d3   : > { %v2878_v35 = vadd.f32 %v2877_v42, %v2870_v32  ;;  %v2879_v47 = vadd.f32 %v2877_v42, %v2871_v33  ;;  %v2880_v48 = vadd.f32 %v2877_v42, %v2872_v5  ;;  %v2881_v51 = vadd.f32 %v2877_v42, %v2873_v38 }
 0x3d5   : > { %vm2882_vm4 = vcmp.gt.f32.partialorder %v2878_v35, 0.0  ;;  %vm2883_vm5 = vcmp.gt.f32.partialorder %v2879_v47, 0.0  ;;  %vm2884_vm6 = vcmp.gt.f32.partialorder %v2880_v48, 0.0  ;;  %vm2885_vm7 = vcmp.gt.f32.partialorder %v2881_v51, 0.0 }
 0x3d6   : > { %v2886_v45 = vmul.f32 0.2, %v2878_v35  ;;  %v2887_v50 = vmul.f32 0.2, %v2879_v47  ;;  %v2888_v6 = vmul.f32 0.2, %v2880_v48 }
 0x3d7   : > { %v2889_v63 = vmul.f32 0.2, %v2881_v51 }
 0x3d8   : > { %v2890_v4 = vsel %vm2882_vm4, %v2878_v35, %v2886_v45  ;;  %v2891_v10 = vsel %vm2883_vm5, %v2879_v47, %v2887_v50  ;;  %v2892_v15 = vsel %vm2884_vm6, %v2880_v48, %v2888_v6 }
 0x3d9   : > { %v2893_v20 = vsel %vm2885_vm7, %v2881_v51, %v2889_v63  ;;  %2894 = vst.msk [vmem:[%s251_s15] sm:$0xff] %vm700_vm2, %v2890_v4  ;;  %2895 = vst.msk [vmem:[%s251_s15 + $0x8] sm:$0xff] %vm700_vm2, %v2891_v10 }
 0x3da   : > { %2896 = vst.msk [vmem:[%s251_s15 + $0x10] sm:$0xff] %vm700_vm2, %v2892_v15  ;;  %2897 = vst.msk [vmem:[%s251_s15 + $0x18] sm:$0xff] %vm700_vm2, %v2893_v20 }
 0x3db PF: > { %s16_s21 = sadd.s32 1, %s4128_s21  }
 0x3dc   : > { %p13_p4 = scmp.ge.s32.totalorder %s16_s21, 4  }
 0x3de   :  { %15 = sbr.rel (!%p13_p4) target bundleno = 1 (0x1), region = 77 }

// kernel: netD_forward.6
= control target key start
LH: loop header
LB: loop body
LE: loop exit
PB: predicated region body
PF: predicated region fallthrough
CT: control target
= control target key end

     0   :  { %s4688_s21 = smov 0   ;;  %s5639_s0 = inlined_call_operand.vmem [shape: f32[2,36,96], index: 0, kind: input, shape index: {}]   ;;  %s5640_s1 = inlined_call_operand.vmem [shape: f32[4,96,128], index: 1, kind: input, shape index: {}]   ;;  %s5641_s2 = inlined_call_operand.vmem [shape: f32[1,32], index: 2, kind: input, shape index: {}]   ;;  %s5642_s3 = inlined_call_operand.vmem [shape: f32[1,32], index: 3, kind: input, shape index: {}]   ;;  %s5643_s4 = inlined_call_operand.vmem [shape: f32[128,32], index: 4, kind: input, shape index: {}]   ;;  %s5644_s5 = inlined_call_operand.vmem [shape: f32[32,128], index: 5, kind: input, shape index: {}]   ;;  %s5645_s6 = inlined_call_operand.vmem [shape: f32[2,17,128], index: 6, kind: output, shape index: {}]  }
   0x1 LB: > { %s3072_s22 = sadd.s32 4294967295, %s4648_s21   ;;  %p3076_p0 = scmp.ge.s32.totalorder %s4648_s21, 1  ;;  %s4648_s21 = sphi %s4688_s21, %s16_s21  }
   0x2   : > { %p212_p1 = scmp.lt.s32.totalorder %s4648_s21, 3 }
   0x4   : > { %p213_p2 = pnand %p3076_p0, %p212_p1 }
   0x6   : > { %216 = sbr.rel (%p213_p2) target bundleno = 1069 (0x42d), region = 44 }
   0xd   : > { %v3079_v0 = vld [vmem:[%s5640_s1 + $0x60] sm:$0xff]  ;;  %v3080_v1 = vld [vmem:[%s5640_s1 + $0x68] sm:$0xff]  ;;  %v3081_v2 = vld [vmem:[%s5640_s1 + $0x70] sm:$0xff]  ;;  %v5662_v3 = vmov 0.0|0.0   ;;  %vm4651_vm0 = vmmov 0   ;;  %v5664_v6 = vmov 0.0  }
   0xe   : > { %4137 = vmatprep.subr.bf16.mxu0 %v5662_v3  ;;  %v4138_v4 = vpack.c.bf16 %v3080_v1, %v3079_v0  ;;  %v3082_v5 = vld [vmem:[%s5640_s1 + $0x78] sm:$0xff]  ;;  %3477 = vmatprep.mubr.msk.f32.mxu0 %vm4651_vm0, %v5664_v6  ;;  %v3083_v8 = vld [vmem:[%s5640_s1 + $0x80] sm:$0xff]  ;;  %v3084_v9 = vld [vmem:[%s5640_s1 + $0x88] sm:$0xff]  ;;  %p242_p3 = scmp.lt.s32.totalorder %s3072_s22, 1  ;;  %vm283_vm1 = vcmask 785408   ;;  %vm679_vm2 = vcmask 1040384  }
   0xf   : > { %4209 = vmatprep.subr.bf16.mxu1 %v5662_v3  ;;  %3617 = vmatprep.mubr.msk.f32.mxu1 %vm4651_vm0, %v5664_v6  ;;  %v4141_v7 = vpack.c.bf16 %v3082_v5, %v3081_v2  ;;  %v4144_v10 = vpack.c.bf16 %v3084_v9, %v3083_v8  ;;  %v3085_v11 = vld [vmem:[%s5640_s1 + $0x90] sm:$0xff]  ;;  %v3086_v12 = vld [vmem:[%s5640_s1 + $0x98] sm:$0xff]  ;;  %v3087_v14 = vld [vmem:[%s5640_s1 + $0xa0] sm:$0xff]  ;;  %vm2014_vm3 = vcmask 261120  }
  0x10   : > { %4139 = vmatpush3.bf16.msra.mxu0 %v4138_v4  ;;  %v4147_v13 = vpack.c.bf16 %v3086_v12, %v3085_v11  ;;  %v3088_v15 = vld [vmem:[%s5640_s1 + $0xa8] sm:$0xff]  ;;  %s5688_s22 = smov (!%p242_p3, %s3072_s22), 1  ;;  %v3089_v17 = vld [vmem:[%s5640_s1 + $0xb0] sm:$0xff]  ;;  %v3090_v18 = vld [vmem:[%s5640_s1 + $0xb8] sm:$0xff] }
  0x11   : > { %4140 = vmatprep.subr.bf16.mxu0 %v5662_v3  ;;  %v4150_v16 = vpack.c.bf16 %v3088_v15, %v3087_v14  ;;  %s4627_s25 = smul.u32 40, %s5688_s22  ;;  %v4153_v19 = vpack.c.bf16 %v3090_v18, %v3089_v17  ;;  %v255_v20 = vld [vmem:[%s5640_s1] sm:$0xff]  ;;  %v256_v21 = vld [vmem:[%s5640_s1 + $0x8] sm:$0xff]  ;;  %v257_v24 = vld [vmem:[%s5640_s1 + $0x10] sm:$0xff] }
  0x12   : > { %v4156_v23 = vpack.c.bf16 %v256_v21, %v255_v20  ;;  %v258_v25 = vld [vmem:[%s5640_s1 + $0x18] sm:$0xff]  ;;  %v259_v28 = vld [vmem:[%s5640_s1 + $0x20] sm:$0xff]  ;;  %v260_v29 = vld [vmem:[%s5640_s1 + $0x28] sm:$0xff]  ;;  %s4628_s14 = smul.u32 24, %s5688_s22 }
  0x13   : > { %s4753_s28 = scalar_lea.vmem %s5639_s0, %s4627_s25  ;;  %v4159_v26 = vpack.c.bf16 %v258_v25, %v257_v24  ;;  %v4162_v30 = vpack.c.bf16 %v260_v29, %v259_v28  ;;  %v261_v32 = vld [vmem:[%s5640_s1 + $0x30] sm:$0xff]  ;;  %v262_v33 = vld [vmem:[%s5640_s1 + $0x38] sm:$0xff]  ;;  %v263_v35 = vld [vmem:[%s5640_s1 + $0x40] sm:$0xff] }
  0x14   : > { %4142 = vmatpush3.bf16.msra.mxu0 %v4141_v7  ;;  %v267_v22 = vld [vmem:[%s4753_s28 + $0x12] sm:$0xff]  ;;  %v268_v27 = vld [vmem:[%s4753_s28 + $0x1a] sm:$0xff]  ;;  %v269_v31 = vld [vmem:[%s4753_s28 + $0x22] sm:$0x1]  ;;  %v4165_v34 = vpack.c.bf16 %v262_v33, %v261_v32  ;;  %s251_s17 = scalar_lea.vmem %s5645_s6, %s4628_s14 }
  0x15   : > { %4143 = vmatprep.subr.bf16.mxu0 %v5662_v3  ;;  %v264_v36 = vld [vmem:[%s5640_s1 + $0x48] sm:$0xff]  ;;  %v265_v38 = vld [vmem:[%s5640_s1 + $0x50] sm:$0xff]  ;;  %v266_v39 = vld [vmem:[%s5640_s1 + $0x58] sm:$0xff] }
  0x16   : > { %v4168_v37 = vpack.c.bf16 %v264_v36, %v263_v35  ;;  %v4171_v40 = vpack.c.bf16 %v266_v39, %v265_v38  ;;  %v3097_v41 = vld [vmem:[%s5640_s1 + $0xc0] sm:$0xff]  ;;  %v3098_v42 = vld [vmem:[%s5640_s1 + $0xc8] sm:$0xff]  ;;  %v3099_v45 = vld [vmem:[%s5640_s1 + $0xd0] sm:$0xff] }
  0x17   : > { %v252_v43 = vld [vmem:[%s4753_s28] sm:$0xff]  ;;  %v4174_v44 = vpack.c.bf16 %v3098_v42, %v3097_v41  ;;  %v3100_v46 = vld [vmem:[%s5640_s1 + $0xd8] sm:$0xff]  ;;  %v253_v48 = vld [vmem:[%s4753_s28 + $0x8] sm:$0xff] }
  0x18   : > { %4145 = vmatpush3.bf16.msra.mxu0 %v4144_v10  ;;  %v4177_v47 = vpack.c.bf16 %v3100_v46, %v3099_v45  ;;  %v3101_v49 = vld [vmem:[%s5640_s1 + $0xe0] sm:$0xff]  ;;  %v3102_v50 = vld [vmem:[%s5640_s1 + $0xe8] sm:$0xff]  ;;  %v254_v52 = vld [vmem:[%s4753_s28 + $0x10] sm:$0x1] }
  0x19   : > { %4146 = vmatprep.subr.bf16.mxu0 %v5662_v3  ;;  %v4180_v51 = vpack.c.bf16 %v3102_v50, %v3101_v49  ;;  %v3103_v53 = vld [vmem:[%s5640_s1 + $0xf0] sm:$0xff]  ;;  %v3104_v54 = vld [vmem:[%s5640_s1 + $0xf8] sm:$0xff]  ;;  %v3105_v56 = vld [vmem:[%s5640_s1 + $0x100] sm:$0xff] }
  0x1a   : > { %v4183_v55 = vpack.c.bf16 %v3104_v54, %v3103_v53  ;;  %v3106_v57 = vld [vmem:[%s5640_s1 + $0x108] sm:$0xff]  ;;  %v3107_v59 = vld [vmem:[%s5640_s1 + $0x110] sm:$0xff]  ;;  %v3108_v60 = vld [vmem:[%s5640_s1 + $0x118] sm:$0xff] }
  0x1b   : > { %v4186_v58 = vpack.c.bf16 %v3106_v57, %v3105_v56  ;;  %v4189_v61 = vpack.c.bf16 %v3108_v60, %v3107_v59  ;;  %v3112_v62 = vld [vmem:[%s5640_s1 + $0x120] sm:$0xff]  ;;  %v3113_v63 = vld [vmem:[%s5640_s1 + $0x128] sm:$0xff]  ;;  %v3114_v2 = vld [vmem:[%s5640_s1 + $0x130] sm:$0xff] }
  0x1c   : > { %4148 = vmatpush3.bf16.msra.mxu0 %v4147_v13  ;;  %v462_v0 = vld [vmem:[%s4753_s28 + $0x1] sm:$0xff]  ;;  %v4192_v1 = vpack.c.bf16 %v3113_v63, %v3112_v62  ;;  %v3115_v4 = vld [vmem:[%s5640_s1 + $0x138] sm:$0xff]  ;;  %v463_v7 = vld [vmem:[%s4753_s28 + $0x9] sm:$0xff] }
  0x1d   : > { %4149 = vmatprep.subr.bf16.mxu0 %v5662_v3  ;;  %v4195_v5 = vpack.c.bf16 %v3115_v4, %v3114_v2  ;;  %v3116_v8 = vld [vmem:[%s5640_s1 + $0x140] sm:$0xff]  ;;  %v3117_v9 = vld [vmem:[%s5640_s1 + $0x148] sm:$0xff]  ;;  %v464_v11 = vld [vmem:[%s4753_s28 + $0x11] sm:$0x1] }
  0x1e   : > { %v4198_v10 = vpack.c.bf16 %v3117_v9, %v3116_v8  ;;  %v3118_v12 = vld [vmem:[%s5640_s1 + $0x150] sm:$0xff]  ;;  %v3119_v13 = vld [vmem:[%s5640_s1 + $0x158] sm:$0xff]  ;;  %v3120_v15 = vld [vmem:[%s5640_s1 + $0x160] sm:$0xff] }
  0x1f   : > { %v4201_v14 = vpack.c.bf16 %v3119_v13, %v3118_v12  ;;  %v3122_v18 = vld [vmem:[%s5640_s1 + $0x170] sm:$0xff]  ;;  %v688_v24 = vld [vmem:[%s5643_s4] sm:$0xff]  ;;  %v689_v25 = vld [vmem:[%s5643_s4 + $0x8] sm:$0xff] }
  0x20   : > { %4151 = vmatpush3.bf16.msra.mxu0 %v4150_v16  ;;  %v3121_v16 = vld [vmem:[%s5640_s1 + $0x168] sm:$0xff]  ;;  %v570_v21 = vld [vmem:[%s4753_s28 + $0x13] sm:$0xff]  ;;  %v5051_v54 = vld [vmem:[%s5643_s4 + $0x60] sm:$0xff] }
  0x21   : > { %4152 = vmatprep.subr.bf16.mxu0 %v5662_v3  ;;  %v4204_v17 = vpack.c.bf16 %v3121_v16, %v3120_v15  ;;  %v4941_v29 = vld [vmem:[%s5643_s4 + $0x10] sm:$0xff]  ;;  %v4968_v35 = vld [vmem:[%s5643_s4 + $0x28] sm:$0xff]  ;;  %v5034_v50 = vld [vmem:[%s5643_s4 + $0x58] sm:$0xff]  ;;  %v741_v56 = vand.u32 4294901760, %v5051_v54 }
  0x22   : > { %v4985_v39 = vld [vmem:[%s5643_s4 + $0x30] sm:$0xff]  ;;  %v5012_v45 = vld [vmem:[%s5643_s4 + $0x48] sm:$0xff]  ;;  %v5082_v62 = vld [vmem:[%s5643_s4 + $0x78] sm:$0xff] }
  0x23   : > { %v723_v41 = vand.u32 4294901760, %v4985_v39  ;;  %v5029_v49 = vld [vmem:[%s5643_s4 + $0x50] sm:$0xff] }
  0x24   : > { %4154 = vmatpush3.bf16.msra.mxu0 %v4153_v19  ;;  %v3123_v19 = vld [vmem:[%s5640_s1 + $0x178] sm:$0xff] }
  0x25   : > { %4155 = vmatprep.subr.bf16.mxu0 %v5662_v3  ;;  %v4207_v20 = vpack.c.bf16 %v3123_v19, %v3122_v18 }
  0x27   : > { %3478 = vmatmul.mubr.msk.f32.vlgmr.msra.gmra.mrb[0].mxu0 %vm283_vm1, %v267_v22  ;;  %v571_v22 = vld [vmem:[%s4753_s28 + $0x1b] sm:$0xff] }
  0x28   : > { %4157 = vmatpush3.bf16.msra.mxu0 %v4156_v23  ;;  %3480 = vmatprep.mubr.msk.f32.mxu0 %vm4651_vm0, %v5664_v6  ;;  %v572_v23 = vld [vmem:[%s4753_s28 + $0x23] sm:$0x1] }
  0x29   : > { %4158 = vmatprep.subr.bf16.mxu0 %v5662_v3 }
  0x2b   : > { %3481 = vmatmul.mubr.msk.f32.gmra.mrb[2].mxu0 %vm283_vm1, %v268_v27  ;;  %v708_v27 = vand.u32 4294901760, %v689_v25 }
  0x2c   : > { %4160 = vmatpush3.bf16.msra.mxu0 %v4159_v26  ;;  %3483 = vmatprep.mubr.msk.f32.mxu0 %vm4651_vm0, %v5664_v6  ;;  %v705_v26 = vand.u32 4294901760, %v688_v24 }
  0x2d   : > { %4161 = vmatprep.subr.bf16.mxu0 %v5662_v3  ;;  %v5072_v60 = vsub.f32 %v689_v25, %v708_v27 }
  0x2e   : > { %v4936_v28 = vpack.c.bf16 %v708_v27, %v705_v26  ;;  %v5070_v59 = vsub.f32 %v688_v24, %v705_v26  ;;  %v5151_v26 = vsub.f32 %v4985_v39, %v723_v41 }
  0x2f   : > { %3484 = vmatmul.mubr.msk.f32.gmra.mrb[4].mxu0 %vm283_vm1, %v269_v31  ;;  %v711_v31 = vand.u32 4294901760, %v4941_v29  ;;  %v5660_v2 = vand.u32 4294901760, %v5072_v60 }
  0x30   : > { %4163 = vmatpush3.bf16.msra.mxu0 %v4162_v30  ;;  %3510 = vmatprep.mubr.msk.f32.mxu0 %vm4651_vm0, %v5664_v6  ;;  %v4946_v30 = vld [vmem:[%s5643_s4 + $0x18] sm:$0xff] }
  0x31   : > { %4164 = vmatprep.subr.bf16.mxu0 %v5662_v3  ;;  %4211 = vmatpush3.bf16.msra.mxu1 %v4936_v28  ;;  %v714_v32 = vand.u32 4294901760, %v4946_v30  ;;  %v5107_v8 = vsub.f32 %v4941_v29, %v711_v31 }
  0x32   : > { %4212 = vmatprep.subr.bf16.mxu1 %v5662_v3 }
  0x33   : > { %v4958_v33 = vpack.c.bf16 %v714_v32, %v711_v31  ;;  %v5112_v9 = vsub.f32 %v4946_v30, %v714_v32  ;;  %v5659_v12 = vand.u32 4294901760, %v5107_v8  ;;  %v5655_v31 = vand.u32 4294901760, %v5151_v26 }
  0x34   : > { %4166 = vmatpush3.bf16.msra.mxu0 %v4165_v34  ;;  %v4963_v34 = vld [vmem:[%s5643_s4 + $0x20] sm:$0xff] }
  0x35   : > { %4167 = vmatprep.subr.bf16.mxu0 %v5662_v3  ;;  %4214 = vmatpush3.bf16.msra.mxu1 %v4958_v33  ;;  %v717_v36 = vand.u32 4294901760, %v4963_v34  ;;  %v5658_v13 = vand.u32 4294901760, %v5112_v9  ;;  %v813_v15 = vsub.f32 %v5107_v8, %v5659_v12 }
  0x36   : > { %4215 = vmatprep.subr.bf16.mxu1 %v5662_v3 }
  0x37   : > { %v820_v16 = vsub.f32 %v5112_v9, %v5658_v13  ;;  %v814_v19 = vand.u32 4294901760, %v813_v15 }
  0x38   : > { %4169 = vmatpush3.bf16.msra.mxu0 %v4168_v37  ;;  %v720_v37 = vand.u32 4294901760, %v4968_v35 }
  0x39   : > { %4170 = vmatprep.subr.bf16.mxu0 %v5662_v3 }
  0x3a   : > { %v4980_v38 = vpack.c.bf16 %v720_v37, %v717_v36  ;;  %v5136_v18 = vsub.f32 %v4968_v35, %v720_v37  ;;  %v841_v35 = vsub.f32 %v5151_v26, %v5655_v31 }
  0x3c   : > { %4172 = vmatpush3.bf16.msra.mxu0 %v4171_v40  ;;  %v4990_v40 = vld [vmem:[%s5643_s4 + $0x38] sm:$0xff]  ;;  %4217 = vmatpush3.bf16.msra.mxu1 %v4980_v38 }
  0x3d   : > { %4173 = vmatprep.subr.bf16.mxu0 %v5662_v3  ;;  %v726_v42 = vand.u32 4294901760, %v4990_v40  ;;  %4218 = vmatprep.subr.bf16.mxu1 %v5662_v3 }
  0x3f   : > { %3511 = vmatmul.mubr.msk.f32.vlgmr.msra.gmra.mrb[0].mxu0 %vm283_vm1, %v252_v43  ;;  %v5002_v43 = vpack.c.bf16 %v726_v42, %v723_v41  ;;  %v5156_v27 = vsub.f32 %v4990_v40, %v726_v42  ;;  %v842_v40 = vand.u32 4294901760, %v841_v35 }
  0x40   : > { %4175 = vmatpush3.bf16.msra.mxu0 %v4174_v44  ;;  %3513 = vmatprep.mubr.msk.f32.mxu0 %vm4651_vm0, %v5664_v6  ;;  %v5007_v44 = vld [vmem:[%s5643_s4 + $0x40] sm:$0xff] }
  0x41   : > { %4176 = vmatprep.subr.bf16.mxu0 %v5662_v3  ;;  %4220 = vmatpush3.bf16.msra.mxu1 %v5002_v43  ;;  %v729_v46 = vand.u32 4294901760, %v5007_v44  ;;  %v5654_v32 = vand.u32 4294901760, %v5156_v27 }
  0x42   : > { %4221 = vmatprep.subr.bf16.mxu1 %v5662_v3 }
  0x43   : > { %3514 = vmatmul.mubr.msk.f32.gmra.mrb[2].mxu0 %vm283_vm1, %v253_v48  ;;  %v848_v39 = vsub.f32 %v5156_v27, %v5654_v32 }
  0x44   : > { %4178 = vmatpush3.bf16.msra.mxu0 %v4177_v47  ;;  %3516 = vmatprep.mubr.msk.f32.mxu0 %vm4651_vm0, %v5664_v6  ;;  %v732_v47 = vand.u32 4294901760, %v5012_v45 }
  0x45   : > { %4179 = vmatprep.subr.bf16.mxu0 %v5662_v3 }
  0x46   : > { %v5024_v48 = vpack.c.bf16 %v732_v47, %v729_v46  ;;  %v5173_v37 = vsub.f32 %v5012_v45, %v732_v47 }
  0x47   : > { %3517 = vmatmul.mubr.msk.f32.gmra.mrb[4].mxu0 %vm283_vm1, %v254_v52  ;;  %v738_v52 = vand.u32 4294901760, %v5034_v50 }
  0x48   : > { %4181 = vmatpush3.bf16.msra.mxu0 %v4180_v51  ;;  %3543 = vmatprep.mubr.msk.f32.mxu0 %vm4651_vm0, %v5664_v6  ;;  %v735_v51 = vand.u32 4294901760, %v5029_v49  ;;  %v5652_v42 = vand.u32 4294901760, %v5173_v37 }
  0x49   : > { %4182 = vmatprep.subr.bf16.mxu0 %v5662_v3  ;;  %4223 = vmatpush3.bf16.msra.mxu1 %v5024_v48  ;;  %v5194_v47 = vsub.f32 %v5034_v50, %v738_v52  ;;  %v5211_v50 = vsub.f32 %v5051_v54, %v741_v56 }
  0x4a   : > { %4224 = vmatprep.subr.bf16.mxu1 %v5662_v3  ;;  %v5046_v53 = vpack.c.bf16 %v738_v52, %v735_v51  ;;  %v5189_v45 = vsub.f32 %v5029_v49, %v735_v51 }
  0x4c   : > { %4184 = vmatpush3.bf16.msra.mxu0 %v4183_v55  ;;  %v5056_v55 = vld [vmem:[%s5643_s4 + $0x68] sm:$0xff]  ;;  %v5651_v15 = vand.u32 4294901760, %v5189_v45 }
  0x4d   : > { %4185 = vmatprep.subr.bf16.mxu0 %v5662_v3  ;;  %4226 = vmatpush3.bf16.msra.mxu1 %v5046_v53  ;;  %v744_v57 = vand.u32 4294901760, %v5056_v55 }
  0x4e   : > { %4227 = vmatprep.subr.bf16.mxu1 %v5662_v3  ;;  %v869_v49 = vsub.f32 %v5189_v45, %v5651_v15 }
  0x4f   : > { %v5216_v52 = vsub.f32 %v5056_v55, %v744_v57 }
  0x50   : > { %4187 = vmatpush3.bf16.msra.mxu0 %v4186_v58  ;;  %v5068_v58 = vpack.c.bf16 %v744_v57, %v741_v56 }
  0x51   : > { %4188 = vmatprep.subr.bf16.mxu0 %v5662_v3 }
  0x52   : > { %4229 = vmatpush3.bf16.msra.mxu1 %v5068_v58 }
  0x53   : > { %4230 = vmatprep.subr.bf16.mxu1 %v5662_v3 }
  0x54   : > { %4190 = vmatpush3.bf16.msra.mxu0 %v4189_v61  ;;  %v5077_v61 = vld [vmem:[%s5643_s4 + $0x70] sm:$0xff] }
  0x55   : > { %4191 = vmatprep.subr.bf16.mxu0 %v5662_v3  ;;  %v747_v63 = vand.u32 4294901760, %v5077_v61 }
  0x57   : > { %3544 = vmatmul.mubr.msk.f32.vlgmr.msra.gmra.mrb[0].mxu0 %vm283_vm1, %v462_v0  ;;  %v750_v0 = vand.u32 4294901760, %v5082_v62  ;;  %v5228_v54 = vsub.f32 %v5077_v61, %v747_v63 }
  0x58   : > { %4193 = vmatpush3.bf16.msra.mxu0 %v4192_v1  ;;  %3546 = vmatprep.mubr.msk.f32.mxu0 %vm4651_vm0, %v5664_v6  ;;  %v5661_v1 = vand.u32 4294901760, %v5070_v59 }
  0x59   : > { %4194 = vmatprep.subr.bf16.mxu0 %v5662_v3  ;;  %v5096_v4 = vpack.c.bf16 %v750_v0, %v747_v63  ;;  %v5233_v55 = vsub.f32 %v5082_v62, %v750_v0 }
  0x5b   : > { %3547 = vmatmul.mubr.msk.f32.gmra.mrb[2].mxu0 %vm283_vm1, %v463_v7  ;;  %v806_v7 = vsub.f32 %v5072_v60, %v5660_v2  ;;  %4232 = vmatpush3.bf16.msra.mxu1 %v5096_v4 }
  0x5c   : > { %4196 = vmatpush3.bf16.msra.mxu0 %v4195_v5  ;;  %3549 = vmatprep.mubr.msk.f32.mxu0 %vm4651_vm0, %v5664_v6  ;;  %v799_v5 = vsub.f32 %v5070_v59, %v5661_v1 }
  0x5d   : > { %4197 = vmatprep.subr.bf16.mxu0 %v5662_v3  ;;  %4233 = vmatprep.subr.bf16.mxu1 %v5662_v3 }
  0x5f   : > { %3550 = vmatmul.mubr.msk.f32.gmra.mrb[4].mxu0 %vm283_vm1, %v464_v11  ;;  %v807_v11 = vand.u32 4294901760, %v806_v7 }
  0x60   : > { %4199 = vmatpush3.bf16.msra.mxu0 %v4198_v10  ;;  %3576 = vmatprep.mubr.msk.f32.mxu0 %vm4651_vm0, %v5664_v6  ;;  %v800_v10 = vand.u32 4294901760, %v799_v5  ;;  %v849_v5 = vand.u32 4294901760, %v848_v39  ;;  %v5647_v39 = vand.u32 4294901760, %v5228_v54 }
  0x61   : > { %4200 = vmatprep.subr.bf16.mxu0 %v5662_v3 }
  0x62   : > { %v5196_v7 = vpack.c.bf16 %v849_v5, %v842_v40  ;;  %v5646_v40 = vand.u32 4294901760, %v5233_v55  ;;  %v897_v61 = vsub.f32 %v5228_v54, %v5647_v39 }
  0x64   : > { %4202 = vmatpush3.bf16.msra.mxu0 %v4201_v14  ;;  %v5120_v14 = vpack.c.bf16 %v807_v11, %v800_v10  ;;  %v904_v63 = vsub.f32 %v5233_v55, %v5646_v40  ;;  %v898_v0 = vand.u32 4294901760, %v897_v61 }
  0x65   : > { %4203 = vmatprep.subr.bf16.mxu0 %v5662_v3 }
  0x68   : > { %4205 = vmatpush3.bf16.msra.mxu0 %v4204_v17  ;;  %v5131_v17 = vsub.f32 %v4963_v34, %v717_v36  ;;  %v5168_v36 = vsub.f32 %v5007_v44, %v729_v46  ;;  %v862_v46 = vsub.f32 %v5173_v37, %v5652_v42 }
  0x69   : > { %4206 = vmatprep.subr.bf16.mxu0 %v5662_v3 }
  0x6a   : > { %v5653_v41 = vand.u32 4294901760, %v5168_v36  ;;  %v863_v11 = vand.u32 4294901760, %v862_v46 }
  0x6c   : > { %4208 = vmatpush3.bf16.msra.mxu0 %v4207_v20  ;;  %v821_v20 = vand.u32 4294901760, %v820_v16  ;;  %v855_v44 = vsub.f32 %v5168_v36, %v5653_v41  ;;  %v5650_v16 = vand.u32 4294901760, %v5194_v47 }
  0x6d   : > { %4353 = vmatprep.subr.bf16.mxu0 %v5662_v3 }
  0x6e   : > { %v856_v10 = vand.u32 4294901760, %v855_v44  ;;  %v876_v51 = vsub.f32 %v5194_v47, %v5650_v16  ;;  %v905_v44 = vand.u32 4294901760, %v904_v63 }
  0x6f   : > { %3577 = vmatmul.mubr.msk.f32.vlgmr.msra.gmra.mrb[0].mxu0 %vm283_vm1, %v570_v21  ;;  %v5657_v21 = vand.u32 4294901760, %v5131_v17 }
  0x70   : > { %3579 = vmatprep.mubr.msk.f32.mxu0 %vm4651_vm0, %v5664_v6  ;;  %4355 = vmatpush3.bf16.msra.mxu0 %v4936_v28  ;;  %v5248_v46 = vpack.c.bf16 %v905_v44, %v898_v0 }
  0x71   : > { %4356 = vmatprep.subr.bf16.mxu0 %v5662_v3  ;;  %v827_v24 = vsub.f32 %v5131_v17, %v5657_v21 }
  0x73   : > { %3580 = vmatmul.mubr.msk.f32.gmra.mrb[2].mxu0 %vm283_vm1, %v571_v22  ;;  %v5656_v22 = vand.u32 4294901760, %v5136_v18  ;;  %v828_v29 = vand.u32 4294901760, %v827_v24  ;;  %v877_v24 = vand.u32 4294901760, %v876_v51  ;;  %v5264_v51 = vpack.c.bf16 %v5156_v27, %v5151_v26 }
  0x74   : > { %3582 = vmatprep.mubr.msk.f32.mxu0 %vm4651_vm0, %v5664_v6  ;;  %4358 = vmatpush3.bf16.msra.mxu0 %v4958_v33 }
  0x75   : > { %4359 = vmatprep.subr.bf16.mxu0 %v5662_v3  ;;  %v834_v25 = vsub.f32 %v5136_v18, %v5656_v22 }
  0x77   : > { %3583 = vmatmul.mubr.msk.f32.gmra.mrb[4].mxu0 %vm283_vm1, %v572_v23  ;;  %v5140_v23 = vpack.c.bf16 %v821_v20, %v814_v19  ;;  %v835_v30 = vand.u32 4294901760, %v834_v25  ;;  %v5200_v19 = vpack.c.bf16 %v863_v11, %v856_v10  ;;  %v870_v20 = vand.u32 4294901760, %v869_v49 }
  0x78   : > { %3827 = vmatprep.mubr.msk.f32.mxu0 %vm4651_vm0, %v5664_v6  ;;  %4361 = vmatpush3.bf16.msra.mxu0 %v4980_v38  ;;  %v5649_v25 = vand.u32 4294901760, %v5211_v50  ;;  %v5252_v10 = vpack.c.bf16 %v5072_v60, %v5070_v59  ;;  %v5256_v11 = vpack.c.bf16 %v5112_v9, %v5107_v8  ;;  %v5260_v49 = vpack.c.bf16 %v5136_v18, %v5131_v17 }
  0x79   : > { %4362 = vmatprep.subr.bf16.mxu0 %v5662_v3  ;;  %v5160_v34 = vpack.c.bf16 %v835_v30, %v828_v29  ;;  %v5648_v29 = vand.u32 4294901760, %v5216_v52  ;;  %v5220_v30 = vpack.c.bf16 %v877_v24, %v870_v20  ;;  %v5268_v20 = vpack.c.bf16 %v5173_v37, %v5168_v36 }
  0x7a   : > { %v883_v35 = vsub.f32 %v5211_v50, %v5649_v25  ;;  %v5272_v24 = vpack.c.bf16 %v5194_v47, %v5189_v45 }
  0x7b   : > { %v890_v56 = vsub.f32 %v5216_v52, %v5648_v29 }
  0x7c   : > { %4364 = vmatpush3.bf16.msra.mxu0 %v5002_v43  ;;  %v884_v57 = vand.u32 4294901760, %v883_v35  ;;  %v5276_v35 = vpack.c.bf16 %v5216_v52, %v5211_v50 }
  0x7d   : > { %4365 = vmatprep.subr.bf16.mxu0 %v5662_v3  ;;  %v891_v5 = vand.u32 4294901760, %v890_v56  ;;  %v5280_v56 = vpack.c.bf16 %v5233_v55, %v5228_v54 }
  0x7f   : > { %v5246_v62 = vpack.c.bf16 %v891_v5, %v884_v57 }
  0x80   : > { %4367 = vmatpush3.bf16.msra.mxu0 %v5024_v48 }
  0x81   : > { %4368 = vmatprep.subr.bf16.mxu0 %v5662_v3 }
  0x84   : > { %4370 = vmatpush3.bf16.msra.mxu0 %v5046_v53 }
  0x85   : > { %4371 = vmatprep.subr.bf16.mxu0 %v5662_v3 }
  0x88   : > { %4373 = vmatpush3.bf16.msra.mxu0 %v5068_v58 }
  0x89   : > { %4374 = vmatprep.subr.bf16.mxu0 %v5662_v3 }
  0x8c   : > { %4376 = vmatpush3.bf16.msra.mxu0 %v5096_v4 }
  0x8d   : > { %4377 = vmatprep.subr.bf16.mxu0 %v5662_v3 }
 0x142   : > { %v5282_v57 = vpop.f32.mrb[0].mxu0 }
 0x143   : > { %v3578_v5 = vpop.f32.mrb[1].mxu0  ;;  %v1345_v63 = vmul.f32 %v5282_v57, %v5282_v57 }
 0x146   : > { %v5284_v61 = vpop.f32.mrb[2].mxu0 }
 0x147   : > { %5667 = vst [vmem:[#allocation2_spill] sm:$0xff] %v5284_v61  ;;  %v678_v0 = vadd.f32 %v5284_v61, %v5282_v57  ;;  %v1346_v44 = vmul.f32 %v5284_v61, %v5284_v61  ;;  %v3581_v40 = vpop.f32.mrb[3].mxu0 }
 0x149   : > { %v1348_v39 = vadd.f32 %v1346_v44, %v1345_v63 }
 0x14a   : > { %v5292_v29 = vpop.f32.mrb[4].mxu0 }
 0x14b   : > { %v680_v25 = vsel %vm679_vm2, %v5292_v29, 0.0  ;;  %v1347_v5 = vmul.f32 %v5292_v29, %v5292_v29  ;;  %v3584_v16 = vpop.f32.mrb[5].mxu0 }
 0x14c   : > { %v681_v15 = vadd.f32 %v680_v25, %v678_v0 }
 0x14d   : > { %v1349_v42 = vsel %vm679_vm2, %v1347_v5, 0.0 }
 0x14e   : > { %v682_v41 = vrot.slane %v681_v15, 4  ;;  %v1350_v32 = vadd.f32 %v1349_v42, %v1348_v39 }
 0x150   : > { %v683_v31 = vadd.f32 %v682_v41, %v681_v15  ;;  %v1351_v22 = vrot.slane %v1350_v32, 4  ;;  %v5677_v15 = vand.u32 4294901760, %v5156_v27  ;;  %v5681_v27 = vand.u32 4294901760, %v5194_v47 }
 0x151   : > { %v5685_v47 = vand.u32 4294901760, %v5233_v55 }
 0x152   : > { %v684_v21 = vrot.slane %v683_v31, 2  ;;  %v1352_v13 = vadd.f32 %v1351_v22, %v1350_v32  ;;  %v5668_v22 = vmov 0.0   ;;  %v5672_v32 = vand.u32 4294901760, %v5107_v8 }
 0x154   : > { %v685_v12 = vadd.f32 %v684_v21, %v683_v31  ;;  %v1353_v40 = vrot.slane %v1352_v13, 2 }
 0x156   : > { %v686_v2 = vrot.slane %v685_v12, 1  ;;  %v1354_v63 = vadd.f32 %v1353_v40, %v1352_v13 }
 0x158   : > { %v687_v44 = vadd.f32 %v686_v2, %v685_v12  ;;  %v1355_v1 = vrot.slane %v1354_v63, 1 }
 0x15a   : > { %v5297_v3 = vand.u32 4294901760, %v687_v44  ;;  %v1356_v6 = vadd.f32 %v1355_v1, %v1354_v63 }
 0x15c   : > { %v5299_v61 = vand.u32 4294901760, %v1356_v6  ;;  %v5302_v16 = vsub.f32 %v687_v44, %v5297_v3 }
 0x15e   : > { %v5305_v42 = vsub.f32 %v1356_v6, %v5299_v61  ;;  %v787_v41 = vand.u32 4294901760, %v5302_v16  ;;  %v5669_v6 = vmov 0.0|0.0  }
 0x160   : > { %v788_v21 = vsub.f32 %v5302_v16, %v787_v41  ;;  %v1440_v2 = vand.u32 4294901760, %v5305_v42 }
 0x162   : > { %v789_v12 = vand.u32 4294901760, %v788_v21  ;;  %v1441_v1 = vsub.f32 %v5305_v42, %v1440_v2 }
 0x164   : > { %3618 = vmatmul.mubr.f32.vlgmr.msra.gmra.mrb[0].mxu1 %v789_v12  ;;  %v1442_v13 = vand.u32 4294901760, %v1441_v1 }
 0x165   : > { %4235 = vmatpush3.bf16.msra.mxu1 %v5120_v14  ;;  %3652 = vmatprep.mubr.msk.f32.mxu1 %vm4651_vm0, %v5668_v22 }
 0x166   : > { %3828 = vmatmul.mubr.f32.vlgmr.msra.gmra.mrb[6].mxu0 %v1442_v13  ;;  %4236 = vmatprep.subr.bf16.mxu1 %v5669_v6 }
 0x167   : > { %4379 = vmatpush3.bf16.msra.mxu0 %v5120_v14  ;;  %3862 = vmatprep.mubr.msk.f32.mxu0 %vm4651_vm0, %v5668_v22  ;;  %v5670_v14 = vand.u32 4294901760, %v5070_v59  ;;  %v5674_v59 = vand.u32 4294901760, %v5131_v17  ;;  %v5678_v17 = vand.u32 4294901760, %v5168_v36  ;;  %v5682_v36 = vand.u32 4294901760, %v5211_v50 }
 0x168   : > { %4380 = vmatprep.subr.bf16.mxu0 %v5669_v6 }
 0x169   : > { %4238 = vmatpush3.bf16.msra.mxu1 %v5140_v23 }
 0x16a   : > { %4239 = vmatprep.subr.bf16.mxu1 %v5669_v6 }
 0x16b   : > { %4382 = vmatpush3.bf16.msra.mxu0 %v5140_v23  ;;  %v5671_v23 = vand.u32 4294901760, %v5072_v60  ;;  %v5675_v60 = vand.u32 4294901760, %v5136_v18  ;;  %v5679_v18 = vand.u32 4294901760, %v5173_v37  ;;  %v5683_v37 = vand.u32 4294901760, %v5216_v52 }
 0x16c   : > { %4383 = vmatprep.subr.bf16.mxu0 %v5669_v6 }
 0x16d   : > { %4241 = vmatpush3.bf16.msra.mxu1 %v5160_v34  ;;  %v4306_v31 = vpack.c.bf16 %v5671_v23, %v5670_v14  ;;  %v4312_v8 = vpack.c.bf16 %v5675_v60, %v5674_v59  ;;  %v4318_v25 = vpack.c.bf16 %v5679_v18, %v5678_v17  ;;  %v4324_v39 = vpack.c.bf16 %v5683_v37, %v5682_v36 }
 0x16e   : > { %4242 = vmatprep.subr.bf16.mxu1 %v5669_v6 }
 0x16f   : > { %4385 = vmatpush3.bf16.msra.mxu0 %v5160_v34  ;;  %v5673_v34 = vand.u32 4294901760, %v5112_v9  ;;  %v5676_v9 = vand.u32 4294901760, %v5151_v26  ;;  %v5680_v26 = vand.u32 4294901760, %v5189_v45  ;;  %v5684_v45 = vand.u32 4294901760, %v5228_v54 }
 0x170   : > { %4386 = vmatprep.subr.bf16.mxu0 %v5669_v6 }
 0x171   : > { %4244 = vmatpush3.bf16.msra.mxu1 %v5196_v7 }
 0x172   : > { %4245 = vmatprep.subr.bf16.mxu1 %v5669_v6 }
 0x173   : > { %4388 = vmatpush3.bf16.msra.mxu0 %v5196_v7  ;;  %v4309_v7 = vpack.c.bf16 %v5673_v34, %v5672_v32 }
 0x174   : > { %4389 = vmatprep.subr.bf16.mxu0 %v5669_v6 }
 0x175   : > { %4247 = vmatpush3.bf16.msra.mxu1 %v5200_v19 }
 0x176   : > { %4248 = vmatprep.subr.bf16.mxu1 %v5669_v6 }
 0x177   : > { %4391 = vmatpush3.bf16.msra.mxu0 %v5200_v19  ;;  %v4315_v19 = vpack.c.bf16 %v5677_v15, %v5676_v9 }
 0x178   : > { %4392 = vmatprep.subr.bf16.mxu0 %v5669_v6 }
 0x179   : > { %4250 = vmatpush3.bf16.msra.mxu1 %v5220_v30 }
 0x17a   : > { %4251 = vmatprep.subr.bf16.mxu1 %v5669_v6 }
 0x17b   : > { %4394 = vmatpush3.bf16.msra.mxu0 %v5220_v30  ;;  %v4321_v30 = vpack.c.bf16 %v5681_v27, %v5680_v26  ;;  %v2007_v26 = vld [vmem:[%s5642_s3] sm:$0x1] }
 0x17c   : > { %4395 = vmatprep.subr.bf16.mxu0 %v5669_v6 }
 0x17d   : > { %4253 = vmatpush3.bf16.msra.mxu1 %v5246_v62 }
 0x17e   : > { %4254 = vmatprep.subr.bf16.mxu1 %v5669_v6 }
 0x17f   : > { %4397 = vmatpush3.bf16.msra.mxu0 %v5246_v62  ;;  %v4327_v62 = vpack.c.bf16 %v5685_v47, %v5684_v45 }
 0x180   : > { %4398 = vmatprep.subr.bf16.mxu0 %v5669_v6 }
 0x181   : > { %4256 = vmatpush3.bf16.msra.mxu1 %v5248_v46 }
 0x182   : > { %4257 = vmatprep.subr.bf16.mxu1 %v5669_v6 }
 0x183   : > { %4400 = vmatpush3.bf16.msra.mxu0 %v5248_v46 }
 0x184   : > { %3653 = vmatmul.mubr.f32.vlgmr.msra.gmra.mrb[0].mxu1 %v5297_v3  ;;  %4401 = vmatprep.subr.bf16.mxu0 %v5669_v6 }
 0x185   : > { %4259 = vmatpush3.bf16.msra.mxu1 %v5252_v10  ;;  %3687 = vmatprep.mubr.msk.f32.mxu1 %vm4651_vm0, %v5668_v22 }
 0x186   : > { %3863 = vmatmul.mubr.f32.vlgmr.msra.gmra.mrb[6].mxu0 %v5299_v61  ;;  %4260 = vmatprep.subr.bf16.mxu1 %v5669_v6 }
 0x187   : > { %4403 = vmatpush3.bf16.msra.mxu0 %v5252_v10  ;;  %3897 = vmatprep.mubr.msk.f32.mxu0 %vm4651_vm0, %v5668_v22 }
 0x188   : > { %4404 = vmatprep.subr.bf16.mxu0 %v5669_v6 }
 0x189   : > { %4262 = vmatpush3.bf16.msra.mxu1 %v5256_v11 }
 0x18a   : > { %4263 = vmatprep.subr.bf16.mxu1 %v5669_v6 }
 0x18b   : > { %4406 = vmatpush3.bf16.msra.mxu0 %v5256_v11 }
 0x18c   : > { %4407 = vmatprep.subr.bf16.mxu0 %v5669_v6 }
 0x18d   : > { %4265 = vmatpush3.bf16.msra.mxu1 %v5260_v49 }
 0x18e   : > { %4266 = vmatprep.subr.bf16.mxu1 %v5669_v6 }
 0x18f   : > { %4409 = vmatpush3.bf16.msra.mxu0 %v5260_v49 }
 0x190   : > { %4410 = vmatprep.subr.bf16.mxu0 %v5669_v6 }
 0x191   : > { %4268 = vmatpush3.bf16.msra.mxu1 %v5264_v51 }
 0x192   : > { %4269 = vmatprep.subr.bf16.mxu1 %v5669_v6 }
 0x193   : > { %4412 = vmatpush3.bf16.msra.mxu0 %v5264_v51 }
 0x194   : > { %4413 = vmatprep.subr.bf16.mxu0 %v5669_v6 }
 0x195   : > { %4271 = vmatpush3.bf16.msra.mxu1 %v5268_v20 }
 0x196   : > { %4272 = vmatprep.subr.bf16.mxu1 %v5669_v6 }
 0x197   : > { %4415 = vmatpush3.bf16.msra.mxu0 %v5268_v20 }
 0x198   : > { %4416 = vmatprep.subr.bf16.mxu0 %v5669_v6 }
 0x199   : > { %4274 = vmatpush3.bf16.msra.mxu1 %v5272_v24 }
 0x19a   : > { %4275 = vmatprep.subr.bf16.mxu1 %v5669_v6 }
 0x19b   : > { %4418 = vmatpush3.bf16.msra.mxu0 %v5272_v24 }
 0x19c   : > { %4419 = vmatprep.subr.bf16.mxu0 %v5669_v6 }
 0x19d   : > { %4277 = vmatpush3.bf16.msra.mxu1 %v5276_v35 }
 0x19e   : > { %4278 = vmatprep.subr.bf16.mxu1 %v5669_v6 }
 0x19f   : > { %4421 = vmatpush3.bf16.msra.mxu0 %v5276_v35 }
 0x1a0   : > { %4422 = vmatprep.subr.bf16.mxu0 %v5669_v6 }
 0x1a1   : > { %4280 = vmatpush3.bf16.msra.mxu1 %v5280_v56 }
 0x1a2   : > { %4281 = vmatprep.subr.bf16.mxu1 %v5669_v6 }
 0x1a3   : > { %4424 = vmatpush3.bf16.msra.mxu0 %v5280_v56 }
 0x1a4   : > { %3688 = vmatmul.mubr.f32.vlgmr.msra.gmra.mrb[0].mxu1 %v5302_v16  ;;  %4425 = vmatprep.subr.bf16.mxu0 %v5669_v6 }
 0x1a5   : > { %4283 = vmatpush3.bf16.msra.mxu1 %v4936_v28  ;;  %3722 = vmatprep.mubr.msk.f32.mxu1 %vm4651_vm0, %v5668_v22 }
 0x1a6   : > { %3898 = vmatmul.mubr.f32.vlgmr.msra.gmra.mrb[6].mxu0 %v5305_v42  ;;  %4284 = vmatprep.subr.bf16.mxu1 %v5669_v6 }
 0x1a7   : > { %4427 = vmatpush3.bf16.msra.mxu0 %v4936_v28  ;;  %3932 = vmatprep.mubr.msk.f32.mxu0 %vm4651_vm0, %v5668_v22 }
 0x1a8   : > { %4428 = vmatprep.subr.bf16.mxu0 %v5669_v6 }
 0x1a9   : > { %4286 = vmatpush3.bf16.msra.mxu1 %v4958_v33 }
 0x1aa   : > { %4287 = vmatprep.subr.bf16.mxu1 %v5669_v6 }
 0x1ab   : > { %4430 = vmatpush3.bf16.msra.mxu0 %v4958_v33 }
 0x1ac   : > { %4431 = vmatprep.subr.bf16.mxu0 %v5669_v6 }
 0x1ad   : > { %4289 = vmatpush3.bf16.msra.mxu1 %v4980_v38 }
 0x1ae   : > { %4290 = vmatprep.subr.bf16.mxu1 %v5669_v6 }
 0x1af   : > { %4433 = vmatpush3.bf16.msra.mxu0 %v4980_v38 }
 0x1b0   : > { %4434 = vmatprep.subr.bf16.mxu0 %v5669_v6 }
 0x1b1   : > { %4292 = vmatpush3.bf16.msra.mxu1 %v5002_v43 }
 0x1b2   : > { %4293 = vmatprep.subr.bf16.mxu1 %v5669_v6 }
 0x1b3   : > { %4436 = vmatpush3.bf16.msra.mxu0 %v5002_v43 }
 0x1b4   : > { %4437 = vmatprep.subr.bf16.mxu0 %v5669_v6 }
 0x1b5   : > { %4295 = vmatpush3.bf16.msra.mxu1 %v5024_v48 }
 0x1b6   : > { %4296 = vmatprep.subr.bf16.mxu1 %v5669_v6 }
 0x1b7   : > { %4439 = vmatpush3.bf16.msra.mxu0 %v5024_v48 }
 0x1b8   : > { %4440 = vmatprep.subr.bf16.mxu0 %v5669_v6 }
 0x1b9   : > { %4298 = vmatpush3.bf16.msra.mxu1 %v5046_v53 }
 0x1ba   : > { %4299 = vmatprep.subr.bf16.mxu1 %v5669_v6 }
 0x1bb   : > { %4442 = vmatpush3.bf16.msra.mxu0 %v5046_v53 }
 0x1bc   : > { %4443 = vmatprep.subr.bf16.mxu0 %v5669_v6 }
 0x1bd   : > { %4301 = vmatpush3.bf16.msra.mxu1 %v5068_v58 }
 0x1be   : > { %4302 = vmatprep.subr.bf16.mxu1 %v5669_v6 }
 0x1bf   : > { %4445 = vmatpush3.bf16.msra.mxu0 %v5068_v58 }
 0x1c0   : > { %4446 = vmatprep.subr.bf16.mxu0 %v5669_v6 }
 0x1c1   : > { %4304 = vmatpush3.bf16.msra.mxu1 %v5096_v4 }
 0x1c2   : > { %4305 = vmatprep.subr.bf16.mxu1 %v5669_v6 }
 0x1c3   : > { %4448 = vmatpush3.bf16.msra.mxu0 %v5096_v4 }
 0x1c4   : > { %3723 = vmatmul.mubr.f32.vlgmr.msra.gmra.mrb[0].mxu1 %v787_v41  ;;  %4449 = vmatprep.subr.bf16.mxu0 %v5669_v6 }
 0x1c5   : > { %4307 = vmatpush3.bf16.msra.mxu1 %v4306_v31  ;;  %3757 = vmatprep.mubr.msk.f32.mxu1 %vm4651_vm0, %v5668_v22 }
 0x1c6   : > { %3933 = vmatmul.mubr.f32.vlgmr.msra.gmra.mrb[6].mxu0 %v1440_v2  ;;  %4308 = vmatprep.subr.bf16.mxu1 %v5669_v6 }
 0x1c7   : > { %4451 = vmatpush3.bf16.msra.mxu0 %v4306_v31  ;;  %3967 = vmatprep.mubr.msk.f32.mxu0 %vm4651_vm0, %v5668_v22 }
 0x1c8   : > { %4452 = vmatprep.subr.bf16.mxu0 %v5669_v6 }
 0x1c9   : > { %4310 = vmatpush3.bf16.msra.mxu1 %v4309_v7 }
 0x1ca   : > { %4311 = vmatprep.subr.bf16.mxu1 %v5669_v6 }
 0x1cb   : > { %4454 = vmatpush3.bf16.msra.mxu0 %v4309_v7  ;;  %v2003_v7 = vld [vmem:[%s5641_s2] sm:$0x1] }
 0x1cc   : > { %4455 = vmatprep.subr.bf16.mxu0 %v5669_v6 }
 0x1cd   : > { %4313 = vmatpush3.bf16.msra.mxu1 %v4312_v8 }
 0x1ce   : > { %4314 = vmatprep.subr.bf16.mxu1 %v5669_v6 }
 0x1cf   : > { %4457 = vmatpush3.bf16.msra.mxu0 %v4312_v8 }
 0x1d0   : > { %4458 = vmatprep.subr.bf16.mxu0 %v5669_v6 }
 0x1d1   : > { %4316 = vmatpush3.bf16.msra.mxu1 %v4315_v19 }
 0x1d2   : > { %4317 = vmatprep.subr.bf16.mxu1 %v5669_v6 }
 0x1d3   : > { %4460 = vmatpush3.bf16.msra.mxu0 %v4315_v19 }
 0x1d4   : > { %4461 = vmatprep.subr.bf16.mxu0 %v5669_v6 }
 0x1d5   : > { %4319 = vmatpush3.bf16.msra.mxu1 %v4318_v25 }
 0x1d6   : > { %4320 = vmatprep.subr.bf16.mxu1 %v5669_v6 }
 0x1d7   : > { %4463 = vmatpush3.bf16.msra.mxu0 %v4318_v25 }
 0x1d8   : > { %4464 = vmatprep.subr.bf16.mxu0 %v5669_v6 }
 0x1d9   : > { %4322 = vmatpush3.bf16.msra.mxu1 %v4321_v30 }
 0x1da   : > { %4323 = vmatprep.subr.bf16.mxu1 %v5669_v6 }
 0x1db   : > { %4466 = vmatpush3.bf16.msra.mxu0 %v4321_v30 }
 0x1dc   : > { %4467 = vmatprep.subr.bf16.mxu0 %v5669_v6 }
 0x1dd   : > { %4325 = vmatpush3.bf16.msra.mxu1 %v4324_v39 }
 0x1de   : > { %4326 = vmatprep.subr.bf16.mxu1 %v5669_v6 }
 0x1df   : > { %4469 = vmatpush3.bf16.msra.mxu0 %v4324_v39 }
 0x1e0   : > { %4470 = vmatprep.subr.bf16.mxu0 %v5669_v6 }
 0x1e1   : > { %4328 = vmatpush3.bf16.msra.mxu1 %v4327_v62 }
 0x1e2   : > { %4329 = vmatprep.subr.bf16.mxu1 %v5669_v6 }
 0x1e3   : > { %4472 = vmatpush3.bf16.msra.mxu0 %v4327_v62  ;;  %v2991_v62 = vlaneseq }
 0x1e4   : > { %3758 = vmatmul.mubr.f32.vlgmr.msra.gmra.mrb[0].mxu1 %v5297_v3  ;;  %4473 = vmatprep.subr.bf16.mxu0 %v5669_v6 }
 0x1e5   : > { %4331 = vmatpush3.bf16.msra.mxu1 %v4936_v28  ;;  %3792 = vmatprep.mubr.msk.f32.mxu1 %vm4651_vm0, %v5668_v22 }
 0x1e6   : > { %3968 = vmatmul.mubr.f32.vlgmr.msra.gmra.mrb[6].mxu0 %v5299_v61  ;;  %4332 = vmatprep.subr.bf16.mxu1 %v5669_v6 }
 0x1e7   : > { %4475 = vmatpush3.bf16.msra.mxu0 %v4936_v28  ;;  %4002 = vmatprep.mubr.msk.f32.mxu0 %vm4651_vm0, %v5668_v22  ;;  %v2010_v28 = vld [vmem:[%s5644_s5] sm:$0xff] }
 0x1e8   : > { %4476 = vmatprep.subr.bf16.mxu0 %v5669_v6 }
 0x1e9   : > { %4334 = vmatpush3.bf16.msra.mxu1 %v4958_v33 }
 0x1ea   : > { %4335 = vmatprep.subr.bf16.mxu1 %v5669_v6 }
 0x1eb   : > { %4478 = vmatpush3.bf16.msra.mxu0 %v4958_v33  ;;  %v2011_v33 = vld [vmem:[%s5644_s5 + $0x8] sm:$0xff] }
 0x1ec   : > { %4479 = vmatprep.subr.bf16.mxu0 %v5669_v6 }
 0x1ed   : > { %4337 = vmatpush3.bf16.msra.mxu1 %v4980_v38 }
 0x1ee   : > { %4338 = vmatprep.subr.bf16.mxu1 %v5669_v6 }
 0x1ef   : > { %4481 = vmatpush3.bf16.msra.mxu0 %v4980_v38  ;;  %v2019_v38 = vand.u32 4294901760, %v2010_v28 }
 0x1f0   : > { %4482 = vmatprep.subr.bf16.mxu0 %v5669_v6 }
 0x1f1   : > { %4340 = vmatpush3.bf16.msra.mxu1 %v5002_v43  ;;  %v2099_v50 = vsub.f32 %v2010_v28, %v2019_v38  ;;  %v2992_v28 = vshrl.u32 %v2991_v62, 7 }
 0x1f2   : > { %4341 = vmatprep.subr.bf16.mxu1 %v5669_v6 }
 0x1f3   : > { %4484 = vmatpush3.bf16.msra.mxu0 %v5002_v43  ;;  %v2022_v43 = vand.u32 4294901760, %v2011_v33  ;;  %v2100_v55 = vand.u32 4294901760, %v2099_v50 }
 0x1f4   : > { %4485 = vmatprep.subr.bf16.mxu0 %v5669_v6 }
 0x1f5   : > { %4343 = vmatpush3.bf16.msra.mxu1 %v5024_v48  ;;  %v2106_v52 = vsub.f32 %v2011_v33, %v2022_v43  ;;  %v2101_v10 = vsub.f32 %v2099_v50, %v2100_v55  ;;  %v2993_v33 = vsub.s32 0, %v2992_v28 }
 0x1f6   : > { %4344 = vmatprep.subr.bf16.mxu1 %v5669_v6 }
 0x1f7   : > { %4487 = vmatpush3.bf16.msra.mxu0 %v5024_v48  ;;  %v2012_v48 = vld [vmem:[%s5644_s5 + $0x10] sm:$0xff]  ;;  %v2107_v46 = vand.u32 4294901760, %v2106_v52  ;;  %v2102_v20 = vand.u32 4294901760, %v2101_v10  ;;  %v5548_v16 = vpack.c.bf16 %v2106_v52, %v2099_v50 }
 0x1f8   : > { %4488 = vmatprep.subr.bf16.mxu0 %v5669_v6 }
 0x1f9   : > { %4346 = vmatpush3.bf16.msra.mxu1 %v5046_v53  ;;  %v2108_v11 = vsub.f32 %v2106_v52, %v2107_v46  ;;  %v5552_v41 = vpack.c.bf16 %v2107_v46, %v2100_v55 }
 0x1fa   : > { %4347 = vmatprep.subr.bf16.mxu1 %v5669_v6 }
 0x1fb   : > { %4490 = vmatpush3.bf16.msra.mxu0 %v5046_v53  ;;  %v5536_v53 = vpack.c.bf16 %v2022_v43, %v2019_v38  ;;  %v2109_v24 = vand.u32 4294901760, %v2108_v11 }
 0x1fc   : > { %4491 = vmatprep.subr.bf16.mxu0 %v5669_v6 }
 0x1fd   : > { %4349 = vmatpush3.bf16.msra.mxu1 %v5068_v58 }
 0x1fe   : > { %4350 = vmatprep.subr.bf16.mxu1 %v5669_v6 }
 0x1ff   : > { %4493 = vmatpush3.bf16.msra.mxu0 %v5068_v58  ;;  %v2025_v58 = vand.u32 4294901760, %v2012_v48 }
 0x200   : > { %4494 = vmatprep.subr.bf16.mxu0 %v5669_v6 }
 0x201   : > { %4352 = vmatpush3.bf16.msra.mxu1 %v5096_v4  ;;  %v2113_v49 = vsub.f32 %v2012_v48, %v2025_v58 }
 0x202   : > { %4497 = vmatprep.subr.bf16.mxu1 %v5669_v6 }
 0x203   : > { %4496 = vmatpush3.bf16.msra.mxu0 %v5096_v4  ;;  %v2114_v35 = vand.u32 4294901760, %v2113_v49 }
 0x204   : > { %3793 = vmatmul.mubr.f32.vlgmr.msra.gmra.mrb[0].mxu1 %v5297_v3  ;;  %v2013_v3 = vld [vmem:[%s5644_s5 + $0x18] sm:$0xff] }
 0x205   : > { %4013 = vmatprep.mubr.msk.f32.mxu1 %vm4651_vm0, %v5668_v22  ;;  %v2028_v4 = vand.u32 4294901760, %v2013_v3  ;;  %4499 = vmatpush3.bf16.msra.mxu1 %v5536_v53  ;;  %v2115_v0 = vsub.f32 %v2113_v49, %v2114_v35 }
 0x206   : > { %4003 = vmatmul.mubr.f32.vlgmr.msra.gmra.mrb[6].mxu0 %v5299_v61  ;;  %4500 = vmatprep.subr.bf16.mxu1 %v5669_v6  ;;  %v5544_v61 = vpack.c.bf16 %v2109_v24, %v2102_v20 }
 0x207   : > { %v5539_v54 = vpack.c.bf16 %v2028_v4, %v2025_v58  ;;  %v2120_v51 = vsub.f32 %v2013_v3, %v2028_v4  ;;  %v2116_v40 = vand.u32 4294901760, %v2115_v0  ;;  %v5686_v58 = vld [vmem:[#allocation2_spill] sm:$0xff] }
 0x209   : > { %4502 = vmatpush3.bf16.msra.mxu1 %v5539_v54  ;;  %v2121_v56 = vand.u32 4294901760, %v2120_v51  ;;  %v5550_v42 = vpack.c.bf16 %v2120_v51, %v2113_v49 }
 0x20a   : > { %4503 = vmatprep.subr.bf16.mxu1 %v5669_v6 }
 0x20b   : > { %v2122_v5 = vsub.f32 %v2120_v51, %v2121_v56  ;;  %v5554_v21 = vpack.c.bf16 %v2121_v56, %v2114_v35 }
 0x20d   : > { %v2123_v63 = vand.u32 4294901760, %v2122_v5 }
 0x20f   : > { %v5546_v44 = vpack.c.bf16 %v2123_v63, %v2116_v40 }
 0x2d7   : > { %v1341_v2 = vpop.f32.mrb[0].mxu1 }
 0x2d8   : > { %v1999_v12 = vmul.f32 0.014705882, %v1341_v2  ;;  %v3794_v1 = vpop.f32.mrb[1].mxu1 }
 0x2d9   : > { %v1994_v13 = vpop.f32.mrb[6].mxu0 }
 0x2da   : > { %v2001_v14 = vmul.f32 %v1999_v12, %v1999_v12  ;;  %v2000_v23 = vmul.f32 0.014705882, %v1994_v13  ;;  %v4004_v31 = vpop.f32.mrb[7].mxu0 }
 0x2dc   : > { %v2002_v32 = vsub.f32 %v2000_v23, %v2001_v14 }
 0x2de   : > { %v2004_v34 = vadd.f32 1e-05, %v2002_v32 }
 0x2e0   : > { %4640 = vrsqrt.f32 %v2004_v34 }
 0x2ea   : > { %v4641_v59 = vpop.eup %4640 }
 0x2eb   : > { %v2006_v60 = vmul.f32 %v4641_v59, %v2003_v7 }
 0x2ed   : > { %v2008_v8 = vmul.f32 %v2006_v60, %v1999_v12  ;;  %v2016_v9 = vsel %vm2014_vm3, %v2006_v60, 0 }
 0x2ee   : > { %v2087_v15 = vand.u32 4294901760, %v2016_v9 }
 0x2ef   : > { %v2009_v27 = vsub.f32 %v2007_v26, %v2008_v8 }
 0x2f0   : > { %v2088_v19 = vsub.f32 %v2016_v9, %v2087_v15 }
 0x2f1   : > { %v2504_v30 = vsel %vm2014_vm3, %v2009_v27, 0 }
 0x2f2   : > { %v2089_v17 = vand.u32 4294901760, %v2088_v19  ;;  %v2575_v36 = vand.u32 4294901760, %v2504_v30 }
 0x2f4   : > { %v2090_v18 = vsub.f32 %v2088_v19, %v2089_v17  ;;  %v2576_v37 = vsub.f32 %v2504_v30, %v2575_v36 }
 0x2f6   : > { %v2091_v25 = vand.u32 4294901760, %v2090_v18  ;;  %v2577_v39 = vand.u32 4294901760, %v2576_v37 }
 0x2f8   : > { %4014 = vmatmul.mubr.f32.vlgmr.msra.gmra.mrb[2].mxu1 %v2091_v25  ;;  %v2578_v45 = vsub.f32 %v2576_v37, %v2577_v39 }
 0x2f9   : > { %4505 = vmatpush3.bf16.msra.mxu1 %v5544_v61  ;;  %4024 = vmatprep.mubr.msk.f32.mxu1 %vm4651_vm0, %v5668_v22 }
 0x2fa   : > { %4506 = vmatprep.subr.bf16.mxu1 %v5669_v6  ;;  %v2579_v47 = vand.u32 4294901760, %v2578_v45 }
 0x2fd   : > { %4508 = vmatpush3.bf16.msra.mxu1 %v5546_v44 }
 0x2fe   : > { %4509 = vmatprep.subr.bf16.mxu1 %v5669_v6 }
 0x300   : > { %4025 = vmatmul.mubr.f32.vlgmr.msra.gmra.mrb[2].mxu1 %v2087_v15 }
 0x301   : > { %4511 = vmatpush3.bf16.msra.mxu1 %v5548_v16  ;;  %4035 = vmatprep.mubr.msk.f32.mxu1 %vm4651_vm0, %v5668_v22 }
 0x302   : > { %4512 = vmatprep.subr.bf16.mxu1 %v5669_v6 }
 0x305   : > { %4514 = vmatpush3.bf16.msra.mxu1 %v5550_v42 }
 0x306   : > { %4515 = vmatprep.subr.bf16.mxu1 %v5669_v6 }
 0x308   : > { %4036 = vmatmul.mubr.f32.vlgmr.msra.gmra.mrb[2].mxu1 %v2088_v19 }
 0x309   : > { %4517 = vmatpush3.bf16.msra.mxu1 %v5536_v53  ;;  %4046 = vmatprep.mubr.msk.f32.mxu1 %vm4651_vm0, %v5668_v22 }
 0x30a   : > { %4518 = vmatprep.subr.bf16.mxu1 %v5669_v6 }
 0x30d   : > { %4520 = vmatpush3.bf16.msra.mxu1 %v5539_v54 }
 0x30e   : > { %4521 = vmatprep.subr.bf16.mxu1 %v5669_v6 }
 0x310   : > { %4047 = vmatmul.mubr.f32.vlgmr.msra.gmra.mrb[2].mxu1 %v2089_v17 }
 0x311   : > { %4523 = vmatpush3.bf16.msra.mxu1 %v5552_v41  ;;  %4057 = vmatprep.mubr.msk.f32.mxu1 %vm4651_vm0, %v5668_v22 }
 0x312   : > { %4524 = vmatprep.subr.bf16.mxu1 %v5669_v6 }
 0x315   : > { %4526 = vmatpush3.bf16.msra.mxu1 %v5554_v21 }
 0x316   : > { %4527 = vmatprep.subr.bf16.mxu1 %v5669_v6 }
 0x318   : > { %4058 = vmatmul.mubr.f32.vlgmr.msra.gmra.mrb[2].mxu1 %v2087_v15 }
 0x319   : > { %4529 = vmatpush3.bf16.msra.mxu1 %v5536_v53  ;;  %4068 = vmatprep.mubr.msk.f32.mxu1 %vm4651_vm0, %v5668_v22 }
 0x31a   : > { %4530 = vmatprep.subr.bf16.mxu1 %v5669_v6 }
 0x31d   : > { %4532 = vmatpush3.bf16.msra.mxu1 %v5539_v54 }
 0x31e   : > { %4533 = vmatprep.subr.bf16.mxu1 %v5669_v6 }
 0x320   : > { %4069 = vmatmul.mubr.f32.vlgmr.msra.gmra.mrb[2].mxu1 %v2087_v15 }
 0x321   : > { %4535 = vmatpush3.bf16.msra.mxu1 %v5536_v53  ;;  %4079 = vmatprep.mubr.msk.f32.mxu1 %vm4651_vm0, %v5668_v22 }
 0x322   : > { %4536 = vmatprep.subr.bf16.mxu1 %v5669_v6 }
 0x325   : > { %4538 = vmatpush3.bf16.msra.mxu1 %v5539_v54 }
 0x326   : > { %4539 = vmatprep.subr.bf16.mxu1 %v5669_v6 }
 0x328   : > { %4080 = vmatmul.mubr.f32.vlgmr.msra.gmra.mrb[4].mxu1 %v2579_v47 }
 0x329   : > { %4541 = vmatpush3.bf16.msra.mxu1 %v5544_v61  ;;  %4090 = vmatprep.mubr.msk.f32.mxu1 %vm4651_vm0, %v5668_v22 }
 0x32a   : > { %4542 = vmatprep.subr.bf16.mxu1 %v5669_v6 }
 0x32d   : > { %4544 = vmatpush3.bf16.msra.mxu1 %v5546_v44 }
 0x32e   : > { %4545 = vmatprep.subr.bf16.mxu1 %v5669_v6 }
 0x330   : > { %4091 = vmatmul.mubr.f32.vlgmr.msra.gmra.mrb[4].mxu1 %v2575_v36 }
 0x331   : > { %4547 = vmatpush3.bf16.msra.mxu1 %v5548_v16  ;;  %4101 = vmatprep.mubr.msk.f32.mxu1 %vm4651_vm0, %v5668_v22 }
 0x332   : > { %4548 = vmatprep.subr.bf16.mxu1 %v5669_v6 }
 0x335   : > { %4550 = vmatpush3.bf16.msra.mxu1 %v5550_v42 }
 0x336   : > { %4551 = vmatprep.subr.bf16.mxu1 %v5669_v6 }
 0x338   : > { %4102 = vmatmul.mubr.f32.vlgmr.msra.gmra.mrb[4].mxu1 %v2576_v37 }
 0x339   : > { %4553 = vmatpush3.bf16.msra.mxu1 %v5536_v53  ;;  %4112 = vmatprep.mubr.msk.f32.mxu1 %vm4651_vm0, %v5668_v22 }
 0x33a   : > { %4554 = vmatprep.subr.bf16.mxu1 %v5669_v6 }
 0x33d   : > { %4556 = vmatpush3.bf16.msra.mxu1 %v5539_v54 }
 0x33e   : > { %4557 = vmatprep.subr.bf16.mxu1 %v5669_v6 }
 0x340   : > { %4113 = vmatmul.mubr.f32.vlgmr.msra.gmra.mrb[4].mxu1 %v2577_v39 }
 0x341   : > { %4559 = vmatpush3.bf16.msra.mxu1 %v5552_v41  ;;  %4123 = vmatprep.mubr.msk.f32.mxu1 %vm4651_vm0, %v5668_v22 }
 0x342   : > { %4560 = vmatprep.subr.bf16.mxu1 %v5669_v6 }
 0x345   : > { %4562 = vmatpush3.bf16.msra.mxu1 %v5554_v21 }
 0x346   : > { %4563 = vmatprep.subr.bf16.mxu1 %v5669_v6 }
 0x348   : > { %4124 = vmatmul.mubr.f32.vlgmr.msra.gmra.mrb[4].mxu1 %v2575_v36 }
 0x349   : > { %4565 = vmatpush3.bf16.msra.mxu1 %v5536_v53  ;;  %4134 = vmatprep.mubr.msk.f32.mxu1 %vm4651_vm0, %v5668_v22 }
 0x34a   : > { %4566 = vmatprep.subr.bf16.mxu1 %v5669_v6 }
 0x34d   : > { %4568 = vmatpush3.bf16.msra.mxu1 %v5539_v54 }
 0x350   : > { %4135 = vmatmul.mubr.f32.vlgmr.msra.gmra.mrb[4].mxu1 %v2575_v36 }
 0x3f3   : > { %v2499_v38 = vpop.f32.mrb[2].mxu1 }
 0x3f4   : > { %v2994_v43 = vrot.slane %v2499_v38, %v2993_v33  ;;  %v4070_v48 = vpop.f32.mrb[3].mxu1 }
 0x3f6   : > { %v2995_v3 = vmul.f32 %v2994_v43, %v5282_v57  ;;  %v2996_v4 = vmul.f32 %v2994_v43, %v5686_v58  ;;  %v2997_v53 = vmul.f32 %v2994_v43, %v5292_v29 }
 0x423   : > { %v2987_v50 = vpop.f32.mrb[4].mxu1 }
 0x424   : > { %v3001_v22 = vrot.slane %v2987_v50, %v2993_v33  ;;  %v4136_v52 = vpop.f32.mrb[5].mxu1 }
 0x426   : > { %v3002_v6 = vadd.f32 %v3001_v22, %v2995_v3  ;;  %v3003_v55 = vadd.f32 %v3001_v22, %v2996_v4  ;;  %v3004_v54 = vadd.f32 %v3001_v22, %v2997_v53 }
 0x428   : > { %vm3005_vm4 = vcmp.gt.f32.partialorder %v3002_v6, 0.0  ;;  %vm3006_vm5 = vcmp.gt.f32.partialorder %v3003_v55, 0.0  ;;  %vm3007_vm6 = vcmp.gt.f32.partialorder %v3004_v54, 0.0  ;;  %v3008_v46 = vmul.f32 0.2, %v3002_v6 }
 0x429   : > { %v3009_v57 = vmul.f32 0.2, %v3003_v55  ;;  %v3010_v10 = vmul.f32 0.2, %v3004_v54 }
 0x42a   : > { %v3011_v11 = vsel %vm3005_vm4, %v3002_v6, %v3008_v46 }
 0x42b   : > { %v3012_v49 = vsel %vm3006_vm5, %v3003_v55, %v3009_v57  ;;  %v3013_v29 = vsel %vm3007_vm6, %v3004_v54, %v3010_v10  ;;  %3014 = vst [vmem:[%s251_s17] sm:$0xff] %v3011_v11 }
 0x42c   : > { %3015 = vst [vmem:[%s251_s17 + $0x8] sm:$0xff] %v3012_v49  ;;  %3016 = vst [vmem:[%s251_s17 + $0x10] sm:$0x1] %v3013_v29 }
 0x42d PF: > { %s16_s21 = sadd.s32 1, %s4648_s21  }
 0x42e   : > { %p13_p4 = scmp.ge.s32.totalorder %s16_s21, 4  }
 0x430   :  { %15 = sbr.rel (!%p13_p4) target bundleno = 1 (0x1), region = 77 }

// kernel: netD_forward.7
= control target key start
LH: loop header
LB: loop body
LE: loop exit
PB: predicated region body
PF: predicated region fallthrough
CT: control target
= control target key end

     0   :  { %s5837_s24 = smov 0   ;;  %s8233_s0 = inlined_call_operand.vmem [shape: f32[2,20,192], index: 0, kind: input, shape index: {}]   ;;  %s8234_s1 = inlined_call_operand.vmem [shape: f32[8,192,192], index: 1, kind: input, shape index: {}]   ;;  %s8235_s2 = inlined_call_operand.vmem [shape: f32[1,64], index: 2, kind: input, shape index: {}]   ;;  %s8236_s3 = inlined_call_operand.vmem [shape: f32[1,64], index: 3, kind: input, shape index: {}]   ;;  %s8237_s4 = inlined_call_operand.vmem [shape: f32[192,64], index: 4, kind: input, shape index: {}]   ;;  %s8238_s5 = inlined_call_operand.vmem [shape: f32[64,192], index: 5, kind: input, shape index: {}]   ;;  %s8239_s6 = inlined_call_operand.vmem [shape: f32[6,192], index: 6, kind: input, shape index: {}]   ;;  %s8240_s7 = inlined_call_operand.vmem [shape: f32[2,1,1], index: 7, kind: output, shape index: {}]  }
   0x1 LB: > { %s4354_s25 = sadd.s32 4294967295, %s5793_s24   ;;  %p4358_p0 = scmp.ge.s32.totalorder %s5793_s24, 1  ;;  %s5793_s24 = sphi %s5837_s24, %s17_s24  }
   0x2   : > { %p237_p1 = scmp.lt.s32.totalorder %s5793_s24, 3 }
   0x4   : > { %p238_p2 = pnand %p4358_p0, %p237_p1 }
   0x6   : > { %241 = sbr.rel (%p238_p2) target bundleno = 2043 (0x7fb), region = 48 }
   0xd   : > { %v4361_v0 = vld [vmem:[%s8234_s1 + $0x188] sm:$0xff]  ;;  %v4363_v1 = vld [vmem:[%s8234_s1 + $0x198] sm:$0xff]  ;;  %v4360_v2 = vld [vmem:[%s8234_s1 + $0x180] sm:$0xff]  ;;  %p5863_p3 = scmp.lt.s32.totalorder %s4354_s25, 1  ;;  %vm381_vm0 = vcmask 523264   ;;  %vm717_vm1 = vcmask 1044480  }
   0xe   : > { %v4706_v3 = vpack.c.bf16 %v4363_v1, %v4361_v0  ;;  %v4362_v4 = vld [vmem:[%s8234_s1 + $0x190] sm:$0xff]  ;;  %v4365_v5 = vld [vmem:[%s8234_s1 + $0x1a8] sm:$0xff]  ;;  %v4367_v6 = vld [vmem:[%s8234_s1 + $0x1b8] sm:$0xff]  ;;  %vm988_vm2 = vcmask 1043456   ;;  %vm1267_vm3 = vcmask 1042432   ;;  %vm1350_vm4 = vcmask 1045504  }
   0xf   : > { %v4708_v7 = vpack.c.bf16 %v4362_v4, %v4360_v2  ;;  %v4710_v8 = vpack.c.bf16 %v4367_v6, %v4365_v5  ;;  %v4364_v9 = vld [vmem:[%s8234_s1 + $0x1a0] sm:$0xff]  ;;  %v4366_v10 = vld [vmem:[%s8234_s1 + $0x1b0] sm:$0xff]  ;;  %v4369_v11 = vld [vmem:[%s8234_s1 + $0x1c8] sm:$0xff]  ;;  %s8354_s25 = smov (!%p5863_p3, %s4354_s25), 1  ;;  %vm1358_vm5 = vcmask 521216   ;;  %vm4305_vm8 = vcmask 0  }
  0x10   : > { %4707 = vmatprep.subr.bf16.mxu0 %v4706_v3  ;;  %v4371_v12 = vld [vmem:[%s8234_s1 + $0x1d8] sm:$0xff]  ;;  %v4712_v13 = vpack.c.bf16 %v4366_v10, %v4364_v9  ;;  %v4368_v15 = vld [vmem:[%s8234_s1 + $0x1c0] sm:$0xff]  ;;  %v4370_v16 = vld [vmem:[%s8234_s1 + $0x1d0] sm:$0xff]  ;;  %s5768_s15 = smul.u32 48, %s8354_s25 }
  0x11   : > { %4709 = vmatpush1.bf16.msra.mxu0 %v4708_v7  ;;  %v4714_v14 = vpack.c.bf16 %v4371_v12, %v4369_v11  ;;  %v4373_v17 = vld [vmem:[%s8234_s1 + $0x1e8] sm:$0xff]  ;;  %v4375_v18 = vld [vmem:[%s8234_s1 + $0x1f8] sm:$0xff]  ;;  %v4716_v19 = vpack.c.bf16 %v4370_v16, %v4368_v15  ;;  %v4372_v21 = vld [vmem:[%s8234_s1 + $0x1e0] sm:$0xff] }
  0x12   : > { %4711 = vmatprep.subr.bf16.mxu0 %v4710_v8  ;;  %v4718_v20 = vpack.c.bf16 %v4375_v18, %v4373_v17  ;;  %v4374_v22 = vld [vmem:[%s8234_s1 + $0x1f0] sm:$0xff]  ;;  %v4377_v23 = vld [vmem:[%s8234_s1 + $0x208] sm:$0xff]  ;;  %v4379_v24 = vld [vmem:[%s8234_s1 + $0x218] sm:$0xff]  ;;  %s5917_s28 = scalar_lea.vmem %s8233_s0, %s5768_s15 }
  0x13   : > { %v4720_v25 = vpack.c.bf16 %v4374_v22, %v4372_v21  ;;  %v4722_v26 = vpack.c.bf16 %v4379_v24, %v4377_v23  ;;  %v4376_v27 = vld [vmem:[%s8234_s1 + $0x200] sm:$0xff]  ;;  %v4378_v28 = vld [vmem:[%s8234_s1 + $0x210] sm:$0xff]  ;;  %v4381_v29 = vld [vmem:[%s8234_s1 + $0x228] sm:$0xff] }
  0x14   : > { %v4383_v30 = vld [vmem:[%s8234_s1 + $0x238] sm:$0xff]  ;;  %v4724_v31 = vpack.c.bf16 %v4378_v28, %v4376_v27  ;;  %v4380_v34 = vld [vmem:[%s8234_s1 + $0x220] sm:$0xff]  ;;  %v4382_v35 = vld [vmem:[%s8234_s1 + $0x230] sm:$0xff] }
  0x15   : > { %4713 = vmatpush1.bf16.msra.mxu0 %v4712_v13  ;;  %v326_v32 = vld [vmem:[%s5917_s28 + $0x18] sm:$0xfc]  ;;  %v4726_v33 = vpack.c.bf16 %v4383_v30, %v4381_v29  ;;  %v4385_v37 = vld [vmem:[%s8234_s1 + $0x248] sm:$0xff]  ;;  %v4728_v39 = vpack.c.bf16 %v4382_v35, %v4380_v34  ;;  %v4384_v41 = vld [vmem:[%s8234_s1 + $0x240] sm:$0xff] }
  0x16   : > { %4715 = vmatprep.subr.bf16.mxu0 %v4714_v14  ;;  %v379_v36 = vrot.slane %v326_v32, 2  ;;  %v4387_v38 = vld [vmem:[%s8234_s1 + $0x258] sm:$0xff]  ;;  %v4386_v42 = vld [vmem:[%s8234_s1 + $0x250] sm:$0xff]  ;;  %v4389_v43 = vld [vmem:[%s8234_s1 + $0x268] sm:$0xff] }
  0x17   : > { %v4730_v40 = vpack.c.bf16 %v4387_v38, %v4385_v37  ;;  %v4391_v44 = vld [vmem:[%s8234_s1 + $0x278] sm:$0xff]  ;;  %v4732_v45 = vpack.c.bf16 %v4386_v42, %v4384_v41  ;;  %v4388_v47 = vld [vmem:[%s8234_s1 + $0x260] sm:$0xff]  ;;  %v4390_v48 = vld [vmem:[%s8234_s1 + $0x270] sm:$0xff] }
  0x18   : > { %4408 = vmatprep.mubr.msk.f32.mxu0 %vm381_vm0, %v379_v36  ;;  %v4734_v46 = vpack.c.bf16 %v4391_v44, %v4389_v43  ;;  %v4393_v49 = vld [vmem:[%s8234_s1 + $0x288] sm:$0xff]  ;;  %v4395_v50 = vld [vmem:[%s8234_s1 + $0x298] sm:$0xff]  ;;  %v4736_v51 = vpack.c.bf16 %v4390_v48, %v4388_v47  ;;  %v4392_v53 = vld [vmem:[%s8234_s1 + $0x280] sm:$0xff] }
  0x19   : > { %4717 = vmatpush1.bf16.msra.mxu0 %v4716_v19  ;;  %v4738_v52 = vpack.c.bf16 %v4395_v50, %v4393_v49  ;;  %v4394_v54 = vld [vmem:[%s8234_s1 + $0x290] sm:$0xff]  ;;  %v4397_v55 = vld [vmem:[%s8234_s1 + $0x2a8] sm:$0xff]  ;;  %v4399_v56 = vld [vmem:[%s8234_s1 + $0x2b8] sm:$0xff] }
  0x1a   : > { %4719 = vmatprep.subr.bf16.mxu0 %v4718_v20  ;;  %v4740_v57 = vpack.c.bf16 %v4394_v54, %v4392_v53  ;;  %v4742_v58 = vpack.c.bf16 %v4399_v56, %v4397_v55  ;;  %v4396_v59 = vld [vmem:[%s8234_s1 + $0x2a0] sm:$0xff]  ;;  %v4398_v60 = vld [vmem:[%s8234_s1 + $0x2b0] sm:$0xff]  ;;  %v4401_v61 = vld [vmem:[%s8234_s1 + $0x2c8] sm:$0xff] }
  0x1b   : > { %v4403_v62 = vld [vmem:[%s8234_s1 + $0x2d8] sm:$0xff]  ;;  %v4744_v63 = vpack.c.bf16 %v4398_v60, %v4396_v59  ;;  %v4400_v1 = vld [vmem:[%s8234_s1 + $0x2c0] sm:$0xff]  ;;  %v4402_v2 = vld [vmem:[%s8234_s1 + $0x2d0] sm:$0xff] }
  0x1c   : > { %v4746_v0 = vpack.c.bf16 %v4403_v62, %v4401_v61  ;;  %v4405_v3 = vld [vmem:[%s8234_s1 + $0x2e8] sm:$0xff]  ;;  %v4407_v4 = vld [vmem:[%s8234_s1 + $0x2f8] sm:$0xff]  ;;  %v4748_v5 = vpack.c.bf16 %v4402_v2, %v4400_v1  ;;  %v4404_v7 = vld [vmem:[%s8234_s1 + $0x2e0] sm:$0xff] }
  0x1d   : > { %4721 = vmatpush1.bf16.msra.mxu0 %v4720_v25  ;;  %v4750_v6 = vpack.c.bf16 %v4407_v4, %v4405_v3  ;;  %v4406_v8 = vld [vmem:[%s8234_s1 + $0x2f0] sm:$0xff]  ;;  %v278_v9 = vld [vmem:[%s8234_s1 + $0x8] sm:$0xff]  ;;  %v280_v10 = vld [vmem:[%s8234_s1 + $0x18] sm:$0xff] }
  0x1e   : > { %4723 = vmatprep.subr.bf16.mxu0 %v4722_v26  ;;  %v4752_v11 = vpack.c.bf16 %v4406_v8, %v4404_v7  ;;  %v325_v12 = vld [vmem:[%s5917_s28 + $0x10] sm:$0xfc]  ;;  %v4754_v13 = vpack.c.bf16 %v280_v10, %v278_v9  ;;  %v277_v14 = vld [vmem:[%s8234_s1] sm:$0xff]  ;;  %v282_v16 = vld [vmem:[%s8234_s1 + $0x28] sm:$0xff] }
  0x1f   : > { %v279_v15 = vld [vmem:[%s8234_s1 + $0x10] sm:$0xff]  ;;  %v284_v17 = vld [vmem:[%s8234_s1 + $0x38] sm:$0xff]  ;;  %v378_v18 = vrot.slane %v325_v12, 2  ;;  %v281_v21 = vld [vmem:[%s8234_s1 + $0x20] sm:$0xff] }
  0x20   : > { %v4756_v19 = vpack.c.bf16 %v279_v15, %v277_v14  ;;  %v4758_v20 = vpack.c.bf16 %v284_v17, %v282_v16  ;;  %v283_v22 = vld [vmem:[%s8234_s1 + $0x30] sm:$0xff]  ;;  %v276_v23 = vld [vmem:[%s5917_s28 + $0x8] sm:$0x3f]  ;;  %v288_v25 = vld [vmem:[%s8234_s1 + $0x58] sm:$0xff] }
  0x21   : > { %4725 = vmatpush1.bf16.msra.mxu0 %v4724_v31  ;;  %v286_v24 = vld [vmem:[%s8234_s1 + $0x48] sm:$0xff]  ;;  %v4760_v26 = vpack.c.bf16 %v283_v22, %v281_v21  ;;  %v285_v28 = vld [vmem:[%s8234_s1 + $0x40] sm:$0xff]  ;;  %v287_v29 = vld [vmem:[%s8234_s1 + $0x50] sm:$0xff] }
  0x22   : > { %4727 = vmatprep.subr.bf16.mxu0 %v4726_v33  ;;  %v4762_v27 = vpack.c.bf16 %v288_v25, %v286_v24  ;;  %v290_v30 = vld [vmem:[%s8234_s1 + $0x68] sm:$0xff]  ;;  %v292_v31 = vld [vmem:[%s8234_s1 + $0x78] sm:$0xff]  ;;  %v4764_v32 = vpack.c.bf16 %v287_v29, %v285_v28  ;;  %v289_v34 = vld [vmem:[%s8234_s1 + $0x60] sm:$0xff] }
  0x23   : > { %v4766_v33 = vpack.c.bf16 %v292_v31, %v290_v30  ;;  %v291_v35 = vld [vmem:[%s8234_s1 + $0x70] sm:$0xff]  ;;  %v294_v36 = vld [vmem:[%s8234_s1 + $0x88] sm:$0xff]  ;;  %v296_v37 = vld [vmem:[%s8234_s1 + $0x98] sm:$0xff] }
  0x24   : > { %v4768_v38 = vpack.c.bf16 %v291_v35, %v289_v34  ;;  %v295_v41 = vld [vmem:[%s8234_s1 + $0x90] sm:$0xff]  ;;  %v298_v42 = vld [vmem:[%s8234_s1 + $0xa8] sm:$0xff]  ;;  %v300_v43 = vld [vmem:[%s8234_s1 + $0xb8] sm:$0xff] }
  0x25   : > { %4729 = vmatpush1.bf16.msra.mxu0 %v4728_v39  ;;  %v4770_v39 = vpack.c.bf16 %v296_v37, %v294_v36  ;;  %v299_v47 = vld [vmem:[%s8234_s1 + $0xb0] sm:$0xff]  ;;  %v302_v48 = vld [vmem:[%s8234_s1 + $0xc8] sm:$0xff]  ;;  %v304_v49 = vld [vmem:[%s8234_s1 + $0xd8] sm:$0xff] }
  0x26   : > { %4731 = vmatprep.subr.bf16.mxu0 %v4730_v40  ;;  %v293_v40 = vld [vmem:[%s8234_s1 + $0x80] sm:$0xff]  ;;  %v303_v53 = vld [vmem:[%s8234_s1 + $0xd0] sm:$0xff]  ;;  %v306_v54 = vld [vmem:[%s8234_s1 + $0xe8] sm:$0xff] }
  0x27   : > { %v4772_v44 = vpack.c.bf16 %v295_v41, %v293_v40  ;;  %v308_v55 = vld [vmem:[%s8234_s1 + $0xf8] sm:$0xff]  ;;  %v307_v59 = vld [vmem:[%s8234_s1 + $0xf0] sm:$0xff]  ;;  %v310_v60 = vld [vmem:[%s8234_s1 + $0x108] sm:$0xff] }
  0x28   : > { %v312_v61 = vld [vmem:[%s8234_s1 + $0x118] sm:$0xff]  ;;  %v311_v1 = vld [vmem:[%s8234_s1 + $0x110] sm:$0xff]  ;;  %v314_v2 = vld [vmem:[%s8234_s1 + $0x128] sm:$0xff] }
  0x29   : > { %4733 = vmatpush1.bf16.msra.mxu0 %v4732_v45  ;;  %v4774_v45 = vpack.c.bf16 %v300_v43, %v298_v42  ;;  %v316_v3 = vld [vmem:[%s8234_s1 + $0x138] sm:$0xff]  ;;  %v315_v7 = vld [vmem:[%s8234_s1 + $0x130] sm:$0xff]  ;;  %v318_v8 = vld [vmem:[%s8234_s1 + $0x148] sm:$0xff] }
  0x2a   : > { %4735 = vmatprep.subr.bf16.mxu0 %v4734_v46  ;;  %v297_v46 = vld [vmem:[%s8234_s1 + $0xa0] sm:$0xff]  ;;  %v320_v9 = vld [vmem:[%s8234_s1 + $0x158] sm:$0xff]  ;;  %v322_v14 = vld [vmem:[%s8234_s1 + $0x168] sm:$0xff] }
  0x2b   : > { %v4776_v50 = vpack.c.bf16 %v299_v47, %v297_v46  ;;  %v317_v12 = vld [vmem:[%s8234_s1 + $0x140] sm:$0xff]  ;;  %v324_v15 = vld [vmem:[%s8234_s1 + $0x178] sm:$0xff]  ;;  %v4412_v25 = vld [vmem:[%s8234_s1 + $0x310] sm:$0xff] }
  0x2c   : > { %v4798_v17 = vpack.c.bf16 %v324_v15, %v322_v14  ;;  %v4413_v21 = vld [vmem:[%s8234_s1 + $0x318] sm:$0xff]  ;;  %v4410_v24 = vld [vmem:[%s8234_s1 + $0x300] sm:$0xff]  ;;  %v4416_v34 = vld [vmem:[%s8234_s1 + $0x330] sm:$0xff] }
  0x2d   : > { %4737 = vmatpush1.bf16.msra.mxu0 %v4736_v51  ;;  %v4778_v51 = vpack.c.bf16 %v304_v49, %v302_v48  ;;  %v4417_v28 = vld [vmem:[%s8234_s1 + $0x338] sm:$0xff]  ;;  %v275_v29 = vld [vmem:[%s5917_s28] sm:$0x3f]  ;;  %v4804_v30 = vpack.c.bf16 %v4412_v25, %v4410_v24  ;;  %v4419_v35 = vld [vmem:[%s8234_s1 + $0x348] sm:$0xff] }
  0x2e   : > { %4739 = vmatprep.subr.bf16.mxu0 %v4738_v52  ;;  %v301_v52 = vld [vmem:[%s8234_s1 + $0xc0] sm:$0xff]  ;;  %v4421_v36 = vld [vmem:[%s8234_s1 + $0x358] sm:$0xff]  ;;  %v4420_v40 = vld [vmem:[%s8234_s1 + $0x350] sm:$0xff] }
  0x2f   : > { %v4780_v56 = vpack.c.bf16 %v303_v53, %v301_v52  ;;  %v4423_v41 = vld [vmem:[%s8234_s1 + $0x368] sm:$0xff]  ;;  %v4425_v42 = vld [vmem:[%s8234_s1 + $0x378] sm:$0xff]  ;;  %v4424_v46 = vld [vmem:[%s8234_s1 + $0x370] sm:$0xff] }
  0x30   : > { %v4427_v47 = vld [vmem:[%s8234_s1 + $0x388] sm:$0xff]  ;;  %v4429_v48 = vld [vmem:[%s8234_s1 + $0x398] sm:$0xff]  ;;  %v4428_v52 = vld [vmem:[%s8234_s1 + $0x390] sm:$0xff] }
  0x31   : > { %4741 = vmatpush1.bf16.msra.mxu0 %v4740_v57  ;;  %v4782_v57 = vpack.c.bf16 %v308_v55, %v306_v54  ;;  %v4431_v53 = vld [vmem:[%s8234_s1 + $0x3a8] sm:$0xff]  ;;  %v4433_v54 = vld [vmem:[%s8234_s1 + $0x3b8] sm:$0xff]  ;;  %v4452_v24 = vld [vmem:[%s8234_s1 + $0x450] sm:$0xff] }
  0x32   : > { %4743 = vmatprep.subr.bf16.mxu0 %v4742_v58  ;;  %v305_v58 = vld [vmem:[%s8234_s1 + $0xe0] sm:$0xff]  ;;  %v4449_v14 = vld [vmem:[%s8234_s1 + $0x438] sm:$0xff]  ;;  %v4455_v25 = vld [vmem:[%s8234_s1 + $0x468] sm:$0xff] }
  0x33   : > { %v4784_v62 = vpack.c.bf16 %v307_v59, %v305_v58  ;;  %v4432_v58 = vld [vmem:[%s8234_s1 + $0x3b0] sm:$0xff]  ;;  %v4435_v59 = vld [vmem:[%s8234_s1 + $0x3c8] sm:$0xff] }
  0x35   : > { %4745 = vmatpush1.bf16.msra.mxu0 %v4744_v63  ;;  %v4786_v63 = vpack.c.bf16 %v312_v61, %v310_v60  ;;  %v4437_v60 = vld [vmem:[%s8234_s1 + $0x3d8] sm:$0xff] }
  0x36   : > { %4747 = vmatprep.subr.bf16.mxu0 %v4746_v0  ;;  %v309_v0 = vld [vmem:[%s8234_s1 + $0x100] sm:$0xff] }
  0x37   : > { %v4788_v4 = vpack.c.bf16 %v311_v1, %v309_v0  ;;  %v4436_v0 = vld [vmem:[%s8234_s1 + $0x3d0] sm:$0xff]  ;;  %v4439_v1 = vld [vmem:[%s8234_s1 + $0x3e8] sm:$0xff] }
  0x39   : > { %4749 = vmatpush1.bf16.msra.mxu0 %v4748_v5  ;;  %v4790_v5 = vpack.c.bf16 %v316_v3, %v314_v2  ;;  %v4441_v2 = vld [vmem:[%s8234_s1 + $0x3f8] sm:$0xff] }
  0x3a   : > { %4751 = vmatprep.subr.bf16.mxu0 %v4750_v6  ;;  %v313_v6 = vld [vmem:[%s8234_s1 + $0x120] sm:$0xff] }
  0x3b   : > { %v4792_v10 = vpack.c.bf16 %v315_v7, %v313_v6  ;;  %v4440_v6 = vld [vmem:[%s8234_s1 + $0x3f0] sm:$0xff]  ;;  %v4443_v7 = vld [vmem:[%s8234_s1 + $0x408] sm:$0xff] }
  0x3d   : > { %4753 = vmatpush1.bf16.msra.mxu0 %v4752_v11  ;;  %v4794_v11 = vpack.c.bf16 %v320_v9, %v318_v8  ;;  %v4445_v8 = vld [vmem:[%s8234_s1 + $0x418] sm:$0xff] }
  0x3e   : > { %4755 = vmatprep.subr.bf16.mxu0 %v4754_v13  ;;  %v319_v13 = vld [vmem:[%s8234_s1 + $0x150] sm:$0xff] }
  0x3f   : > { %v4796_v16 = vpack.c.bf16 %v319_v13, %v317_v12  ;;  %v4444_v12 = vld [vmem:[%s8234_s1 + $0x410] sm:$0xff]  ;;  %v4447_v13 = vld [vmem:[%s8234_s1 + $0x428] sm:$0xff] }
  0x40   : > { %449 = vmatmul.mubr.f32.vlgmr.msra.gmra.mrb[0].mxu0 %v378_v18  ;;  %v321_v18 = vld [vmem:[%s8234_s1 + $0x160] sm:$0xff] }
  0x41   : > { %4757 = vmatpush1.bf16.msra.mxu0 %v4756_v19  ;;  %4409 = vmatprep.mubr.msk.f32.mxu0 %vm381_vm0, %v276_v23  ;;  %v323_v19 = vld [vmem:[%s8234_s1 + $0x170] sm:$0xff] }
  0x42   : > { %4759 = vmatprep.subr.bf16.mxu0 %v4758_v20  ;;  %v4411_v20 = vld [vmem:[%s8234_s1 + $0x308] sm:$0xff]  ;;  %v4800_v22 = vpack.c.bf16 %v323_v19, %v321_v18  ;;  %v4448_v18 = vld [vmem:[%s8234_s1 + $0x430] sm:$0xff] }
  0x43   : > { %v4802_v23 = vpack.c.bf16 %v4413_v21, %v4411_v20  ;;  %v4451_v19 = vld [vmem:[%s8234_s1 + $0x448] sm:$0xff]  ;;  %v4453_v20 = vld [vmem:[%s8234_s1 + $0x458] sm:$0xff] }
  0x45   : > { %4761 = vmatpush1.bf16.msra.mxu0 %v4760_v26  ;;  %v530_v26 = vld [vmem:[%s5917_s28 + $0x8] sm:$0x7e] }
  0x46   : > { %4763 = vmatprep.subr.bf16.mxu0 %v4762_v27  ;;  %v4415_v27 = vld [vmem:[%s8234_s1 + $0x328] sm:$0xff]  ;;  %v583_v31 = vrot.slane %v530_v26, 1  ;;  %v4457_v26 = vld [vmem:[%s8234_s1 + $0x478] sm:$0xff] }
  0x49   : > { %4765 = vmatpush1.bf16.msra.mxu0 %v4764_v32  ;;  %v4806_v32 = vpack.c.bf16 %v4417_v28, %v4415_v27  ;;  %v4846_v28 = vpack.c.bf16 %v4457_v26, %v4455_v25  ;;  %v4491_v26 = vld [vmem:[%s8234_s1 + $0x580] sm:$0xff] }
  0x4a   : > { %4767 = vmatprep.subr.bf16.mxu0 %v4766_v33  ;;  %v4414_v33 = vld [vmem:[%s8234_s1 + $0x320] sm:$0xff] }
  0x4b   : > { %v4808_v37 = vpack.c.bf16 %v4416_v34, %v4414_v33  ;;  %v661_v33 = vld [vmem:[%s5917_s28 + $0x18] sm:$0xf8]  ;;  %v663_v34 = vld [vmem:[%s5917_s28 + $0x28] sm:$0x1] }
  0x4d   : > { %4769 = vmatpush1.bf16.msra.mxu0 %v4768_v38  ;;  %v4810_v38 = vpack.c.bf16 %v4421_v36, %v4419_v35  ;;  %v529_v36 = vld [vmem:[%s5917_s28] sm:$0x7e] }
  0x4e   : > { %4771 = vmatprep.subr.bf16.mxu0 %v4770_v39  ;;  %v4418_v39 = vld [vmem:[%s8234_s1 + $0x340] sm:$0xff] }
  0x4f   : > { %v4812_v43 = vpack.c.bf16 %v4420_v40, %v4418_v39  ;;  %v4461_v39 = vld [vmem:[%s8234_s1 + $0x490] sm:$0xff]  ;;  %v721_v40 = vrot.slane %v661_v33, 3 }
  0x50   : > { %v4497_v33 = vld [vmem:[%s8234_s1 + $0x5b0] sm:$0xff] }
  0x51   : > { %4773 = vmatpush1.bf16.msra.mxu0 %v4772_v44  ;;  %v4814_v44 = vpack.c.bf16 %v4425_v42, %v4423_v41  ;;  %v722_v41 = vrot.slane %v663_v34, 3  ;;  %v4464_v42 = vld [vmem:[%s8234_s1 + $0x4a8] sm:$0xff] }
  0x52   : > { %4775 = vmatprep.subr.bf16.mxu0 %v4774_v45  ;;  %v4422_v45 = vld [vmem:[%s8234_s1 + $0x360] sm:$0xff]  ;;  %v4500_v34 = vld [vmem:[%s8234_s1 + $0x5c8] sm:$0xff] }
  0x53   : > { %v4816_v49 = vpack.c.bf16 %v4424_v46, %v4422_v45 }
  0x55   : > { %4777 = vmatpush1.bf16.msra.mxu0 %v4776_v50  ;;  %v4818_v50 = vpack.c.bf16 %v4429_v48, %v4427_v47  ;;  %v4463_v47 = vld [vmem:[%s8234_s1 + $0x4a0] sm:$0xff]  ;;  %v4465_v48 = vld [vmem:[%s8234_s1 + $0x4b0] sm:$0xff] }
  0x56   : > { %4779 = vmatprep.subr.bf16.mxu0 %v4778_v51  ;;  %v4426_v51 = vld [vmem:[%s8234_s1 + $0x380] sm:$0xff] }
  0x57   : > { %v4820_v55 = vpack.c.bf16 %v4428_v52, %v4426_v51  ;;  %v4470_v51 = vld [vmem:[%s8234_s1 + $0x4d8] sm:$0xff]  ;;  %v4856_v52 = vpack.c.bf16 %v4465_v48, %v4463_v47  ;;  %v662_v47 = vld [vmem:[%s5917_s28 + $0x20] sm:$0x1]  ;;  %v4509_v48 = vld [vmem:[%s8234_s1 + $0x608] sm:$0xff] }
  0x59   : > { %4781 = vmatpush1.bf16.msra.mxu0 %v4780_v56  ;;  %v4822_v56 = vpack.c.bf16 %v4433_v54, %v4431_v53  ;;  %v4467_v54 = vld [vmem:[%s8234_s1 + $0x4c0] sm:$0xff] }
  0x5a   : > { %4783 = vmatprep.subr.bf16.mxu0 %v4782_v57  ;;  %v4430_v57 = vld [vmem:[%s8234_s1 + $0x3a0] sm:$0xff] }
  0x5b   : > { %v4824_v61 = vpack.c.bf16 %v4432_v58, %v4430_v57  ;;  %v4474_v57 = vld [vmem:[%s8234_s1 + $0x4f8] sm:$0xff] }
  0x5d   : > { %4785 = vmatpush1.bf16.msra.mxu0 %v4784_v62  ;;  %v4826_v62 = vpack.c.bf16 %v4437_v60, %v4435_v59  ;;  %v4471_v60 = vld [vmem:[%s8234_s1 + $0x4e0] sm:$0xff] }
  0x5e   : > { %4787 = vmatprep.subr.bf16.mxu0 %v4786_v63  ;;  %v4434_v63 = vld [vmem:[%s8234_s1 + $0x3c0] sm:$0xff] }
  0x5f   : > { %v4828_v3 = vpack.c.bf16 %v4436_v0, %v4434_v63  ;;  %v4478_v63 = vld [vmem:[%s8234_s1 + $0x518] sm:$0xff] }
  0x61   : > { %4789 = vmatpush1.bf16.msra.mxu0 %v4788_v4  ;;  %v4830_v4 = vpack.c.bf16 %v4441_v2, %v4439_v1  ;;  %v4475_v2 = vld [vmem:[%s8234_s1 + $0x500] sm:$0xff] }
  0x62   : > { %4791 = vmatprep.subr.bf16.mxu0 %v4790_v5  ;;  %v4438_v5 = vld [vmem:[%s8234_s1 + $0x3e0] sm:$0xff] }
  0x63   : > { %v4832_v9 = vpack.c.bf16 %v4440_v6, %v4438_v5  ;;  %v4482_v5 = vld [vmem:[%s8234_s1 + $0x538] sm:$0xff] }
  0x65   : > { %4793 = vmatpush1.bf16.msra.mxu0 %v4792_v10  ;;  %v4834_v10 = vpack.c.bf16 %v4445_v8, %v4443_v7  ;;  %v4479_v8 = vld [vmem:[%s8234_s1 + $0x520] sm:$0xff] }
  0x66   : > { %4795 = vmatprep.subr.bf16.mxu0 %v4794_v11  ;;  %v4442_v11 = vld [vmem:[%s8234_s1 + $0x400] sm:$0xff] }
  0x67   : > { %v4836_v15 = vpack.c.bf16 %v4444_v12, %v4442_v11  ;;  %v4486_v11 = vld [vmem:[%s8234_s1 + $0x558] sm:$0xff] }
  0x69   : > { %4797 = vmatpush1.bf16.msra.mxu0 %v4796_v16  ;;  %v4838_v16 = vpack.c.bf16 %v4449_v14, %v4447_v13  ;;  %v4483_v14 = vld [vmem:[%s8234_s1 + $0x540] sm:$0xff] }
  0x6a   : > { %4799 = vmatprep.subr.bf16.mxu0 %v4798_v17  ;;  %v4446_v17 = vld [vmem:[%s8234_s1 + $0x420] sm:$0xff] }
  0x6b   : > { %v4840_v21 = vpack.c.bf16 %v4448_v18, %v4446_v17  ;;  %v4490_v17 = vld [vmem:[%s8234_s1 + $0x578] sm:$0xff] }
  0x6d   : > { %4801 = vmatpush1.bf16.msra.mxu0 %v4800_v22  ;;  %v4842_v22 = vpack.c.bf16 %v4453_v20, %v4451_v19  ;;  %v4487_v20 = vld [vmem:[%s8234_s1 + $0x560] sm:$0xff] }
  0x6e   : > { %4803 = vmatprep.subr.bf16.mxu0 %v4802_v23  ;;  %v4450_v23 = vld [vmem:[%s8234_s1 + $0x440] sm:$0xff] }
  0x6f   : > { %v4844_v27 = vpack.c.bf16 %v4452_v24, %v4450_v23  ;;  %v4494_v23 = vld [vmem:[%s8234_s1 + $0x598] sm:$0xff] }
  0x70   : > { %523 = vmatmul.mubr.f32.vlgmr.msra.gmra.mrb[0].mxu0 %v275_v29  ;;  %v4454_v29 = vld [vmem:[%s8234_s1 + $0x460] sm:$0xff] }
  0x71   : > { %4805 = vmatpush1.bf16.msra.mxu0 %v4804_v30  ;;  %4458 = vmatprep.mubr.msk.f32.mxu0 %vm381_vm0, %v583_v31  ;;  %v4456_v30 = vld [vmem:[%s8234_s1 + $0x470] sm:$0xff]  ;;  %v4460_v31 = vld [vmem:[%s8234_s1 + $0x488] sm:$0xff] }
  0x72   : > { %4807 = vmatprep.subr.bf16.mxu0 %v4806_v32  ;;  %v4462_v32 = vld [vmem:[%s8234_s1 + $0x498] sm:$0xff]  ;;  %v4848_v35 = vpack.c.bf16 %v4456_v30, %v4454_v29 }
  0x73   : > { %v4498_v29 = vld [vmem:[%s8234_s1 + $0x5b8] sm:$0xff] }
  0x75   : > { %4809 = vmatpush1.bf16.msra.mxu0 %v4808_v37  ;;  %v4850_v37 = vpack.c.bf16 %v4462_v32, %v4460_v31  ;;  %v4495_v32 = vld [vmem:[%s8234_s1 + $0x5a0] sm:$0xff] }
  0x76   : > { %4811 = vmatprep.subr.bf16.mxu0 %v4810_v38  ;;  %v4459_v38 = vld [vmem:[%s8234_s1 + $0x480] sm:$0xff] }
  0x77   : > { %v4852_v45 = vpack.c.bf16 %v4461_v39, %v4459_v38  ;;  %v4499_v38 = vld [vmem:[%s8234_s1 + $0x5c0] sm:$0xff]  ;;  %v4501_v39 = vld [vmem:[%s8234_s1 + $0x5d0] sm:$0xff] }
  0x79   : > { %4813 = vmatpush1.bf16.msra.mxu0 %v4812_v43  ;;  %v4466_v43 = vld [vmem:[%s8234_s1 + $0x4b8] sm:$0xff] }
  0x7a   : > { %4815 = vmatprep.subr.bf16.mxu0 %v4814_v44  ;;  %v582_v44 = vrot.slane %v529_v36, 1  ;;  %v4854_v46 = vpack.c.bf16 %v4466_v43, %v4464_v42  ;;  %v4888_v36 = vpack.c.bf16 %v4497_v33, %v4495_v32  ;;  %v4892_v42 = vpack.c.bf16 %v4501_v39, %v4499_v38  ;;  %v4503_v43 = vld [vmem:[%s8234_s1 + $0x5e0] sm:$0xff]  ;;  %v4539_v32 = vld [vmem:[%s8234_s1 + $0x6f8] sm:$0xff] }
  0x7b   : > { %v4543_v38 = vld [vmem:[%s8234_s1 + $0x718] sm:$0xff] }
  0x7d   : > { %4817 = vmatpush1.bf16.msra.mxu0 %v4816_v49  ;;  %v723_v49 = vsel %vm717_vm1, %v721_v40, %v722_v41  ;;  %v4504_v40 = vld [vmem:[%s8234_s1 + $0x5e8] sm:$0xff]  ;;  %v4506_v41 = vld [vmem:[%s8234_s1 + $0x5f8] sm:$0xff] }
  0x7e   : > { %4819 = vmatprep.subr.bf16.mxu0 %v4818_v50  ;;  %v4468_v50 = vld [vmem:[%s8234_s1 + $0x4c8] sm:$0xff] }
  0x7f   : > { %v4858_v53 = vpack.c.bf16 %v4470_v51, %v4468_v50 }
  0x81   : > { %4821 = vmatpush1.bf16.msra.mxu0 %v4820_v55  ;;  %v4469_v55 = vld [vmem:[%s8234_s1 + $0x4d0] sm:$0xff] }
  0x82   : > { %4823 = vmatprep.subr.bf16.mxu0 %v4822_v56  ;;  %v4472_v56 = vld [vmem:[%s8234_s1 + $0x4e8] sm:$0xff]  ;;  %v4860_v58 = vpack.c.bf16 %v4469_v55, %v4467_v54  ;;  %v4508_v54 = vld [vmem:[%s8234_s1 + $0x600] sm:$0xff]  ;;  %v4510_v55 = vld [vmem:[%s8234_s1 + $0x610] sm:$0xff] }
  0x83   : > { %v4862_v59 = vpack.c.bf16 %v4474_v57, %v4472_v56  ;;  %v801_v56 = vld [vmem:[%s5917_s28 + $0x8] sm:$0xfc] }
  0x84   : > { %v4513_v57 = vld [vmem:[%s8234_s1 + $0x628] sm:$0xff] }
  0x85   : > { %4825 = vmatpush1.bf16.msra.mxu0 %v4824_v61  ;;  %v4473_v61 = vld [vmem:[%s8234_s1 + $0x4f0] sm:$0xff] }
  0x86   : > { %4827 = vmatprep.subr.bf16.mxu0 %v4826_v62  ;;  %v4476_v62 = vld [vmem:[%s8234_s1 + $0x508] sm:$0xff]  ;;  %v4864_v0 = vpack.c.bf16 %v4473_v61, %v4471_v60  ;;  %v4900_v60 = vpack.c.bf16 %v4510_v55, %v4508_v54  ;;  %v854_v61 = vrot.slane %v801_v56, 2  ;;  %v4550_v54 = vld [vmem:[%s8234_s1 + $0x750] sm:$0xff]  ;;  %v4555_v56 = vld [vmem:[%s8234_s1 + $0x778] sm:$0xff] }
  0x87   : > { %v4866_v1 = vpack.c.bf16 %v4478_v63, %v4476_v62  ;;  %v4512_v63 = vld [vmem:[%s8234_s1 + $0x620] sm:$0xff]  ;;  %v4553_v55 = vld [vmem:[%s8234_s1 + $0x768] sm:$0xff] }
  0x89   : > { %4829 = vmatpush1.bf16.msra.mxu0 %v4828_v3  ;;  %v4477_v3 = vld [vmem:[%s8234_s1 + $0x510] sm:$0xff] }
  0x8a   : > { %4831 = vmatprep.subr.bf16.mxu0 %v4830_v4  ;;  %v4480_v4 = vld [vmem:[%s8234_s1 + $0x528] sm:$0xff]  ;;  %v4868_v6 = vpack.c.bf16 %v4477_v3, %v4475_v2  ;;  %v4519_v2 = vld [vmem:[%s8234_s1 + $0x658] sm:$0xff] }
  0x8b   : > { %v4870_v7 = vpack.c.bf16 %v4482_v5, %v4480_v4  ;;  %v4516_v5 = vld [vmem:[%s8234_s1 + $0x640] sm:$0xff] }
  0x8d   : > { %4833 = vmatpush1.bf16.msra.mxu0 %v4832_v9  ;;  %v4481_v9 = vld [vmem:[%s8234_s1 + $0x530] sm:$0xff] }
  0x8e   : > { %4835 = vmatprep.subr.bf16.mxu0 %v4834_v10  ;;  %v4484_v10 = vld [vmem:[%s8234_s1 + $0x548] sm:$0xff]  ;;  %v4872_v12 = vpack.c.bf16 %v4481_v9, %v4479_v8  ;;  %v4523_v8 = vld [vmem:[%s8234_s1 + $0x678] sm:$0xff] }
  0x8f   : > { %v4874_v13 = vpack.c.bf16 %v4486_v11, %v4484_v10  ;;  %v4520_v11 = vld [vmem:[%s8234_s1 + $0x660] sm:$0xff] }
  0x91   : > { %4837 = vmatpush1.bf16.msra.mxu0 %v4836_v15  ;;  %v4485_v15 = vld [vmem:[%s8234_s1 + $0x550] sm:$0xff] }
  0x92   : > { %4839 = vmatprep.subr.bf16.mxu0 %v4838_v16  ;;  %v4488_v16 = vld [vmem:[%s8234_s1 + $0x568] sm:$0xff]  ;;  %v4876_v18 = vpack.c.bf16 %v4485_v15, %v4483_v14  ;;  %v4527_v14 = vld [vmem:[%s8234_s1 + $0x698] sm:$0xff] }
  0x93   : > { %v4878_v19 = vpack.c.bf16 %v4490_v17, %v4488_v16  ;;  %v4524_v17 = vld [vmem:[%s8234_s1 + $0x680] sm:$0xff] }
  0x95   : > { %4841 = vmatpush1.bf16.msra.mxu0 %v4840_v21  ;;  %v4489_v21 = vld [vmem:[%s8234_s1 + $0x570] sm:$0xff] }
  0x96   : > { %4843 = vmatprep.subr.bf16.mxu0 %v4842_v22  ;;  %v4492_v22 = vld [vmem:[%s8234_s1 + $0x588] sm:$0xff]  ;;  %v4880_v24 = vpack.c.bf16 %v4489_v21, %v4487_v20  ;;  %v4531_v20 = vld [vmem:[%s8234_s1 + $0x6b8] sm:$0xff] }
  0x97   : > { %v4882_v25 = vpack.c.bf16 %v4494_v23, %v4492_v22  ;;  %v4528_v23 = vld [vmem:[%s8234_s1 + $0x6a0] sm:$0xff] }
  0x99   : > { %4845 = vmatpush1.bf16.msra.mxu0 %v4844_v27  ;;  %v4493_v27 = vld [vmem:[%s8234_s1 + $0x590] sm:$0xff] }
  0x9a   : > { %4847 = vmatprep.subr.bf16.mxu0 %v4846_v28  ;;  %v4496_v28 = vld [vmem:[%s8234_s1 + $0x5a8] sm:$0xff]  ;;  %v4884_v30 = vpack.c.bf16 %v4493_v27, %v4491_v26  ;;  %v4535_v26 = vld [vmem:[%s8234_s1 + $0x6d8] sm:$0xff] }
  0x9b   : > { %v4886_v31 = vpack.c.bf16 %v4498_v29, %v4496_v28  ;;  %v4532_v29 = vld [vmem:[%s8234_s1 + $0x6c0] sm:$0xff] }
  0x9d   : > { %4849 = vmatpush1.bf16.msra.mxu0 %v4848_v35  ;;  %v4502_v35 = vld [vmem:[%s8234_s1 + $0x5d8] sm:$0xff] }
  0x9e   : > { %4851 = vmatprep.subr.bf16.mxu0 %v4850_v37  ;;  %v4890_v37 = vpack.c.bf16 %v4502_v35, %v4500_v34  ;;  %v4536_v35 = vld [vmem:[%s8234_s1 + $0x6e0] sm:$0xff] }
  0xa0   : > { %652 = vmatmul.mubr.f32.vlgmr.msra.gmra.mrb[0].mxu0 %v582_v44  ;;  %v4894_v44 = vpack.c.bf16 %v4506_v41, %v4504_v40  ;;  %v4540_v41 = vld [vmem:[%s8234_s1 + $0x700] sm:$0xff] }
  0xa1   : > { %4853 = vmatpush1.bf16.msra.mxu0 %v4852_v45  ;;  %4507 = vmatprep.mubr.msk.f32.mxu0 %vm381_vm0, %v723_v49  ;;  %v4505_v45 = vld [vmem:[%s8234_s1 + $0x5f0] sm:$0xff]  ;;  %v4511_v49 = vld [vmem:[%s8234_s1 + $0x618] sm:$0xff] }
  0xa2   : > { %4855 = vmatprep.subr.bf16.mxu0 %v4854_v46  ;;  %v660_v46 = vld [vmem:[%s5917_s28 + $0x10] sm:$0xf8]  ;;  %v4896_v50 = vpack.c.bf16 %v4505_v45, %v4503_v43  ;;  %v4545_v43 = vld [vmem:[%s8234_s1 + $0x728] sm:$0xff] }
  0xa3   : > { %v718_v51 = vrot.slane %v660_v46, 3 }
  0xa5   : > { %4857 = vmatpush1.bf16.msra.mxu0 %v4856_v52  ;;  %v719_v52 = vrot.slane %v662_v47, 3  ;;  %v4544_v47 = vld [vmem:[%s8234_s1 + $0x720] sm:$0xff] }
  0xa6   : > { %4859 = vmatprep.subr.bf16.mxu0 %v4858_v53  ;;  %v4898_v53 = vpack.c.bf16 %v4511_v49, %v4509_v48  ;;  %v4546_v48 = vld [vmem:[%s8234_s1 + $0x730] sm:$0xff]  ;;  %v4549_v49 = vld [vmem:[%s8234_s1 + $0x748] sm:$0xff] }
  0xa9   : > { %4861 = vmatpush1.bf16.msra.mxu0 %v4860_v58  ;;  %v4515_v58 = vld [vmem:[%s8234_s1 + $0x638] sm:$0xff] }
  0xaa   : > { %4863 = vmatprep.subr.bf16.mxu0 %v4862_v59  ;;  %v720_v59 = vsel %vm717_vm1, %v718_v51, %v719_v52  ;;  %v4902_v62 = vpack.c.bf16 %v4515_v58, %v4513_v57  ;;  %v4936_v51 = vpack.c.bf16 %v4546_v48, %v4544_v47  ;;  %v4942_v58 = vpack.c.bf16 %v4555_v56, %v4553_v55  ;;  %v6714_v55 = vld [vmem:[%s8237_s4 + $0x20] sm:$0xff]  ;;  %v6719_v56 = vld [vmem:[%s8237_s4 + $0x28] sm:$0xff] }
  0xab   : > { %v8246_v47 = vmov 0.0|0.0  }
  0xac   : > { %5090 = vmatprep.subr.bf16.mxu1 %v8246_v47 }
  0xad   : > { %4865 = vmatpush1.bf16.msra.mxu0 %v4864_v0  ;;  %v4514_v0 = vld [vmem:[%s8234_s1 + $0x630] sm:$0xff] }
  0xae   : > { %4867 = vmatprep.subr.bf16.mxu0 %v4866_v1  ;;  %v4517_v1 = vld [vmem:[%s8234_s1 + $0x648] sm:$0xff]  ;;  %v4904_v3 = vpack.c.bf16 %v4514_v0, %v4512_v63  ;;  %v932_v63 = vld [vmem:[%s5917_s28 + $0x18] sm:$0xf0] }
  0xaf   : > { %v4906_v4 = vpack.c.bf16 %v4519_v2, %v4517_v1  ;;  %v934_v0 = vld [vmem:[%s5917_s28 + $0x28] sm:$0x3]  ;;  %v800_v2 = vld [vmem:[%s5917_s28] sm:$0xfc] }
  0xb1   : > { %4869 = vmatpush1.bf16.msra.mxu0 %v4868_v6  ;;  %v4518_v6 = vld [vmem:[%s8234_s1 + $0x650] sm:$0xff] }
  0xb2   : > { %4871 = vmatprep.subr.bf16.mxu0 %v4870_v7  ;;  %v4521_v7 = vld [vmem:[%s8234_s1 + $0x668] sm:$0xff]  ;;  %v4908_v9 = vpack.c.bf16 %v4518_v6, %v4516_v5  ;;  %v4559_v5 = vld [vmem:[%s8234_s1 + $0x790] sm:$0xff]  ;;  %v992_v6 = vrot.slane %v932_v63, 4  ;;  %v8262_v63 = vand.u32 4294901760, %v6714_v55 }
  0xb3   : > { %v4910_v10 = vpack.c.bf16 %v4523_v8, %v4521_v7  ;;  %v993_v7 = vrot.slane %v934_v0, 4  ;;  %v4562_v8 = vld [vmem:[%s8234_s1 + $0x7a8] sm:$0xff]  ;;  %v8261_v0 = vand.u32 4294901760, %v6719_v56 }
  0xb5   : > { %4873 = vmatpush1.bf16.msra.mxu0 %v4872_v12  ;;  %v4522_v12 = vld [vmem:[%s8234_s1 + $0x670] sm:$0xff] }
  0xb6   : > { %4875 = vmatprep.subr.bf16.mxu0 %v4874_v13  ;;  %v4525_v13 = vld [vmem:[%s8234_s1 + $0x688] sm:$0xff]  ;;  %v4912_v15 = vpack.c.bf16 %v4522_v12, %v4520_v11 }
  0xb7   : > { %v4914_v16 = vpack.c.bf16 %v4527_v14, %v4525_v13  ;;  %v4561_v13 = vld [vmem:[%s8234_s1 + $0x7a0] sm:$0xff]  ;;  %v4563_v14 = vld [vmem:[%s8234_s1 + $0x7b0] sm:$0xff] }
  0xb9   : > { %4877 = vmatpush1.bf16.msra.mxu0 %v4876_v18  ;;  %v4526_v18 = vld [vmem:[%s8234_s1 + $0x690] sm:$0xff] }
  0xba   : > { %4879 = vmatprep.subr.bf16.mxu0 %v4878_v19  ;;  %v4529_v19 = vld [vmem:[%s8234_s1 + $0x6a8] sm:$0xff]  ;;  %v4916_v21 = vpack.c.bf16 %v4526_v18, %v4524_v17  ;;  %v4568_v17 = vld [vmem:[%s8234_s1 + $0x7d8] sm:$0xff]  ;;  %v4952_v18 = vpack.c.bf16 %v4563_v14, %v4561_v13  ;;  %v4591_v13 = vld [vmem:[%s8234_s1 + $0x890] sm:$0xff] }
  0xbb   : > { %v4918_v22 = vpack.c.bf16 %v4531_v20, %v4529_v19  ;;  %v4565_v20 = vld [vmem:[%s8234_s1 + $0x7c0] sm:$0xff] }
  0xbc   : > { %v6784_v14 = vld [vmem:[%s8237_s4 + $0x40] sm:$0xff] }
  0xbd   : > { %4881 = vmatpush1.bf16.msra.mxu0 %v4880_v24  ;;  %v4530_v24 = vld [vmem:[%s8234_s1 + $0x6b0] sm:$0xff] }
  0xbe   : > { %4883 = vmatprep.subr.bf16.mxu0 %v4882_v25  ;;  %v4533_v25 = vld [vmem:[%s8234_s1 + $0x6c8] sm:$0xff]  ;;  %v4920_v27 = vpack.c.bf16 %v4530_v24, %v4528_v23  ;;  %v4572_v23 = vld [vmem:[%s8234_s1 + $0x7f8] sm:$0xff] }
  0xbf   : > { %v4922_v28 = vpack.c.bf16 %v4535_v26, %v4533_v25  ;;  %v4569_v26 = vld [vmem:[%s8234_s1 + $0x7e0] sm:$0xff] }
  0xc1   : > { %4885 = vmatpush1.bf16.msra.mxu0 %v4884_v30  ;;  %v4534_v30 = vld [vmem:[%s8234_s1 + $0x6d0] sm:$0xff] }
  0xc2   : > { %4887 = vmatprep.subr.bf16.mxu0 %v4886_v31  ;;  %v4537_v31 = vld [vmem:[%s8234_s1 + $0x6e8] sm:$0xff]  ;;  %v4924_v33 = vpack.c.bf16 %v4534_v30, %v4532_v29  ;;  %v4576_v29 = vld [vmem:[%s8234_s1 + $0x818] sm:$0xff] }
  0xc3   : > { %v4926_v34 = vpack.c.bf16 %v4539_v32, %v4537_v31  ;;  %v4573_v32 = vld [vmem:[%s8234_s1 + $0x800] sm:$0xff] }
  0xc5   : > { %4889 = vmatpush1.bf16.msra.mxu0 %v4888_v36  ;;  %v4538_v36 = vld [vmem:[%s8234_s1 + $0x6f0] sm:$0xff] }
  0xc6   : > { %4891 = vmatprep.subr.bf16.mxu0 %v4890_v37  ;;  %v4541_v37 = vld [vmem:[%s8234_s1 + $0x708] sm:$0xff]  ;;  %v4928_v39 = vpack.c.bf16 %v4538_v36, %v4536_v35  ;;  %v4580_v35 = vld [vmem:[%s8234_s1 + $0x838] sm:$0xff] }
  0xc7   : > { %v4930_v40 = vpack.c.bf16 %v4543_v38, %v4541_v37  ;;  %v4577_v38 = vld [vmem:[%s8234_s1 + $0x820] sm:$0xff] }
  0xc9   : > { %4893 = vmatpush1.bf16.msra.mxu0 %v4892_v42  ;;  %v4542_v42 = vld [vmem:[%s8234_s1 + $0x710] sm:$0xff] }
  0xca   : > { %4895 = vmatprep.subr.bf16.mxu0 %v4894_v44  ;;  %v4547_v44 = vld [vmem:[%s8234_s1 + $0x738] sm:$0xff]  ;;  %v4932_v45 = vpack.c.bf16 %v4542_v42, %v4540_v41  ;;  %v6683_v42 = vld [vmem:[%s8237_s4] sm:$0xff] }
  0xcb   : > { %v4934_v46 = vpack.c.bf16 %v4547_v44, %v4545_v43  ;;  %v4584_v41 = vld [vmem:[%s8234_s1 + $0x858] sm:$0xff]  ;;  %v6688_v43 = vld [vmem:[%s8237_s4 + $0x8] sm:$0xff]  ;;  %v6693_v44 = vld [vmem:[%s8237_s4 + $0x10] sm:$0xff]  ;;  %v1394_v48 = vand.u32 4294901760, %v6683_v42 }
  0xcd   : > { %4897 = vmatpush1.bf16.msra.mxu0 %v4896_v50  ;;  %v4551_v50 = vld [vmem:[%s8234_s1 + $0x758] sm:$0xff] }
  0xce   : > { %4899 = vmatprep.subr.bf16.mxu0 %v4898_v53  ;;  %v4938_v52 = vpack.c.bf16 %v4551_v50, %v4549_v49  ;;  %v4548_v53 = vld [vmem:[%s8234_s1 + $0x740] sm:$0xff]  ;;  %v1397_v49 = vand.u32 4294901760, %v6688_v43  ;;  %v6704_v50 = vld [vmem:[%s8237_s4 + $0x18] sm:$0xff] }
  0xcf   : > { %v4940_v57 = vpack.c.bf16 %v4550_v54, %v4548_v53  ;;  %v4583_v53 = vld [vmem:[%s8234_s1 + $0x850] sm:$0xff]  ;;  %v8263_v54 = vand.u32 4294901760, %v6704_v50 }
  0xd0   : > { %792 = vmatmul.mubr.f32.vlgmr.msra.gmra.mrb[0].mxu0 %v720_v59  ;;  %v4552_v59 = vld [vmem:[%s8234_s1 + $0x760] sm:$0xff] }
  0xd1   : > { %4901 = vmatpush1.bf16.msra.mxu0 %v4900_v60  ;;  %4556 = vmatprep.mubr.msk.f32.mxu0 %vm381_vm0, %v854_v61  ;;  %v4554_v60 = vld [vmem:[%s8234_s1 + $0x770] sm:$0xff]  ;;  %v4558_v61 = vld [vmem:[%s8234_s1 + $0x788] sm:$0xff] }
  0xd2   : > { %4903 = vmatprep.subr.bf16.mxu0 %v4902_v62  ;;  %v4560_v62 = vld [vmem:[%s8234_s1 + $0x798] sm:$0xff]  ;;  %v4944_v1 = vpack.c.bf16 %v4554_v60, %v4552_v59  ;;  %v6731_v59 = vpack.c.bf16 %v1397_v49, %v1394_v48 }
  0xd4   : > { %5092 = vmatpush1.bf16.msra.mxu1 %v6731_v59 }
  0xd5   : > { %4905 = vmatpush1.bf16.msra.mxu0 %v4904_v3  ;;  %v4946_v3 = vpack.c.bf16 %v4560_v62, %v4558_v61  ;;  %v4585_v61 = vld [vmem:[%s8234_s1 + $0x860] sm:$0xff]  ;;  %5093 = vmatprep.subr.bf16.mxu1 %v8246_v47 }
  0xd6   : > { %4907 = vmatprep.subr.bf16.mxu0 %v4906_v4  ;;  %v4557_v4 = vld [vmem:[%s8234_s1 + $0x780] sm:$0xff] }
  0xd7   : > { %v4948_v11 = vpack.c.bf16 %v4559_v5, %v4557_v4  ;;  %v6757_v4 = vld [vmem:[%s8237_s4 + $0x38] sm:$0xff]  ;;  %v4590_v5 = vld [vmem:[%s8234_s1 + $0x888] sm:$0xff] }
  0xd9   : > { %4909 = vmatpush1.bf16.msra.mxu0 %v4908_v9  ;;  %v4564_v9 = vld [vmem:[%s8234_s1 + $0x7b8] sm:$0xff] }
  0xda   : > { %4911 = vmatprep.subr.bf16.mxu0 %v4910_v10  ;;  %v853_v10 = vrot.slane %v800_v2, 2  ;;  %v4950_v12 = vpack.c.bf16 %v4564_v9, %v4562_v8  ;;  %v4587_v2 = vld [vmem:[%s8234_s1 + $0x870] sm:$0xff]  ;;  %v4589_v8 = vld [vmem:[%s8234_s1 + $0x880] sm:$0xff]  ;;  %v6773_v9 = vpack.c.bf16 %v8261_v0, %v8262_v63  ;;  %v7351_v63 = vsub.f32 %v6683_v42, %v1394_v48 }
  0xdc   : > { %v8269_v48 = vand.u32 4294901760, %v7351_v63 }
  0xdd   : > { %4913 = vmatpush1.bf16.msra.mxu0 %v4912_v15  ;;  %v994_v15 = vsel %vm988_vm2, %v992_v6, %v993_v7  ;;  %v4592_v6 = vld [vmem:[%s8234_s1 + $0x898] sm:$0xff]  ;;  %v4976_v7 = vpack.c.bf16 %v4587_v2, %v4585_v61 }
  0xde   : > { %4915 = vmatprep.subr.bf16.mxu0 %v4914_v16  ;;  %v4566_v16 = vld [vmem:[%s8234_s1 + $0x7c8] sm:$0xff] }
  0xdf   : > { %v4954_v19 = vpack.c.bf16 %v4568_v17, %v4566_v16  ;;  %v4594_v16 = vld [vmem:[%s8234_s1 + $0x8a8] sm:$0xff]  ;;  %v4596_v17 = vld [vmem:[%s8234_s1 + $0x8b8] sm:$0xff] }
  0xe1   : > { %4917 = vmatpush1.bf16.msra.mxu0 %v4916_v21  ;;  %v4567_v21 = vld [vmem:[%s8234_s1 + $0x7d0] sm:$0xff] }
  0xe2   : > { %4919 = vmatprep.subr.bf16.mxu0 %v4918_v22  ;;  %v4570_v22 = vld [vmem:[%s8234_s1 + $0x7e8] sm:$0xff]  ;;  %v4956_v24 = vpack.c.bf16 %v4567_v21, %v4565_v20  ;;  %v8244_v21 = vand.u32 4294901760, %v6784_v14 }
  0xe3   : > { %v4958_v25 = vpack.c.bf16 %v4572_v23, %v4570_v22  ;;  %v4982_v23 = vpack.c.bf16 %v4596_v17, %v4594_v16  ;;  %v4613_v16 = vld [vmem:[%s8234_s1 + $0x938] sm:$0xff] }
  0xe5   : > { %4921 = vmatpush1.bf16.msra.mxu0 %v4920_v27  ;;  %v4571_v27 = vld [vmem:[%s8234_s1 + $0x7f0] sm:$0xff] }
  0xe6   : > { %4923 = vmatprep.subr.bf16.mxu0 %v4922_v28  ;;  %v4574_v28 = vld [vmem:[%s8234_s1 + $0x808] sm:$0xff]  ;;  %v4960_v30 = vpack.c.bf16 %v4571_v27, %v4569_v26  ;;  %v6821_v26 = vld [vmem:[%s8237_s4 + $0x58] sm:$0xff] }
  0xe7   : > { %v4962_v31 = vpack.c.bf16 %v4576_v29, %v4574_v28  ;;  %v4598_v27 = vld [vmem:[%s8234_s1 + $0x8c8] sm:$0xff]  ;;  %v4600_v28 = vld [vmem:[%s8234_s1 + $0x8d8] sm:$0xff] }
  0xe9   : > { %4925 = vmatpush1.bf16.msra.mxu0 %v4924_v33  ;;  %v4575_v33 = vld [vmem:[%s8234_s1 + $0x810] sm:$0xff] }
  0xea   : > { %4927 = vmatprep.subr.bf16.mxu0 %v4926_v34  ;;  %v4578_v34 = vld [vmem:[%s8234_s1 + $0x828] sm:$0xff]  ;;  %v4964_v36 = vpack.c.bf16 %v4575_v33, %v4573_v32  ;;  %v8241_v32 = vand.u32 4294901760, %v6821_v26  ;;  %v4986_v33 = vpack.c.bf16 %v4600_v28, %v4598_v27 }
  0xeb   : > { %v4966_v37 = vpack.c.bf16 %v4580_v35, %v4578_v34  ;;  %v4597_v34 = vld [vmem:[%s8234_s1 + $0x8c0] sm:$0xff]  ;;  %v4599_v35 = vld [vmem:[%s8234_s1 + $0x8d0] sm:$0xff]  ;;  %v4615_v28 = vld [vmem:[%s8234_s1 + $0x948] sm:$0xff] }
  0xed   : > { %4929 = vmatpush1.bf16.msra.mxu0 %v4928_v39  ;;  %v4579_v39 = vld [vmem:[%s8234_s1 + $0x830] sm:$0xff] }
  0xee   : > { %4931 = vmatprep.subr.bf16.mxu0 %v4930_v40  ;;  %v4582_v40 = vld [vmem:[%s8234_s1 + $0x848] sm:$0xff] }
  0xf1   : > { %4933 = vmatpush1.bf16.msra.mxu0 %v4932_v45  ;;  %v4968_v45 = vpack.c.bf16 %v4579_v39, %v4577_v38  ;;  %v4988_v38 = vpack.c.bf16 %v4599_v35, %v4597_v34  ;;  %v4601_v39 = vld [vmem:[%s8234_s1 + $0x8e0] sm:$0xff] }
  0xf2   : > { %4935 = vmatprep.subr.bf16.mxu0 %v4934_v46  ;;  %v4581_v46 = vld [vmem:[%s8234_s1 + $0x840] sm:$0xff] }
  0xf3   : > { %v4972_v60 = vpack.c.bf16 %v4583_v53, %v4581_v46  ;;  %v4607_v46 = vld [vmem:[%s8234_s1 + $0x908] sm:$0xff]  ;;  %v933_v53 = vld [vmem:[%s5917_s28 + $0x20] sm:$0x3] }
  0xf4   : > { %v990_v2 = vrot.slane %v933_v53, 4  ;;  %v4614_v35 = vld [vmem:[%s8234_s1 + $0x940] sm:$0xff]  ;;  %v4625_v53 = vld [vmem:[%s8234_s1 + $0x998] sm:$0xff] }
  0xf5   : > { %4937 = vmatpush1.bf16.msra.mxu0 %v4936_v51  ;;  %v8264_v51 = vand.u32 4294901760, %v6693_v44 }
  0xf6   : > { %4939 = vmatprep.subr.bf16.mxu0 %v4938_v52  ;;  %v4970_v52 = vpack.c.bf16 %v4584_v41, %v4582_v40  ;;  %v4603_v40 = vld [vmem:[%s8234_s1 + $0x8f0] sm:$0xff] }
  0xf7   : > { %v6741_v62 = vpack.c.bf16 %v8263_v54, %v8264_v51  ;;  %v4992_v61 = vpack.c.bf16 %v4603_v40, %v4601_v39  ;;  %v7356_v54 = vsub.f32 %v6688_v43, %v1397_v49 }
  0xf9   : > { %4941 = vmatpush1.bf16.msra.mxu0 %v4940_v57  ;;  %v4586_v57 = vld [vmem:[%s8234_s1 + $0x868] sm:$0xff]  ;;  %5095 = vmatpush1.bf16.msra.mxu1 %v6741_v62 }
  0xfa   : > { %4943 = vmatprep.subr.bf16.mxu0 %v4942_v58  ;;  %v4588_v58 = vld [vmem:[%s8234_s1 + $0x878] sm:$0xff]  ;;  %5096 = vmatprep.subr.bf16.mxu1 %v8246_v47 }
  0xfd   : > { %4945 = vmatpush1.bf16.msra.mxu0 %v4944_v1  ;;  %v4974_v1 = vpack.c.bf16 %v4588_v58, %v4586_v57  ;;  %5098 = vmatpush1.bf16.msra.mxu1 %v6773_v9  ;;  %v4609_v57 = vld [vmem:[%s8234_s1 + $0x918] sm:$0xff]  ;;  %v1072_v58 = vld [vmem:[%s5917_s28 + $0x8] sm:$0xf8] }
  0xfe   : > { %4947 = vmatprep.subr.bf16.mxu0 %v4946_v3  ;;  %v6752_v3 = vld [vmem:[%s8237_s4 + $0x30] sm:$0xff]  ;;  %5099 = vmatprep.subr.bf16.mxu1 %v8246_v47 }
 0x100   : > { %923 = vmatmul.mubr.f32.vlgmr.msra.gmra.mrb[0].mxu0 %v853_v10  ;;  %v8251_v10 = vand.u32 4294901760, %v6752_v3 }
 0x101   : > { %4949 = vmatpush1.bf16.msra.mxu0 %v4948_v11  ;;  %4605 = vmatprep.mubr.msk.f32.mxu0 %vm381_vm0, %v994_v15  ;;  %v8245_v11 = vand.u32 4294901760, %v6757_v4  ;;  %v6789_v15 = vld [vmem:[%s8237_s4 + $0x48] sm:$0xff] }
 0x102   : > { %4951 = vmatprep.subr.bf16.mxu0 %v4950_v12  ;;  %v4978_v12 = vpack.c.bf16 %v4592_v6, %v4590_v5  ;;  %v8243_v22 = vand.u32 4294901760, %v6789_v15  ;;  %v4994_v5 = vpack.c.bf16 %v4609_v57, %v4607_v46  ;;  %v4606_v6 = vld [vmem:[%s8234_s1 + $0x900] sm:$0xff]  ;;  %v4620_v46 = vld [vmem:[%s8234_s1 + $0x970] sm:$0xff] }
 0x103   : > { %v6805_v20 = vpack.c.bf16 %v8245_v11, %v8251_v10 }
 0x105   : > { %4953 = vmatpush1.bf16.msra.mxu0 %v4952_v18  ;;  %v4980_v18 = vpack.c.bf16 %v4591_v13, %v4589_v8  ;;  %5101 = vmatpush1.bf16.msra.mxu1 %v6805_v20  ;;  %v1131_v8 = vrot.slane %v1072_v58, 3  ;;  %v4611_v13 = vld [vmem:[%s8234_s1 + $0x928] sm:$0xff] }
 0x106   : > { %4955 = vmatprep.subr.bf16.mxu0 %v4954_v19  ;;  %v4593_v19 = vld [vmem:[%s8234_s1 + $0x8a0] sm:$0xff]  ;;  %5102 = vmatprep.subr.bf16.mxu1 %v8246_v47 }
 0x109   : > { %4957 = vmatpush1.bf16.msra.mxu0 %v4956_v24  ;;  %v4595_v24 = vld [vmem:[%s8234_s1 + $0x8b0] sm:$0xff] }
 0x10a   : > { %4959 = vmatprep.subr.bf16.mxu0 %v4958_v25  ;;  %v6816_v25 = vld [vmem:[%s8237_s4 + $0x50] sm:$0xff]  ;;  %v4984_v29 = vpack.c.bf16 %v4595_v24, %v4593_v19  ;;  %v4998_v19 = vpack.c.bf16 %v4613_v16, %v4611_v13  ;;  %v4633_v13 = vld [vmem:[%s8234_s1 + $0x9d8] sm:$0xff] }
 0x10b   : > { %v4612_v24 = vld [vmem:[%s8234_s1 + $0x930] sm:$0xff] }
 0x10d   : > { %4961 = vmatpush1.bf16.msra.mxu0 %v4960_v30  ;;  %v6834_v30 = vpack.c.bf16 %v8243_v22, %v8244_v21 }
 0x10e   : > { %4963 = vmatprep.subr.bf16.mxu0 %v4962_v31  ;;  %v8242_v31 = vand.u32 4294901760, %v6816_v25 }
 0x10f   : > { %5104 = vmatpush1.bf16.msra.mxu1 %v6834_v30 }
 0x110   : > { %v6862_v41 = vpack.c.bf16 %v8241_v32, %v8242_v31  ;;  %5105 = vmatprep.subr.bf16.mxu1 %v8246_v47 }
 0x111   : > { %4965 = vmatpush1.bf16.msra.mxu0 %v4964_v36  ;;  %v4602_v36 = vld [vmem:[%s8234_s1 + $0x8e8] sm:$0xff] }
 0x112   : > { %4967 = vmatprep.subr.bf16.mxu0 %v4966_v37  ;;  %v4604_v37 = vld [vmem:[%s8234_s1 + $0x8f8] sm:$0xff] }
 0x113   : > { %5107 = vmatpush1.bf16.msra.mxu1 %v6862_v41 }
 0x114   : > { %5108 = vmatprep.subr.bf16.mxu1 %v8246_v47 }
 0x115   : > { %4969 = vmatpush1.bf16.msra.mxu0 %v4968_v45  ;;  %v4990_v45 = vpack.c.bf16 %v4604_v37, %v4602_v36  ;;  %v4616_v36 = vld [vmem:[%s8234_s1 + $0x950] sm:$0xff]  ;;  %v4619_v37 = vld [vmem:[%s8234_s1 + $0x968] sm:$0xff] }
 0x116   : > { %4971 = vmatprep.subr.bf16.mxu0 %v4970_v52  ;;  %v931_v52 = vld [vmem:[%s5917_s28 + $0x10] sm:$0xf0]  ;;  %v5004_v39 = vpack.c.bf16 %v4616_v36, %v4614_v35  ;;  %v4641_v35 = vld [vmem:[%s8234_s1 + $0xa18] sm:$0xff] }
 0x119   : > { %4973 = vmatpush1.bf16.msra.mxu0 %v4972_v60  ;;  %v1074_v60 = vld [vmem:[%s5917_s28 + $0x18] sm:$0x1] }
 0x11a   : > { %4975 = vmatprep.subr.bf16.mxu0 %v4974_v1  ;;  %v989_v1 = vrot.slane %v931_v52, 4  ;;  %v4623_v52 = vld [vmem:[%s8234_s1 + $0x988] sm:$0xff] }
 0x11b   : > { %v5010_v58 = vpack.c.bf16 %v4625_v53, %v4623_v52  ;;  %v4642_v53 = vld [vmem:[%s8234_s1 + $0xa20] sm:$0xff] }
 0x11c   : > { %v991_v17 = vsel %vm988_vm2, %v989_v1, %v990_v2  ;;  %v4627_v1 = vld [vmem:[%s8234_s1 + $0x9a8] sm:$0xff]  ;;  %v4629_v2 = vld [vmem:[%s8234_s1 + $0x9b8] sm:$0xff] }
 0x11d   : > { %4977 = vmatpush1.bf16.msra.mxu0 %v4976_v7  ;;  %v4608_v7 = vld [vmem:[%s8234_s1 + $0x910] sm:$0xff] }
 0x11e   : > { %4979 = vmatprep.subr.bf16.mxu0 %v4978_v12  ;;  %v1132_v12 = vrot.slane %v1074_v60, 3  ;;  %v4622_v60 = vld [vmem:[%s8234_s1 + $0x980] sm:$0xff] }
 0x120   : > { %v1133_v27 = vsel %vm717_vm1, %v1131_v8, %v1132_v12  ;;  %v4628_v8 = vld [vmem:[%s8234_s1 + $0x9b0] sm:$0xff]  ;;  %v4631_v12 = vld [vmem:[%s8234_s1 + $0x9c8] sm:$0xff] }
 0x121   : > { %4981 = vmatpush1.bf16.msra.mxu0 %v4980_v18  ;;  %v4996_v18 = vpack.c.bf16 %v4608_v7, %v4606_v6  ;;  %v5014_v6 = vpack.c.bf16 %v4629_v2, %v4627_v1  ;;  %v4626_v7 = vld [vmem:[%s8234_s1 + $0x9a0] sm:$0xff] }
 0x122   : > { %4983 = vmatprep.subr.bf16.mxu0 %v4982_v23  ;;  %v4610_v23 = vld [vmem:[%s8234_s1 + $0x920] sm:$0xff]  ;;  %v5016_v16 = vpack.c.bf16 %v4628_v8, %v4626_v7  ;;  %v4653_v7 = vld [vmem:[%s8234_s1 + $0xa78] sm:$0xff] }
 0x123   : > { %v4646_v2 = vld [vmem:[%s8234_s1 + $0xa40] sm:$0xff] }
 0x125   : > { %4985 = vmatpush1.bf16.msra.mxu0 %v4984_v29  ;;  %v4617_v29 = vld [vmem:[%s8234_s1 + $0x958] sm:$0xff] }
 0x126   : > { %4987 = vmatprep.subr.bf16.mxu0 %v4986_v33  ;;  %v5000_v33 = vpack.c.bf16 %v4612_v24, %v4610_v23  ;;  %v5002_v34 = vpack.c.bf16 %v4617_v29, %v4615_v28  ;;  %v4635_v23 = vld [vmem:[%s8234_s1 + $0x9e8] sm:$0xff]  ;;  %v4637_v24 = vld [vmem:[%s8234_s1 + $0x9f8] sm:$0xff]  ;;  %v4634_v29 = vld [vmem:[%s8234_s1 + $0x9e0] sm:$0xff] }
 0x127   : > { %v5022_v28 = vpack.c.bf16 %v4637_v24, %v4635_v23  ;;  %v4658_v23 = vld [vmem:[%s8234_s1 + $0xa98] sm:$0xff] }
 0x128   : > { %v1211_v24 = vld [vmem:[%s5917_s28 + $0x18] sm:$0xe0] }
 0x129   : > { %4989 = vmatpush1.bf16.msra.mxu0 %v4988_v38  ;;  %v4621_v38 = vld [vmem:[%s8234_s1 + $0x978] sm:$0xff] }
 0x12a   : > { %4991 = vmatprep.subr.bf16.mxu0 %v4990_v45  ;;  %v5006_v40 = vpack.c.bf16 %v4621_v38, %v4619_v37  ;;  %v4618_v45 = vld [vmem:[%s8234_s1 + $0x960] sm:$0xff] }
 0x12b   : > { %v5008_v57 = vpack.c.bf16 %v4620_v46, %v4618_v45  ;;  %v4638_v38 = vld [vmem:[%s8234_s1 + $0xa00] sm:$0xff]  ;;  %v4645_v45 = vld [vmem:[%s8234_s1 + $0xa38] sm:$0xff] }
 0x12d   : > { %4993 = vmatpush1.bf16.msra.mxu0 %v4992_v61  ;;  %v4624_v61 = vld [vmem:[%s8234_s1 + $0x990] sm:$0xff] }
 0x12e   : > { %4995 = vmatprep.subr.bf16.mxu0 %v4994_v5  ;;  %v5012_v5 = vpack.c.bf16 %v4624_v61, %v4622_v60  ;;  %v4649_v60 = vld [vmem:[%s8234_s1 + $0xa58] sm:$0xff] }
 0x130   : > { %1063 = vmatmul.mubr.f32.vlgmr.msra.gmra.mrb[0].mxu0 %v991_v17  ;;  %v5018_v17 = vpack.c.bf16 %v4633_v13, %v4631_v12  ;;  %v4650_v12 = vld [vmem:[%s8234_s1 + $0xa60] sm:$0xff]  ;;  %v4652_v13 = vld [vmem:[%s8234_s1 + $0xa70] sm:$0xff] }
 0x131   : > { %4997 = vmatpush1.bf16.msra.mxu0 %v4996_v18  ;;  %4654 = vmatprep.mubr.msk.f32.mxu0 %vm381_vm0, %v1133_v27  ;;  %v4630_v18 = vld [vmem:[%s8234_s1 + $0x9c0] sm:$0xff] }
 0x132   : > { %4999 = vmatprep.subr.bf16.mxu0 %v4998_v19  ;;  %v4632_v19 = vld [vmem:[%s8234_s1 + $0x9d0] sm:$0xff] }
 0x133   : > { %v5020_v27 = vpack.c.bf16 %v4632_v19, %v4630_v18  ;;  %v1071_v18 = vld [vmem:[%s5917_s28] sm:$0xf8]  ;;  %v1073_v19 = vld [vmem:[%s5917_s28 + $0x10] sm:$0x1] }
 0x135   : > { %5001 = vmatpush1.bf16.msra.mxu0 %v5000_v33  ;;  %v4636_v33 = vld [vmem:[%s8234_s1 + $0x9f0] sm:$0xff] }
 0x136   : > { %5003 = vmatprep.subr.bf16.mxu0 %v5002_v34  ;;  %v4639_v34 = vld [vmem:[%s8234_s1 + $0xa08] sm:$0xff]  ;;  %v5024_v36 = vpack.c.bf16 %v4636_v33, %v4634_v29  ;;  %v1128_v29 = vrot.slane %v1071_v18, 3  ;;  %v1129_v33 = vrot.slane %v1073_v19, 3  ;;  %v4674_v19 = vld [vmem:[%s8234_s1 + $0xb18] sm:$0xff] }
 0x137   : > { %v5026_v37 = vpack.c.bf16 %v4641_v35, %v4639_v34  ;;  %v4655_v35 = vld [vmem:[%s8234_s1 + $0xa80] sm:$0xff]  ;;  %v4672_v18 = vld [vmem:[%s8234_s1 + $0xb08] sm:$0xff] }
 0x139   : > { %5005 = vmatpush1.bf16.msra.mxu0 %v5004_v39  ;;  %v4640_v39 = vld [vmem:[%s8234_s1 + $0xa10] sm:$0xff] }
 0x13a   : > { %5007 = vmatprep.subr.bf16.mxu0 %v5006_v40  ;;  %v4643_v40 = vld [vmem:[%s8234_s1 + $0xa28] sm:$0xff]  ;;  %v5028_v46 = vpack.c.bf16 %v4640_v39, %v4638_v38 }
 0x13b   : > { %v5030_v52 = vpack.c.bf16 %v4645_v45, %v4643_v40  ;;  %v4660_v39 = vld [vmem:[%s8234_s1 + $0xaa8] sm:$0xff]  ;;  %v4662_v40 = vld [vmem:[%s8234_s1 + $0xab8] sm:$0xff]  ;;  %v1130_v45 = vsel %vm717_vm1, %v1128_v29, %v1129_v33 }
 0x13c   : > { %v4676_v29 = vld [vmem:[%s8234_s1 + $0xb28] sm:$0xff]  ;;  %v4678_v33 = vld [vmem:[%s8234_s1 + $0xb38] sm:$0xff] }
 0x13d   : > { %5009 = vmatpush1.bf16.msra.mxu0 %v5008_v57  ;;  %v4644_v57 = vld [vmem:[%s8234_s1 + $0xa30] sm:$0xff] }
 0x13e   : > { %5011 = vmatprep.subr.bf16.mxu0 %v5010_v58  ;;  %v4647_v58 = vld [vmem:[%s8234_s1 + $0xa48] sm:$0xff]  ;;  %v5032_v61 = vpack.c.bf16 %v4644_v57, %v4642_v53  ;;  %v4659_v53 = vld [vmem:[%s8234_s1 + $0xaa0] sm:$0xff]  ;;  %v4661_v57 = vld [vmem:[%s8234_s1 + $0xab0] sm:$0xff] }
 0x13f   : > { %v5034_v1 = vpack.c.bf16 %v4649_v60, %v4647_v58  ;;  %v4664_v60 = vld [vmem:[%s8234_s1 + $0xac8] sm:$0xff] }
 0x141   : > { %5013 = vmatpush1.bf16.msra.mxu0 %v5012_v5  ;;  %v4648_v5 = vld [vmem:[%s8234_s1 + $0xa50] sm:$0xff] }
 0x142   : > { %5015 = vmatprep.subr.bf16.mxu0 %v5014_v6  ;;  %v4651_v6 = vld [vmem:[%s8234_s1 + $0xa68] sm:$0xff]  ;;  %v5036_v8 = vpack.c.bf16 %v4648_v5, %v4646_v2  ;;  %v4663_v5 = vld [vmem:[%s8234_s1 + $0xac0] sm:$0xff] }
 0x145   : > { %5017 = vmatpush1.bf16.msra.mxu0 %v5016_v16  ;;  %v5038_v16 = vpack.c.bf16 %v4653_v7, %v4651_v6  ;;  %v4665_v6 = vld [vmem:[%s8234_s1 + $0xad0] sm:$0xff]  ;;  %v4668_v7 = vld [vmem:[%s8234_s1 + $0xae8] sm:$0xff] }
 0x146   : > { %5019 = vmatprep.subr.bf16.mxu0 %v5018_v17  ;;  %v4656_v17 = vld [vmem:[%s8234_s1 + $0xa88] sm:$0xff] }
 0x147   : > { %v5042_v34 = vpack.c.bf16 %v4658_v23, %v4656_v17  ;;  %v4669_v17 = vld [vmem:[%s8234_s1 + $0xaf0] sm:$0xff] }
 0x149   : > { %5021 = vmatpush1.bf16.msra.mxu0 %v5020_v27  ;;  %v1213_v27 = vld [vmem:[%s5917_s28 + $0x28] sm:$0x7] }
 0x14a   : > { %5023 = vmatprep.subr.bf16.mxu0 %v5022_v28  ;;  %v5040_v28 = vpack.c.bf16 %v4652_v13, %v4650_v12  ;;  %v1272_v38 = vrot.slane %v1213_v27, 5  ;;  %v5052_v12 = vpack.c.bf16 %v4665_v6, %v4663_v5  ;;  %v4671_v27 = vld [vmem:[%s8234_s1 + $0xb00] sm:$0xff]  ;;  %v4690_v5 = vld [vmem:[%s8234_s1 + $0xb98] sm:$0xff] }
 0x14d   : > { %5025 = vmatpush1.bf16.msra.mxu0 %v5024_v36  ;;  %v4657_v36 = vld [vmem:[%s8234_s1 + $0xa90] sm:$0xff] }
 0x14e   : > { %5027 = vmatprep.subr.bf16.mxu0 %v5026_v37  ;;  %v1271_v37 = vrot.slane %v1211_v24, 5  ;;  %v5058_v24 = vpack.c.bf16 %v4674_v19, %v4672_v18  ;;  %v4691_v19 = vld [vmem:[%s8234_s1 + $0xba0] sm:$0xff] }
 0x150   : > { %v1273_v58 = vsel %vm1267_vm3, %v1271_v37, %v1272_v38  ;;  %v4677_v37 = vld [vmem:[%s8234_s1 + $0xb30] sm:$0xff]  ;;  %v4680_v38 = vld [vmem:[%s8234_s1 + $0xb48] sm:$0xff] }
 0x151   : > { %5029 = vmatpush1.bf16.msra.mxu0 %v5028_v46  ;;  %v5044_v46 = vpack.c.bf16 %v4657_v36, %v4655_v35  ;;  %v5062_v35 = vpack.c.bf16 %v4678_v33, %v4676_v29  ;;  %v4675_v36 = vld [vmem:[%s8234_s1 + $0xb20] sm:$0xff] }
 0x152   : > { %5031 = vmatprep.subr.bf16.mxu0 %v5030_v52  ;;  %v5046_v52 = vpack.c.bf16 %v4662_v40, %v4660_v39  ;;  %v4682_v39 = vld [vmem:[%s8234_s1 + $0xb58] sm:$0xff]  ;;  %v5064_v40 = vpack.c.bf16 %v4677_v37, %v4675_v36  ;;  %v4695_v33 = vld [vmem:[%s8234_s1 + $0xbc0] sm:$0xff] }
 0x153   : > { %v4702_v36 = vld [vmem:[%s8234_s1 + $0xbf8] sm:$0xff] }
 0x155   : > { %5033 = vmatpush1.bf16.msra.mxu0 %v5032_v61  ;;  %v4666_v61 = vld [vmem:[%s8234_s1 + $0xad8] sm:$0xff] }
 0x156   : > { %5035 = vmatprep.subr.bf16.mxu0 %v5034_v1  ;;  %v5048_v1 = vpack.c.bf16 %v4661_v57, %v4659_v53  ;;  %v5050_v2 = vpack.c.bf16 %v4666_v61, %v4664_v60  ;;  %v4684_v53 = vld [vmem:[%s8234_s1 + $0xb68] sm:$0xff]  ;;  %v4686_v57 = vld [vmem:[%s8234_s1 + $0xb78] sm:$0xff]  ;;  %v4683_v61 = vld [vmem:[%s8234_s1 + $0xb60] sm:$0xff] }
 0x157   : > { %v5070_v60 = vpack.c.bf16 %v4686_v57, %v4684_v53 }
 0x159   : > { %5037 = vmatpush1.bf16.msra.mxu0 %v5036_v8  ;;  %v4670_v8 = vld [vmem:[%s8234_s1 + $0xaf8] sm:$0xff] }
 0x15a   : > { %5039 = vmatprep.subr.bf16.mxu0 %v5038_v16  ;;  %v5054_v13 = vpack.c.bf16 %v4670_v8, %v4668_v7  ;;  %v4667_v16 = vld [vmem:[%s8234_s1 + $0xae0] sm:$0xff] }
 0x15b   : > { %v5056_v23 = vpack.c.bf16 %v4669_v17, %v4667_v16  ;;  %v4687_v8 = vld [vmem:[%s8234_s1 + $0xb80] sm:$0xff]  ;;  %v4694_v16 = vld [vmem:[%s8234_s1 + $0xbb8] sm:$0xff] }
 0x15d   : > { %5041 = vmatpush1.bf16.msra.mxu0 %v5040_v28  ;;  %v4673_v28 = vld [vmem:[%s8234_s1 + $0xb10] sm:$0xff] }
 0x15e   : > { %5043 = vmatprep.subr.bf16.mxu0 %v5042_v34  ;;  %v5060_v34 = vpack.c.bf16 %v4673_v28, %v4671_v27  ;;  %v4698_v27 = vld [vmem:[%s8234_s1 + $0xbd8] sm:$0xff] }
 0x160   : > { %1202 = vmatmul.mubr.f32.vlgmr.msra.gmra.mrb[0].mxu0 %v1130_v45  ;;  %v5066_v45 = vpack.c.bf16 %v4682_v39, %v4680_v38  ;;  %v4699_v38 = vld [vmem:[%s8234_s1 + $0xbe0] sm:$0xff] }
 0x161   : > { %5045 = vmatpush1.bf16.msra.mxu0 %v5044_v46  ;;  %4703 = vmatprep.mubr.msk.f32.mxu0 %vm381_vm0, %v1273_v58  ;;  %v4679_v46 = vld [vmem:[%s8234_s1 + $0xb40] sm:$0xff] }
 0x162   : > { %5047 = vmatprep.subr.bf16.mxu0 %v5046_v52  ;;  %v4681_v52 = vld [vmem:[%s8234_s1 + $0xb50] sm:$0xff] }
 0x163   : > { %v5068_v58 = vpack.c.bf16 %v4681_v52, %v4679_v46  ;;  %v1212_v46 = vld [vmem:[%s5917_s28 + $0x20] sm:$0x7] }
 0x164   : > { %v1269_v57 = vrot.slane %v1212_v46, 5 }
 0x165   : > { %5049 = vmatpush1.bf16.msra.mxu0 %v5048_v1  ;;  %v4685_v1 = vld [vmem:[%s8234_s1 + $0xb70] sm:$0xff] }
 0x166   : > { %5051 = vmatprep.subr.bf16.mxu0 %v5050_v2  ;;  %v4688_v2 = vld [vmem:[%s8234_s1 + $0xb88] sm:$0xff]  ;;  %v5072_v6 = vpack.c.bf16 %v4685_v1, %v4683_v61 }
 0x167   : > { %v5074_v7 = vpack.c.bf16 %v4690_v5, %v4688_v2  ;;  %v1379_v61 = vld [vmem:[%s8237_s4 + $0x68] sm:$0xff] }
 0x168   : > { %v1433_v2 = vand.u32 4294901760, %v1379_v61 }
 0x169   : > { %5053 = vmatpush1.bf16.msra.mxu0 %v5052_v12  ;;  %v4689_v12 = vld [vmem:[%s8234_s1 + $0xb90] sm:$0xff] }
 0x16a   : > { %5055 = vmatprep.subr.bf16.mxu0 %v5054_v13  ;;  %v4692_v13 = vld [vmem:[%s8234_s1 + $0xba8] sm:$0xff]  ;;  %v5076_v17 = vpack.c.bf16 %v4689_v12, %v4687_v8 }
 0x16b   : > { %v5078_v18 = vpack.c.bf16 %v4694_v16, %v4692_v13  ;;  %v1382_v16 = vld [vmem:[%s8237_s4 + $0x80] sm:$0xff] }
 0x16d   : > { %5057 = vmatpush1.bf16.msra.mxu0 %v5056_v23  ;;  %v4693_v23 = vld [vmem:[%s8234_s1 + $0xbb0] sm:$0xff] }
 0x16e   : > { %5059 = vmatprep.subr.bf16.mxu0 %v5058_v24  ;;  %v4696_v24 = vld [vmem:[%s8234_s1 + $0xbc8] sm:$0xff]  ;;  %v5080_v28 = vpack.c.bf16 %v4693_v23, %v4691_v19 }
 0x16f   : > { %v5082_v29 = vpack.c.bf16 %v4698_v27, %v4696_v24  ;;  %v1384_v24 = vld [vmem:[%s8237_s4 + $0x90] sm:$0xff]  ;;  %v1385_v27 = vld [vmem:[%s8237_s4 + $0x98] sm:$0xff] }
 0x171   : > { %5061 = vmatpush1.bf16.msra.mxu0 %v5060_v34  ;;  %v4697_v34 = vld [vmem:[%s8234_s1 + $0xbd0] sm:$0xff] }
 0x172   : > { %5063 = vmatprep.subr.bf16.mxu0 %v5062_v35  ;;  %v4700_v35 = vld [vmem:[%s8234_s1 + $0xbe8] sm:$0xff]  ;;  %v5084_v37 = vpack.c.bf16 %v4697_v34, %v4695_v33  ;;  %v1386_v34 = vld [vmem:[%s8237_s4 + $0xa0] sm:$0xff] }
 0x173   : > { %v5086_v39 = vpack.c.bf16 %v4702_v36, %v4700_v35  ;;  %v1387_v35 = vld [vmem:[%s8237_s4 + $0xa8] sm:$0xff]  ;;  %v1454_v36 = vand.u32 4294901760, %v1386_v34 }
 0x175   : > { %5065 = vmatpush1.bf16.msra.mxu0 %v5064_v40  ;;  %v4701_v40 = vld [vmem:[%s8234_s1 + $0xbf0] sm:$0xff] }
 0x176   : > { %5067 = vmatprep.subr.bf16.mxu0 %v5066_v45  ;;  %v1210_v45 = vld [vmem:[%s5917_s28 + $0x10] sm:$0xe0]  ;;  %v5088_v52 = vpack.c.bf16 %v4701_v40, %v4699_v38  ;;  %s274_s28 = scalar_lea.vmem %s8240_s7, %s8354_s25 }
 0x177   : > { %v1268_v53 = vrot.slane %v1210_v45, 5  ;;  %v1388_v38 = vld [vmem:[%s8237_s4 + $0xb0] sm:$0xff] }
 0x178   : > { %v1460_v45 = vand.u32 4294901760, %v1388_v38 }
 0x179   : > { %5069 = vmatpush1.bf16.msra.mxu0 %v5068_v58  ;;  %v1270_v58 = vsel %vm1267_vm3, %v1268_v53, %v1269_v57  ;;  %v7234_v57 = vsub.f32 %v1379_v61, %v1433_v2 }
 0x17a   : > { %5071 = vmatprep.subr.bf16.mxu0 %v5070_v60  ;;  %v1378_v60 = vld [vmem:[%s8237_s4 + $0x60] sm:$0xff] }
 0x17b   : > { %v1430_v1 = vand.u32 4294901760, %v1378_v60  ;;  %v8249_v32 = vand.u32 4294901760, %v7234_v57 }
 0x17d   : > { %5073 = vmatpush1.bf16.msra.mxu0 %v5072_v6  ;;  %v7178_v5 = vpack.c.bf16 %v1433_v2, %v1430_v1  ;;  %v1380_v6 = vld [vmem:[%s8237_s4 + $0x70] sm:$0xff]  ;;  %v7232_v53 = vsub.f32 %v1378_v60, %v1430_v1  ;;  %v1592_v22 = vsub.f32 %v7234_v57, %v8249_v32 }
 0x17e   : > { %5075 = vmatprep.subr.bf16.mxu0 %v5074_v7  ;;  %v1381_v7 = vld [vmem:[%s8237_s4 + $0x78] sm:$0xff]  ;;  %v1436_v8 = vand.u32 4294901760, %v1380_v6 }
 0x17f   : > { %5110 = vmatpush1.bf16.msra.mxu1 %v7178_v5  ;;  %v1439_v12 = vand.u32 4294901760, %v1381_v7  ;;  %v1593_v1 = vand.u32 4294901760, %v1592_v22 }
 0x180   : > { %5111 = vmatprep.subr.bf16.mxu1 %v8246_v47  ;;  %v7244_v21 = vsub.f32 %v1380_v6, %v1436_v8 }
 0x181   : > { %5077 = vmatpush1.bf16.msra.mxu0 %v5076_v17  ;;  %v7188_v13 = vpack.c.bf16 %v1439_v12, %v1436_v8  ;;  %v1383_v17 = vld [vmem:[%s8237_s4 + $0x88] sm:$0xff]  ;;  %v7246_v11 = vsub.f32 %v1381_v7, %v1439_v12 }
 0x182   : > { %5079 = vmatprep.subr.bf16.mxu0 %v5078_v18  ;;  %v1442_v18 = vand.u32 4294901760, %v1382_v16  ;;  %v1445_v19 = vand.u32 4294901760, %v1383_v17  ;;  %v8250_v61 = vand.u32 4294901760, %v7244_v21 }
 0x183   : > { %5113 = vmatpush1.bf16.msra.mxu1 %v7188_v13  ;;  %v8260_v2 = vand.u32 4294901760, %v7246_v11 }
 0x184   : > { %5114 = vmatprep.subr.bf16.mxu1 %v8246_v47  ;;  %v7198_v23 = vpack.c.bf16 %v1445_v19, %v1442_v18  ;;  %v7258_v6 = vsub.f32 %v1382_v16, %v1442_v18  ;;  %v7260_v7 = vsub.f32 %v1383_v17, %v1445_v19 }
 0x185   : > { %5081 = vmatpush1.bf16.msra.mxu0 %v5080_v28  ;;  %v1448_v28 = vand.u32 4294901760, %v1384_v24  ;;  %v1606_v32 = vsub.f32 %v7246_v11, %v8260_v2 }
 0x186   : > { %5083 = vmatprep.subr.bf16.mxu0 %v5082_v29  ;;  %v1451_v29 = vand.u32 4294901760, %v1385_v27  ;;  %v8259_v8 = vand.u32 4294901760, %v7258_v6  ;;  %v8252_v12 = vand.u32 4294901760, %v7260_v7 }
 0x187   : > { %5116 = vmatpush1.bf16.msra.mxu1 %v7198_v23  ;;  %v1607_v22 = vand.u32 4294901760, %v1606_v32 }
 0x188   : > { %5117 = vmatprep.subr.bf16.mxu1 %v8246_v47  ;;  %v7208_v33 = vpack.c.bf16 %v1451_v29, %v1448_v28  ;;  %v7271_v10 = vsub.f32 %v1385_v27, %v1451_v29  ;;  %v1620_v16 = vsub.f32 %v7260_v7, %v8252_v12  ;;  %v7284_v27 = vsub.f32 %v1386_v34, %v1454_v36 }
 0x189   : > { %5085 = vmatpush1.bf16.msra.mxu0 %v5084_v37  ;;  %v1457_v37 = vand.u32 4294901760, %v1387_v35 }
 0x18a   : > { %5087 = vmatprep.subr.bf16.mxu0 %v5086_v39  ;;  %v1389_v39 = vld [vmem:[%s8237_s4 + $0xb8] sm:$0xff]  ;;  %8291 = vst [vmem:[#allocation3_spill] sm:$0xff] %v7271_v10  ;;  %v8258_v18 = vand.u32 4294901760, %v7271_v10  ;;  %v1621_v19 = vand.u32 4294901760, %v1620_v16  ;;  %8292 = vst [vmem:[#allocation4_spill] sm:$0xff] %v7284_v27 }
 0x18b   : > { %5119 = vmatpush1.bf16.msra.mxu1 %v7208_v33  ;;  %v7224_v40 = vpack.c.bf16 %v1457_v37, %v1454_v36  ;;  %v1463_v46 = vand.u32 4294901760, %v1389_v39 }
 0x18c   : > { %5120 = vmatprep.subr.bf16.mxu1 %v8246_v47 }
 0x18d   : > { %5089 = vmatpush1.bf16.msra.mxu0 %v5088_v52  ;;  %v7227_v52 = vpack.c.bf16 %v1463_v46, %v1460_v45  ;;  %v7302_v36 = vsub.f32 %v1389_v39, %v1463_v46  ;;  %v7318_v46 = vpack.c.bf16 %v7234_v57, %v7232_v53 }
 0x18f   : > { %5122 = vmatpush1.bf16.msra.mxu1 %v7224_v40  ;;  %8295 = vst [vmem:[#allocation7_spill] sm:$0xff] %v7302_v36 }
 0x190   : > { %1342 = vmatmul.mubr.f32.vlgmr.msra.gmra.mrb[0].mxu0 %v1270_v58  ;;  %5123 = vmatprep.subr.bf16.mxu1 %v8246_v47  ;;  %v8248_v58 = vand.u32 4294901760, %v7232_v53 }
 0x192   : > { %v1585_v31 = vsub.f32 %v7232_v53, %v8248_v58  ;;  %v1599_v58 = vsub.f32 %v7244_v21, %v8250_v61  ;;  %v7269_v61 = vsub.f32 %v1384_v24, %v1448_v28  ;;  %v1634_v24 = vsub.f32 %v7271_v10, %v8258_v18 }
 0x193   : > { %5125 = vmatpush1.bf16.msra.mxu1 %v7227_v52  ;;  %v7286_v28 = vsub.f32 %v1387_v35, %v1457_v37  ;;  %v7300_v35 = vsub.f32 %v1388_v38, %v1460_v45 }
 0x194   : > { %5126 = vmatprep.subr.bf16.mxu1 %v8246_v47  ;;  %v1586_v60 = vand.u32 4294901760, %v1585_v31  ;;  %v1600_v31 = vand.u32 4294901760, %v1599_v58  ;;  %8290 = vst [vmem:[#allocation2_spill] sm:$0xff] %v7269_v61  ;;  %v8253_v32 = vand.u32 4294901760, %v7269_v61 }
 0x195   : > { %8293 = vst [vmem:[#allocation5_spill] sm:$0xff] %v7286_v28  ;;  %v8256_v16 = vand.u32 4294901760, %v7286_v28  ;;  %8294 = vst [vmem:[#allocation6_spill] sm:$0xff] %v7300_v35 }
 0x196   : > { %v7250_v47 = vpack.c.bf16 %v1593_v1, %v1586_v60  ;;  %v7264_v60 = vpack.c.bf16 %v1607_v22, %v1600_v31  ;;  %v1613_v1 = vsub.f32 %v7258_v6, %v8259_v8  ;;  %v1627_v58 = vsub.f32 %v7269_v61, %v8253_v32 }
 0x197   : > { %v1635_v22 = vand.u32 4294901760, %v1634_v24  ;;  %v1648_v34 = vsub.f32 %v7286_v28, %v8256_v16 }
 0x198   : > { %v1614_v17 = vand.u32 4294901760, %v1613_v1  ;;  %v1628_v31 = vand.u32 4294901760, %v1627_v58  ;;  %v8257_v1 = vand.u32 4294901760, %v7284_v27  ;;  %v8254_v58 = vand.u32 4294901760, %v7302_v36 }
 0x19a   : > { %v7288_v29 = vpack.c.bf16 %v1621_v19, %v1614_v17  ;;  %v7292_v12 = vpack.c.bf16 %v1635_v22, %v1628_v31  ;;  %v1641_v32 = vsub.f32 %v7284_v27, %v8257_v1  ;;  %v1649_v17 = vand.u32 4294901760, %v1648_v34 }
 0x19b   : > { %v8255_v19 = vand.u32 4294901760, %v7300_v35  ;;  %v1662_v22 = vsub.f32 %v7302_v36, %v8254_v58  ;;  %v7326_v34 = vpack.c.bf16 %v7260_v7, %v7258_v6 }
 0x19c   : > { %v1642_v37 = vand.u32 4294901760, %v1641_v32  ;;  %v7322_v32 = vpack.c.bf16 %v7246_v11, %v7244_v21 }
 0x19d   : > { %v1655_v31 = vsub.f32 %v7300_v35, %v8255_v19  ;;  %v1663_v45 = vand.u32 4294901760, %v1662_v22 }
 0x19e   : > { %v7306_v24 = vpack.c.bf16 %v1649_v17, %v1642_v37  ;;  %v7330_v37 = vpack.c.bf16 %v7271_v10, %v7269_v61  ;;  %v7334_v17 = vpack.c.bf16 %v7286_v28, %v7284_v27  ;;  %v8308_v61 = vand.u32 4294901760, %v6784_v14 }
 0x19f   : > { %v1656_v38 = vand.u32 4294901760, %v1655_v31  ;;  %v7338_v31 = vpack.c.bf16 %v7302_v36, %v7300_v35 }
 0x1a1   : > { %v7314_v39 = vpack.c.bf16 %v1663_v45, %v1656_v38  ;;  %8296 = vst [vmem:[#allocation8_spill] sm:$0xff] %v7338_v31 }
 0x263   : > { %v7340_v22 = vpop.f32.mrb[0].mxu0 }
 0x264   : > { %8297 = vst [vmem:[#allocation9_spill] sm:$0xff] %v7340_v22  ;;  %v1351_v38 = vsel %vm1350_vm4, %v7340_v22, 0.0  ;;  %v7344_v45 = vpop.f32.mrb[1].mxu0 }
 0x265   : > { %8298 = vst [vmem:[#allocation10_spill] sm:$0xff] %v7344_v45  ;;  %v1352_v58 = vrot.slane %v1351_v38, 4  ;;  %v1359_v19 = vsel %vm1358_vm5, %v7344_v45, 0.0  ;;  %v8299_v45 = vand.u32 4294901760, %v6693_v44 }
 0x266   : > { %v1360_v16 = vrot.slane %v1359_v19, 4 }
 0x267   : > { %v1353_v1 = vadd.f32 %v1352_v58, %v1351_v38  ;;  %v7361_v58 = vsub.f32 %v6693_v44, %v8299_v45  ;;  %v8301_v38 = vand.u32 4294901760, %v6714_v55 }
 0x268   : > { %v1361_v18 = vadd.f32 %v1360_v16, %v1359_v19  ;;  %v8300_v16 = vand.u32 4294901760, %v6704_v50  ;;  %v8270_v19 = vand.u32 4294901760, %v7356_v54 }
 0x269   : > { %v1354_v8 = vrot.slane %v1353_v1, 2 }
 0x26a   : > { %v1362_v2 = vrot.slane %v1361_v18, 2 }
 0x26b   : > { %v1355_v0 = vadd.f32 %v1354_v8, %v1353_v1  ;;  %v7366_v8 = vsub.f32 %v6704_v50, %v8300_v16  ;;  %v7378_v50 = vsub.f32 %v6714_v55, %v8301_v38  ;;  %v1501_v16 = vsub.f32 %v7351_v63, %v8269_v48 }
 0x26c   : > { %v1363_v51 = vadd.f32 %v1362_v2, %v1361_v18  ;;  %v8271_v2 = vand.u32 4294901760, %v7361_v58  ;;  %v8303_v48 = vand.u32 4294901760, %v6752_v3 }
 0x26d   : > { %v1356_v22 = vrot.slane %v1355_v0, 1  ;;  %v8274_v18 = vand.u32 4294901760, %v7366_v8  ;;  %v1502_v36 = vand.u32 4294901760, %v1501_v16 }
 0x26e   : > { %v1364_v1 = vrot.slane %v1363_v51, 1 }
 0x26f   : > { %v1357_v42 = vadd.f32 %v1356_v22, %v1355_v0  ;;  %v8302_v0 = vand.u32 4294901760, %v6719_v56 }
 0x270   : > { %v1365_v43 = vadd.f32 %v1364_v1, %v1363_v51  ;;  %v1508_v1 = vsub.f32 %v7356_v54, %v8270_v19  ;;  %v7411_v19 = vsub.f32 %v6752_v3, %v8303_v48  ;;  %v8306_v48 = vand.u32 4294901760, %v7378_v50 }
 0x271   : > { %v7370_v49 = vand.u32 4294901760, %v1357_v42  ;;  %v7383_v22 = vsub.f32 %v6719_v56, %v8302_v0  ;;  %v1515_v56 = vsub.f32 %v7361_v58, %v8271_v2 }
 0x272   : > { %v1391_v44 = vsel %vm381_vm0, %v1365_v43, 0  ;;  %v1509_v35 = vand.u32 4294901760, %v1508_v1  ;;  %v1529_v27 = vsub.f32 %v7378_v50, %v8306_v48 }
 0x273   : > { %v7385_v45 = vand.u32 4294901760, %v1391_v44  ;;  %v7388_v51 = vsub.f32 %v1357_v42, %v7370_v49  ;;  %v1522_v42 = vsub.f32 %v7366_v8, %v8274_v18  ;;  %v1516_v28 = vand.u32 4294901760, %v1515_v56 }
 0x274   : > { %v7438_v56 = vsub.f32 %v6784_v14, %v8308_v61  ;;  %v1530_v16 = vand.u32 4294901760, %v1529_v27  ;;  %v8312_v61 = vand.u32 4294901760, %v6816_v25 }
 0x275   : > { %v7397_v55 = vsub.f32 %v1391_v44, %v7385_v45  ;;  %v8304_v44 = vand.u32 4294901760, %v6757_v4  ;;  %v8305_v18 = vand.u32 4294901760, %v7388_v51  ;;  %v1523_v3 = vand.u32 4294901760, %v1522_v42 }
 0x276   : > { %v8309_v42 = vand.u32 4294901760, %v6789_v15  ;;  %v7460_v27 = vsub.f32 %v6816_v25, %v8312_v61 }
 0x277   : > { %v7416_v43 = vsub.f32 %v6757_v4, %v8304_v44  ;;  %v8279_v2 = vand.u32 4294901760, %v7397_v55  ;;  %v1490_v38 = vsub.f32 %v7388_v51, %v8305_v18  ;;  %v8307_v4 = vand.u32 4294901760, %v7383_v22 }
 0x278   : > { %v7433_v18 = vpack.c.bf16 %v1509_v35, %v1502_v36  ;;  %v7443_v48 = vsub.f32 %v6789_v15, %v8309_v42  ;;  %v8310_v35 = vand.u32 4294901760, %v7411_v19  ;;  %v8283_v15 = vand.u32 4294901760, %v7438_v56 }
 0x279   : > { %v1484_v0 = vsub.f32 %v7397_v55, %v8279_v2  ;;  %v1536_v44 = vsub.f32 %v7383_v22, %v8307_v4  ;;  %v1491_v2 = vand.u32 4294901760, %v1490_v38  ;;  %v7445_v4 = vpack.c.bf16 %v1523_v3, %v1516_v28 }
 0x27a   : > { %v1543_v36 = vsub.f32 %v7411_v19, %v8310_v35  ;;  %v8313_v28 = vand.u32 4294901760, %v6821_v26  ;;  %v8314_v38 = vmov 0.0|0.0   ;;  %v1557_v35 = vsub.f32 %v7438_v56, %v8283_v15 }
 0x27b   : > { %v1485_v10 = vand.u32 4294901760, %v1484_v0  ;;  %v1537_v1 = vand.u32 4294901760, %v1536_v44  ;;  %v8311_v0 = vand.u32 4294901760, %v7416_v43  ;;  %v8320_v15 = vand.u32 4294901760, %v7366_v8 }
 0x27c   : > { %v1544_v44 = vand.u32 4294901760, %v1543_v36 }
 0x27d   : > { %1486 = vmatprep.mubr.f32.mxu1 %v1485_v10  ;;  %v1550_v14 = vsub.f32 %v7416_v43, %v8311_v0  ;;  %v8282_v10 = vand.u32 4294901760, %v7443_v48  ;;  %v7468_v3 = vpack.c.bf16 %v1537_v1, %v1530_v16  ;;  %v8281_v0 = vand.u32 4294901760, %v7460_v27 }
 0x27e   : > { %1492 = vmatmul.mubr.f32.vlgmr.msra.gmra.mrb[0].mxu1 %v1491_v2  ;;  %v7465_v2 = vsub.f32 %v6821_v26, %v8313_v28  ;;  %v1558_v1 = vand.u32 4294901760, %v1557_v35 }
 0x27f   : > { %5128 = vmatpush1.bf16.msra.mxu1 %v7433_v18  ;;  %1682 = vmatprep.mubr.f32.mxu1 %v7385_v45  ;;  %v1551_v42 = vand.u32 4294901760, %v1550_v14  ;;  %v1564_v25 = vsub.f32 %v7443_v48, %v8282_v10  ;;  %v1571_v14 = vsub.f32 %v7460_v27, %v8281_v0  ;;  %v8318_v0 = vand.u32 4294901760, %v7388_v51 }
 0x280   : > { %5129 = vmatprep.subr.bf16.mxu1 %v8314_v38  ;;  %v8280_v26 = vand.u32 4294901760, %v7465_v2  ;;  %v8319_v10 = vand.u32 4294901760, %v7361_v58 }
 0x281   : > { %v7480_v16 = vpack.c.bf16 %v1551_v42, %v1544_v44  ;;  %v1565_v36 = vand.u32 4294901760, %v1564_v25  ;;  %v1572_v44 = vand.u32 4294901760, %v1571_v14  ;;  %v7513_v25 = vpack.c.bf16 %v7356_v54, %v7351_v63 }
 0x282   : > { %v1578_v61 = vsub.f32 %v7465_v2, %v8280_v26  ;;  %v7533_v14 = vpack.c.bf16 %v7416_v43, %v7411_v19 }
 0x283   : > { %5131 = vmatpush1.bf16.msra.mxu1 %v7445_v4  ;;  %v7491_v28 = vpack.c.bf16 %v1565_v36, %v1558_v1  ;;  %v7521_v1 = vpack.c.bf16 %v7366_v8, %v7361_v58  ;;  %v7527_v36 = vpack.c.bf16 %v7383_v22, %v7378_v50  ;;  %v8323_v58 = vand.u32 4294901760, %v7411_v19 }
 0x284   : > { %5132 = vmatprep.subr.bf16.mxu1 %v8314_v38  ;;  %v1579_v42 = vand.u32 4294901760, %v1578_v61  ;;  %v7539_v61 = vpack.c.bf16 %v7443_v48, %v7438_v56  ;;  %v8324_v8 = vand.u32 4294901760, %v7416_v43  ;;  %v8327_v19 = vand.u32 4294901760, %v7460_v27 }
 0x285   : > { %v8328_v43 = vand.u32 4294901760, %v7465_v2 }
 0x286   : > { %v7495_v35 = vpack.c.bf16 %v1579_v42, %v1572_v44  ;;  %v7545_v44 = vpack.c.bf16 %v7465_v2, %v7460_v27  ;;  %v8315_v42 = vand.u32 4294901760, %v7397_v55  ;;  %v8331_v27 = vand.u32 4294901760, %v7244_v21 }
 0x287   : > { %5134 = vmatpush1.bf16.msra.mxu1 %v7468_v3  ;;  %v8332_v2 = vand.u32 4294901760, %v7246_v11 }
 0x288   : > { %5135 = vmatprep.subr.bf16.mxu1 %v8314_v38 }
 0x28b   : > { %5137 = vmatpush1.bf16.msra.mxu1 %v7480_v16 }
 0x28c   : > { %5138 = vmatprep.subr.bf16.mxu1 %v8314_v38 }
 0x28f   : > { %5140 = vmatpush1.bf16.msra.mxu1 %v7491_v28 }
 0x290   : > { %5141 = vmatprep.subr.bf16.mxu1 %v8314_v38 }
 0x293   : > { %5143 = vmatpush1.bf16.msra.mxu1 %v7495_v35 }
 0x294   : > { %5144 = vmatprep.subr.bf16.mxu1 %v8314_v38 }
 0x297   : > { %5146 = vmatpush1.bf16.msra.mxu1 %v7250_v47 }
 0x298   : > { %5147 = vmatprep.subr.bf16.mxu1 %v8314_v38 }
 0x29b   : > { %5149 = vmatpush1.bf16.msra.mxu1 %v7264_v60 }
 0x29c   : > { %5150 = vmatprep.subr.bf16.mxu1 %v8314_v38 }
 0x29f   : > { %5152 = vmatpush1.bf16.msra.mxu1 %v7288_v29 }
 0x2a0   : > { %5153 = vmatprep.subr.bf16.mxu1 %v8314_v38 }
 0x2a3   : > { %5155 = vmatpush1.bf16.msra.mxu1 %v7292_v12 }
 0x2a4   : > { %5156 = vmatprep.subr.bf16.mxu1 %v8314_v38 }
 0x2a7   : > { %5158 = vmatpush1.bf16.msra.mxu1 %v7306_v24 }
 0x2a8   : > { %5159 = vmatprep.subr.bf16.mxu1 %v8314_v38 }
 0x2ab   : > { %5161 = vmatpush1.bf16.msra.mxu1 %v7314_v39 }
 0x2ac   : > { %5162 = vmatprep.subr.bf16.mxu1 %v8314_v38 }
 0x2ae   : > { %1684 = vmatmul.mubr.f32.vlgmr.msra.gmra.mrb[0].mxu1 %v7370_v49 }
 0x2af   : > { %5164 = vmatpush1.bf16.msra.mxu1 %v7513_v25  ;;  %1803 = vmatprep.mubr.f32.mxu1 %v7397_v55  ;;  %v8316_v55 = vand.u32 4294901760, %v7351_v63  ;;  %v8322_v63 = vand.u32 4294901760, %v7383_v22  ;;  %v8326_v22 = vand.u32 4294901760, %v7443_v48  ;;  %v8330_v48 = vand.u32 4294901760, %v7234_v57 }
 0x2b0   : > { %5165 = vmatprep.subr.bf16.mxu1 %v8314_v38  ;;  %v8334_v57 = vand.u32 4294901760, %v7260_v7 }
 0x2b3   : > { %5167 = vmatpush1.bf16.msra.mxu1 %v7521_v1 }
 0x2b4   : > { %5168 = vmatprep.subr.bf16.mxu1 %v8314_v38 }
 0x2b7   : > { %5170 = vmatpush1.bf16.msra.mxu1 %v7527_v36 }
 0x2b8   : > { %5171 = vmatprep.subr.bf16.mxu1 %v8314_v38 }
 0x2bb   : > { %5173 = vmatpush1.bf16.msra.mxu1 %v7533_v14 }
 0x2bc   : > { %5174 = vmatprep.subr.bf16.mxu1 %v8314_v38 }
 0x2bf   : > { %5176 = vmatpush1.bf16.msra.mxu1 %v7539_v61 }
 0x2c0   : > { %5177 = vmatprep.subr.bf16.mxu1 %v8314_v38 }
 0x2c3   : > { %5179 = vmatpush1.bf16.msra.mxu1 %v7545_v44 }
 0x2c4   : > { %5180 = vmatprep.subr.bf16.mxu1 %v8314_v38 }
 0x2c7   : > { %5182 = vmatpush1.bf16.msra.mxu1 %v7318_v46 }
 0x2c8   : > { %5183 = vmatprep.subr.bf16.mxu1 %v8314_v38 }
 0x2cb   : > { %5185 = vmatpush1.bf16.msra.mxu1 %v7322_v32 }
 0x2cc   : > { %5186 = vmatprep.subr.bf16.mxu1 %v8314_v38 }
 0x2cf   : > { %5188 = vmatpush1.bf16.msra.mxu1 %v7326_v34 }
 0x2d0   : > { %5189 = vmatprep.subr.bf16.mxu1 %v8314_v38 }
 0x2d3   : > { %5191 = vmatpush1.bf16.msra.mxu1 %v7330_v37 }
 0x2d4   : > { %5192 = vmatprep.subr.bf16.mxu1 %v8314_v38 }
 0x2d7   : > { %5194 = vmatpush1.bf16.msra.mxu1 %v7334_v17 }
 0x2d8   : > { %5195 = vmatprep.subr.bf16.mxu1 %v8314_v38 }
 0x2db   : > { %5197 = vmatpush1.bf16.msra.mxu1 %v7338_v31  ;;  %v7603_v31 = vpack.c.bf16 %v8320_v15, %v8319_v10  ;;  %v7619_v15 = vpack.c.bf16 %v8324_v8, %v8323_v58  ;;  %v8337_v58 = vld [vmem:[#allocation3_spill] sm:$0xff] }
 0x2dc   : > { %5198 = vmatprep.subr.bf16.mxu1 %v8314_v38  ;;  %v8338_v11 = vand.u32 4294901760, %v8337_v58 }
 0x2de   : > { %1806 = vmatmul.mubr.f32.vlgmr.msra.gmra.mrb[0].mxu1 %v7388_v51 }
 0x2df   : > { %5200 = vmatpush1.bf16.msra.mxu1 %v6731_v59  ;;  %1902 = vmatprep.mubr.f32.mxu1 %v8315_v42  ;;  %v8317_v42 = vand.u32 4294901760, %v7356_v54  ;;  %v8321_v54 = vand.u32 4294901760, %v7378_v50  ;;  %v8325_v50 = vand.u32 4294901760, %v7438_v56  ;;  %v8329_v56 = vand.u32 4294901760, %v7232_v53 }
 0x2e0   : > { %5201 = vmatprep.subr.bf16.mxu1 %v8314_v38  ;;  %v8333_v53 = vand.u32 4294901760, %v7258_v6 }
 0x2e1   : > { %v7592_v26 = vpack.c.bf16 %v8317_v42, %v8316_v55  ;;  %v7611_v51 = vpack.c.bf16 %v8322_v63, %v8321_v54  ;;  %v7627_v10 = vpack.c.bf16 %v8326_v22, %v8325_v50  ;;  %v7643_v55 = vpack.c.bf16 %v8330_v48, %v8329_v56  ;;  %v8335_v63 = vld [vmem:[#allocation2_spill] sm:$0xff]  ;;  %v8339_v50 = vld [vmem:[#allocation4_spill] sm:$0xff]  ;;  %v8341_v22 = vld [vmem:[#allocation5_spill] sm:$0xff] }
 0x2e2   : > { %v7651_v42 = vpack.c.bf16 %v8332_v2, %v8331_v27  ;;  %v7659_v54 = vpack.c.bf16 %v8334_v57, %v8333_v53  ;;  %v8336_v21 = vand.u32 4294901760, %v8335_v63  ;;  %v8340_v6 = vand.u32 4294901760, %v8339_v50  ;;  %v8345_v48 = vld [vmem:[#allocation7_spill] sm:$0xff]  ;;  %v8347_v53 = vld [vmem:[#allocation10_spill] sm:$0xff] }
 0x2e3   : > { %5203 = vmatpush1.bf16.msra.mxu1 %v6741_v62  ;;  %v8342_v7 = vand.u32 4294901760, %v8341_v22  ;;  %v8346_v27 = vand.u32 4294901760, %v8345_v48  ;;  %v2152_v57 = vmul.f32 %v8347_v53, %v8347_v53 }
 0x2e4   : > { %5204 = vmatprep.subr.bf16.mxu1 %v8314_v38  ;;  %v7667_v8 = vpack.c.bf16 %v8338_v11, %v8336_v21 }
 0x2e5   : > { %v2160_v63 = vsel %vm1358_vm5, %v2152_v57, 0.0 }
 0x2e6   : > { %v2161_v21 = vrot.slane %v2160_v63, 4 }
 0x2e7   : > { %5206 = vmatpush1.bf16.msra.mxu1 %v6773_v9 }
 0x2e8   : > { %5207 = vmatprep.subr.bf16.mxu1 %v8314_v38  ;;  %v2162_v58 = vadd.f32 %v2161_v21, %v2160_v63 }
 0x2ea   : > { %v2163_v11 = vrot.slane %v2162_v58, 2 }
 0x2eb   : > { %5209 = vmatpush1.bf16.msra.mxu1 %v6805_v20 }
 0x2ec   : > { %5210 = vmatprep.subr.bf16.mxu1 %v8314_v38  ;;  %v2164_v50 = vadd.f32 %v2163_v11, %v2162_v58 }
 0x2ef   : > { %5212 = vmatpush1.bf16.msra.mxu1 %v6834_v30 }
 0x2f0   : > { %5213 = vmatprep.subr.bf16.mxu1 %v8314_v38 }
 0x2f3   : > { %5215 = vmatpush1.bf16.msra.mxu1 %v6862_v41 }
 0x2f4   : > { %5216 = vmatprep.subr.bf16.mxu1 %v8314_v38 }
 0x2f7   : > { %5218 = vmatpush1.bf16.msra.mxu1 %v7178_v5 }
 0x2f8   : > { %5219 = vmatprep.subr.bf16.mxu1 %v8314_v38 }
 0x2fb   : > { %5221 = vmatpush1.bf16.msra.mxu1 %v7188_v13 }
 0x2fc   : > { %5222 = vmatprep.subr.bf16.mxu1 %v8314_v38 }
 0x2ff   : > { %5224 = vmatpush1.bf16.msra.mxu1 %v7198_v23 }
 0x300   : > { %5225 = vmatprep.subr.bf16.mxu1 %v8314_v38 }
 0x303   : > { %5227 = vmatpush1.bf16.msra.mxu1 %v7208_v33 }
 0x304   : > { %5228 = vmatprep.subr.bf16.mxu1 %v8314_v38 }
 0x307   : > { %5230 = vmatpush1.bf16.msra.mxu1 %v7224_v40 }
 0x308   : > { %5231 = vmatprep.subr.bf16.mxu1 %v8314_v38 }
 0x30b   : > { %5233 = vmatpush1.bf16.msra.mxu1 %v7227_v52 }
 0x30c   : > { %5234 = vmatprep.subr.bf16.mxu1 %v8314_v38 }
 0x30e   : > { %1906 = vmatmul.mubr.f32.vlgmr.msra.gmra.mrb[0].mxu1 %v8318_v0  ;;  %v7635_v0 = vpack.c.bf16 %v8328_v43, %v8327_v19  ;;  %v7675_v19 = vpack.c.bf16 %v8342_v7, %v8340_v6  ;;  %v8343_v43 = vld [vmem:[#allocation6_spill] sm:$0xff] }
 0x30f   : > { %5236 = vmatpush1.bf16.msra.mxu1 %v7592_v26  ;;  %2048 = vmatprep.mubr.f32.mxu1 %v7385_v45  ;;  %v8344_v56 = vand.u32 4294901760, %v8343_v43 }
 0x310   : > { %5237 = vmatprep.subr.bf16.mxu1 %v8314_v38 }
 0x311   : > { %v7683_v2 = vpack.c.bf16 %v8346_v27, %v8344_v56  ;;  %v8348_v27 = vld [vmem:[#allocation9_spill] sm:$0xff] }
 0x312   : > { %v2151_v57 = vmul.f32 %v8348_v27, %v8348_v27 }
 0x313   : > { %5239 = vmatpush1.bf16.msra.mxu1 %v7603_v31 }
 0x314   : > { %5240 = vmatprep.subr.bf16.mxu1 %v8314_v38  ;;  %v2153_v21 = vsel %vm1350_vm4, %v2151_v57, 0.0 }
 0x315   : > { %v2154_v58 = vrot.slane %v2153_v21, 4 }
 0x317   : > { %5242 = vmatpush1.bf16.msra.mxu1 %v7611_v51  ;;  %v2155_v11 = vadd.f32 %v2154_v58, %v2153_v21 }
 0x318   : > { %5243 = vmatprep.subr.bf16.mxu1 %v8314_v38 }
 0x31b   : > { %5245 = vmatpush1.bf16.msra.mxu1 %v7619_v15 }
 0x31c   : > { %5246 = vmatprep.subr.bf16.mxu1 %v8314_v38 }
 0x31f   : > { %5248 = vmatpush1.bf16.msra.mxu1 %v7627_v10 }
 0x320   : > { %5249 = vmatprep.subr.bf16.mxu1 %v8314_v38 }
 0x323   : > { %5251 = vmatpush1.bf16.msra.mxu1 %v7635_v0 }
 0x324   : > { %5252 = vmatprep.subr.bf16.mxu1 %v8314_v38 }
 0x327   : > { %5254 = vmatpush1.bf16.msra.mxu1 %v7643_v55 }
 0x328   : > { %5255 = vmatprep.subr.bf16.mxu1 %v8314_v38 }
 0x32b   : > { %5257 = vmatpush1.bf16.msra.mxu1 %v7651_v42 }
 0x32c   : > { %5258 = vmatprep.subr.bf16.mxu1 %v8314_v38 }
 0x32f   : > { %5260 = vmatpush1.bf16.msra.mxu1 %v7659_v54 }
 0x330   : > { %5261 = vmatprep.subr.bf16.mxu1 %v8314_v38 }
 0x333   : > { %5263 = vmatpush1.bf16.msra.mxu1 %v7667_v8 }
 0x334   : > { %5264 = vmatprep.subr.bf16.mxu1 %v8314_v38 }
 0x337   : > { %5266 = vmatpush1.bf16.msra.mxu1 %v7675_v19 }
 0x338   : > { %5267 = vmatprep.subr.bf16.mxu1 %v8314_v38 }
 0x33b   : > { %5269 = vmatpush1.bf16.msra.mxu1 %v7683_v2 }
 0x33c   : > { %5270 = vmatprep.subr.bf16.mxu1 %v8314_v38 }
 0x33e   : > { %2050 = vmatmul.mubr.f32.vlgmr.msra.gmra.mrb[0].mxu1 %v7370_v49 }
 0x33f   : > { %5272 = vmatpush1.bf16.msra.mxu1 %v6731_v59  ;;  %2144 = vmatprep.mubr.f32.mxu1 %v7385_v45  ;;  %v2165_v45 = vrot.slane %v2164_v50, 1 }
 0x340   : > { %5273 = vmatprep.subr.bf16.mxu1 %v8314_v38 }
 0x341   : > { %v2166_v6 = vadd.f32 %v2165_v45, %v2164_v50 }
 0x343   : > { %5275 = vmatpush1.bf16.msra.mxu1 %v6741_v62  ;;  %v2168_v22 = vsel %vm381_vm0, %v2166_v6, 0 }
 0x344   : > { %5276 = vmatprep.subr.bf16.mxu1 %v8314_v38  ;;  %v7710_v7 = vand.u32 4294901760, %v2168_v22 }
 0x346   : > { %v7715_v43 = vsub.f32 %v2168_v22, %v7710_v7 }
 0x347   : > { %5278 = vmatpush1.bf16.msra.mxu1 %v6773_v9 }
 0x348   : > { %5279 = vmatprep.subr.bf16.mxu1 %v8314_v38  ;;  %v2260_v56 = vand.u32 4294901760, %v7715_v43 }
 0x34a   : > { %v2261_v48 = vsub.f32 %v7715_v43, %v2260_v56 }
 0x34b   : > { %5281 = vmatpush1.bf16.msra.mxu1 %v6805_v20 }
 0x34c   : > { %5282 = vmatprep.subr.bf16.mxu1 %v8314_v38  ;;  %v2262_v63 = vand.u32 4294901760, %v2261_v48 }
 0x34f   : > { %5284 = vmatpush1.bf16.msra.mxu1 %v6834_v30 }
 0x350   : > { %5285 = vmatprep.subr.bf16.mxu1 %v8314_v38 }
 0x353   : > { %5287 = vmatpush1.bf16.msra.mxu1 %v6862_v41 }
 0x354   : > { %5288 = vmatprep.subr.bf16.mxu1 %v8314_v38 }
 0x357   : > { %5290 = vmatpush1.bf16.msra.mxu1 %v7178_v5 }
 0x358   : > { %5291 = vmatprep.subr.bf16.mxu1 %v8314_v38 }
 0x35b   : > { %5293 = vmatpush1.bf16.msra.mxu1 %v7188_v13 }
 0x35c   : > { %5294 = vmatprep.subr.bf16.mxu1 %v8314_v38 }
 0x35f   : > { %5296 = vmatpush1.bf16.msra.mxu1 %v7198_v23 }
 0x360   : > { %5297 = vmatprep.subr.bf16.mxu1 %v8314_v38 }
 0x363   : > { %5299 = vmatpush1.bf16.msra.mxu1 %v7208_v33 }
 0x364   : > { %5300 = vmatprep.subr.bf16.mxu1 %v8314_v38 }
 0x367   : > { %5302 = vmatpush1.bf16.msra.mxu1 %v7224_v40 }
 0x368   : > { %5303 = vmatprep.subr.bf16.mxu1 %v8314_v38 }
 0x36b   : > { %5305 = vmatpush1.bf16.msra.mxu1 %v7227_v52 }
 0x36c   : > { %5306 = vmatprep.subr.bf16.mxu1 %v8314_v38 }
 0x36e   : > { %2146 = vmatmul.mubr.f32.vlgmr.msra.gmra.mrb[0].mxu1 %v7370_v49  ;;  %v2156_v49 = vrot.slane %v2155_v11, 2 }
 0x36f   : > { %5308 = vmatpush1.bf16.msra.mxu1 %v6731_v59  ;;  %2263 = vmatprep.mubr.f32.mxu1 %v2262_v63 }
 0x370   : > { %5309 = vmatprep.subr.bf16.mxu1 %v8314_v38  ;;  %v2157_v50 = vadd.f32 %v2156_v49, %v2155_v11 }
 0x372   : > { %v2158_v45 = vrot.slane %v2157_v50, 1 }
 0x373   : > { %5311 = vmatpush1.bf16.msra.mxu1 %v6741_v62 }
 0x374   : > { %5312 = vmatprep.subr.bf16.mxu1 %v8314_v38  ;;  %v2159_v6 = vadd.f32 %v2158_v45, %v2157_v50 }
 0x376   : > { %v7746_v22 = vand.u32 4294901760, %v2159_v6 }
 0x377   : > { %5314 = vmatpush1.bf16.msra.mxu1 %v6773_v9 }
 0x378   : > { %5315 = vmatprep.subr.bf16.mxu1 %v8314_v38  ;;  %v7752_v48 = vsub.f32 %v2159_v6, %v7746_v22 }
 0x37a   : > { %v2266_v57 = vand.u32 4294901760, %v7752_v48 }
 0x37b   : > { %5317 = vmatpush1.bf16.msra.mxu1 %v6805_v20 }
 0x37c   : > { %5318 = vmatprep.subr.bf16.mxu1 %v8314_v38  ;;  %v2267_v63 = vsub.f32 %v7752_v48, %v2266_v57 }
 0x37e   : > { %v2268_v21 = vand.u32 4294901760, %v2267_v63 }
 0x37f   : > { %5320 = vmatpush1.bf16.msra.mxu1 %v6834_v30 }
 0x380   : > { %5321 = vmatprep.subr.bf16.mxu1 %v8314_v38 }
 0x383   : > { %5323 = vmatpush1.bf16.msra.mxu1 %v6862_v41 }
 0x384   : > { %5324 = vmatprep.subr.bf16.mxu1 %v8314_v38 }
 0x387   : > { %5326 = vmatpush1.bf16.msra.mxu1 %v7178_v5 }
 0x388   : > { %5327 = vmatprep.subr.bf16.mxu1 %v8314_v38 }
 0x38b   : > { %5329 = vmatpush1.bf16.msra.mxu1 %v7188_v13 }
 0x38c   : > { %5330 = vmatprep.subr.bf16.mxu1 %v8314_v38 }
 0x38f   : > { %5332 = vmatpush1.bf16.msra.mxu1 %v7198_v23 }
 0x390   : > { %5333 = vmatprep.subr.bf16.mxu1 %v8314_v38 }
 0x393   : > { %5335 = vmatpush1.bf16.msra.mxu1 %v7208_v33 }
 0x394   : > { %5336 = vmatprep.subr.bf16.mxu1 %v8314_v38 }
 0x397   : > { %5338 = vmatpush1.bf16.msra.mxu1 %v7224_v40 }
 0x398   : > { %5339 = vmatprep.subr.bf16.mxu1 %v8314_v38 }
 0x39b   : > { %5341 = vmatpush1.bf16.msra.mxu1 %v7227_v52 }
 0x39c   : > { %5342 = vmatprep.subr.bf16.mxu1 %v8314_v38 }
 0x39e   : > { %2269 = vmatmul.mubr.f32.vlgmr.msra.gmra.mrb[2].mxu1 %v2268_v21 }
 0x39f   : > { %5344 = vmatpush1.bf16.msra.mxu1 %v7433_v18  ;;  %2459 = vmatprep.mubr.f32.mxu1 %v7710_v7  ;;  %v2951_v18 = vld [vmem:[%s8238_s5 + $0x58] sm:$0xff] }
 0x3a0   : > { %5345 = vmatprep.subr.bf16.mxu1 %v8314_v38 }
 0x3a3   : > { %5347 = vmatpush1.bf16.msra.mxu1 %v7445_v4 }
 0x3a4   : > { %5348 = vmatprep.subr.bf16.mxu1 %v8314_v38 }
 0x3a7   : > { %5350 = vmatpush1.bf16.msra.mxu1 %v7468_v3  ;;  %v2948_v3 = vld [vmem:[%s8238_s5 + $0x40] sm:$0xff] }
 0x3a8   : > { %5351 = vmatprep.subr.bf16.mxu1 %v8314_v38 }
 0x3ab   : > { %5353 = vmatpush1.bf16.msra.mxu1 %v7480_v16  ;;  %v2977_v16 = vand.u32 4294901760, %v2948_v3 }
 0x3ac   : > { %5354 = vmatprep.subr.bf16.mxu1 %v8314_v38 }
 0x3af   : > { %5356 = vmatpush1.bf16.msra.mxu1 %v7491_v28 }
 0x3b0   : > { %5357 = vmatprep.subr.bf16.mxu1 %v8314_v38 }
 0x3b3   : > { %5359 = vmatpush1.bf16.msra.mxu1 %v7495_v35 }
 0x3b4   : > { %5360 = vmatprep.subr.bf16.mxu1 %v8314_v38 }
 0x3b7   : > { %5362 = vmatpush1.bf16.msra.mxu1 %v7250_v47  ;;  %v8349_v47 = vld [vmem:[#allocation8_spill] sm:$0xff] }
 0x3b8   : > { %5363 = vmatprep.subr.bf16.mxu1 %v8314_v38 }
 0x3bb   : > { %5365 = vmatpush1.bf16.msra.mxu1 %v7264_v60 }
 0x3bc   : > { %5366 = vmatprep.subr.bf16.mxu1 %v8314_v38 }
 0x3bf   : > { %5368 = vmatpush1.bf16.msra.mxu1 %v7288_v29 }
 0x3c0   : > { %5369 = vmatprep.subr.bf16.mxu1 %v8314_v38 }
 0x3c3   : > { %5371 = vmatpush1.bf16.msra.mxu1 %v7292_v12 }
 0x3c4   : > { %5372 = vmatprep.subr.bf16.mxu1 %v8314_v38 }
 0x3c7   : > { %5374 = vmatpush1.bf16.msra.mxu1 %v7306_v24 }
 0x3c8   : > { %5375 = vmatprep.subr.bf16.mxu1 %v8314_v38 }
 0x3cb   : > { %5377 = vmatpush1.bf16.msra.mxu1 %v7314_v39  ;;  %v2944_v39 = vld [vmem:[%s8238_s5 + $0x20] sm:$0xff] }
 0x3cc   : > { %5378 = vmatprep.subr.bf16.mxu1 %v8314_v38 }
 0x3ce   : > { %2461 = vmatmul.mubr.f32.vlgmr.msra.gmra.mrb[2].mxu1 %v7746_v22 }
 0x3cf   : > { %5380 = vmatpush1.bf16.msra.mxu1 %v7513_v25  ;;  %2580 = vmatprep.mubr.f32.mxu1 %v7715_v43  ;;  %v2953_v25 = vld [vmem:[%s8238_s5 + $0x68] sm:$0xff] }
 0x3d0   : > { %5381 = vmatprep.subr.bf16.mxu1 %v8314_v38 }
 0x3d3   : > { %5383 = vmatpush1.bf16.msra.mxu1 %v7521_v1  ;;  %v7956_v1 = vld [vmem:[%s8238_s5 + $0x78] sm:$0xff] }
 0x3d4   : > { %5384 = vmatprep.subr.bf16.mxu1 %v8314_v38 }
 0x3d7   : > { %5386 = vmatpush1.bf16.msra.mxu1 %v7527_v36  ;;  %v7961_v36 = vld [vmem:[%s8238_s5 + $0x60] sm:$0xff] }
 0x3d8   : > { %5387 = vmatprep.subr.bf16.mxu1 %v8314_v38 }
 0x3db   : > { %5389 = vmatpush1.bf16.msra.mxu1 %v7533_v14 }
 0x3dc   : > { %5390 = vmatprep.subr.bf16.mxu1 %v8314_v38 }
 0x3df   : > { %5392 = vmatpush1.bf16.msra.mxu1 %v7539_v61 }
 0x3e0   : > { %5393 = vmatprep.subr.bf16.mxu1 %v8314_v38 }
 0x3e3   : > { %5395 = vmatpush1.bf16.msra.mxu1 %v7545_v44 }
 0x3e4   : > { %5396 = vmatprep.subr.bf16.mxu1 %v8314_v38 }
 0x3e7   : > { %5398 = vmatpush1.bf16.msra.mxu1 %v7318_v46  ;;  %v2946_v46 = vld [vmem:[%s8238_s5 + $0x30] sm:$0xff] }
 0x3e8   : > { %5399 = vmatprep.subr.bf16.mxu1 %v8314_v38 }
 0x3eb   : > { %5401 = vmatpush1.bf16.msra.mxu1 %v7322_v32  ;;  %v2969_v32 = vand.u32 4294901760, %v2944_v39 }
 0x3ec   : > { %5402 = vmatprep.subr.bf16.mxu1 %v8314_v38 }
 0x3ef   : > { %5404 = vmatpush1.bf16.msra.mxu1 %v7326_v34  ;;  %v2973_v34 = vand.u32 4294901760, %v2946_v46 }
 0x3f0   : > { %5405 = vmatprep.subr.bf16.mxu1 %v8314_v38 }
 0x3f3   : > { %5407 = vmatpush1.bf16.msra.mxu1 %v7330_v37 }
 0x3f4   : > { %5408 = vmatprep.subr.bf16.mxu1 %v8314_v38 }
 0x3f7   : > { %5410 = vmatpush1.bf16.msra.mxu1 %v7334_v17  ;;  %v7929_v17 = vpack.c.bf16 %v2973_v34, %v2969_v32 }
 0x3f8   : > { %5411 = vmatprep.subr.bf16.mxu1 %v8314_v38 }
 0x3fb   : > { %5413 = vmatpush1.bf16.msra.mxu1 %v8349_v47 }
 0x3fc   : > { %5414 = vmatprep.subr.bf16.mxu1 %v8314_v38 }
 0x3fe   : > { %2583 = vmatmul.mubr.f32.vlgmr.msra.gmra.mrb[2].mxu1 %v7752_v48 }
 0x3ff   : > { %5416 = vmatpush1.bf16.msra.mxu1 %v6731_v59  ;;  %2679 = vmatprep.mubr.f32.mxu1 %v2260_v56 }
 0x400   : > { %5417 = vmatprep.subr.bf16.mxu1 %v8314_v38 }
 0x403   : > { %5419 = vmatpush1.bf16.msra.mxu1 %v6741_v62 }
 0x404   : > { %5420 = vmatprep.subr.bf16.mxu1 %v8314_v38 }
 0x407   : > { %5422 = vmatpush1.bf16.msra.mxu1 %v6773_v9 }
 0x408   : > { %5423 = vmatprep.subr.bf16.mxu1 %v8314_v38 }
 0x40b   : > { %5425 = vmatpush1.bf16.msra.mxu1 %v6805_v20 }
 0x40c   : > { %5426 = vmatprep.subr.bf16.mxu1 %v8314_v38 }
 0x40f   : > { %5428 = vmatpush1.bf16.msra.mxu1 %v6834_v30 }
 0x410   : > { %5429 = vmatprep.subr.bf16.mxu1 %v8314_v38 }
 0x413   : > { %5431 = vmatpush1.bf16.msra.mxu1 %v6862_v41 }
 0x414   : > { %5432 = vmatprep.subr.bf16.mxu1 %v8314_v38 }
 0x417   : > { %5434 = vmatpush1.bf16.msra.mxu1 %v7178_v5 }
 0x418   : > { %5435 = vmatprep.subr.bf16.mxu1 %v8314_v38 }
 0x41b   : > { %5437 = vmatpush1.bf16.msra.mxu1 %v7188_v13 }
 0x41c   : > { %5438 = vmatprep.subr.bf16.mxu1 %v8314_v38 }
 0x41f   : > { %5440 = vmatpush1.bf16.msra.mxu1 %v7198_v23 }
 0x420   : > { %5441 = vmatprep.subr.bf16.mxu1 %v8314_v38 }
 0x423   : > { %5443 = vmatpush1.bf16.msra.mxu1 %v7208_v33 }
 0x424   : > { %5444 = vmatprep.subr.bf16.mxu1 %v8314_v38 }
 0x427   : > { %5446 = vmatpush1.bf16.msra.mxu1 %v7224_v40 }
 0x428   : > { %5447 = vmatprep.subr.bf16.mxu1 %v8314_v38 }
 0x42b   : > { %5449 = vmatpush1.bf16.msra.mxu1 %v7227_v52 }
 0x42c   : > { %5450 = vmatprep.subr.bf16.mxu1 %v8314_v38 }
 0x42e   : > { %2683 = vmatmul.mubr.f32.vlgmr.msra.gmra.mrb[2].mxu1 %v2266_v57  ;;  %v8008_v57 = vsub.f32 %v2944_v39, %v2969_v32 }
 0x42f   : > { %5452 = vmatpush1.bf16.msra.mxu1 %v7592_v26  ;;  %2825 = vmatprep.mubr.f32.mxu1 %v7710_v7  ;;  %v7944_v26 = vld [vmem:[%s8238_s5 + $0x50] sm:$0xff] }
 0x430   : > { %5453 = vmatprep.subr.bf16.mxu1 %v8314_v38  ;;  %v2981_v28 = vand.u32 4294901760, %v7944_v26 }
 0x432   : > { %v7967_v44 = vpack.c.bf16 %v2981_v28, %v2977_v16 }
 0x433   : > { %5455 = vmatpush1.bf16.msra.mxu1 %v7603_v31  ;;  %v2949_v31 = vld [vmem:[%s8238_s5 + $0x48] sm:$0xff] }
 0x434   : > { %5456 = vmatprep.subr.bf16.mxu1 %v8314_v38  ;;  %v2975_v4 = vand.u32 4294901760, %v2949_v31 }
 0x437   : > { %5458 = vmatpush1.bf16.msra.mxu1 %v7611_v51  ;;  %v2983_v51 = vand.u32 4294901760, %v2953_v25 }
 0x438   : > { %5459 = vmatprep.subr.bf16.mxu1 %v8314_v38 }
 0x43b   : > { %5461 = vmatpush1.bf16.msra.mxu1 %v7619_v15  ;;  %v2987_v15 = vand.u32 4294901760, %v7956_v1 }
 0x43c   : > { %5462 = vmatprep.subr.bf16.mxu1 %v8314_v38 }
 0x43f   : > { %5464 = vmatpush1.bf16.msra.mxu1 %v7627_v10  ;;  %v7973_v10 = vld [vmem:[%s8238_s5 + $0x70] sm:$0xff] }
 0x440   : > { %5465 = vmatprep.subr.bf16.mxu1 %v8314_v38 }
 0x441   : > { %v7855_v12 = vpop.f32.mrb[0].mxu1 }
 0x442   : > { %v2149_v60 = vpop.f32.mrb[1].mxu1 }
 0x443   : > { %5467 = vmatpush1.bf16.msra.mxu1 %v7635_v0  ;;  %v2985_v0 = vand.u32 4294901760, %v7961_v36  ;;  %v8016_v60 = vsub.f32 %v2946_v46, %v2973_v34 }
 0x444   : > { %5468 = vmatprep.subr.bf16.mxu1 %v8314_v38 }
 0x447   : > { %5470 = vmatpush1.bf16.msra.mxu1 %v7643_v55  ;;  %v8285_v55 = vmov 0.0  }
 0x448   : > { %5471 = vmatprep.subr.bf16.mxu1 %v8314_v38  ;;  %3039 = vmatprep.mubr.f32.mxu0 %v8285_v55  ;;  %v3124_v55 = vsub.f32 %v2953_v25, %v2983_v51 }
 0x44b   : > { %5473 = vmatpush1.bf16.msra.mxu1 %v7651_v42  ;;  %v2989_v42 = vand.u32 4294901760, %v7973_v10 }
 0x44c   : > { %5474 = vmatprep.subr.bf16.mxu1 %v8314_v38 }
 0x44d   : > { %v7990_v43 = vpack.c.bf16 %v2989_v42, %v2985_v0 }
 0x44f   : > { %5476 = vmatpush1.bf16.msra.mxu1 %v7659_v54 }
 0x450   : > { %5477 = vmatprep.subr.bf16.mxu1 %v8314_v38 }
 0x453   : > { %5479 = vmatpush1.bf16.msra.mxu1 %v7667_v8 }
 0x454   : > { %5480 = vmatprep.subr.bf16.mxu1 %v8314_v38 }
 0x457   : > { %5482 = vmatpush1.bf16.msra.mxu1 %v7675_v19 }
 0x458   : > { %5483 = vmatprep.subr.bf16.mxu1 %v8314_v38 }
 0x45b   : > { %5485 = vmatpush1.bf16.msra.mxu1 %v7683_v2  ;;  %v7984_v2 = vpack.c.bf16 %v2987_v15, %v2983_v51 }
 0x45c   : > { %5486 = vmatprep.subr.bf16.mxu1 %v8314_v38 }
 0x45e   : > { %2827 = vmatmul.mubr.f32.vlgmr.msra.gmra.mrb[2].mxu1 %v7746_v22 }
 0x45f   : > { %5488 = vmatpush1.bf16.msra.mxu1 %v6731_v59  ;;  %2921 = vmatprep.mubr.f32.mxu1 %v7710_v7  ;;  %v2941_v59 = vld [vmem:[%s8238_s5 + $0x8] sm:$0xff] }
 0x460   : > { %5489 = vmatprep.subr.bf16.mxu1 %v8314_v38 }
 0x463   : > { %5491 = vmatpush1.bf16.msra.mxu1 %v6741_v62  ;;  %v2943_v62 = vld [vmem:[%s8238_s5 + $0x18] sm:$0xff] }
 0x464   : > { %5492 = vmatprep.subr.bf16.mxu1 %v8314_v38 }
 0x467   : > { %5494 = vmatpush1.bf16.msra.mxu1 %v6773_v9  ;;  %v2959_v9 = vand.u32 4294901760, %v2941_v59 }
 0x468   : > { %5495 = vmatprep.subr.bf16.mxu1 %v8314_v38 }
 0x469   : > { %v7963_v14 = vsub.f32 %v2941_v59, %v2959_v9 }
 0x46b   : > { %5497 = vmatpush1.bf16.msra.mxu1 %v6805_v20  ;;  %v2963_v20 = vand.u32 4294901760, %v2943_v62  ;;  %v3053_v54 = vand.u32 4294901760, %v7963_v14 }
 0x46c   : > { %5498 = vmatprep.subr.bf16.mxu1 %v8314_v38 }
 0x46d   : > { %v7965_v61 = vsub.f32 %v2943_v62, %v2963_v20  ;;  %v3054_v56 = vsub.f32 %v7963_v14, %v3053_v54 }
 0x46f   : > { %5500 = vmatpush1.bf16.msra.mxu1 %v6834_v30  ;;  %v2940_v30 = vld [vmem:[%s8238_s5] sm:$0xff]  ;;  %v3065_v8 = vand.u32 4294901760, %v7965_v61  ;;  %v3055_v6 = vand.u32 4294901760, %v3054_v56 }
 0x470   : > { %5501 = vmatprep.subr.bf16.mxu1 %v8314_v38 }
 0x471   : > { %v3066_v58 = vsub.f32 %v7965_v61, %v3065_v8 }
 0x473   : > { %5503 = vmatpush1.bf16.msra.mxu1 %v6862_v41  ;;  %v2942_v41 = vld [vmem:[%s8238_s5 + $0x10] sm:$0xff] }
 0x474   : > { %5504 = vmatprep.subr.bf16.mxu1 %v8314_v38 }
 0x477   : > { %5506 = vmatpush1.bf16.msra.mxu1 %v7178_v5  ;;  %v2961_v5 = vand.u32 4294901760, %v2940_v30 }
 0x478   : > { %5507 = vmatprep.subr.bf16.mxu1 %v8314_v38 }
 0x479   : > { %v7981_v19 = vsub.f32 %v2940_v30, %v2961_v5 }
 0x47b   : > { %5509 = vmatpush1.bf16.msra.mxu1 %v7188_v13  ;;  %v2965_v13 = vand.u32 4294901760, %v2942_v41  ;;  %v3059_v11 = vand.u32 4294901760, %v7981_v19 }
 0x47c   : > { %5510 = vmatprep.subr.bf16.mxu1 %v8314_v38 }
 0x47d   : > { %v7986_v7 = vsub.f32 %v2942_v41, %v2965_v13  ;;  %v3060_v48 = vsub.f32 %v7981_v19, %v3059_v11 }
 0x47f   : > { %5512 = vmatpush1.bf16.msra.mxu1 %v7198_v23  ;;  %v7909_v23 = vpack.c.bf16 %v2963_v20, %v2959_v9  ;;  %v3071_v49 = vand.u32 4294901760, %v7986_v7  ;;  %v3061_v62 = vand.u32 4294901760, %v3060_v48  ;;  %v3083_v9 = vand.u32 4294901760, %v8008_v57 }
 0x480   : > { %5513 = vmatprep.subr.bf16.mxu1 %v8314_v38 }
 0x481   : > { %5523 = vmatprep.subr.bf16.mxu0 %v7909_v23  ;;  %v3072_v63 = vsub.f32 %v7986_v7, %v3071_v49 }
 0x483   : > { %5515 = vmatpush1.bf16.msra.mxu1 %v7208_v33  ;;  %v7911_v33 = vpack.c.bf16 %v2965_v13, %v2961_v5  ;;  %v3073_v20 = vand.u32 4294901760, %v3072_v63  ;;  %v3095_v5 = vand.u32 4294901760, %v8016_v60  ;;  %v3084_v13 = vsub.f32 %v8008_v57, %v3083_v9 }
 0x484   : > { %5516 = vmatprep.subr.bf16.mxu1 %v8314_v38  ;;  %v3118_v63 = vsub.f32 %v7944_v26, %v2981_v28  ;;  %v3142_v26 = vsub.f32 %v7973_v10, %v2989_v42  ;;  %v8053_v10 = vpack.c.bf16 %v7965_v61, %v7963_v14  ;;  %v8057_v42 = vpack.c.bf16 %v7986_v7, %v7981_v19 }
 0x485   : > { %5525 = vmatpush1.bf16.msra.mxu0 %v7911_v33  ;;  %v3096_v32 = vsub.f32 %v8016_v60, %v3095_v5  ;;  %v3085_v34 = vand.u32 4294901760, %v3084_v13 }
 0x487   : > { %5518 = vmatpush1.bf16.msra.mxu1 %v7224_v40  ;;  %v2945_v40 = vld [vmem:[%s8238_s5 + $0x28] sm:$0xff]  ;;  %v3097_v48 = vand.u32 4294901760, %v3096_v32 }
 0x488   : > { %5519 = vmatprep.subr.bf16.mxu1 %v8314_v38  ;;  %v2967_v29 = vand.u32 4294901760, %v2945_v40  ;;  %v2979_v38 = vand.u32 4294901760, %v2951_v18 }
 0x48a   : > { %v7948_v35 = vpack.c.bf16 %v2979_v38, %v2975_v4  ;;  %v8001_v50 = vsub.f32 %v2945_v40, %v2967_v29  ;;  %v3100_v40 = vsub.f32 %v2949_v31, %v2975_v4  ;;  %v3136_v4 = vsub.f32 %v7956_v1, %v2987_v15 }
 0x48b   : > { %5521 = vmatpush1.bf16.msra.mxu1 %v7227_v52  ;;  %v2947_v52 = vld [vmem:[%s8238_s5 + $0x38] sm:$0xff] }
 0x48c   : > { %v2971_v24 = vand.u32 4294901760, %v2947_v52  ;;  %v8288_v21 = vand.u32 4294901760, %v8001_v50  ;;  %v3101_v56 = vand.u32 4294901760, %v3100_v40  ;;  %v3137_v13 = vand.u32 4294901760, %v3136_v4 }
 0x48e   : > { %2923 = vmatmul.mubr.f32.vlgmr.msra.gmra.mrb[2].mxu1 %v7746_v22  ;;  %v7927_v37 = vpack.c.bf16 %v2971_v24, %v2967_v29  ;;  %v8003_v45 = vsub.f32 %v2947_v52, %v2971_v24  ;;  %v3067_v22 = vand.u32 4294901760, %v3066_v58  ;;  %v3078_v30 = vsub.f32 %v8001_v50, %v8288_v21 }
 0x48f   : > { %v3112_v52 = vsub.f32 %v2951_v18, %v2979_v38  ;;  %v3106_v29 = vsub.f32 %v2948_v3, %v2977_v16  ;;  %v8030_v24 = vpack.c.bf16 %v3073_v20, %v3061_v62  ;;  %v8037_v38 = vpack.c.bf16 %v3097_v48, %v3085_v34 }
 0x490   : > { %5527 = vmatprep.subr.bf16.mxu0 %v7927_v37  ;;  %v8287_v47 = vand.u32 4294901760, %v8003_v45  ;;  %v8018_v59 = vpack.c.bf16 %v3067_v22, %v3055_v6  ;;  %v3079_v39 = vand.u32 4294901760, %v3078_v30  ;;  %v3119_v3 = vand.u32 4294901760, %v3118_v63 }
 0x491   : > { %5529 = vmatpush1.bf16.msra.mxu0 %v7929_v17  ;;  %v3113_v58 = vand.u32 4294901760, %v3112_v52  ;;  %v3107_v6 = vand.u32 4294901760, %v3106_v29  ;;  %v3125_v16 = vand.u32 4294901760, %v3124_v55  ;;  %v3130_v62 = vsub.f32 %v7961_v36, %v2985_v0 }
 0x492   : > { %5531 = vmatprep.subr.bf16.mxu0 %v7948_v35  ;;  %v3090_v41 = vsub.f32 %v8003_v45, %v8287_v47  ;;  %v3102_v47 = vsub.f32 %v3100_v40, %v3101_v56  ;;  %v3138_v25 = vsub.f32 %v3136_v4, %v3137_v13  ;;  %v3143_v34 = vand.u32 4294901760, %v3142_v26 }
 0x493   : > { %v3114_v31 = vsub.f32 %v3112_v52, %v3113_v58  ;;  %v3108_v18 = vsub.f32 %v3106_v29, %v3107_v6  ;;  %v3131_v32 = vand.u32 4294901760, %v3130_v62  ;;  %v8097_v14 = vpack.c.bf16 %v3119_v3, %v3107_v6 }
 0x494   : > { %v3091_v46 = vand.u32 4294901760, %v3090_v41  ;;  %v3103_v20 = vand.u32 4294901760, %v3102_v47  ;;  %v3139_v48 = vand.u32 4294901760, %v3138_v25  ;;  %v3144_v47 = vsub.f32 %v3142_v26, %v3143_v34 }
 0x495   : > { %5533 = vmatpush1.bf16.msra.mxu0 %v7967_v44  ;;  %v3115_v30 = vand.u32 4294901760, %v3114_v31  ;;  %v3109_v41 = vand.u32 4294901760, %v3108_v18  ;;  %v3132_v15 = vsub.f32 %v3130_v62, %v3131_v32  ;;  %v8073_v25 = vpack.c.bf16 %v3142_v26, %v3130_v62 }
 0x496   : > { %5535 = vmatprep.subr.bf16.mxu0 %v7984_v2  ;;  %v8033_v22 = vpack.c.bf16 %v3091_v46, %v3079_v39  ;;  %v3120_v39 = vsub.f32 %v3118_v63, %v3119_v3  ;;  %v3126_v46 = vsub.f32 %v3124_v55, %v3125_v16  ;;  %v3145_v18 = vand.u32 4294901760, %v3144_v47 }
 0x497   : > { %v8043_v28 = vpack.c.bf16 %v3115_v30, %v3103_v20  ;;  %v3133_v0 = vand.u32 4294901760, %v3132_v15  ;;  %v8061_v20 = vpack.c.bf16 %v8003_v45, %v8001_v50  ;;  %v8065_v30 = vpack.c.bf16 %v8016_v60, %v8008_v57 }
 0x498   : > { %v3121_v1 = vand.u32 4294901760, %v3120_v39  ;;  %v3127_v51 = vand.u32 4294901760, %v3126_v46  ;;  %v8069_v39 = vpack.c.bf16 %v3118_v63, %v3106_v29  ;;  %v8071_v46 = vpack.c.bf16 %v3136_v4, %v3124_v55 }
 0x499   : > { %5537 = vmatpush1.bf16.msra.mxu0 %v7990_v43  ;;  %v8049_v21 = vpack.c.bf16 %v3145_v18, %v3133_v0  ;;  %v8085_v57 = vpack.c.bf16 %v3071_v49, %v3059_v11  ;;  %v8350_v60 = vand.u32 4294901760, %v8001_v50  ;;  %v8095_v29 = vpack.c.bf16 %v3113_v58, %v3101_v56 }
 0x49a   : > { %5539 = vmatprep.subr.bf16.mxu0 %v8018_v59  ;;  %v8045_v36 = vpack.c.bf16 %v3121_v1, %v3109_v41  ;;  %v8047_v31 = vpack.c.bf16 %v3139_v48, %v3127_v51  ;;  %v8067_v41 = vpack.c.bf16 %v3112_v52, %v3100_v40  ;;  %v8079_v1 = vpack.c.bf16 %v3065_v8, %v3053_v54 }
 0x49b   : > { %v8351_v40 = vand.u32 4294901760, %v8003_v45  ;;  %v8093_v52 = vpack.c.bf16 %v3095_v5, %v3083_v9  ;;  %v8099_v61 = vpack.c.bf16 %v3137_v13, %v3125_v16  ;;  %v8101_v54 = vpack.c.bf16 %v3143_v34, %v3131_v32  ;;  %v2933_v9 = vld [vmem:[%s8235_s2] sm:$0x1] }
 0x49c   : > { %v2929_v8 = vmul.f32 0.055555556, %v7855_v12  ;;  %v8352_v16 = vmov 0.0   ;;  %v2937_v13 = vld [vmem:[%s8236_s3] sm:$0x1] }
 0x49d   : > { %v8091_v55 = vpack.c.bf16 %v8351_v40, %v8350_v60 }
 0x49e   : > { %v2931_v7 = vmul.f32 %v2929_v8, %v2929_v8 }
 0x561   : > { %v2924_v19 = vpop.f32.mrb[2].mxu1 }
 0x562   : > { %v2930_v11 = vmul.f32 0.055555556, %v2924_v19  ;;  %v2926_v49 = vpop.f32.mrb[3].mxu1 }
 0x564   : > { %v2932_v50 = vsub.f32 %v2930_v11, %v2931_v7 }
 0x566   : > { %v2934_v45 = vadd.f32 1e-05, %v2932_v50 }
 0x568   : > { %5781 = vrsqrt.f32 %v2934_v45 }
 0x572   : > { %v5782_v5 = vpop.eup %5781 }
 0x573   : > { %v2936_v56 = vmul.f32 %v5782_v5, %v2933_v9 }
 0x575   : > { %v2957_v58 = vsel %vm381_vm0, %v2936_v56, 0  ;;  %v2938_v62 = vmul.f32 %v2936_v56, %v2929_v8 }
 0x576   : > { %v3040_v6 = vand.u32 4294901760, %v2957_v58 }
 0x577   : > { %v2939_v32 = vsub.f32 %v2937_v13, %v2938_v62 }
 0x578   : > { %v3041_v63 = vsub.f32 %v2957_v58, %v3040_v6 }
 0x579   : > { %v3607_v26 = vsel %vm381_vm0, %v2939_v32, 0 }
 0x57a   : > { %v3042_v4 = vand.u32 4294901760, %v3041_v63  ;;  %v8157_v51 = vand.u32 4294901760, %v3607_v26 }
 0x57c   : > { %v3043_v3 = vsub.f32 %v3041_v63, %v3042_v4  ;;  %v3691_v15 = vsub.f32 %v3607_v26, %v8157_v51 }
 0x57e   : > { %v3044_v12 = vand.u32 4294901760, %v3043_v3  ;;  %v3692_v34 = vand.u32 4294901760, %v3691_v15 }
 0x580   : > { %3045 = vmatmul.mubr.f32.vlgmr.msra.gmra.mrb[2].mxu0 %v3044_v12  ;;  %v3693_v48 = vsub.f32 %v3691_v15, %v3692_v34 }
 0x581   : > { %5541 = vmatpush1.bf16.msra.mxu0 %v8030_v24  ;;  %3195 = vmatprep.mubr.f32.mxu0 %v8352_v16 }
 0x582   : > { %5543 = vmatprep.subr.bf16.mxu0 %v8033_v22  ;;  %v3694_v0 = vand.u32 4294901760, %v3693_v48 }
 0x585   : > { %5545 = vmatpush1.bf16.msra.mxu0 %v8037_v38 }
 0x586   : > { %5547 = vmatprep.subr.bf16.mxu0 %v8043_v28 }
 0x589   : > { %5549 = vmatpush1.bf16.msra.mxu0 %v8045_v36 }
 0x58a   : > { %5551 = vmatprep.subr.bf16.mxu0 %v8047_v31 }
 0x58d   : > { %5553 = vmatpush1.bf16.msra.mxu0 %v8049_v21 }
 0x58e   : > { %5555 = vmatprep.subr.bf16.mxu0 %v8053_v10 }
 0x590   : > { %3197 = vmatmul.mubr.f32.vlgmr.msra.gmra.mrb[2].mxu0 %v3040_v6 }
 0x591   : > { %5557 = vmatpush1.bf16.msra.mxu0 %v8057_v42  ;;  %3299 = vmatprep.mubr.f32.mxu0 %v8352_v16 }
 0x592   : > { %5559 = vmatprep.subr.bf16.mxu0 %v8061_v20 }
 0x595   : > { %5561 = vmatpush1.bf16.msra.mxu0 %v8065_v30 }
 0x596   : > { %5563 = vmatprep.subr.bf16.mxu0 %v8067_v41 }
 0x599   : > { %5565 = vmatpush1.bf16.msra.mxu0 %v8069_v39 }
 0x59a   : > { %5567 = vmatprep.subr.bf16.mxu0 %v8071_v46 }
 0x59d   : > { %5569 = vmatpush1.bf16.msra.mxu0 %v8073_v25 }
 0x59e   : > { %5571 = vmatprep.subr.bf16.mxu0 %v7909_v23 }
 0x5a0   : > { %3302 = vmatmul.mubr.f32.vlgmr.msra.gmra.mrb[2].mxu0 %v3041_v63 }
 0x5a1   : > { %5573 = vmatpush1.bf16.msra.mxu0 %v7911_v33  ;;  %3388 = vmatprep.mubr.f32.mxu0 %v8352_v16 }
 0x5a2   : > { %5575 = vmatprep.subr.bf16.mxu0 %v7927_v37 }
 0x5a5   : > { %5577 = vmatpush1.bf16.msra.mxu0 %v7929_v17 }
 0x5a6   : > { %5579 = vmatprep.subr.bf16.mxu0 %v7948_v35 }
 0x5a9   : > { %5581 = vmatpush1.bf16.msra.mxu0 %v7967_v44 }
 0x5aa   : > { %5583 = vmatprep.subr.bf16.mxu0 %v7984_v2 }
 0x5ad   : > { %5585 = vmatpush1.bf16.msra.mxu0 %v7990_v43 }
 0x5ae   : > { %5587 = vmatprep.subr.bf16.mxu0 %v8079_v1 }
 0x5b0   : > { %3392 = vmatmul.mubr.f32.vlgmr.msra.gmra.mrb[2].mxu0 %v3042_v4 }
 0x5b1   : > { %5589 = vmatpush1.bf16.msra.mxu0 %v8085_v57  ;;  %3510 = vmatprep.mubr.f32.mxu0 %v8352_v16 }
 0x5b2   : > { %5591 = vmatprep.subr.bf16.mxu0 %v8091_v55 }
 0x5b5   : > { %5593 = vmatpush1.bf16.msra.mxu0 %v8093_v52 }
 0x5b6   : > { %5595 = vmatprep.subr.bf16.mxu0 %v8095_v29 }
 0x5b9   : > { %5597 = vmatpush1.bf16.msra.mxu0 %v8097_v14 }
 0x5ba   : > { %5599 = vmatprep.subr.bf16.mxu0 %v8099_v61 }
 0x5bd   : > { %5601 = vmatpush1.bf16.msra.mxu0 %v8101_v54 }
 0x5be   : > { %5603 = vmatprep.subr.bf16.mxu0 %v7909_v23 }
 0x5c0   : > { %3512 = vmatmul.mubr.f32.vlgmr.msra.gmra.mrb[2].mxu0 %v3040_v6 }
 0x5c1   : > { %5605 = vmatpush1.bf16.msra.mxu0 %v7911_v33  ;;  %3598 = vmatprep.mubr.f32.mxu0 %v8352_v16 }
 0x5c2   : > { %5607 = vmatprep.subr.bf16.mxu0 %v7927_v37 }
 0x5c5   : > { %5609 = vmatpush1.bf16.msra.mxu0 %v7929_v17 }
 0x5c6   : > { %5611 = vmatprep.subr.bf16.mxu0 %v7948_v35 }
 0x5c9   : > { %5613 = vmatpush1.bf16.msra.mxu0 %v7967_v44 }
 0x5ca   : > { %5615 = vmatprep.subr.bf16.mxu0 %v7984_v2 }
 0x5cd   : > { %5617 = vmatpush1.bf16.msra.mxu0 %v7990_v43 }
 0x5ce   : > { %5619 = vmatprep.subr.bf16.mxu0 %v7909_v23 }
 0x5d0   : > { %3600 = vmatmul.mubr.f32.vlgmr.msra.gmra.mrb[2].mxu0 %v3040_v6 }
 0x5d1   : > { %5621 = vmatpush1.bf16.msra.mxu0 %v7911_v33  ;;  %3689 = vmatprep.mubr.f32.mxu0 %v8352_v16 }
 0x5d2   : > { %5623 = vmatprep.subr.bf16.mxu0 %v7927_v37 }
 0x5d5   : > { %5625 = vmatpush1.bf16.msra.mxu0 %v7929_v17 }
 0x5d6   : > { %5627 = vmatprep.subr.bf16.mxu0 %v7948_v35 }
 0x5d9   : > { %5629 = vmatpush1.bf16.msra.mxu0 %v7967_v44 }
 0x5da   : > { %5631 = vmatprep.subr.bf16.mxu0 %v7984_v2 }
 0x5dd   : > { %5633 = vmatpush1.bf16.msra.mxu0 %v7990_v43 }
 0x5de   : > { %5635 = vmatprep.subr.bf16.mxu0 %v8018_v59 }
 0x5e0   : > { %3695 = vmatmul.mubr.f32.vlgmr.msra.gmra.mrb[4].mxu0 %v3694_v0 }
 0x5e1   : > { %5637 = vmatpush1.bf16.msra.mxu0 %v8030_v24  ;;  %3845 = vmatprep.mubr.f32.mxu0 %v8352_v16 }
 0x5e2   : > { %5639 = vmatprep.subr.bf16.mxu0 %v8033_v22 }
 0x5e5   : > { %5641 = vmatpush1.bf16.msra.mxu0 %v8037_v38 }
 0x5e6   : > { %5643 = vmatprep.subr.bf16.mxu0 %v8043_v28 }
 0x5e9   : > { %5645 = vmatpush1.bf16.msra.mxu0 %v8045_v36 }
 0x5ea   : > { %5647 = vmatprep.subr.bf16.mxu0 %v8047_v31  ;;  %v4282_v31 = vld [vmem:[%s8239_s6] sm:$0x3f] }
 0x5ed   : > { %5649 = vmatpush1.bf16.msra.mxu0 %v8049_v21 }
 0x5ee   : > { %5651 = vmatprep.subr.bf16.mxu0 %v8053_v10 }
 0x5f0   : > { %3847 = vmatmul.mubr.f32.vlgmr.msra.gmra.mrb[4].mxu0 %v8157_v51 }
 0x5f1   : > { %5653 = vmatpush1.bf16.msra.mxu0 %v8057_v42  ;;  %3949 = vmatprep.mubr.f32.mxu0 %v8352_v16 }
 0x5f2   : > { %5655 = vmatprep.subr.bf16.mxu0 %v8061_v20 }
 0x5f5   : > { %5657 = vmatpush1.bf16.msra.mxu0 %v8065_v30 }
 0x5f6   : > { %5659 = vmatprep.subr.bf16.mxu0 %v8067_v41 }
 0x5f9   : > { %5661 = vmatpush1.bf16.msra.mxu0 %v8069_v39 }
 0x5fa   : > { %5663 = vmatprep.subr.bf16.mxu0 %v8071_v46 }
 0x5fd   : > { %5665 = vmatpush1.bf16.msra.mxu0 %v8073_v25 }
 0x5fe   : > { %5667 = vmatprep.subr.bf16.mxu0 %v7909_v23 }
 0x600   : > { %3952 = vmatmul.mubr.f32.vlgmr.msra.gmra.mrb[4].mxu0 %v3691_v15 }
 0x601   : > { %5669 = vmatpush1.bf16.msra.mxu0 %v7911_v33  ;;  %4038 = vmatprep.mubr.f32.mxu0 %v8352_v16 }
 0x602   : > { %5671 = vmatprep.subr.bf16.mxu0 %v7927_v37 }
 0x605   : > { %5673 = vmatpush1.bf16.msra.mxu0 %v7929_v17 }
 0x606   : > { %5675 = vmatprep.subr.bf16.mxu0 %v7948_v35 }
 0x609   : > { %5677 = vmatpush1.bf16.msra.mxu0 %v7967_v44 }
 0x60a   : > { %5679 = vmatprep.subr.bf16.mxu0 %v7984_v2 }
 0x60d   : > { %5681 = vmatpush1.bf16.msra.mxu0 %v7990_v43 }
 0x60e   : > { %5683 = vmatprep.subr.bf16.mxu0 %v8079_v1 }
 0x610   : > { %4042 = vmatmul.mubr.f32.vlgmr.msra.gmra.mrb[4].mxu0 %v3692_v34 }
 0x611   : > { %5685 = vmatpush1.bf16.msra.mxu0 %v8085_v57  ;;  %4160 = vmatprep.mubr.f32.mxu0 %v8352_v16 }
 0x612   : > { %5687 = vmatprep.subr.bf16.mxu0 %v8091_v55 }
 0x615   : > { %5689 = vmatpush1.bf16.msra.mxu0 %v8093_v52 }
 0x616   : > { %5691 = vmatprep.subr.bf16.mxu0 %v8095_v29 }
 0x619   : > { %5693 = vmatpush1.bf16.msra.mxu0 %v8097_v14 }
 0x61a   : > { %5695 = vmatprep.subr.bf16.mxu0 %v8099_v61 }
 0x61d   : > { %5697 = vmatpush1.bf16.msra.mxu0 %v8101_v54 }
 0x61e   : > { %5699 = vmatprep.subr.bf16.mxu0 %v7909_v23  ;;  %v4256_v23 = vlaneseq }
 0x620   : > { %4162 = vmatmul.mubr.f32.vlgmr.msra.gmra.mrb[4].mxu0 %v8157_v51  ;;  %v4257_v21 = vshrl.u32 %v4256_v23, 7 }
 0x621   : > { %5701 = vmatpush1.bf16.msra.mxu0 %v7911_v33  ;;  %4248 = vmatprep.mubr.f32.mxu0 %v8352_v16 }
 0x622   : > { %5703 = vmatprep.subr.bf16.mxu0 %v7927_v37  ;;  %v4258_v59 = vsub.s32 0, %v4257_v21 }
 0x625   : > { %5705 = vmatpush1.bf16.msra.mxu0 %v7929_v17 }
 0x626   : > { %5707 = vmatprep.subr.bf16.mxu0 %v7948_v35 }
 0x629   : > { %5709 = vmatpush1.bf16.msra.mxu0 %v7967_v44 }
 0x62a   : > { %5711 = vmatprep.subr.bf16.mxu0 %v7984_v2 }
 0x62d   : > { %5713 = vmatpush1.bf16.msra.mxu0 %v7990_v43 }
 0x630   : > { %4250 = vmatmul.mubr.f32.vlgmr.msra.gmra.mrb[4].mxu0 %v8157_v51 }
 0x6a3   : > { %v3601_v33 = vpop.f32.mrb[2].mxu0 }
 0x6a4   : > { %v4259_v24 = vrot.slane %v3601_v33, %v4258_v59  ;;  %v3603_v22 = vpop.f32.mrb[3].mxu0 }
 0x6a5   : > { %v4263_v38 = vrot.slane %v3603_v22, %v4258_v59 }
 0x6a6   : > { %v4264_v37 = vmul.f32 %v4259_v24, %v8348_v27  ;;  %v4283_v27 = vld [vmem:[%s8239_s6 + $0x8] sm:$0x3f] }
 0x6a7   : > { %v4265_v17 = vmul.f32 %v4263_v38, %v8347_v53 }
 0x703   : > { %v4251_v35 = vpop.f32.mrb[4].mxu0 }
 0x704   : > { %v4269_v28 = vrot.slane %v4251_v35, %v4258_v59  ;;  %v4253_v44 = vpop.f32.mrb[5].mxu0 }
 0x705   : > { %v4273_v36 = vrot.slane %v4253_v44, %v4258_v59 }
 0x706   : > { %v4274_v2 = vadd.f32 %v4269_v28, %v4264_v37 }
 0x707   : > { %v4275_v47 = vadd.f32 %v4273_v36, %v4265_v17 }
 0x708   : > { %v4278_v43 = vmul.f32 0.2, %v4274_v2  ;;  %vm4276_vm6 = vcmp.gt.f32.partialorder %v4274_v2, 0.0 }
 0x709   : > { %v4279_v18 = vmul.f32 0.2, %v4275_v47  ;;  %vm4277_vm7 = vcmp.gt.f32.partialorder %v4275_v47, 0.0 }
 0x70a   : > { %v4280_v10 = vsel %vm4276_vm6, %v4274_v2, %v4278_v43 }
 0x70b   : > { %v4281_v53 = vsel %vm4277_vm7, %v4275_v47, %v4279_v18  ;;  %v4284_v42 = vmul.f32 %v4282_v31, %v4280_v10 }
 0x70c   : > { %v4285_v20 = vmul.f32 %v4283_v27, %v4281_v53 }
 0x70d   : > { %v4286_v30 = vsel %vm1350_vm4, %v4284_v42, 0.0 }
 0x70e   : > { %v4287_v41 = vsel %vm1358_vm5, %v4285_v20, 0.0 }
 0x70f   : > { %v4288_v39 = vadd.f32 %v4287_v41, %v4286_v30 }
 0x711   : > { %4289 = vadd.xlane.f32.xlu0 %v4288_v39 }
 0x79e   : > { %v4290_v46 = vpop.xlane.xlu0 %4289 }
 0x79f   : > { %v4291_v25 = vrot.slane %v4290_v46, 4 }
 0x7a1   : > { %v4292_v1 = vadd.f32 %v4291_v25, %v4290_v46 }
 0x7a3   : > { %v4293_v57 = vrot.slane %v4292_v1, 2 }
 0x7a5   : > { %v4294_v60 = vadd.f32 %v4293_v57, %v4292_v1 }
 0x7a7   : > { %v4295_v40 = vrot.slane %v4294_v60, 1 }
 0x7a9   : > { %v4296_v55 = vadd.f32 %v4295_v40, %v4294_v60 }
 0x7ab   : > { %5769 = vpush %v4296_v55 }
 0x7dc   : > { %s5770_s19 = spop %5769 }
 0x7dd   : > { %v4298_v52 = vstv %s5770_s19 }
 0x7de   : > { %v4299_v29 = vsub.f32 0.0, %v4298_v52 }
 0x7e0   : > { %v4300_v14 = vmul.f32 1.442695, %v4299_v29 }
 0x7e2   : > { %5783 = vpow2.f32 %v4300_v14 }
 0x7ec   : > { %v5784_v61 = vpop.eup %5783 }
 0x7ed   : > { %v4302_v54 = vadd.f32 1.0, %v5784_v61 }
 0x7ef   : > { %5785 = vrcp.f32 %v4302_v54 }
 0x7f9   : > { %v5786_v8 = vpop.eup %5785 }
 0x7fa   : > { %4306 = vst.msk [vmem:[%s274_s28] sm:$0x1] %vm4305_vm8, %v5786_v8 }
 0x7fb PF: > { %s17_s24 = sadd.s32 1, %s5793_s24  }
 0x7fc   : > { %p14_p4 = scmp.ge.s32.totalorder %s17_s24, 4  }
 0x7fe   :  { %16 = sbr.rel (!%p14_p4) target bundleno = 1 (0x1), region = 85 }

</bundles_post_ra>
